<compile_context>
chip_gen: v6e
topology: v6e:2x2x1
jax: 0.10.0
libtpu: 0.0.40
codegen_flags: <defaults>
</compile_context>

<pallas_src>
import jax
import jax.numpy as jnp
from jax.experimental import pallas as pl
from jax.experimental.pallas import tpu as pltpu

_FC_TN = 768      # FC1 column tile (2160 padded to 2304 = 3 tiles)
_FC_TM = 128      # FC head batch-row tile
_CONV_TM = 2048   # conv stages: pooled-pixel (lane) tile


def _round_up(v, m):
    return ((v + m - 1) // m) * m


# ---------------------------------------------------------------------------
# Pallas kernels
# ---------------------------------------------------------------------------
def _convT_bias_tanh_kernel(w_ref, p_ref, b_ref, o_ref):
    """Transposed conv-as-matmul: (Cout_pad, K) @ (K, tm) + bias, tanh, bf16."""
    acc = jnp.dot(w_ref[...], p_ref[...], preferred_element_type=jnp.float32)
    o_ref[...] = jnp.tanh(acc + b_ref[...]).astype(o_ref.dtype)   # lane-bcast bias


def _matmul_bias_tanh_kernel(x_ref, w_ref, b_ref, o_ref):
    """Standard (tm, K) @ (K, N) + bias, tanh, bf16 store (conv3)."""
    acc = jnp.dot(x_ref[...], w_ref[...], preferred_element_type=jnp.float32)
    o_ref[...] = jnp.tanh(acc + b_ref[...]).astype(o_ref.dtype)


def _fc_head_kernel(x_ref, w1_ref, b1_ref, w2_ref, b2_ref, o_ref, acc_ref):
    """Fused Linear(4320,2160) + Tanh + Linear(2160,num_class).

    Grid = (M tiles ["parallel"], FC1 column tiles ["arbitrary" reduction]).
    The 2160-wide hidden activation never leaves VMEM.
    """
    j = pl.program_id(1)

    @pl.when(j == 0)
    def _():
        acc_ref[...] = jnp.broadcast_to(b2_ref[...], acc_ref.shape)

    h = jnp.dot(x_ref[...], w1_ref[...], preferred_element_type=jnp.float32)
    h = jnp.tanh(h + b1_ref[...])                                 # EUP
    acc_ref[...] += jnp.dot(h.astype(jnp.bfloat16), w2_ref[...],
                            preferred_element_type=jnp.float32)

    @pl.when(j == pl.num_programs(1) - 1)
    def _():
        o_ref[...] = acc_ref[...]


# ---------------------------------------------------------------------------
# Kernel wrappers
# ---------------------------------------------------------------------------
def convT_stage(patches_t, w_t, b_col, *, tm=_CONV_TM):
    """out(Cout_pad, M) = tanh(w_t(Cout_pad,K) @ patches_t(K,M) + b).  M tiled on lanes."""
    Cs, K = w_t.shape
    _, M = patches_t.shape
    tm = min(tm, _round_up(M, 128))
    M_pad = _round_up(M, tm)
    p = jnp.pad(patches_t, ((0, 0), (0, M_pad - M)))
    out = pl.pallas_call(
        _convT_bias_tanh_kernel,
        out_shape=jax.ShapeDtypeStruct((Cs, M_pad), jnp.bfloat16),
        grid_spec=pltpu.PrefetchScalarGridSpec(
            num_scalar_prefetch=0,
            grid=(M_pad // tm,),
            in_specs=[
                pl.BlockSpec((Cs, K), lambda m: (0, 0)),    # weights (resident)
                pl.BlockSpec((K, tm), lambda m: (0, m)),    # patch lanes
                pl.BlockSpec((Cs, 1), lambda m: (0, 0)),    # per-row bias
            ],
            out_specs=pl.BlockSpec((Cs, tm), lambda m: (0, m)),
        ),
        compiler_params=pltpu.CompilerParams(
            dimension_semantics=("parallel",)),
    )(w_t, p, b_col)
    return out[:, :M]


def conv3_stage(x, w, b_row, *, tm=512):
    """tanh((M,400) @ (400,120) + b) -> bf16 (M_pad, 120); M tiled on sublanes."""
    M, K = x.shape
    N = w.shape[1]
    M_pad = _round_up(M, 16)                   # bf16 sublane packing
    tm = min(tm, M_pad)
    M_pad = _round_up(M_pad, tm)
    x_p = jnp.pad(x, ((0, M_pad - M), (0, 0)))
    out = pl.pallas_call(
        _matmul_bias_tanh_kernel,
        out_shape=jax.ShapeDtypeStruct((M_pad, N), jnp.bfloat16),
        grid_spec=pltpu.PrefetchScalarGridSpec(
            num_scalar_prefetch=0,
            grid=(M_pad // tm,),
            in_specs=[
                pl.BlockSpec((tm, K), lambda m: (m, 0)),
                pl.BlockSpec((K, N), lambda m: (0, 0)),
                pl.BlockSpec((1, N), lambda m: (0, 0)),
            ],
            out_specs=pl.BlockSpec((tm, N), lambda m: (m, 0)),
        ),
        compiler_params=pltpu.CompilerParams(
            dimension_semantics=("parallel",)),
    )(x_p, w, b_row)
    return out


def fc_head(x, w1, b1, w2, b2, *, tm=_FC_TM, tn=_FC_TN):
    """Fused FC1 -> tanh -> FC2.  M ("parallel") x N1-reduction ("arbitrary") grid."""
    M, K = x.shape
    N1p = w1.shape[1]
    Cp = w2.shape[1]
    M_pad = _round_up(M, 16)
    tm = min(tm, M_pad)
    M_pad = _round_up(M_pad, tm)
    x_p = jnp.pad(x, ((0, M_pad - M), (0, 0)))
    out = pl.pallas_call(
        _fc_head_kernel,
        out_shape=jax.ShapeDtypeStruct((M_pad, Cp), jnp.float32),
        grid_spec=pltpu.PrefetchScalarGridSpec(
            num_scalar_prefetch=0,
            grid=(M_pad // tm, N1p // tn),
            in_specs=[
                pl.BlockSpec((tm, K), lambda i, j: (i, 0)),    # x tile (constant in j)
                pl.BlockSpec((K, tn), lambda i, j: (0, j)),    # FC1 weight tile (bf16)
                pl.BlockSpec((1, tn), lambda i, j: (0, j)),    # FC1 bias tile
                pl.BlockSpec((tn, Cp), lambda i, j: (j, 0)),   # FC2 weight tile (bf16)
                pl.BlockSpec((1, Cp), lambda i, j: (0, 0)),    # FC2 bias
            ],
            out_specs=pl.BlockSpec((tm, Cp), lambda i, j: (i, 0)),
            scratch_shapes=[pltpu.VMEM((tm, Cp), jnp.float32)],
        ),
        compiler_params=pltpu.CompilerParams(
            dimension_semantics=("parallel", "arbitrary")),
    )(x_p, w1, b1, w2, b2)
    return out[:M]


# ---------------------------------------------------------------------------
# XLA-side helpers (all operate on small channel-major tensors)
# ---------------------------------------------------------------------------
def _pool_s1_bf16(t):
    """stride-1 2x2 average over (C, N, H, W); f32 accumulate, bf16 out."""
    t = t.astype(jnp.float32)
    s = t[:, :, :-1, :-1] + t[:, :, 1:, :-1] + t[:, :, :-1, 1:] + t[:, :, 1:, 1:]
    return (0.25 * s).astype(jnp.bfloat16)


def _pooled_taps(a, hp, wp):
    """Strided 5x5 tap sampling of the stride-1-pooled map -> (25*C, N*hp*wp)."""
    C, B = a.shape[0], a.shape[1]
    taps = [a[:, :, i:i + 2 * hp - 1:2, j:j + 2 * wp - 1:2]
            for i in range(5) for j in range(5)]
    return jnp.stack(taps, axis=0).reshape(25 * C, B * hp * wp)


# ---------------------------------------------------------------------------
# Parameters
# ---------------------------------------------------------------------------
def init_params(key, num_class=8):
    """PyTorch-convention parameters (conv: OIHW, linear: (in,out))."""
    ks = jax.random.split(key, 10)

    def conv(kw_, kb_, o, i, k):
        scale = (2.0 / (k * k * o)) ** 0.5          # mirrors init_weights()
        return (jax.random.normal(kw_, (o, i, k, k), jnp.float32) * scale,
                jax.random.normal(kb_, (o,), jnp.float32) * 0.01)

    def fc(kw_, kb_, i, o):
        scale = (1.0 / i) ** 0.5
        return (jax.random.normal(kw_, (i, o), jnp.float32) * scale,
                jax.random.normal(kb_, (o,), jnp.float32) * 0.01)

    p = {}
    p["c1_w"], p["c1_b"] = conv(ks[0], ks[1], 6, 3, 5)
    p["c2_w"], p["c2_b"] = conv(ks[2], ks[3], 16, 6, 5)
    p["c3_w"], p["c3_b"] = conv(ks[4], ks[5], 120, 16, 5)
    p["f1_w"], p["f1_b"] = fc(ks[6], ks[7], 4320, 2160)
    p["f2_w"], p["f2_b"] = fc(ks[8], ks[9], 2160, num_class)
    return p


def prepare_params(p):
    """One-time conversion into kernel layouts (run once, outside the jit)."""
    out = {}

    def conv_t(w, b, cpad):                         # (O,I,kh,kw) -> (cpad, kh*kw*I)
        o, i, kh, kw = w.shape
        wm = jnp.transpose(w, (0, 2, 3, 1)).reshape(o, kh * kw * i)
        wm = jnp.pad(wm, ((0, cpad - o), (0, 0))).astype(jnp.bfloat16)
        bb = jnp.pad(b, (0, cpad - o)).astype(jnp.float32).reshape(cpad, 1)
        return wm, bb

    out["c1_w"], out["c1_b"] = conv_t(p["c1_w"], p["c1_b"], 16)
    out["c2_w"], out["c2_b"] = conv_t(p["c2_w"], p["c2_b"], 16)

    o3, i3, kh, kw = p["c3_w"].shape                # (120,16,5,5) -> (400,120)
    out["c3_w"] = jnp.transpose(p["c3_w"], (2, 3, 1, 0)) \
                     .reshape(kh * kw * i3, o3).astype(jnp.bfloat16)
    out["c3_b"] = p["c3_b"].astype(jnp.float32).reshape(1, o3)

    # FC1: permute rows from PyTorch NCHW flatten order (c*36 + h*6 + w) to the
    # kernel's (h*6+w)*120 + c order, pad columns to a multiple of the N1 tile.
    K1, N1 = p["f1_w"].shape
    k = jnp.arange(K1)
    perm = (k % 120) * 36 + (k // 120)
    w1 = p["f1_w"][perm, :]
    N1p = _round_up(N1, _FC_TN)
    out["f1_w"] = jnp.pad(w1, ((0, 0), (0, N1p - N1))).astype(jnp.bfloat16)
    out["f1_b"] = jnp.pad(p["f1_b"], (0, N1p - N1)).astype(jnp.float32).reshape(1, N1p)

    C = p["f2_w"].shape[1]
    Cp = _round_up(C, 128)
    out["f2_w"] = jnp.pad(p["f2_w"], ((0, N1p - N1), (0, Cp - C))).astype(jnp.bfloat16)
    out["f2_b"] = jnp.pad(p["f2_b"], (0, Cp - C)).astype(jnp.float32).reshape(1, Cp)
    return out


# ---------------------------------------------------------------------------
# Forward
# ---------------------------------------------------------------------------
def lenet_forward(params, x_nchw, num_class=8):
    B = x_nchw.shape[0]
    # NCHW -> CNHW (channel-major) for the transposed conv matmuls.
    x = jnp.transpose(x_nchw, (1, 0, 2, 3)).astype(jnp.float32)    # (3,B,52,52)

    # ---- Conv1(3->6,5x5) + AvgPool2 + Tanh (fused via linearity) ----
    a1 = _pool_s1_bf16(x)                                          # (3,B,51,51)
    pat1 = _pooled_taps(a1, 24, 24)                                # (75, B*576)
    act1 = convT_stage(pat1, params["c1_w"], params["c1_b"])       # (16, B*576)
    act1 = act1[:6].reshape(6, B, 24, 24)

    # ---- Conv2(6->16,5x5) + AvgPool2 + Tanh ----
    a2 = _pool_s1_bf16(act1)                                       # (6,B,23,23)
    pat2 = _pooled_taps(a2, 10, 10)                                # (150, B*100)
    act2 = convT_stage(pat2, params["c2_w"], params["c2_b"])       # (16, >=B*100)
    act2 = act2[:16, :B * 100].reshape(16, B, 10, 10)

    # ---- Conv3(16->120,5x5) + Tanh ----
    taps3 = [act2[:, :, i:i + 6, j:j + 6] for i in range(5) for j in range(5)]
    pat3 = jnp.stack(taps3, axis=0)                                # (25,16,B,6,6)
    pat3 = jnp.transpose(pat3, (2, 3, 4, 0, 1)).reshape(B * 36, 400)
    act3 = conv3_stage(pat3, params["c3_w"], params["c3_b"])       # (>=B*36, 120)

    # Flatten: (B*36, 120) -> (B, 4320) is layout-free; FC1 rows were permuted
    # at prepare_params() time to match this (h,w,c) order.
    feats = act3[:B * 36].reshape(B, 36 * 120)

    # ---- Fused Linear(4320,2160) -> Tanh -> Linear(2160,num_class) ----
    logits = fc_head(feats, params["f1_w"], params["f1_b"],
                     params["f2_w"], params["f2_b"])               # (B, 128)
    return logits[:, :num_class]


if __name__ == "__main__":
    key = jax.random.PRNGKey(0)
    pkey, xkey = jax.random.split(key)
    params = prepare_params(init_params(pkey, num_class=8))
    # Linear(in_features=4320) implies 52x52 input: 52->48->24->20->10->6, 120*6*6=4320.
    x = jax.random.normal(xkey, (2, 3, 52, 52), jnp.float32)
    out = jax.jit(lenet_forward)(params, x)
    jax.block_until_ready(out)
    assert out.shape == (2, 8) and out.dtype == jnp.float32
    print("KERNEL_OK")
</pallas_src>

<mosaic_0001>
module attributes {stable_mosaic.version = 11 : i64} {
  func.func @_convT_bias_tanh_kernel(%arg0: i32, %arg1: memref<16x75xbf16, #tpu.memory_space<vmem>>, %arg2: memref<75x1152xbf16, #tpu.memory_space<vmem>>, %arg3: memref<16x1xf32, #tpu.memory_space<vmem>>, %arg4: memref<16x1152xbf16, #tpu.memory_space<vmem>>) attributes {dimension_semantics = [#tpu.dimension_semantics<parallel>], iteration_bounds = array<i64: 1>, scalar_prefetch = 0 : i64, scratch_operands = 0 : i64, tpu.core_type = #tpu.core_type<tc>, window_params = [{pipeline_mode = #tpu.pipeline_mode<synchronous>, transform_indices = @transform_0, window_bounds = array<i64: 16, 75>}, {transform_indices = @transform_1, window_bounds = array<i64: 75, 1152>}, {pipeline_mode = #tpu.pipeline_mode<synchronous>, transform_indices = @transform_2, window_bounds = array<i64: 16, 1>}, {transform_indices = @transform_3, window_bounds = array<i64: 16, 1152>}]} {
    %c0 = arith.constant 0 : index
    %c0_0 = arith.constant 0 : index
    %0 = vector.load %arg1[%c0, %c0_0] : memref<16x75xbf16, #tpu.memory_space<vmem>>, vector<16x75xbf16>
    %c0_1 = arith.constant 0 : index
    %c0_2 = arith.constant 0 : index
    %1 = vector.load %arg2[%c0_1, %c0_2] : memref<75x1152xbf16, #tpu.memory_space<vmem>>, vector<75x1152xbf16>
    %cst = arith.constant dense<0.000000e+00> : vector<16x1152xf32>
    %2 = tpu.matmul %0, %1, %cst {dimension_numbers = #tpu.dot_dimension_numbers<[1], [0], [0], [1], [0, 0, 1, 1], [], []>} : vector<16x75xbf16>, vector<75x1152xbf16>, vector<16x1152xf32> -> vector<16x1152xf32>
    %c0_3 = arith.constant 0 : index
    %c0_4 = arith.constant 0 : index
    %3 = vector.load %arg3[%c0_3, %c0_4] : memref<16x1xf32, #tpu.memory_space<vmem>>, vector<16x1xf32>
    %4 = vector.broadcast %3 : vector<16x1xf32> to vector<16x1152xf32>
    %5 = arith.addf %2, %4 : vector<16x1152xf32>
    %6 = math.tanh %5 : vector<16x1152xf32>
    %7 = arith.truncf %6 : vector<16x1152xf32> to vector<16x1152xbf16>
    %c0_5 = arith.constant 0 : index
    %c0_6 = arith.constant 0 : index
    %8 = vector.load %arg4[%c0_5, %c0_6] : memref<16x1152xbf16, #tpu.memory_space<vmem>>, vector<16x1152xbf16>
    tpu.vector_store %arg4[%c0_5, %c0_6], %7 {strides = array<i32>} : memref<16x1152xbf16, #tpu.memory_space<vmem>>, vector<16x1152xbf16>,
    return
  }
  func.func @transform_0(%arg0: i32) -> (i32, i32) {
    %c0_i32 = arith.constant 0 : i32
    %c0_i32_0 = arith.constant 0 : i32
    %c0_i32_1 = arith.constant 0 : i32
    return %c0_i32, %c0_i32_0 : i32, i32
  }
  func.func @transform_1(%arg0: i32) -> (i32, i32) {
    %c0_i32 = arith.constant 0 : i32
    %c0_i32_0 = arith.constant 0 : i32
    return %c0_i32, %arg0 : i32, i32
  }
  func.func @transform_2(%arg0: i32) -> (i32, i32) {
    %c0_i32 = arith.constant 0 : i32
    %c0_i32_0 = arith.constant 0 : i32
    %c0_i32_1 = arith.constant 0 : i32
    return %c0_i32, %c0_i32_0 : i32, i32
  }
  func.func @transform_3(%arg0: i32) -> (i32, i32) {
    %c0_i32 = arith.constant 0 : i32
    %c0_i32_0 = arith.constant 0 : i32
    return %c0_i32, %arg0 : i32, i32
  }
}

module attributes {stable_mosaic.version = 11 : i64} {
  func.func @_convT_bias_tanh_kernel(%arg0: i32, %arg1: memref<16x150xbf16, #tpu.memory_space<vmem>>, %arg2: memref<150x256xbf16, #tpu.memory_space<vmem>>, %arg3: memref<16x1xf32, #tpu.memory_space<vmem>>, %arg4: memref<16x256xbf16, #tpu.memory_space<vmem>>) attributes {dimension_semantics = [#tpu.dimension_semantics<parallel>], iteration_bounds = array<i64: 1>, scalar_prefetch = 0 : i64, scratch_operands = 0 : i64, tpu.core_type = #tpu.core_type<tc>, window_params = [{pipeline_mode = #tpu.pipeline_mode<synchronous>, transform_indices = @transform_0, window_bounds = array<i64: 16, 150>}, {transform_indices = @transform_1, window_bounds = array<i64: 150, 256>}, {pipeline_mode = #tpu.pipeline_mode<synchronous>, transform_indices = @transform_2, window_bounds = array<i64: 16, 1>}, {transform_indices = @transform_3, window_bounds = array<i64: 16, 256>}]} {
    %c0 = arith.constant 0 : index
    %c0_0 = arith.constant 0 : index
    %0 = vector.load %arg1[%c0, %c0_0] : memref<16x150xbf16, #tpu.memory_space<vmem>>, vector<16x150xbf16>
    %c0_1 = arith.constant 0 : index
    %c0_2 = arith.constant 0 : index
    %1 = vector.load %arg2[%c0_1, %c0_2] : memref<150x256xbf16, #tpu.memory_space<vmem>>, vector<150x256xbf16>
    %cst = arith.constant dense<0.000000e+00> : vector<16x256xf32>
    %2 = tpu.matmul %0, %1, %cst {dimension_numbers = #tpu.dot_dimension_numbers<[1], [0], [0], [1], [0, 0, 1, 1], [], []>} : vector<16x150xbf16>, vector<150x256xbf16>, vector<16x256xf32> -> vector<16x256xf32>
    %c0_3 = arith.constant 0 : index
    %c0_4 = arith.constant 0 : index
    %3 = vector.load %arg3[%c0_3, %c0_4] : memref<16x1xf32, #tpu.memory_space<vmem>>, vector<16x1xf32>
    %4 = vector.broadcast %3 : vector<16x1xf32> to vector<16x256xf32>
    %5 = arith.addf %2, %4 : vector<16x256xf32>
    %6 = math.tanh %5 : vector<16x256xf32>
    %7 = arith.truncf %6 : vector<16x256xf32> to vector<16x256xbf16>
    %c0_5 = arith.constant 0 : index
    %c0_6 = arith.constant 0 : index
    %8 = vector.load %arg4[%c0_5, %c0_6] : memref<16x256xbf16, #tpu.memory_space<vmem>>, vector<16x256xbf16>
    tpu.vector_store %arg4[%c0_5, %c0_6], %7 {strides = array<i32>} : memref<16x256xbf16, #tpu.memory_space<vmem>>, vector<16x256xbf16>,
    return
  }
  func.func @transform_0(%arg0: i32) -> (i32, i32) {
    %c0_i32 = arith.constant 0 : i32
    %c0_i32_0 = arith.constant 0 : i32
    %c0_i32_1 = arith.constant 0 : i32
    return %c0_i32, %c0_i32_0 : i32, i32
  }
  func.func @transform_1(%arg0: i32) -> (i32, i32) {
    %c0_i32 = arith.constant 0 : i32
    %c0_i32_0 = arith.constant 0 : i32
    return %c0_i32, %arg0 : i32, i32
  }
  func.func @transform_2(%arg0: i32) -> (i32, i32) {
    %c0_i32 = arith.constant 0 : i32
    %c0_i32_0 = arith.constant 0 : i32
    %c0_i32_1 = arith.constant 0 : i32
    return %c0_i32, %c0_i32_0 : i32, i32
  }
  func.func @transform_3(%arg0: i32) -> (i32, i32) {
    %c0_i32 = arith.constant 0 : i32
    %c0_i32_0 = arith.constant 0 : i32
    return %c0_i32, %arg0 : i32, i32
  }
}

module attributes {stable_mosaic.version = 11 : i64} {
  func.func @_matmul_bias_tanh_kernel(%arg0: i32, %arg1: memref<80x400xbf16, #tpu.memory_space<vmem>>, %arg2: memref<400x120xbf16, #tpu.memory_space<vmem>>, %arg3: memref<1x120xf32, #tpu.memory_space<vmem>>, %arg4: memref<80x120xbf16, #tpu.memory_space<vmem>>) attributes {dimension_semantics = [#tpu.dimension_semantics<parallel>], iteration_bounds = array<i64: 1>, scalar_prefetch = 0 : i64, scratch_operands = 0 : i64, tpu.core_type = #tpu.core_type<tc>, window_params = [{transform_indices = @transform_0, window_bounds = array<i64: 80, 400>}, {pipeline_mode = #tpu.pipeline_mode<synchronous>, transform_indices = @transform_1, window_bounds = array<i64: 400, 120>}, {pipeline_mode = #tpu.pipeline_mode<synchronous>, transform_indices = @transform_2, window_bounds = array<i64: 1, 120>}, {transform_indices = @transform_3, window_bounds = array<i64: 80, 120>}]} {
    %c0 = arith.constant 0 : index
    %c0_0 = arith.constant 0 : index
    %0 = vector.load %arg1[%c0, %c0_0] : memref<80x400xbf16, #tpu.memory_space<vmem>>, vector<80x400xbf16>
    %c0_1 = arith.constant 0 : index
    %c0_2 = arith.constant 0 : index
    %1 = vector.load %arg2[%c0_1, %c0_2] : memref<400x120xbf16, #tpu.memory_space<vmem>>, vector<400x120xbf16>
    %cst = arith.constant dense<0.000000e+00> : vector<80x120xf32>
    %2 = tpu.matmul %0, %1, %cst {dimension_numbers = #tpu.dot_dimension_numbers<[1], [0], [0], [1], [0, 0, 1, 1], [], []>} : vector<80x400xbf16>, vector<400x120xbf16>, vector<80x120xf32> -> vector<80x120xf32>
    %c0_3 = arith.constant 0 : index
    %c0_4 = arith.constant 0 : index
    %3 = vector.load %arg3[%c0_3, %c0_4] : memref<1x120xf32, #tpu.memory_space<vmem>>, vector<1x120xf32>
    %4 = vector.broadcast %3 : vector<1x120xf32> to vector<80x120xf32>
    %5 = arith.addf %2, %4 : vector<80x120xf32>
    %6 = math.tanh %5 : vector<80x120xf32>
    %7 = arith.truncf %6 : vector<80x120xf32> to vector<80x120xbf16>
    %c0_5 = arith.constant 0 : index
    %c0_6 = arith.constant 0 : index
    %8 = vector.load %arg4[%c0_5, %c0_6] : memref<80x120xbf16, #tpu.memory_space<vmem>>, vector<80x120xbf16>
    tpu.vector_store %arg4[%c0_5, %c0_6], %7 {strides = array<i32>} : memref<80x120xbf16, #tpu.memory_space<vmem>>, vector<80x120xbf16>,
    return
  }
  func.func @transform_0(%arg0: i32) -> (i32, i32) {
    %c0_i32 = arith.constant 0 : i32
    %c0_i32_0 = arith.constant 0 : i32
    return %arg0, %c0_i32 : i32, i32
  }
  func.func @transform_1(%arg0: i32) -> (i32, i32) {
    %c0_i32 = arith.constant 0 : i32
    %c0_i32_0 = arith.constant 0 : i32
    %c0_i32_1 = arith.constant 0 : i32
    return %c0_i32, %c0_i32_0 : i32, i32
  }
  func.func @transform_2(%arg0: i32) -> (i32, i32) {
    %c0_i32 = arith.constant 0 : i32
    %c0_i32_0 = arith.constant 0 : i32
    %c0_i32_1 = arith.constant 0 : i32
    return %c0_i32, %c0_i32_0 : i32, i32
  }
  func.func @transform_3(%arg0: i32) -> (i32, i32) {
    %c0_i32 = arith.constant 0 : i32
    %c0_i32_0 = arith.constant 0 : i32
    return %arg0, %c0_i32 : i32, i32
  }
}

module attributes {stable_mosaic.version = 11 : i64} {
  func.func @_fc_head_kernel(%arg0: i32, %arg1: i32, %arg2: memref<16x4320xbf16, #tpu.memory_space<vmem>>, %arg3: memref<4320x768xbf16, #tpu.memory_space<vmem>>, %arg4: memref<1x768xf32, #tpu.memory_space<vmem>>, %arg5: memref<768x128xbf16, #tpu.memory_space<vmem>>, %arg6: memref<1x128xf32, #tpu.memory_space<vmem>>, %arg7: memref<16x128xf32, #tpu.memory_space<vmem>>, %arg8: memref<16x128xf32, #tpu.memory_space<vmem>>) attributes {dimension_semantics = [#tpu.dimension_semantics<parallel>, #tpu.dimension_semantics<arbitrary>], iteration_bounds = array<i64: 1, 3>, scalar_prefetch = 0 : i64, scratch_operands = 1 : i64, tpu.core_type = #tpu.core_type<tc>, window_params = [{transform_indices = @transform_0, window_bounds = array<i64: 16, 4320>}, {transform_indices = @transform_1, window_bounds = array<i64: 4320, 768>}, {transform_indices = @transform_2, window_bounds = array<i64: 1, 768>}, {transform_indices = @transform_3, window_bounds = array<i64: 768, 128>}, {pipeline_mode = #tpu.pipeline_mode<synchronous>, transform_indices = @transform_4, window_bounds = array<i64: 1, 128>}, {transform_indices = @transform_5, window_bounds = array<i64: 16, 128>}]} {
    %c0_i32 = arith.constant 0 : i32
    %0 = arith.cmpi eq, %arg1, %c0_i32 : i32
    %1 = arith.extui %0 : i1 to i32
    %c0_i32_0 = arith.constant 0 : i32
    %2 = arith.cmpi ne, %1, %c0_i32_0 : i32
    scf.if %2 {
      %c0_14 = arith.constant 0 : index
      %c0_15 = arith.constant 0 : index
      %19 = vector.load %arg6[%c0_14, %c0_15] : memref<1x128xf32, #tpu.memory_space<vmem>>, vector<1x128xf32>
      %20 = vector.shape_cast %19 : vector<1x128xf32> to vector<1x128xf32>
      %21 = vector.broadcast %20 : vector<1x128xf32> to vector<16x128xf32>
      %c0_16 = arith.constant 0 : index
      %c0_17 = arith.constant 0 : index
      %22 = vector.load %arg8[%c0_16, %c0_17] : memref<16x128xf32, #tpu.memory_space<vmem>>, vector<16x128xf32>
      tpu.vector_store %arg8[%c0_16, %c0_17], %21 {strides = array<i32>} : memref<16x128xf32, #tpu.memory_space<vmem>>, vector<16x128xf32>,
    } else {
    }
    %c0 = arith.constant 0 : index
    %c0_1 = arith.constant 0 : index
    %3 = vector.load %arg2[%c0, %c0_1] : memref<16x4320xbf16, #tpu.memory_space<vmem>>, vector<16x4320xbf16>
    %c0_2 = arith.constant 0 : index
    %c0_3 = arith.constant 0 : index
    %4 = vector.load %arg3[%c0_2, %c0_3] : memref<4320x768xbf16, #tpu.memory_space<vmem>>, vector<4320x768xbf16>
    %cst = arith.constant dense<0.000000e+00> : vector<16x768xf32>
    %5 = tpu.matmul %3, %4, %cst {dimension_numbers = #tpu.dot_dimension_numbers<[1], [0], [0], [1], [0, 0, 1, 1], [], []>} : vector<16x4320xbf16>, vector<4320x768xbf16>, vector<16x768xf32> -> vector<16x768xf32>
    %c0_4 = arith.constant 0 : index
    %c0_5 = arith.constant 0 : index
    %6 = vector.load %arg4[%c0_4, %c0_5] : memref<1x768xf32, #tpu.memory_space<vmem>>, vector<1x768xf32>
    %7 = vector.broadcast %6 : vector<1x768xf32> to vector<16x768xf32>
    %8 = arith.addf %5, %7 : vector<16x768xf32>
    %9 = math.tanh %8 : vector<16x768xf32>
    %c0_6 = arith.constant 0 : index
    %c0_7 = arith.constant 0 : index
    %10 = vector.load %arg8[%c0_6, %c0_7] : memref<16x128xf32, #tpu.memory_space<vmem>>, vector<16x128xf32>
    %11 = arith.truncf %9 : vector<16x768xf32> to vector<16x768xbf16>
    %c0_8 = arith.constant 0 : index
    %c0_9 = arith.constant 0 : index
    %12 = vector.load %arg5[%c0_8, %c0_9] : memref<768x128xbf16, #tpu.memory_space<vmem>>, vector<768x128xbf16>
    %cst_10 = arith.constant dense<0.000000e+00> : vector<16x128xf32>
    %13 = tpu.matmul %11, %12, %cst_10 {dimension_numbers = #tpu.dot_dimension_numbers<[1], [0], [0], [1], [0, 0, 1, 1], [], []>} : vector<16x768xbf16>, vector<768x128xbf16>, vector<16x128xf32> -> vector<16x128xf32>
    %14 = arith.addf %10, %13 : vector<16x128xf32>
    %c0_11 = arith.constant 0 : index
    %c0_12 = arith.constant 0 : index
    %15 = vector.load %arg8[%c0_11, %c0_12] : memref<16x128xf32, #tpu.memory_space<vmem>>, vector<16x128xf32>
    tpu.vector_store %arg8[%c0_11, %c0_12], %14 {strides = array<i32>} : memref<16x128xf32, #tpu.memory_space<vmem>>, vector<16x128xf32>,
    %c2_i32 = arith.constant 2 : i32
    %16 = arith.cmpi eq, %arg1, %c2_i32 : i32
    %17 = arith.extui %16 : i1 to i32
    %c0_i32_13 = arith.constant 0 : i32
    %18 = arith.cmpi ne, %17, %c0_i32_13 : i32
    scf.if %18 {
      %c0_14 = arith.constant 0 : index
      %c0_15 = arith.constant 0 : index
      %19 = vector.load %arg8[%c0_14, %c0_15] : memref<16x128xf32, #tpu.memory_space<vmem>>, vector<16x128xf32>
      %c0_16 = arith.constant 0 : index
      %c0_17 = arith.constant 0 : index
      %20 = vector.load %arg7[%c0_16, %c0_17] : memref<16x128xf32, #tpu.memory_space<vmem>>, vector<16x128xf32>
      tpu.vector_store %arg7[%c0_16, %c0_17], %19 {strides = array<i32>} : memref<16x128xf32, #tpu.memory_space<vmem>>, vector<16x128xf32>,
    } else {
    }
    return
  }
  func.func @transform_0(%arg0: i32, %arg1: i32) -> (i32, i32) {
    %c0_i32 = arith.constant 0 : i32
    %c0_i32_0 = arith.constant 0 : i32
    return %arg0, %c0_i32 : i32, i32
  }
  func.func @transform_1(%arg0: i32, %arg1: i32) -> (i32, i32) {
    %c0_i32 = arith.constant 0 : i32
    %c0_i32_0 = arith.constant 0 : i32
    return %c0_i32, %arg1 : i32, i32
  }
  func.func @transform_2(%arg0: i32, %arg1: i32) -> (i32, i32) {
    %c0_i32 = arith.constant 0 : i32
    %c0_i32_0 = arith.constant 0 : i32
    return %c0_i32, %arg1 : i32, i32
  }
  func.func @transform_3(%arg0: i32, %arg1: i32) -> (i32, i32) {
    %c0_i32 = arith.constant 0 : i32
    %c0_i32_0 = arith.constant 0 : i32
    return %arg1, %c0_i32 : i32, i32
  }
  func.func @transform_4(%arg0: i32, %arg1: i32) -> (i32, i32) {
    %c0_i32 = arith.constant 0 : i32
    %c0_i32_0 = arith.constant 0 : i32
    %c0_i32_1 = arith.constant 0 : i32
    return %c0_i32, %c0_i32_0 : i32, i32
  }
  func.func @transform_5(%arg0: i32, %arg1: i32) -> (i32, i32) {
    %c0_i32 = arith.constant 0 : i32
    %c0_i32_0 = arith.constant 0 : i32
    return %arg0, %c0_i32 : i32, i32
  }
}

</mosaic_0001>

<bundles_post_ra>
// kernel: lenet_forward.4
= control target key start
LH: loop header
LB: loop body
LE: loop exit
PB: predicated region body
PF: predicated region fallthrough
CT: control target
= control target key end

     0   :  { %8 = vsyncpa [#allocation3], 0  ;;  %s879_s12 = smov [#allocation2]   ;;  %s1130_s0 = inlined_call_operand.hbm [shape: bf16[16,75], index: 0, kind: input, shape index: {}]   ;;  %s1131_s1 = inlined_call_operand.vmem [shape: bf16[75,1152], index: 1, kind: input, shape index: {}]   ;;  %s1132_s2 = inlined_call_operand.vmem [shape: f32[16,1], index: 2, kind: input, shape index: {}]   ;;  %s1133_s3 = inlined_call_operand.vmem [shape: bf16[16,1152], index: 3, kind: output, shape index: {}]  }
   0x1   :  { %s14_s13 = sshll.u32 %s879_s12, 4  ;;  %s15_s13 = int_to_ptr.vmem [resolvable:$true] %s14_s13 }
   0x2   :  { %s865_s14 = scalar_lea.vmem %s15_s13, 128  ;;  %p870_p1 = scmp.lt.s32.totalorder %s15_s13, %s15_s13 }
   0x3   :  { %p866_p0 = scmp.ne.s32.totalorder %s15_s13, %s865_s14  ;;  %p871_p2 = scmp.lt.s32.totalorder %s865_s14, %s865_s14 }
   0x5   :  { %p872_p3 = por %p871_p2, %p870_p1 }
   0x7   :  { %p873_p4 = pnand %p872_p3, %p866_p0 }
   0x9   :  { %876 = shalt.err (!%p873_p4)
}
   0xa   :  { %s880_s15 = smov 64   ;;  %s881_s16 = smov 4  }
   0xb   :  { %20 = dma.hbm_to_vmem [thread:$0]  %s1130_s0, 128, %s15_s13, [#allocation3], %s880_s15, %s880_s15, %s881_s16  }
   0xc   :  { %877 = dma.done.wait [#allocation3], 128  }
   0xd   :  { %878 = vsyncadd [#allocation3], 4294967168  ;;  %vm323_vm0 = vcmask 1044480   ;;  %v882_v0 = vmov 0   ;;  %vm324_vm1 = vcmask 1045504   ;;  %v883_v1 = vmov 65535  }
   0xe   :  { %386 = vmatprep.mubr.bf16.mxu0 %v882_v0  ;;  %429 = vmatprep.mubr.bf16.mxu1 %v882_v0  ;;  %v325_v2 = vsel %vm323_vm0, 4294967295, %v883_v1  ;;  %v755_v4 = vld [vmem:[%s1131_s1 + $0x124] ss:$36 sps:$4 sm:$0x3f]   ;;  %v758_v7 = vld [vmem:[%s1131_s1 + $0xdc] ss:$36 sps:$4 sm:$0xff]  }
   0xf   :  { %754 = vset.pattern.permute.xlu0 %v882_v0  ;;  %v912_v3 = vsel %vm324_vm1, %v325_v2, 0  ;;  %v757_v5 = vld [vmem:[%s1131_s1 + $0x120] ss:$36 sps:$4 sm:$0x3f]   ;;  %v760_v9 = vld [vmem:[%s1131_s1 + $0xd8] ss:$36 sps:$4 sm:$0xff]  }
  0x10   :  { %v331_v6 = vand.u32 %v755_v4, %v912_v3  ;;  %v328_v8 = vand.u32 %v757_v5, %v912_v3  ;;  %v766_v10 = vld [vmem:[%s1131_s1 + $0x12c] ss:$36 sps:$4 sm:$0x3f]   ;;  %v761_v11 = vld [vmem:[%s1131_s1 + $0x94] ss:$36 sps:$4 sm:$0xff]   ;;  %v979_v29 = vld [vmem:[#allocation2] sm:$0xff]  }
  0x11   :  { %v769_v12 = vld [vmem:[%s1131_s1 + $0x128] ss:$36 sps:$4 sm:$0x3f]   ;;  %v337_v13 = vand.u32 %v766_v10, %v912_v3  ;;  %v763_v14 = vld [vmem:[%s1131_s1 + $0x90] ss:$36 sps:$4 sm:$0xff]   ;;  %vm319_vm2 = vcmask 613376  }
  0x12   :  { %360 = vmatprep.subr.bf16.mxu0 %v331_v6  ;;  %v334_v15 = vand.u32 %v769_v12, %v912_v3  ;;  %v772_v16 = vld [vmem:[%s1131_s1 + $0xe4] ss:$36 sps:$4 sm:$0xff]   ;;  %v764_v17 = vld [vmem:[%s1131_s1 + $0x4c] ss:$36 sps:$4 sm:$0xff]   ;;  %v777_v19 = vld [vmem:[%s1131_s1 + $0x9c] ss:$36 sps:$4 sm:$0xff]  }
  0x13   :  { %361 = vmatpush1.bf16.msra.mxu0 %v328_v8  ;;  %403 = vmatprep.subr.bf16.mxu1 %v337_v13  ;;  %v775_v18 = vld [vmem:[%s1131_s1 + $0xe0] ss:$36 sps:$4 sm:$0xff]   ;;  %v768_v20 = vld [vmem:[%s1131_s1 + $0x48] ss:$36 sps:$4 sm:$0xff]   ;;  %v782_v23 = vld [vmem:[%s1131_s1 + $0x98] ss:$36 sps:$4 sm:$0xff]  }
  0x14   :  { %362 = vmatprep.subr.bf16.mxu0 %v758_v7  ;;  %404 = vmatpush1.bf16.msra.mxu1 %v334_v15  ;;  %v770_v21 = vld [vmem:[%s1131_s1 + $0x4] ss:$36 sps:$4 sm:$0xff]   ;;  %v781_v22 = vld [vmem:[%s1131_s1 + $0x134] ss:$36 sps:$4 sm:$0x3f]   ;;  %v884_v56 = vmov 0.0  }
  0x15   :  { %405 = vmatprep.subr.bf16.mxu1 %v772_v16  ;;  %v783_v24 = vld [vmem:[%s1131_s1 + $0x54] ss:$36 sps:$4 sm:$0xff]   ;;  %v774_v25 = vld [vmem:[%s1131_s1] ss:$36 sps:$4 sm:$0xff]   ;;  %v343_v27 = vand.u32 %v781_v22, %v912_v3  ;;  %v789_v30 = vld [vmem:[%s1131_s1 + $0xc] ss:$36 sps:$4 sm:$0xff]  }
  0x16   :  { %v779_v26 = vld [vmem:[%s1131_s1 + $0x130] ss:$36 sps:$4 sm:$0x3f]   ;;  %v800_v33 = vld [vmem:[%s1131_s1 + $0x13c] ss:$36 sps:$4 sm:$0x3f]  }
  0x17   :  { %363 = vmatpush1.bf16.msra.mxu0 %v760_v9  ;;  %v788_v28 = vld [vmem:[%s1131_s1 + $0x50] ss:$36 sps:$4 sm:$0xff]   ;;  %v340_v32 = vand.u32 %v779_v26, %v912_v3  ;;  %v794_v34 = vld [vmem:[%s1131_s1 + $0x8] ss:$36 sps:$4 sm:$0xff]   ;;  %v349_v36 = vand.u32 %v800_v33, %v912_v3  ;;  %v791_v41 = vld [vmem:[%s1131_s1 + $0xa0] ss:$36 sps:$4 sm:$0xff]  }
  0x18   :  { %364 = vmatprep.subr.bf16.mxu0 %v761_v11  ;;  %406 = vmatpush1.bf16.msra.mxu1 %v775_v18  ;;  %v787_v31 = vld [vmem:[%s1131_s1 + $0xec] ss:$36 sps:$4 sm:$0xff]   ;;  %v798_v35 = vld [vmem:[%s1131_s1 + $0x138] ss:$36 sps:$4 sm:$0x3f]   ;;  %v81_v46 = vld [vmem:[%s1132_s2] sm:$0xff] }
  0x19   :  { %407 = vmatprep.subr.bf16.mxu1 %v777_v19  ;;  %v785_v37 = vld [vmem:[%s1131_s1 + $0xe8] ss:$36 sps:$4 sm:$0xff]   ;;  %v346_v39 = vand.u32 %v798_v35, %v912_v3  ;;  %v806_v40 = vld [vmem:[%s1131_s1 + $0xf4] ss:$36 sps:$4 sm:$0xff]   ;;  %v797_v42 = vld [vmem:[%s1131_s1 + $0x5c] ss:$36 sps:$4 sm:$0xff]   ;;  %85 = vperm.xlu0 %754, %v81_v46  }
  0x1a   :  { %v793_v38 = vld [vmem:[%s1131_s1 + $0xa4] ss:$36 sps:$4 sm:$0xff]   ;;  %v804_v43 = vld [vmem:[%s1131_s1 + $0xf0] ss:$36 sps:$4 sm:$0xff]   ;;  %v795_v45 = vld [vmem:[%s1131_s1 + $0x58] ss:$36 sps:$4 sm:$0xff]  }
  0x1b   :  { %365 = vmatpush1.bf16.msra.mxu0 %v763_v14  ;;  %v809_v44 = vld [vmem:[%s1131_s1 + $0xac] ss:$36 sps:$4 sm:$0xff]   ;;  %v803_v47 = vld [vmem:[%s1131_s1 + $0x14] ss:$36 sps:$4 sm:$0xff]   ;;  %v813_v49 = vld [vmem:[%s1131_s1 + $0x64] ss:$36 sps:$4 sm:$0xff]  }
  0x1c   :  { %366 = vmatprep.subr.bf16.mxu0 %v764_v17  ;;  %408 = vmatpush1.bf16.msra.mxu1 %v782_v23  ;;  %v807_v48 = vld [vmem:[%s1131_s1 + $0xa8] ss:$36 sps:$4 sm:$0xff]   ;;  %v801_v51 = vld [vmem:[%s1131_s1 + $0x10] ss:$36 sps:$4 sm:$0xff]   ;;  %v811_v53 = vld [vmem:[%s1131_s1 + $0x60] ss:$36 sps:$4 sm:$0xff]  }
  0x1d   :  { %409 = vmatprep.subr.bf16.mxu1 %v783_v24  ;;  %v82_v50 = vld [vmem:[%s1132_s2 + $0x8] sm:$0xff]  ;;  %v810_v52 = vld [vmem:[%s1131_s1 + $0x140] ss:$36 sps:$4 sm:$0x3f]   ;;  %v815_v57 = vld [vmem:[%s1131_s1 + $0x18] ss:$36 sps:$4 sm:$0xff]  }
  0x1e   :  { %v817_v54 = vld [vmem:[%s1131_s1 + $0x1c] ss:$36 sps:$4 sm:$0xff]   ;;  %90 = vperm.xlu0 %754, %v82_v50   ;;  %v352_v55 = vand.u32 %v810_v52, %v912_v3  ;;  %vm885_vm3 = vmmov 0   ;;  %v818_v59 = vld [vmem:[%s1131_s1 + $0xb0] ss:$36 sps:$4 sm:$0xff]  }
  0x1f   :  { %367 = vmatpush1.bf16.msra.mxu0 %v768_v20  ;;  %v814_v58 = vld [vmem:[%s1131_s1 + $0xf8] ss:$36 sps:$4 sm:$0xff]   ;;  %v819_v60 = vld [vmem:[%s1131_s1 + $0x68] ss:$36 sps:$4 sm:$0xff]   ;;  %v820_v61 = vld [vmem:[%s1131_s1 + $0x20] ss:$36 sps:$4 sm:$0xff]  }
  0x20   :  { %368 = vmatprep.subr.bf16.mxu0 %v770_v21  ;;  %410 = vmatpush1.bf16.msra.mxu1 %v788_v28 }
  0x21   :  { %411 = vmatprep.subr.bf16.mxu1 %v789_v30 }
  0x23   :  { %369 = vmatpush1.bf16.msra.mxu0 %v774_v25 }
  0x24   :  { %446 = vmatprep.subr.bf16.mxu0 %v343_v27  ;;  %412 = vmatpush1.bf16.msra.mxu1 %v794_v34 }
  0x25   :  { %489 = vmatprep.subr.bf16.mxu1 %v349_v36 }
  0x26   :  { %702 = vmatmul.mubr.msk.bf16.vlgmr.msra.gmra.mxu0 %vm319_vm2, %v979_v29 }
  0x27   :  { %447 = vmatpush1.bf16.msra.mxu0 %v340_v32  ;;  %472 = vmatprep.mubr.bf16.mxu0 %v882_v0 }
  0x28   :  { %448 = vmatprep.subr.bf16.mxu0 %v787_v31  ;;  %703 = vmatmul.mubr.msk.bf16.vlgmr.msra.gmra.mxu1 %vm319_vm2, %v979_v29 }
  0x29   :  { %490 = vmatpush1.bf16.msra.mxu1 %v346_v39  ;;  %515 = vmatprep.mubr.bf16.mxu1 %v882_v0 }
  0x2a   :  { %491 = vmatprep.subr.bf16.mxu1 %v806_v40 }
  0x2b   :  { %449 = vmatpush1.bf16.msra.mxu0 %v785_v37 }
  0x2c   :  { %450 = vmatprep.subr.bf16.mxu0 %v793_v38 }
  0x2d   :  { %492 = vmatpush1.bf16.msra.mxu1 %v804_v43 }
  0x2e   :  { %493 = vmatprep.subr.bf16.mxu1 %v809_v44 }
  0x2f   :  { %451 = vmatpush1.bf16.msra.mxu0 %v791_v41 }
  0x30   :  { %452 = vmatprep.subr.bf16.mxu0 %v797_v42 }
  0x31   :  { %494 = vmatpush1.bf16.msra.mxu1 %v807_v48 }
  0x32   :  { %495 = vmatprep.subr.bf16.mxu1 %v813_v49 }
  0x33   :  { %453 = vmatpush1.bf16.msra.mxu0 %v795_v45 }
  0x34   :  { %454 = vmatprep.subr.bf16.mxu0 %v803_v47 }
  0x35   :  { %496 = vmatpush1.bf16.msra.mxu1 %v811_v53 }
  0x36   :  { %497 = vmatprep.subr.bf16.mxu1 %v817_v54 }
  0x37   :  { %455 = vmatpush1.bf16.msra.mxu0 %v801_v51 }
  0x38   :  { %733 = vmatprep.subr.bf16.mxu0 %v884_v56 }
  0x39   :  { %498 = vmatpush1.bf16.msra.mxu1 %v815_v57 }
  0x3a   :  { %704 = vmatmul.mubr.msk.bf16.vlgmr.msra.gmra.mxu0 %vm319_vm2, %v979_v29 }
  0x3b   :  { %734 = vmatpush3.bf16.msra.mxu0 %v352_v55  ;;  %743 = vmatprep.mubr.msk.bf16.mxu0 %vm885_vm3, %v884_v56 }
  0x3c   :  { %735 = vmatprep.subr.bf16.mxu0 %v884_v56  ;;  %705 = vmatmul.mubr.msk.bf16.vlgmr.msra.gmra.mxu1 %vm319_vm2, %v979_v29 }
  0x3f   :  { %736 = vmatpush3.bf16.msra.mxu0 %v814_v58 }
  0x40   :  { %737 = vmatprep.subr.bf16.mxu0 %v884_v56 }
  0x43   :  { %738 = vmatpush3.bf16.msra.mxu0 %v818_v59 }
  0x44   :  { %739 = vmatprep.subr.bf16.mxu0 %v884_v56 }
  0x47   :  { %740 = vmatpush3.bf16.msra.mxu0 %v819_v60 }
  0x48   :  { %741 = vmatprep.subr.bf16.mxu0 %v884_v56 }
  0x4b   :  { %742 = vmatpush3.bf16.msra.mxu0 %v820_v61 }
  0x4e   :  { %744 = vmatmul.mubr.msk.bf16.vlgmr.msra.gmra.mxu0 %vm319_vm2, %v979_v29 }
  0x94   :  { %v1078_v62 = vpop.permute.xlu0 %85 }
  0x99   :  { %v1081_v2 = vpop.permute.xlu0 %90 }
  0xe6   :  { %v388_v63 = vpop.f32.mrf.mxu0 }
  0xe7   :  { %v389_v0 = vadd.f32 %v388_v63, %v1078_v62 }
  0xe8   :  { %v390_v1 = vpop.f32.mrf.mxu0  ;;  %v431_v6 = vpop.f32.mrf.mxu1 }
  0xe9   :  { %821 = vtanh.f32 %v389_v0  ;;  %v391_v3 = vadd.f32 %v390_v1, %v1078_v62  ;;  %v432_v8 = vadd.f32 %v431_v6, %v1078_v62 }
  0xea   :  { %v392_v4 = vpop.f32.mrf.mxu0  ;;  %v433_v10 = vpop.f32.mrf.mxu1 }
  0xeb   :  { %823 = vtanh.f32 %v391_v3  ;;  %v393_v5 = vadd.f32 %v392_v4, %v1081_v2  ;;  %v434_v11 = vadd.f32 %v433_v10, %v1078_v62 }
  0xec   :  { %v394_v7 = vpop.f32.mrf.mxu0  ;;  %v435_v12 = vpop.f32.mrf.mxu1 }
  0xed   :  { %825 = vtanh.f32 %v393_v5  ;;  %v395_v9 = vadd.f32 %v394_v7, %v1081_v2  ;;  %v436_v13 = vadd.f32 %v435_v12, %v1081_v2 }
  0xee   :  { %827 = vtanh.f32 %v432_v8  ;;  %v437_v14 = vpop.f32.mrf.mxu1 }
  0xef   :  { %829 = vtanh.f32 %v395_v9  ;;  %v438_v15 = vadd.f32 %v437_v14, %v1081_v2 }
  0xf0   :  { %831 = vtanh.f32 %v434_v11 }
  0xf1   :  { %833 = vtanh.f32 %v436_v13 }
  0xf2   :  { %835 = vtanh.f32 %v438_v15 }
  0xf6   :  { %v822_v16 = vpop.eup %821 }
  0xf8   :  { %v824_v17 = vpop.eup %823 }
  0xf9   :  { %v717_v18 = vpack.c.bf16 %v824_v17, %v822_v16 }
  0xfa   :  { %v826_v19 = vpop.eup %825  ;;  %v474_v20 = vpop.f32.mrf.mxu0 }
  0xfb   :  { %v828_v21 = vpop.eup %827  ;;  %641 = vst [vmem:[%s1133_s3] sm:$0xff] %v717_v18  ;;  %v475_v22 = vadd.f32 %v474_v20, %v1078_v62 }
  0xfc   :  { %v830_v23 = vpop.eup %829  ;;  %v476_v24 = vpop.f32.mrf.mxu0 }
  0xfd   :  { %v832_v25 = vpop.eup %831  ;;  %v722_v26 = vpack.c.bf16 %v830_v23, %v826_v19  ;;  %837 = vtanh.f32 %v475_v22  ;;  %v477_v27 = vadd.f32 %v476_v24, %v1078_v62  ;;  %v517_v32 = vpop.f32.mrf.mxu1 }
  0xfe   :  { %v718_v28 = vpack.c.bf16 %v832_v25, %v828_v21  ;;  %v478_v29 = vpop.f32.mrf.mxu0  ;;  %v834_v30 = vpop.eup %833  ;;  %v518_v34 = vadd.f32 %v517_v32, %v1078_v62 }
  0xff   :  { %646 = vst [vmem:[%s1133_s3 + $0x24] sm:$0xff] %v722_v26  ;;  %839 = vtanh.f32 %v477_v27  ;;  %v479_v31 = vadd.f32 %v478_v29, %v1081_v2  ;;  %v836_v35 = vpop.eup %835  ;;  %v519_v37 = vpop.f32.mrf.mxu1 }
 0x100   :  { %642 = vst [vmem:[%s1133_s3 + $0x8] sm:$0xff] %v718_v28  ;;  %v480_v33 = vpop.f32.mrf.mxu0  ;;  %v723_v38 = vpack.c.bf16 %v836_v35, %v834_v30  ;;  %v520_v39 = vadd.f32 %v519_v37, %v1078_v62 }
 0x101   :  { %841 = vtanh.f32 %v479_v31  ;;  %v481_v36 = vadd.f32 %v480_v33, %v1081_v2  ;;  %v521_v40 = vpop.f32.mrf.mxu1 }
 0x102   :  { %843 = vtanh.f32 %v518_v34  ;;  %647 = vst [vmem:[%s1133_s3 + $0x2c] sm:$0xff] %v723_v38  ;;  %v522_v41 = vadd.f32 %v521_v40, %v1081_v2 }
 0x103   :  { %845 = vtanh.f32 %v481_v36  ;;  %v523_v42 = vpop.f32.mrf.mxu1 }
 0x104   :  { %847 = vtanh.f32 %v520_v39  ;;  %v524_v43 = vadd.f32 %v523_v42, %v1081_v2 }
 0x105   :  { %849 = vtanh.f32 %v522_v41 }
 0x106   :  { %851 = vtanh.f32 %v524_v43 }
 0x10a   :  { %v838_v44 = vpop.eup %837 }
 0x10c   :  { %v840_v45 = vpop.eup %839 }
 0x10d   :  { %v719_v46 = vpack.c.bf16 %v840_v45, %v838_v44 }
 0x10e   :  { %v842_v47 = vpop.eup %841  ;;  %v560_v48 = vpop.f32.mrf.mxu0 }
 0x10f   :  { %v844_v49 = vpop.eup %843  ;;  %643 = vst [vmem:[%s1133_s3 + $0x10] sm:$0xff] %v719_v46  ;;  %v561_v50 = vadd.f32 %v560_v48, %v1078_v62 }
 0x110   :  { %v846_v51 = vpop.eup %845  ;;  %v745_v52 = vpop.f32.mrf.mxu0 }
 0x111   :  { %v848_v53 = vpop.eup %847  ;;  %v724_v54 = vpack.c.bf16 %v846_v51, %v842_v47  ;;  %853 = vtanh.f32 %v561_v50 }
 0x112   :  { %v720_v55 = vpack.c.bf16 %v848_v53, %v844_v49  ;;  %v563_v56 = vpop.f32.mrf.mxu0  ;;  %v850_v57 = vpop.eup %849 }
 0x113   :  { %648 = vst [vmem:[%s1133_s3 + $0x34] sm:$0xff] %v724_v54  ;;  %v564_v58 = vadd.f32 %v563_v56, %v1081_v2  ;;  %v852_v60 = vpop.eup %851 }
 0x114   :  { %644 = vst [vmem:[%s1133_s3 + $0x18] sm:$0xff] %v720_v55  ;;  %v746_v59 = vpop.f32.mrf.mxu0  ;;  %v725_v61 = vpack.c.bf16 %v852_v60, %v850_v57 }
 0x115   :  { %855 = vtanh.f32 %v564_v58 }
 0x116   :  { %649 = vst [vmem:[%s1133_s3 + $0x3c] sm:$0xff] %v725_v61 }
 0x11e   :  { %v854_v62 = vpop.eup %853 }
 0x11f   :  { %v721_v63 = vpack.c.bf16 %v854_v62, %v854_v62 }
 0x121   :  { %645 = vst [vmem:[%s1133_s3 + $0x20] sm:$0xf] %v721_v63 }
 0x122   :  { %v856_v0 = vpop.eup %855 }
 0x123   :  { %v726_v1 = vpack.c.bf16 %v856_v0, %v856_v0 }
 0x125   :  { %650 = vst [vmem:[%s1133_s3 + $0x44] sm:$0xf] %v726_v1 }
 0x126   :  { %655 = vsyncpa [#allocation3], 1 }

// kernel: lenet_forward.5
= control target key start
LH: loop header
LB: loop body
LE: loop exit
PB: predicated region body
PF: predicated region fallthrough
CT: control target
= control target key end

     0   :  { %8 = vsyncpa [#allocation3], 0  ;;  %s338_s12 = smov [#allocation2]   ;;  %s434_s0 = inlined_call_operand.hbm [shape: bf16[16,150], index: 0, kind: input, shape index: {}]   ;;  %s435_s1 = inlined_call_operand.vmem [shape: bf16[150,256], index: 1, kind: input, shape index: {}]   ;;  %s436_s2 = inlined_call_operand.vmem [shape: f32[16,1], index: 2, kind: input, shape index: {}]   ;;  %s437_s3 = inlined_call_operand.vmem [shape: bf16[16,256], index: 3, kind: output, shape index: {}]  }
   0x1   :  { %s14_s13 = sshll.u32 %s338_s12, 4  ;;  %s15_s13 = int_to_ptr.vmem [resolvable:$true] %s14_s13 }
   0x2   :  { %s324_s14 = scalar_lea.vmem %s15_s13, 256  ;;  %p329_p1 = scmp.lt.s32.totalorder %s15_s13, %s15_s13 }
   0x3   :  { %p325_p0 = scmp.ne.s32.totalorder %s15_s13, %s324_s14  ;;  %p330_p2 = scmp.lt.s32.totalorder %s324_s14, %s324_s14 }
   0x5   :  { %p331_p3 = por %p330_p2, %p329_p1 }
   0x7   :  { %p332_p4 = pnand %p331_p3, %p325_p0 }
   0x9   :  { %335 = shalt.err (!%p332_p4)
}
   0xa   :  { %s339_s15 = smov 128   ;;  %s340_s16 = smov 8  }
   0xb   :  { %20 = dma.hbm_to_vmem [thread:$0]  %s434_s0, 256, %s15_s13, [#allocation3], %s339_s15, %s339_s15, %s340_s16  }
   0xc   :  { %336 = dma.done.wait [#allocation3], 256  }
   0xd   :  { %337 = vsyncadd [#allocation3], 4294967040  ;;  %v341_v0 = vmov 0   ;;  %v276_v1 = vld [vmem:[%s435_s1 + $0x74] ss:$8 sps:$4 sm:$0xff]   ;;  %vm166_vm0 = vcmask 179200  }
   0xe   :  { %275 = vset.pattern.permute.xlu0 %v341_v0  ;;  %v278_v2 = vld [vmem:[%s435_s1 + $0x70] ss:$8 sps:$4 sm:$0xff]   ;;  %177 = vmatprep.subr.bf16.mxu0 %v276_v1  ;;  %v279_v3 = vld [vmem:[%s435_s1 + $0x64] ss:$8 sps:$4 sm:$0xff]   ;;  %v281_v4 = vld [vmem:[%s435_s1 + $0x60] ss:$8 sps:$4 sm:$0xff]  }
   0xf   :  { %178 = vmatpush1.bf16.msra.mxu0 %v278_v2  ;;  %v282_v5 = vld [vmem:[%s435_s1 + $0x54] ss:$8 sps:$4 sm:$0xff]   ;;  %v284_v6 = vld [vmem:[%s435_s1 + $0x50] ss:$8 sps:$4 sm:$0xff]   ;;  %v285_v7 = vld [vmem:[%s435_s1 + $0x44] ss:$8 sps:$4 sm:$0xff]  }
  0x10   :  { %179 = vmatprep.subr.bf16.mxu0 %v279_v3  ;;  %v287_v8 = vld [vmem:[%s435_s1 + $0x40] ss:$8 sps:$4 sm:$0xff]   ;;  %v288_v9 = vld [vmem:[%s435_s1 + $0x34] ss:$8 sps:$4 sm:$0xff]   ;;  %v307_v10 = vld [vmem:[#allocation2 + $0x4] ss:$8 sps:$4 sm:$0xff]  }
  0x11   :  { %v50_v11 = vld [vmem:[%s436_s2] sm:$0xff]  ;;  %v290_v12 = vld [vmem:[%s435_s1 + $0x30] ss:$8 sps:$4 sm:$0xff]   ;;  %266 = vmatprep.mubr.msk.bf16.mxu0 %vm166_vm0, %v307_v10  ;;  %v51_v13 = vld [vmem:[%s436_s2 + $0x8] sm:$0xff]  ;;  %vm170_vm1 = vcmask 1042432  }
  0x12   :  { %54 = vperm.xlu0 %275, %v50_v11   ;;  %v291_v14 = vld [vmem:[%s435_s1 + $0x24] ss:$8 sps:$4 sm:$0xff]   ;;  %v293_v15 = vld [vmem:[%s435_s1 + $0x20] ss:$8 sps:$4 sm:$0xff]   ;;  %v294_v16 = vld [vmem:[%s435_s1 + $0x14] ss:$8 sps:$4 sm:$0xff]  }
  0x13   :  { %180 = vmatpush1.bf16.msra.mxu0 %v281_v4  ;;  %v296_v17 = vld [vmem:[%s435_s1 + $0x10] ss:$8 sps:$4 sm:$0xff]   ;;  %v297_v18 = vld [vmem:[%s435_s1 + $0x4] ss:$8 sps:$4 sm:$0xff]   ;;  %v299_v20 = vld [vmem:[%s435_s1] ss:$8 sps:$4 sm:$0xff]  }
  0x14   :  { %181 = vmatprep.subr.bf16.mxu0 %v282_v5  ;;  %v49_v19 = vld [vmem:[%s435_s1 + $0x90] sm:$0x77]  ;;  %v302_v24 = vld [vmem:[%s435_s1 + $0x84] ss:$8 sps:$4 sm:$0xff]   ;;  %v304_v25 = vld [vmem:[%s435_s1 + $0x80] ss:$8 sps:$4 sm:$0xff]  }
  0x15   :  { %v264_v21 = vcombine.high %v49_v19, %v49_v19  ;;  %v263_v22 = vcombine.low %v49_v19, %v49_v19  ;;  %v305_v26 = vld [vmem:[#allocation2] ss:$8 sps:$4 sm:$0xff]  }
  0x16   :  { %59 = vperm.xlu0 %275, %v51_v13  }
  0x17   :  { %182 = vmatpush1.bf16.msra.mxu0 %v284_v6  ;;  %v172_v23 = vsel %vm170_vm1, %v263_v22, 0 }
  0x18   :  { %183 = vmatprep.subr.bf16.mxu0 %v285_v7 }
  0x1b   :  { %184 = vmatpush1.bf16.msra.mxu0 %v287_v8 }
  0x1c   :  { %185 = vmatprep.subr.bf16.mxu0 %v288_v9 }
  0x1f   :  { %186 = vmatpush1.bf16.msra.mxu0 %v290_v12 }
  0x20   :  { %187 = vmatprep.subr.bf16.mxu0 %v291_v14 }
  0x23   :  { %188 = vmatpush1.bf16.msra.mxu0 %v293_v15 }
  0x24   :  { %189 = vmatprep.subr.bf16.mxu0 %v294_v16 }
  0x27   :  { %190 = vmatpush1.bf16.msra.mxu0 %v296_v17 }
  0x28   :  { %191 = vmatprep.subr.bf16.mxu0 %v297_v18 }
  0x2b   :  { %192 = vmatpush1.bf16.msra.mxu0 %v299_v20 }
  0x2c   :  { %265 = vmatprep.subr.msk.bf16.mxu0 %vm170_vm1, %v264_v21 }
  0x2f   :  { %206 = vmatpush2.bf16.msra.mxu0 %v172_v23 }
  0x30   :  { %207 = vmatprep.subr.bf16.mxu0 %v302_v24 }
  0x33   :  { %208 = vmatpush2.bf16.msra.mxu0 %v304_v25 }
  0x36   :  { %210 = vmatmul.mubr.bf16.vlgmr.msra.gmra.mxu0 %v305_v26 }
  0x8d   :  { %v55_v27 = vpop.permute.xlu0 %54 }
  0x91   :  { %v60_v32 = vpop.permute.xlu0 %59 }
  0xf6   :  { %v211_v28 = vpop.f32.mrf.mxu0 }
  0xf7   :  { %v212_v29 = vadd.f32 %v211_v28, %v55_v27 }
  0xf8   :  { %v213_v30 = vpop.f32.mrf.mxu0 }
  0xf9   :  { %v214_v31 = vadd.f32 %v213_v30, %v55_v27  ;;  %308 = vtanh.f32 %v212_v29 }
  0xfa   :  { %v215_v33 = vpop.f32.mrf.mxu0 }
  0xfb   :  { %310 = vtanh.f32 %v214_v31  ;;  %v216_v34 = vadd.f32 %v215_v33, %v60_v32 }
  0xfc   :  { %v217_v35 = vpop.f32.mrf.mxu0 }
  0xfd   :  { %v218_v36 = vadd.f32 %v217_v35, %v60_v32  ;;  %312 = vtanh.f32 %v216_v34 }
  0xff   :  { %314 = vtanh.f32 %v218_v36 }
 0x106   :  { %v309_v37 = vpop.eup %308 }
 0x108   :  { %v311_v38 = vpop.eup %310 }
 0x109   :  { %v269_v39 = vpack.c.bf16 %v311_v38, %v309_v37 }
 0x10a   :  { %v313_v40 = vpop.eup %312 }
 0x10b   :  { %236 = vst [vmem:[%s437_s3] sm:$0xff] %v269_v39 }
 0x10c   :  { %v315_v41 = vpop.eup %314 }
 0x10d   :  { %v270_v42 = vpack.c.bf16 %v315_v41, %v313_v40 }
 0x10f   :  { %237 = vst [vmem:[%s437_s3 + $0x8] sm:$0xff] %v270_v42 }
 0x110   :  { %242 = vsyncpa [#allocation3], 1 }

// kernel: lenet_forward.6
= control target key start
LH: loop header
LB: loop body
LE: loop exit
PB: predicated region body
PF: predicated region fallthrough
CT: control target
= control target key end

     0   :  { %v757_v0 = vmov 0   ;;  %vm337_vm0 = vcmask 130048   ;;  %vm549_vm1 = vcmask 977920   ;;  %s982_s1 = inlined_call_operand.vmem [shape: bf16[400,120], index: 1, kind: input, shape index: {}]   ;;  %s983_s0 = inlined_call_operand.vmem [shape: bf16[80,400], index: 0, kind: input, shape index: {}]   ;;  %s984_s2 = inlined_call_operand.vmem [shape: f32[1,120], index: 2, kind: input, shape index: {}]   ;;  %s985_s3 = inlined_call_operand.vmem [shape: bf16[80,120], index: 3, kind: output, shape index: {}]  }
   0x1   :  { %426 = vmatprep.subr.bf16.mxu1 %v757_v0  ;;  %v682_v1 = vld [vmem:[%s982_s1 + $0x78] sm:$0xff]   ;;  %v685_v4 = vld [vmem:[%s982_s1 + $0x70] sm:$0xff]   ;;  %v688_v7 = vld [vmem:[%s982_s1 + $0x68] sm:$0xff]  }
   0x2   :  { %v683_v2 = vld [vmem:[%s982_s1 + $0xb8] sm:$0xff]   ;;  %635 = vmatprep.subr.bf16.mxu0 %v682_v1  ;;  %v686_v5 = vld [vmem:[%s982_s1 + $0xb0] sm:$0xff]   ;;  %v689_v8 = vld [vmem:[%s982_s1 + $0xa8] sm:$0xff]  }
   0x3   :  { %v684_v3 = vld [vmem:[%s982_s1 + $0x38] sm:$0xff]   ;;  %427 = vmatpush1.bf16.msra.mxu1 %v683_v2  ;;  %v687_v6 = vld [vmem:[%s982_s1 + $0x30] sm:$0xff]   ;;  %v690_v9 = vld [vmem:[%s982_s1 + $0x28] sm:$0xff]  }
   0x4   :  { %636 = vmatpush3.bf16.msra.mxu0 %v684_v3  ;;  %428 = vmatprep.subr.bf16.mxu1 %v757_v0  ;;  %v691_v10 = vld [vmem:[%s982_s1 + $0x60] sm:$0xff]   ;;  %v694_v13 = vld [vmem:[%s982_s1 + $0x58] sm:$0xff]   ;;  %v697_v16 = vld [vmem:[%s982_s1 + $0x50] sm:$0xff]  }
   0x5   :  { %637 = vmatprep.subr.bf16.mxu0 %v685_v4  ;;  %v692_v11 = vld [vmem:[%s982_s1 + $0xa0] sm:$0xff]   ;;  %v695_v14 = vld [vmem:[%s982_s1 + $0x98] sm:$0xff]   ;;  %v698_v17 = vld [vmem:[%s982_s1 + $0x90] sm:$0xff]  }
   0x6   :  { %v693_v12 = vld [vmem:[%s982_s1 + $0x20] sm:$0xff]   ;;  %v696_v15 = vld [vmem:[%s982_s1 + $0x18] sm:$0xff]   ;;  %v699_v18 = vld [vmem:[%s982_s1 + $0x10] sm:$0xff]  }
   0x7   :  { %429 = vmatpush1.bf16.msra.mxu1 %v686_v5  ;;  %v700_v19 = vld [vmem:[%s982_s1 + $0x48] sm:$0xff]   ;;  %v703_v22 = vld [vmem:[%s982_s1 + $0x40] sm:$0xff]  }
   0x8   :  { %638 = vmatpush3.bf16.msra.mxu0 %v687_v6  ;;  %430 = vmatprep.subr.bf16.mxu1 %v757_v0  ;;  %v701_v20 = vld [vmem:[%s982_s1 + $0x88] sm:$0xff]   ;;  %v708_v23 = vld [vmem:[%s983_s0 + $0x4] ss:$16 sps:$4 sm:$0xff]   ;;  %v706_v27 = vld [vmem:[%s983_s0] ss:$16 sps:$4 sm:$0xff]  }
   0x9   :  { %639 = vmatprep.subr.bf16.mxu0 %v688_v7  ;;  %v702_v21 = vld [vmem:[%s982_s1 + $0x8] sm:$0xff]   ;;  %v704_v24 = vld [vmem:[%s982_s1 + $0x80] sm:$0xff]   ;;  %385 = vmatprep.mubr.bf16.mxu0 %v708_v23 }
   0xa   :  { %v712_v25 = vld [vmem:[%s983_s0 + $0xc] ss:$16 sps:$4 sm:$0xff]   ;;  %v705_v26 = vld [vmem:[%s982_s1] sm:$0xff]   ;;  %v710_v30 = vld [vmem:[%s983_s0 + $0x8] ss:$16 sps:$4 sm:$0xff]  }
   0xb   :  { %431 = vmatpush1.bf16.msra.mxu1 %v689_v8  ;;  %610 = vmatprep.mubr.msk.bf16.mxu1 %vm337_vm0, %v712_v25  ;;  %v709_v28 = vld [vmem:[%s982_s1 + $0xc0] sm:$0xff]   ;;  %v716_v31 = vld [vmem:[%s983_s0 + $0x2c] ss:$16 sps:$4 sm:$0xff]   ;;  %v718_v34 = vld [vmem:[%s983_s0 + $0x28] ss:$16 sps:$4 sm:$0xff]  }
   0xc   :  { %640 = vmatpush3.bf16.msra.mxu0 %v690_v9  ;;  %432 = vmatprep.subr.bf16.mxu1 %v757_v0  ;;  %v713_v29 = vld [vmem:[%s983_s0 + $0x24] ss:$16 sps:$4 sm:$0xff]   ;;  %v715_v32 = vld [vmem:[%s983_s0 + $0x20] ss:$16 sps:$4 sm:$0xff]   ;;  %v722_v35 = vld [vmem:[%s983_s0 + $0x4c] ss:$16 sps:$4 sm:$0xff]  }
   0xd   :  { %641 = vmatprep.subr.bf16.mxu0 %v691_v10  ;;  %v719_v33 = vld [vmem:[%s983_s0 + $0x44] ss:$16 sps:$4 sm:$0xff]   ;;  %v721_v36 = vld [vmem:[%s983_s0 + $0x40] ss:$16 sps:$4 sm:$0xff]   ;;  %v724_v38 = vld [vmem:[%s983_s0 + $0x48] ss:$16 sps:$4 sm:$0xff]  }
   0xe   :  { %v725_v37 = vld [vmem:[%s983_s0 + $0x64] ss:$16 sps:$4 sm:$0xff]   ;;  %v728_v39 = vld [vmem:[%s983_s0 + $0x6c] ss:$16 sps:$4 sm:$0xff]   ;;  %v727_v40 = vld [vmem:[%s983_s0 + $0x60] ss:$16 sps:$4 sm:$0xff]  }
   0xf   :  { %433 = vmatpush1.bf16.msra.mxu1 %v692_v11  ;;  %v731_v41 = vld [vmem:[%s983_s0 + $0x84] ss:$16 sps:$4 sm:$0xff]   ;;  %v730_v42 = vld [vmem:[%s983_s0 + $0x68] ss:$16 sps:$4 sm:$0xff]   ;;  %v734_v43 = vld [vmem:[%s983_s0 + $0x8c] ss:$16 sps:$4 sm:$0xff]  }
  0x10   :  { %642 = vmatpush3.bf16.msra.mxu0 %v693_v12  ;;  %434 = vmatprep.subr.bf16.mxu1 %v757_v0  ;;  %v733_v44 = vld [vmem:[%s983_s0 + $0x80] ss:$16 sps:$4 sm:$0xff]   ;;  %v736_v45 = vld [vmem:[%s983_s0 + $0x88] ss:$16 sps:$4 sm:$0xff]  }
  0x11   :  { %643 = vmatprep.subr.bf16.mxu0 %v694_v13  ;;  %v930_v48 = vld [vmem:[%s984_s2] ss:$0 sm:$0xff] }
  0x13   :  { %435 = vmatpush1.bf16.msra.mxu1 %v695_v14 }
  0x14   :  { %644 = vmatpush3.bf16.msra.mxu0 %v696_v15  ;;  %436 = vmatprep.subr.bf16.mxu1 %v757_v0 }
  0x15   :  { %645 = vmatprep.subr.bf16.mxu0 %v697_v16 }
  0x17   :  { %437 = vmatpush1.bf16.msra.mxu1 %v698_v17 }
  0x18   :  { %646 = vmatpush3.bf16.msra.mxu0 %v699_v18  ;;  %438 = vmatprep.subr.bf16.mxu1 %v757_v0 }
  0x19   :  { %647 = vmatprep.subr.bf16.mxu0 %v700_v19 }
  0x1b   :  { %439 = vmatpush1.bf16.msra.mxu1 %v701_v20 }
  0x1c   :  { %648 = vmatpush3.bf16.msra.mxu0 %v702_v21  ;;  %440 = vmatprep.subr.bf16.mxu1 %v757_v0 }
  0x1d   :  { %649 = vmatprep.subr.bf16.mxu0 %v703_v22 }
  0x1f   :  { %441 = vmatpush1.bf16.msra.mxu1 %v704_v24 }
  0x20   :  { %650 = vmatpush3.bf16.msra.mxu0 %v705_v26  ;;  %456 = vmatprep.subr.bf16.mxu1 %v757_v0 }
  0x23   :  { %386 = vmatmul.mubr.bf16.vlgmr.msra.gmra.mxu0 %v706_v27  ;;  %457 = vmatpush2.bf16.msra.mxu1 %v709_v28 }
  0x24   :  { %393 = vmatprep.mubr.bf16.mxu0 %v713_v29 }
  0x26   :  { %459 = vmatmul.mubr.bf16.vlgmr.msra.gmra.mxu1 %v710_v30 }
  0x27   :  { %611 = vmatprep.mubr.msk.bf16.mxu1 %vm337_vm0, %v716_v31 }
  0x2b   :  { %394 = vmatmul.mubr.bf16.gmra.mxu0 %v715_v32 }
  0x2c   :  { %401 = vmatprep.mubr.bf16.mxu0 %v719_v33 }
  0x2e   :  { %467 = vmatmul.mubr.bf16.gmra.mxu1 %v718_v34 }
  0x2f   :  { %612 = vmatprep.mubr.msk.bf16.mxu1 %vm337_vm0, %v722_v35 }
  0x33   :  { %402 = vmatmul.mubr.bf16.gmra.mxu0 %v721_v36 }
  0x34   :  { %409 = vmatprep.mubr.bf16.mxu0 %v725_v37 }
  0x36   :  { %475 = vmatmul.mubr.bf16.gmra.mxu1 %v724_v38 }
  0x37   :  { %613 = vmatprep.mubr.msk.bf16.mxu1 %vm337_vm0, %v728_v39 }
  0x3b   :  { %410 = vmatmul.mubr.bf16.gmra.mxu0 %v727_v40 }
  0x3c   :  { %417 = vmatprep.mubr.bf16.mxu0 %v731_v41 }
  0x3e   :  { %483 = vmatmul.mubr.bf16.gmra.mxu1 %v730_v42 }
  0x3f   :  { %614 = vmatprep.mubr.msk.bf16.mxu1 %vm337_vm0, %v734_v43 }
  0x43   :  { %418 = vmatmul.mubr.bf16.gmra.mxu0 %v733_v44 }
  0x46   :  { %491 = vmatmul.mubr.bf16.gmra.mxu1 %v736_v45 }
  0xe3   :  { %v651_v46 = vpop.f32.mrf.mxu0 }
  0xe5   :  { %v652_v47 = vpop.f32.mrf.mxu0 }
  0xe6   :  { %v653_v49 = vadd.f32 %v652_v47, %v651_v46  ;;  %v460_v50 = vpop.f32.mrf.mxu1 }
  0xe7   :  { %v654_v51 = vpop.f32.mrf.mxu0 }
  0xe8   :  { %v388_v52 = vadd.f32 %v653_v49, %v930_v48  ;;  %v462_v53 = vpop.f32.mrf.mxu1 }
  0xe9   :  { %v655_v54 = vpop.f32.mrf.mxu0 }
  0xea   :  { %v461_v55 = vadd.f32 %v460_v50, %v388_v52  ;;  %v656_v56 = vadd.f32 %v655_v54, %v654_v51  ;;  %v463_v57 = vpop.f32.mrf.mxu1 }
  0xeb   :  { %v657_v58 = vpop.f32.mrf.mxu0 }
  0xec   :  { %737 = vtanh.f32 %v461_v55  ;;  %v391_v59 = vadd.f32 %v656_v56, %v930_v48  ;;  %v465_v60 = vpop.f32.mrf.mxu1 }
  0xed   :  { %v658_v61 = vpop.f32.mrf.mxu0 }
  0xee   :  { %v464_v62 = vadd.f32 %v463_v57, %v391_v59  ;;  %v659_v63 = vadd.f32 %v658_v61, %v657_v58  ;;  %v468_v0 = vpop.f32.mrf.mxu1 }
  0xef   :  { %v660_v1 = vpop.f32.mrf.mxu0 }
  0xf0   :  { %739 = vtanh.f32 %v464_v62  ;;  %v396_v2 = vadd.f32 %v659_v63, %v930_v48  ;;  %v470_v3 = vpop.f32.mrf.mxu1 }
  0xf1   :  { %v661_v4 = vpop.f32.mrf.mxu0 }
  0xf2   :  { %v469_v5 = vadd.f32 %v468_v0, %v396_v2  ;;  %v662_v6 = vadd.f32 %v661_v4, %v660_v1  ;;  %v471_v7 = vpop.f32.mrf.mxu1 }
  0xf3   :  { %v663_v8 = vpop.f32.mrf.mxu0 }
  0xf4   :  { %741 = vtanh.f32 %v469_v5  ;;  %v399_v9 = vadd.f32 %v662_v6, %v930_v48  ;;  %v473_v10 = vpop.f32.mrf.mxu1 }
  0xf5   :  { %v664_v11 = vpop.f32.mrf.mxu0 }
  0xf6   :  { %v472_v12 = vadd.f32 %v471_v7, %v399_v9  ;;  %v665_v13 = vadd.f32 %v664_v11, %v663_v8  ;;  %v476_v14 = vpop.f32.mrf.mxu1 }
  0xf7   :  { %v666_v15 = vpop.f32.mrf.mxu0 }
  0xf8   :  { %743 = vtanh.f32 %v472_v12  ;;  %v404_v16 = vadd.f32 %v665_v13, %v930_v48  ;;  %v478_v17 = vpop.f32.mrf.mxu1 }
  0xf9   :  { %v738_v18 = vpop.eup %737  ;;  %v667_v19 = vpop.f32.mrf.mxu0 }
  0xfa   :  { %v625_v20 = vpack.c.bf16 %v738_v18, %v738_v18  ;;  %v477_v21 = vadd.f32 %v476_v14, %v404_v16  ;;  %v668_v22 = vadd.f32 %v667_v19, %v666_v15  ;;  %v479_v23 = vpop.f32.mrf.mxu1 }
  0xfb   :  { %v669_v24 = vpop.f32.mrf.mxu0 }
  0xfc   :  { %550 = vst.msk [vmem:[%s985_s3] sm:$0xf] %vm549_vm1, %v625_v20  ;;  %745 = vtanh.f32 %v477_v21  ;;  %v407_v25 = vadd.f32 %v668_v22, %v930_v48  ;;  %v481_v26 = vpop.f32.mrf.mxu1 }
  0xfd   :  { %v740_v27 = vpop.eup %739  ;;  %v670_v28 = vpop.f32.mrf.mxu0 }
  0xfe   :  { %v626_v29 = vpack.c.bf16 %v740_v27, %v740_v27  ;;  %v480_v30 = vadd.f32 %v479_v23, %v407_v25  ;;  %v671_v31 = vadd.f32 %v670_v28, %v669_v24  ;;  %v484_v32 = vpop.f32.mrf.mxu1 }
  0xff   :  { %v672_v33 = vpop.f32.mrf.mxu0 }
 0x100   :  { %551 = vst.msk [vmem:[%s985_s3 + $0x4] sm:$0xf] %vm549_vm1, %v626_v29  ;;  %747 = vtanh.f32 %v480_v30  ;;  %v412_v34 = vadd.f32 %v671_v31, %v930_v48  ;;  %v486_v35 = vpop.f32.mrf.mxu1 }
 0x101   :  { %v742_v36 = vpop.eup %741  ;;  %v673_v37 = vpop.f32.mrf.mxu0 }
 0x102   :  { %v627_v38 = vpack.c.bf16 %v742_v36, %v742_v36  ;;  %v485_v39 = vadd.f32 %v484_v32, %v412_v34  ;;  %v674_v40 = vadd.f32 %v673_v37, %v672_v33  ;;  %v487_v41 = vpop.f32.mrf.mxu1 }
 0x103   :  { %v675_v42 = vpop.f32.mrf.mxu0 }
 0x104   :  { %552 = vst.msk [vmem:[%s985_s3 + $0x8] sm:$0xf] %vm549_vm1, %v627_v38  ;;  %749 = vtanh.f32 %v485_v39  ;;  %v415_v43 = vadd.f32 %v674_v40, %v930_v48  ;;  %v489_v44 = vpop.f32.mrf.mxu1 }
 0x105   :  { %v744_v45 = vpop.eup %743  ;;  %v676_v46 = vpop.f32.mrf.mxu0 }
 0x106   :  { %v628_v47 = vpack.c.bf16 %v744_v45, %v744_v45  ;;  %v488_v49 = vadd.f32 %v487_v41, %v415_v43  ;;  %v677_v50 = vadd.f32 %v676_v46, %v675_v42  ;;  %v492_v51 = vpop.f32.mrf.mxu1 }
 0x107   :  { %v678_v52 = vpop.f32.mrf.mxu0 }
 0x108   :  { %553 = vst.msk [vmem:[%s985_s3 + $0xc] sm:$0xf] %vm549_vm1, %v628_v47  ;;  %751 = vtanh.f32 %v488_v49  ;;  %v420_v53 = vadd.f32 %v677_v50, %v930_v48  ;;  %v494_v54 = vpop.f32.mrf.mxu1 }
 0x109   :  { %v746_v55 = vpop.eup %745  ;;  %v679_v56 = vpop.f32.mrf.mxu0 }
 0x10a   :  { %v629_v57 = vpack.c.bf16 %v746_v55, %v746_v55  ;;  %v493_v58 = vadd.f32 %v492_v51, %v420_v53  ;;  %v680_v59 = vadd.f32 %v679_v56, %v678_v52  ;;  %v495_v60 = vpop.f32.mrf.mxu1 }
 0x10c   :  { %554 = vst.msk [vmem:[%s985_s3 + $0x10] sm:$0xf] %vm549_vm1, %v629_v57  ;;  %753 = vtanh.f32 %v493_v58  ;;  %v423_v61 = vadd.f32 %v680_v59, %v930_v48  ;;  %v497_v62 = vpop.f32.mrf.mxu1 }
 0x10d   :  { %v748_v63 = vpop.eup %747 }
 0x10e   :  { %v630_v0 = vpack.c.bf16 %v748_v63, %v748_v63  ;;  %v496_v1 = vadd.f32 %v495_v60, %v423_v61 }
 0x110   :  { %555 = vst.msk [vmem:[%s985_s3 + $0x14] sm:$0xf] %vm549_vm1, %v630_v0  ;;  %755 = vtanh.f32 %v496_v1 }
 0x111   :  { %v750_v2 = vpop.eup %749 }
 0x112   :  { %v631_v3 = vpack.c.bf16 %v750_v2, %v750_v2 }
 0x114   :  { %556 = vst.msk [vmem:[%s985_s3 + $0x18] sm:$0xf] %vm549_vm1, %v631_v3 }
 0x115   :  { %v752_v4 = vpop.eup %751 }
 0x116   :  { %v632_v5 = vpack.c.bf16 %v752_v4, %v752_v4 }
 0x118   :  { %557 = vst.msk [vmem:[%s985_s3 + $0x1c] sm:$0xf] %vm549_vm1, %v632_v5 }
 0x119   :  { %v754_v48 = vpop.eup %753 }
 0x11a   :  { %v633_v6 = vpack.c.bf16 %v754_v48, %v754_v48 }
 0x11c   :  { %558 = vst.msk [vmem:[%s985_s3 + $0x20] sm:$0xf] %vm549_vm1, %v633_v6 }
 0x11d   :  { %v756_v7 = vpop.eup %755 }
 0x11e   :  { %v634_v8 = vpack.c.bf16 %v756_v7, %v756_v7 }
 0x120   :  { %559 = vst.msk [vmem:[%s985_s3 + $0x24] sm:$0xf] %vm549_vm1, %v634_v8 }

// kernel: lenet_forward.7
= control target key start
LH: loop header
LB: loop body
LE: loop exit
PB: predicated region body
PF: predicated region fallthrough
CT: control target
= control target key end

     0   :  { %s21017_s18 = smov 0   ;;  %s21019_s19 = smov 0   ;;  %s24555_s0 = inlined_call_operand.vmem [shape: bf16[16,4320], index: 0, kind: input, shape index: {}]   ;;  %s24556_s1 = inlined_call_operand.vmem [shape: bf16[4320,2304], index: 1, kind: input, shape index: {}]   ;;  %s24557_s2 = inlined_call_operand.vmem [shape: f32[1,2304], index: 2, kind: input, shape index: {}]   ;;  %s24558_s3 = inlined_call_operand.vmem [shape: bf16[2304,128], index: 3, kind: input, shape index: {}]   ;;  %s24559_s4 = inlined_call_operand.vmem [shape: f32[1,128], index: 4, kind: input, shape index: {}]   ;;  %s24560_s5 = inlined_call_operand.vmem [shape: f32[16,128], index: 5, kind: output, shape index: {}]  }
   0x1   :  { %s21021_s20 = smov 0   ;;  %s21023_s21 = smov 0  }
   0x2   :  { %s21025_s22 = smov 0  }
   0x3 LB: > { %s24_s23 = sadd.s32 1, %s20965_s21  ;;  %p67_p1 = scmp.ne.s32.totalorder %s20957_s19, %s20953_s18  ;;  %s20969_s22 = sphi %s21025_s22, %s15_s22   ;;  %s20965_s21 = sphi %s21023_s21, %s24570_s21   ;;  %s20961_s20 = sphi %s21021_s20, %s24569_s20   ;;  %s20957_s19 = sphi %s21019_s19, %s24568_s19   ;;  %s20953_s18 = sphi %s21017_s18, %s24567_s18  }
   0x4   : > { %p25_p0 = scmp.ge.s32.totalorder %s24_s23, 3  ;;  %p68_p2 = scmp.eq.s32.totalorder %s20969_s22, 0 }
   0x5   : > { %s60_s25 = sadd.s32 1, %s20957_s19  ;;  %p16433_p5 = scmp.ge.s32.totalorder %s20969_s22, 3 }
   0x6   : > { %s24572_s23 = smov (%p25_p0, %s24_s23), 0  ;;  %p69_p3 = por %p68_p2, %p67_p1 }
   0x7   : > { %s57_s24 = ssub.s32 %s20965_s21, %s24572_s23  ;;  %205 = sbr.rel (%p16433_p5) target bundleno = 289 (0x121), region = 24 }
   0x8   : > { %p58_p4 = scmp.eq.s32.totalorder %s57_s24, 0 }
   0xa   : > { %s21052_s26 = scalar_select %p58_p4, %s20957_s19, %s60_s25  }
   0xc   : > { %208 = sbr.rel (!%p69_p3) target bundleno = 289 (0x121), region = 28  ;;  %s210_s27 = sand.u32 (%p69_p3), 1, %s20957_s19  }
   0xd   : > { %s18151_s28 = smul.u32 (%p69_p3), 24, %s20965_s21  ;;  %s21072_s11 = smov (%p69_p3), 0  }
   0xe   : > { %s21057_s29 = smul.u32 (%p69_p3), 12960, %s210_s27  ;;  %s21074_s12 = smov (%p69_p3), 0  }
   0xf   : > { %s21062_s7 = scalar_lea.vmem (%p69_p3), %s24556_s1, %s18151_s28  }
  0x10   : > { %s212_s8 = scalar_lea.vmem (%p69_p3), [#allocation3], %s21057_s29   ;;  %s24562_s10 = smov (%p69_p3), %s21062_s7 }
  0x11   : > { %s24561_s9 = smov %s212_s8 }
  0x12 LB: >> { %v231_v0 = vld [vmem:[%s20977_s10] sm:$0xff]  ;;  %v233_v1 = vld [vmem:[%s20977_s10 + $0x48] sm:$0xff]  ;;  %v235_v2 = vld [vmem:[%s20977_s10 + $0x90] sm:$0xff]  ;;  %s1311_s13 = sadd.s32 1, %s20981_s11  ;;  %s227_s12 = sadd.s32 1, %s20985_s12   ;;  %s20985_s12 = sphi %s21074_s12, %s227_s12   ;;  %s20981_s11 = sphi %s21072_s11, %s24565_s11   ;;  %s20977_s10 = sphi %s24562_s10, %s24564_s10   ;;  %s20973_s9 = sphi %s24561_s9, %s24563_s9  }
  0x13   : >> { %232 = vst [vmem:[%s20973_s9] sm:$0xff] %v231_v0  ;;  %234 = vst [vmem:[%s20973_s9 + $0x18] sm:$0xff] %v233_v1  ;;  %v237_v3 = vld [vmem:[%s20977_s10 + $0xd8] sm:$0xff]  ;;  %v239_v4 = vld [vmem:[%s20977_s10 + $0x120] sm:$0xff]  ;;  %p1312_p6 = scmp.ge.s32.totalorder %s1311_s13, 3  ;;  %p224_p7 = scmp.ge.s32.totalorder %s227_s12, 3  }
  0x14   : >> { %236 = vst [vmem:[%s20973_s9 + $0x30] sm:$0xff] %v235_v2  ;;  %v241_v5 = vld [vmem:[%s20977_s10 + $0x168] sm:$0xff]  ;;  %238 = vst [vmem:[%s20973_s9 + $0x48] sm:$0xff] %v237_v3  ;;  %v243_v6 = vld [vmem:[%s20977_s10 + $0x1b0] sm:$0xff] }
  0x15   : >> { %240 = vst [vmem:[%s20973_s9 + $0x60] sm:$0xff] %v239_v4  ;;  %242 = vst [vmem:[%s20973_s9 + $0x78] sm:$0xff] %v241_v5  ;;  %v245_v7 = vld [vmem:[%s20977_s10 + $0x1f8] sm:$0xff]  ;;  %v247_v8 = vld [vmem:[%s20977_s10 + $0x240] sm:$0xff]  ;;  %s24574_s13 = smov (%p1312_p6, %s1311_s13), 0 }
  0x16   : >> { %244 = vst [vmem:[%s20973_s9 + $0x90] sm:$0xff] %v243_v6  ;;  %246 = vst [vmem:[%s20973_s9 + $0xa8] sm:$0xff] %v245_v7  ;;  %v249_v9 = vld [vmem:[%s20977_s10 + $0x288] sm:$0xff]  ;;  %v251_v10 = vld [vmem:[%s20977_s10 + $0x2d0] sm:$0xff]  ;;  %s16435_s14 = sshll.u32 %s24574_s13, 3  ;;  %s24565_s11 = smov %s24574_s13 }
  0x17   : >> { %248 = vst [vmem:[%s20973_s9 + $0xc0] sm:$0xff] %v247_v8  ;;  %v253_v11 = vld [vmem:[%s20977_s10 + $0x318] sm:$0xff]  ;;  %250 = vst [vmem:[%s20973_s9 + $0xd8] sm:$0xff] %v249_v9  ;;  %v255_v12 = vld [vmem:[%s20977_s10 + $0x360] sm:$0xff]  ;;  %s21408_s15 = scalar_lea.vmem %s21062_s7, %s16435_s14   ;;  %s21412_s16 = scalar_lea.vmem %s212_s8, %s16435_s14 [#allocation3]  }
  0x18   : >> { %252 = vst [vmem:[%s20973_s9 + $0xf0] sm:$0xff] %v251_v10  ;;  %254 = vst [vmem:[%s20973_s9 + $0x108] sm:$0xff] %v253_v11  ;;  %v257_v13 = vld [vmem:[%s20977_s10 + $0x3a8] sm:$0xff]  ;;  %v259_v14 = vld [vmem:[%s20977_s10 + $0x3f0] sm:$0xff] }
  0x19   : >> { %256 = vst [vmem:[%s20973_s9 + $0x120] sm:$0xff] %v255_v12  ;;  %258 = vst [vmem:[%s20973_s9 + $0x138] sm:$0xff] %v257_v13  ;;  %v261_v15 = vld [vmem:[%s20977_s10 + $0x438] sm:$0xff]  ;;  %v263_v16 = vld [vmem:[%s20977_s10 + $0x480] sm:$0xff] }
  0x1a   : >> { %260 = vst [vmem:[%s20973_s9 + $0x150] sm:$0xff] %v259_v14  ;;  %v265_v17 = vld [vmem:[%s20977_s10 + $0x4c8] sm:$0xff]  ;;  %262 = vst [vmem:[%s20973_s9 + $0x168] sm:$0xff] %v261_v15  ;;  %v267_v18 = vld [vmem:[%s20977_s10 + $0x510] sm:$0xff] }
  0x1b   : >> { %264 = vst [vmem:[%s20973_s9 + $0x180] sm:$0xff] %v263_v16  ;;  %266 = vst [vmem:[%s20973_s9 + $0x198] sm:$0xff] %v265_v17  ;;  %v269_v19 = vld [vmem:[%s20977_s10 + $0x558] sm:$0xff]  ;;  %v271_v20 = vld [vmem:[%s20977_s10 + $0x5a0] sm:$0xff] }
  0x1c   : >> { %268 = vst [vmem:[%s20973_s9 + $0x1b0] sm:$0xff] %v267_v18  ;;  %270 = vst [vmem:[%s20973_s9 + $0x1c8] sm:$0xff] %v269_v19  ;;  %v273_v21 = vld [vmem:[%s20977_s10 + $0x5e8] sm:$0xff]  ;;  %v275_v22 = vld [vmem:[%s20977_s10 + $0x630] sm:$0xff] }
  0x1d   : >> { %272 = vst [vmem:[%s20973_s9 + $0x1e0] sm:$0xff] %v271_v20  ;;  %v277_v23 = vld [vmem:[%s20977_s10 + $0x678] sm:$0xff]  ;;  %274 = vst [vmem:[%s20973_s9 + $0x1f8] sm:$0xff] %v273_v21  ;;  %v279_v24 = vld [vmem:[%s20977_s10 + $0x6c0] sm:$0xff] }
  0x1e   : >> { %276 = vst [vmem:[%s20973_s9 + $0x210] sm:$0xff] %v275_v22  ;;  %278 = vst [vmem:[%s20973_s9 + $0x228] sm:$0xff] %v277_v23  ;;  %v281_v25 = vld [vmem:[%s20977_s10 + $0x708] sm:$0xff]  ;;  %v283_v26 = vld [vmem:[%s20977_s10 + $0x750] sm:$0xff] }
  0x1f   : >> { %280 = vst [vmem:[%s20973_s9 + $0x240] sm:$0xff] %v279_v24  ;;  %282 = vst [vmem:[%s20973_s9 + $0x258] sm:$0xff] %v281_v25  ;;  %v285_v27 = vld [vmem:[%s20977_s10 + $0x798] sm:$0xff]  ;;  %v287_v28 = vld [vmem:[%s20977_s10 + $0x7e0] sm:$0xff] }
  0x20   : >> { %284 = vst [vmem:[%s20973_s9 + $0x270] sm:$0xff] %v283_v26  ;;  %v289_v29 = vld [vmem:[%s20977_s10 + $0x828] sm:$0xff]  ;;  %286 = vst [vmem:[%s20973_s9 + $0x288] sm:$0xff] %v285_v27  ;;  %v291_v30 = vld [vmem:[%s20977_s10 + $0x870] sm:$0xff] }
  0x21   : >> { %288 = vst [vmem:[%s20973_s9 + $0x2a0] sm:$0xff] %v287_v28  ;;  %290 = vst [vmem:[%s20973_s9 + $0x2b8] sm:$0xff] %v289_v29  ;;  %v293_v31 = vld [vmem:[%s20977_s10 + $0x8b8] sm:$0xff]  ;;  %v295_v32 = vld [vmem:[%s20977_s10 + $0x900] sm:$0xff] }
  0x22   : >> { %292 = vst [vmem:[%s20973_s9 + $0x2d0] sm:$0xff] %v291_v30  ;;  %294 = vst [vmem:[%s20973_s9 + $0x2e8] sm:$0xff] %v293_v31  ;;  %v297_v33 = vld [vmem:[%s20977_s10 + $0x948] sm:$0xff]  ;;  %v299_v34 = vld [vmem:[%s20977_s10 + $0x990] sm:$0xff] }
  0x23   : >> { %296 = vst [vmem:[%s20973_s9 + $0x300] sm:$0xff] %v295_v32  ;;  %v301_v35 = vld [vmem:[%s20977_s10 + $0x9d8] sm:$0xff]  ;;  %298 = vst [vmem:[%s20973_s9 + $0x318] sm:$0xff] %v297_v33  ;;  %v303_v36 = vld [vmem:[%s20977_s10 + $0xa20] sm:$0xff] }
  0x24   : >> { %300 = vst [vmem:[%s20973_s9 + $0x330] sm:$0xff] %v299_v34  ;;  %302 = vst [vmem:[%s20973_s9 + $0x348] sm:$0xff] %v301_v35  ;;  %v305_v37 = vld [vmem:[%s20977_s10 + $0xa68] sm:$0xff]  ;;  %v307_v38 = vld [vmem:[%s20977_s10 + $0xab0] sm:$0xff] }
  0x25   : >> { %304 = vst [vmem:[%s20973_s9 + $0x360] sm:$0xff] %v303_v36  ;;  %306 = vst [vmem:[%s20973_s9 + $0x378] sm:$0xff] %v305_v37  ;;  %v309_v39 = vld [vmem:[%s20977_s10 + $0xaf8] sm:$0xff]  ;;  %v311_v40 = vld [vmem:[%s20977_s10 + $0xb40] sm:$0xff] }
  0x26   : >> { %308 = vst [vmem:[%s20973_s9 + $0x390] sm:$0xff] %v307_v38  ;;  %v313_v41 = vld [vmem:[%s20977_s10 + $0xb88] sm:$0xff]  ;;  %310 = vst [vmem:[%s20973_s9 + $0x3a8] sm:$0xff] %v309_v39  ;;  %v315_v42 = vld [vmem:[%s20977_s10 + $0xbd0] sm:$0xff] }
  0x27   : >> { %312 = vst [vmem:[%s20973_s9 + $0x3c0] sm:$0xff] %v311_v40  ;;  %314 = vst [vmem:[%s20973_s9 + $0x3d8] sm:$0xff] %v313_v41  ;;  %v317_v43 = vld [vmem:[%s20977_s10 + $0xc18] sm:$0xff]  ;;  %v319_v44 = vld [vmem:[%s20977_s10 + $0xc60] sm:$0xff] }
  0x28   : >> { %316 = vst [vmem:[%s20973_s9 + $0x3f0] sm:$0xff] %v315_v42  ;;  %318 = vst [vmem:[%s20973_s9 + $0x408] sm:$0xff] %v317_v43  ;;  %v321_v45 = vld [vmem:[%s20977_s10 + $0xca8] sm:$0xff]  ;;  %v323_v46 = vld [vmem:[%s20977_s10 + $0xcf0] sm:$0xff] }
  0x29   : >> { %320 = vst [vmem:[%s20973_s9 + $0x420] sm:$0xff] %v319_v44  ;;  %v325_v47 = vld [vmem:[%s20977_s10 + $0xd38] sm:$0xff]  ;;  %322 = vst [vmem:[%s20973_s9 + $0x438] sm:$0xff] %v321_v45  ;;  %v327_v48 = vld [vmem:[%s20977_s10 + $0xd80] sm:$0xff] }
  0x2a   : >> { %324 = vst [vmem:[%s20973_s9 + $0x450] sm:$0xff] %v323_v46  ;;  %326 = vst [vmem:[%s20973_s9 + $0x468] sm:$0xff] %v325_v47  ;;  %v329_v49 = vld [vmem:[%s20977_s10 + $0xdc8] sm:$0xff]  ;;  %v331_v50 = vld [vmem:[%s20977_s10 + $0xe10] sm:$0xff] }
  0x2b   : >> { %328 = vst [vmem:[%s20973_s9 + $0x480] sm:$0xff] %v327_v48  ;;  %330 = vst [vmem:[%s20973_s9 + $0x498] sm:$0xff] %v329_v49  ;;  %v333_v51 = vld [vmem:[%s20977_s10 + $0xe58] sm:$0xff]  ;;  %v335_v52 = vld [vmem:[%s20977_s10 + $0xea0] sm:$0xff] }
  0x2c   : >> { %332 = vst [vmem:[%s20973_s9 + $0x4b0] sm:$0xff] %v331_v50  ;;  %v337_v53 = vld [vmem:[%s20977_s10 + $0xee8] sm:$0xff]  ;;  %334 = vst [vmem:[%s20973_s9 + $0x4c8] sm:$0xff] %v333_v51  ;;  %v339_v54 = vld [vmem:[%s20977_s10 + $0xf30] sm:$0xff] }
  0x2d   : >> { %336 = vst [vmem:[%s20973_s9 + $0x4e0] sm:$0xff] %v335_v52  ;;  %338 = vst [vmem:[%s20973_s9 + $0x4f8] sm:$0xff] %v337_v53  ;;  %v341_v55 = vld [vmem:[%s20977_s10 + $0xf78] sm:$0xff]  ;;  %v343_v56 = vld [vmem:[%s20977_s10 + $0xfc0] sm:$0xff] }
  0x2e   : >> { %340 = vst [vmem:[%s20973_s9 + $0x510] sm:$0xff] %v339_v54  ;;  %342 = vst [vmem:[%s20973_s9 + $0x528] sm:$0xff] %v341_v55  ;;  %v345_v57 = vld [vmem:[%s20977_s10 + $0x1008] sm:$0xff]  ;;  %v347_v58 = vld [vmem:[%s20977_s10 + $0x1050] sm:$0xff] }
  0x2f   : >> { %344 = vst [vmem:[%s20973_s9 + $0x540] sm:$0xff] %v343_v56  ;;  %v349_v59 = vld [vmem:[%s20977_s10 + $0x1098] sm:$0xff]  ;;  %346 = vst [vmem:[%s20973_s9 + $0x558] sm:$0xff] %v345_v57  ;;  %v351_v60 = vld [vmem:[%s20977_s10 + $0x10e0] sm:$0xff] }
  0x30   : >> { %348 = vst [vmem:[%s20973_s9 + $0x570] sm:$0xff] %v347_v58  ;;  %350 = vst [vmem:[%s20973_s9 + $0x588] sm:$0xff] %v349_v59  ;;  %v353_v61 = vld [vmem:[%s20977_s10 + $0x1128] sm:$0xff]  ;;  %v355_v62 = vld [vmem:[%s20977_s10 + $0x1170] sm:$0xff] }
  0x31   : >> { %352 = vst [vmem:[%s20973_s9 + $0x5a0] sm:$0xff] %v351_v60  ;;  %354 = vst [vmem:[%s20973_s9 + $0x5b8] sm:$0xff] %v353_v61  ;;  %v357_v63 = vld [vmem:[%s20977_s10 + $0x11b8] sm:$0xff]  ;;  %v359_v0 = vld [vmem:[%s20977_s10 + $0x1200] sm:$0xff] }
  0x32   : >> { %356 = vst [vmem:[%s20973_s9 + $0x5d0] sm:$0xff] %v355_v62  ;;  %v361_v1 = vld [vmem:[%s20977_s10 + $0x1248] sm:$0xff]  ;;  %358 = vst [vmem:[%s20973_s9 + $0x5e8] sm:$0xff] %v357_v63  ;;  %v363_v2 = vld [vmem:[%s20977_s10 + $0x1290] sm:$0xff] }
  0x33   : >> { %360 = vst [vmem:[%s20973_s9 + $0x600] sm:$0xff] %v359_v0  ;;  %362 = vst [vmem:[%s20973_s9 + $0x618] sm:$0xff] %v361_v1  ;;  %v365_v3 = vld [vmem:[%s20977_s10 + $0x12d8] sm:$0xff]  ;;  %v367_v4 = vld [vmem:[%s20977_s10 + $0x1320] sm:$0xff] }
  0x34   : >> { %364 = vst [vmem:[%s20973_s9 + $0x630] sm:$0xff] %v363_v2  ;;  %366 = vst [vmem:[%s20973_s9 + $0x648] sm:$0xff] %v365_v3  ;;  %v369_v5 = vld [vmem:[%s20977_s10 + $0x1368] sm:$0xff]  ;;  %v371_v6 = vld [vmem:[%s20977_s10 + $0x13b0] sm:$0xff] }
  0x35   : >> { %368 = vst [vmem:[%s20973_s9 + $0x660] sm:$0xff] %v367_v4  ;;  %v373_v7 = vld [vmem:[%s20977_s10 + $0x13f8] sm:$0xff]  ;;  %370 = vst [vmem:[%s20973_s9 + $0x678] sm:$0xff] %v369_v5  ;;  %v375_v8 = vld [vmem:[%s20977_s10 + $0x1440] sm:$0xff] }
  0x36   : >> { %372 = vst [vmem:[%s20973_s9 + $0x690] sm:$0xff] %v371_v6  ;;  %374 = vst [vmem:[%s20973_s9 + $0x6a8] sm:$0xff] %v373_v7  ;;  %v377_v9 = vld [vmem:[%s20977_s10 + $0x1488] sm:$0xff]  ;;  %v379_v10 = vld [vmem:[%s20977_s10 + $0x14d0] sm:$0xff] }
  0x37   : >> { %376 = vst [vmem:[%s20973_s9 + $0x6c0] sm:$0xff] %v375_v8  ;;  %378 = vst [vmem:[%s20973_s9 + $0x6d8] sm:$0xff] %v377_v9  ;;  %v381_v11 = vld [vmem:[%s20977_s10 + $0x1518] sm:$0xff]  ;;  %v383_v12 = vld [vmem:[%s20977_s10 + $0x1560] sm:$0xff] }
  0x38   : >> { %380 = vst [vmem:[%s20973_s9 + $0x6f0] sm:$0xff] %v379_v10  ;;  %v385_v13 = vld [vmem:[%s20977_s10 + $0x15a8] sm:$0xff]  ;;  %382 = vst [vmem:[%s20973_s9 + $0x708] sm:$0xff] %v381_v11  ;;  %v387_v14 = vld [vmem:[%s20977_s10 + $0x15f0] sm:$0xff] }
  0x39   : >> { %384 = vst [vmem:[%s20973_s9 + $0x720] sm:$0xff] %v383_v12  ;;  %386 = vst [vmem:[%s20973_s9 + $0x738] sm:$0xff] %v385_v13  ;;  %v389_v15 = vld [vmem:[%s20977_s10 + $0x1638] sm:$0xff]  ;;  %v391_v16 = vld [vmem:[%s20977_s10 + $0x1680] sm:$0xff] }
  0x3a   : >> { %388 = vst [vmem:[%s20973_s9 + $0x750] sm:$0xff] %v387_v14  ;;  %390 = vst [vmem:[%s20973_s9 + $0x768] sm:$0xff] %v389_v15  ;;  %v393_v17 = vld [vmem:[%s20977_s10 + $0x16c8] sm:$0xff]  ;;  %v395_v18 = vld [vmem:[%s20977_s10 + $0x1710] sm:$0xff] }
  0x3b   : >> { %392 = vst [vmem:[%s20973_s9 + $0x780] sm:$0xff] %v391_v16  ;;  %v397_v19 = vld [vmem:[%s20977_s10 + $0x1758] sm:$0xff]  ;;  %394 = vst [vmem:[%s20973_s9 + $0x798] sm:$0xff] %v393_v17  ;;  %v399_v20 = vld [vmem:[%s20977_s10 + $0x17a0] sm:$0xff] }
  0x3c   : >> { %396 = vst [vmem:[%s20973_s9 + $0x7b0] sm:$0xff] %v395_v18  ;;  %398 = vst [vmem:[%s20973_s9 + $0x7c8] sm:$0xff] %v397_v19  ;;  %v401_v21 = vld [vmem:[%s20977_s10 + $0x17e8] sm:$0xff]  ;;  %v403_v22 = vld [vmem:[%s20977_s10 + $0x1830] sm:$0xff] }
  0x3d   : >> { %400 = vst [vmem:[%s20973_s9 + $0x7e0] sm:$0xff] %v399_v20  ;;  %402 = vst [vmem:[%s20973_s9 + $0x7f8] sm:$0xff] %v401_v21  ;;  %v405_v23 = vld [vmem:[%s20977_s10 + $0x1878] sm:$0xff]  ;;  %v407_v24 = vld [vmem:[%s20977_s10 + $0x18c0] sm:$0xff] }
  0x3e   : >> { %404 = vst [vmem:[%s20973_s9 + $0x810] sm:$0xff] %v403_v22  ;;  %v409_v25 = vld [vmem:[%s20977_s10 + $0x1908] sm:$0xff]  ;;  %406 = vst [vmem:[%s20973_s9 + $0x828] sm:$0xff] %v405_v23  ;;  %v411_v26 = vld [vmem:[%s20977_s10 + $0x1950] sm:$0xff] }
  0x3f   : >> { %408 = vst [vmem:[%s20973_s9 + $0x840] sm:$0xff] %v407_v24  ;;  %410 = vst [vmem:[%s20973_s9 + $0x858] sm:$0xff] %v409_v25  ;;  %v413_v27 = vld [vmem:[%s20977_s10 + $0x1998] sm:$0xff]  ;;  %v415_v28 = vld [vmem:[%s20977_s10 + $0x19e0] sm:$0xff] }
  0x40   : >> { %412 = vst [vmem:[%s20973_s9 + $0x870] sm:$0xff] %v411_v26  ;;  %414 = vst [vmem:[%s20973_s9 + $0x888] sm:$0xff] %v413_v27  ;;  %v417_v29 = vld [vmem:[%s20977_s10 + $0x1a28] sm:$0xff]  ;;  %v419_v30 = vld [vmem:[%s20977_s10 + $0x1a70] sm:$0xff] }
  0x41   : >> { %416 = vst [vmem:[%s20973_s9 + $0x8a0] sm:$0xff] %v415_v28  ;;  %v421_v31 = vld [vmem:[%s20977_s10 + $0x1ab8] sm:$0xff]  ;;  %418 = vst [vmem:[%s20973_s9 + $0x8b8] sm:$0xff] %v417_v29  ;;  %v423_v32 = vld [vmem:[%s20977_s10 + $0x1b00] sm:$0xff] }
  0x42   : >> { %420 = vst [vmem:[%s20973_s9 + $0x8d0] sm:$0xff] %v419_v30  ;;  %422 = vst [vmem:[%s20973_s9 + $0x8e8] sm:$0xff] %v421_v31  ;;  %v425_v33 = vld [vmem:[%s20977_s10 + $0x1b48] sm:$0xff]  ;;  %v427_v34 = vld [vmem:[%s20977_s10 + $0x1b90] sm:$0xff] }
  0x43   : >> { %424 = vst [vmem:[%s20973_s9 + $0x900] sm:$0xff] %v423_v32  ;;  %426 = vst [vmem:[%s20973_s9 + $0x918] sm:$0xff] %v425_v33  ;;  %v429_v35 = vld [vmem:[%s20977_s10 + $0x1bd8] sm:$0xff]  ;;  %v431_v36 = vld [vmem:[%s20977_s10 + $0x1c20] sm:$0xff] }
  0x44   : >> { %428 = vst [vmem:[%s20973_s9 + $0x930] sm:$0xff] %v427_v34  ;;  %v433_v37 = vld [vmem:[%s20977_s10 + $0x1c68] sm:$0xff]  ;;  %430 = vst [vmem:[%s20973_s9 + $0x948] sm:$0xff] %v429_v35  ;;  %v435_v38 = vld [vmem:[%s20977_s10 + $0x1cb0] sm:$0xff] }
  0x45   : >> { %432 = vst [vmem:[%s20973_s9 + $0x960] sm:$0xff] %v431_v36  ;;  %434 = vst [vmem:[%s20973_s9 + $0x978] sm:$0xff] %v433_v37  ;;  %v437_v39 = vld [vmem:[%s20977_s10 + $0x1cf8] sm:$0xff]  ;;  %v439_v40 = vld [vmem:[%s20977_s10 + $0x1d40] sm:$0xff] }
  0x46   : >> { %436 = vst [vmem:[%s20973_s9 + $0x990] sm:$0xff] %v435_v38  ;;  %438 = vst [vmem:[%s20973_s9 + $0x9a8] sm:$0xff] %v437_v39  ;;  %v441_v41 = vld [vmem:[%s20977_s10 + $0x1d88] sm:$0xff]  ;;  %v443_v42 = vld [vmem:[%s20977_s10 + $0x1dd0] sm:$0xff] }
  0x47   : >> { %440 = vst [vmem:[%s20973_s9 + $0x9c0] sm:$0xff] %v439_v40  ;;  %v445_v43 = vld [vmem:[%s20977_s10 + $0x1e18] sm:$0xff]  ;;  %442 = vst [vmem:[%s20973_s9 + $0x9d8] sm:$0xff] %v441_v41  ;;  %v447_v44 = vld [vmem:[%s20977_s10 + $0x1e60] sm:$0xff] }
  0x48   : >> { %444 = vst [vmem:[%s20973_s9 + $0x9f0] sm:$0xff] %v443_v42  ;;  %446 = vst [vmem:[%s20973_s9 + $0xa08] sm:$0xff] %v445_v43  ;;  %v449_v45 = vld [vmem:[%s20977_s10 + $0x1ea8] sm:$0xff]  ;;  %v451_v46 = vld [vmem:[%s20977_s10 + $0x1ef0] sm:$0xff] }
  0x49   : >> { %448 = vst [vmem:[%s20973_s9 + $0xa20] sm:$0xff] %v447_v44  ;;  %450 = vst [vmem:[%s20973_s9 + $0xa38] sm:$0xff] %v449_v45  ;;  %v453_v47 = vld [vmem:[%s20977_s10 + $0x1f38] sm:$0xff]  ;;  %v455_v48 = vld [vmem:[%s20977_s10 + $0x1f80] sm:$0xff] }
  0x4a   : >> { %452 = vst [vmem:[%s20973_s9 + $0xa50] sm:$0xff] %v451_v46  ;;  %v457_v49 = vld [vmem:[%s20977_s10 + $0x1fc8] sm:$0xff]  ;;  %454 = vst [vmem:[%s20973_s9 + $0xa68] sm:$0xff] %v453_v47  ;;  %v459_v50 = vld [vmem:[%s20977_s10 + $0x2010] sm:$0xff] }
  0x4b   : >> { %456 = vst [vmem:[%s20973_s9 + $0xa80] sm:$0xff] %v455_v48  ;;  %458 = vst [vmem:[%s20973_s9 + $0xa98] sm:$0xff] %v457_v49  ;;  %v461_v51 = vld [vmem:[%s20977_s10 + $0x2058] sm:$0xff]  ;;  %v463_v52 = vld [vmem:[%s20977_s10 + $0x20a0] sm:$0xff] }
  0x4c   : >> { %460 = vst [vmem:[%s20973_s9 + $0xab0] sm:$0xff] %v459_v50  ;;  %462 = vst [vmem:[%s20973_s9 + $0xac8] sm:$0xff] %v461_v51  ;;  %v465_v53 = vld [vmem:[%s20977_s10 + $0x20e8] sm:$0xff]  ;;  %v467_v54 = vld [vmem:[%s20977_s10 + $0x2130] sm:$0xff] }
  0x4d   : >> { %464 = vst [vmem:[%s20973_s9 + $0xae0] sm:$0xff] %v463_v52  ;;  %v469_v55 = vld [vmem:[%s20977_s10 + $0x2178] sm:$0xff]  ;;  %466 = vst [vmem:[%s20973_s9 + $0xaf8] sm:$0xff] %v465_v53  ;;  %v471_v56 = vld [vmem:[%s20977_s10 + $0x21c0] sm:$0xff] }
  0x4e   : >> { %468 = vst [vmem:[%s20973_s9 + $0xb10] sm:$0xff] %v467_v54  ;;  %470 = vst [vmem:[%s20973_s9 + $0xb28] sm:$0xff] %v469_v55  ;;  %v473_v57 = vld [vmem:[%s20977_s10 + $0x2208] sm:$0xff]  ;;  %v475_v58 = vld [vmem:[%s20977_s10 + $0x2250] sm:$0xff] }
  0x4f   : >> { %472 = vst [vmem:[%s20973_s9 + $0xb40] sm:$0xff] %v471_v56  ;;  %474 = vst [vmem:[%s20973_s9 + $0xb58] sm:$0xff] %v473_v57  ;;  %v477_v59 = vld [vmem:[%s20977_s10 + $0x2298] sm:$0xff]  ;;  %v479_v60 = vld [vmem:[%s20977_s10 + $0x22e0] sm:$0xff] }
  0x50   : >> { %476 = vst [vmem:[%s20973_s9 + $0xb70] sm:$0xff] %v475_v58  ;;  %v481_v61 = vld [vmem:[%s20977_s10 + $0x2328] sm:$0xff]  ;;  %478 = vst [vmem:[%s20973_s9 + $0xb88] sm:$0xff] %v477_v59  ;;  %v483_v62 = vld [vmem:[%s20977_s10 + $0x2370] sm:$0xff] }
  0x51   : >> { %480 = vst [vmem:[%s20973_s9 + $0xba0] sm:$0xff] %v479_v60  ;;  %482 = vst [vmem:[%s20973_s9 + $0xbb8] sm:$0xff] %v481_v61  ;;  %v485_v63 = vld [vmem:[%s20977_s10 + $0x23b8] sm:$0xff]  ;;  %v487_v0 = vld [vmem:[%s20977_s10 + $0x2400] sm:$0xff] }
  0x52   : >> { %484 = vst [vmem:[%s20973_s9 + $0xbd0] sm:$0xff] %v483_v62  ;;  %486 = vst [vmem:[%s20973_s9 + $0xbe8] sm:$0xff] %v485_v63  ;;  %v489_v1 = vld [vmem:[%s20977_s10 + $0x2448] sm:$0xff]  ;;  %v491_v2 = vld [vmem:[%s20977_s10 + $0x2490] sm:$0xff] }
  0x53   : >> { %488 = vst [vmem:[%s20973_s9 + $0xc00] sm:$0xff] %v487_v0  ;;  %v493_v3 = vld [vmem:[%s20977_s10 + $0x24d8] sm:$0xff]  ;;  %490 = vst [vmem:[%s20973_s9 + $0xc18] sm:$0xff] %v489_v1  ;;  %v495_v4 = vld [vmem:[%s20977_s10 + $0x2520] sm:$0xff] }
  0x54   : >> { %492 = vst [vmem:[%s20973_s9 + $0xc30] sm:$0xff] %v491_v2  ;;  %494 = vst [vmem:[%s20973_s9 + $0xc48] sm:$0xff] %v493_v3  ;;  %v497_v5 = vld [vmem:[%s20977_s10 + $0x2568] sm:$0xff]  ;;  %v499_v6 = vld [vmem:[%s20977_s10 + $0x25b0] sm:$0xff] }
  0x55   : >> { %496 = vst [vmem:[%s20973_s9 + $0xc60] sm:$0xff] %v495_v4  ;;  %498 = vst [vmem:[%s20973_s9 + $0xc78] sm:$0xff] %v497_v5  ;;  %v501_v7 = vld [vmem:[%s20977_s10 + $0x25f8] sm:$0xff]  ;;  %v503_v8 = vld [vmem:[%s20977_s10 + $0x2640] sm:$0xff] }
  0x56   : >> { %500 = vst [vmem:[%s20973_s9 + $0xc90] sm:$0xff] %v499_v6  ;;  %v505_v9 = vld [vmem:[%s20977_s10 + $0x2688] sm:$0xff]  ;;  %502 = vst [vmem:[%s20973_s9 + $0xca8] sm:$0xff] %v501_v7  ;;  %v507_v10 = vld [vmem:[%s20977_s10 + $0x26d0] sm:$0xff] }
  0x57   : >> { %504 = vst [vmem:[%s20973_s9 + $0xcc0] sm:$0xff] %v503_v8  ;;  %506 = vst [vmem:[%s20973_s9 + $0xcd8] sm:$0xff] %v505_v9  ;;  %v509_v11 = vld [vmem:[%s20977_s10 + $0x2718] sm:$0xff]  ;;  %v511_v12 = vld [vmem:[%s20977_s10 + $0x2760] sm:$0xff] }
  0x58   : >> { %508 = vst [vmem:[%s20973_s9 + $0xcf0] sm:$0xff] %v507_v10  ;;  %510 = vst [vmem:[%s20973_s9 + $0xd08] sm:$0xff] %v509_v11  ;;  %v513_v13 = vld [vmem:[%s20977_s10 + $0x27a8] sm:$0xff]  ;;  %v515_v14 = vld [vmem:[%s20977_s10 + $0x27f0] sm:$0xff] }
  0x59   : >> { %512 = vst [vmem:[%s20973_s9 + $0xd20] sm:$0xff] %v511_v12  ;;  %v517_v15 = vld [vmem:[%s20977_s10 + $0x2838] sm:$0xff]  ;;  %514 = vst [vmem:[%s20973_s9 + $0xd38] sm:$0xff] %v513_v13  ;;  %v519_v16 = vld [vmem:[%s20977_s10 + $0x2880] sm:$0xff] }
  0x5a   : >> { %516 = vst [vmem:[%s20973_s9 + $0xd50] sm:$0xff] %v515_v14  ;;  %518 = vst [vmem:[%s20973_s9 + $0xd68] sm:$0xff] %v517_v15  ;;  %v521_v17 = vld [vmem:[%s20977_s10 + $0x28c8] sm:$0xff]  ;;  %v523_v18 = vld [vmem:[%s20977_s10 + $0x2910] sm:$0xff] }
  0x5b   : >> { %520 = vst [vmem:[%s20973_s9 + $0xd80] sm:$0xff] %v519_v16  ;;  %522 = vst [vmem:[%s20973_s9 + $0xd98] sm:$0xff] %v521_v17  ;;  %v525_v19 = vld [vmem:[%s20977_s10 + $0x2958] sm:$0xff]  ;;  %v527_v20 = vld [vmem:[%s20977_s10 + $0x29a0] sm:$0xff] }
  0x5c   : >> { %524 = vst [vmem:[%s20973_s9 + $0xdb0] sm:$0xff] %v523_v18  ;;  %v529_v21 = vld [vmem:[%s20977_s10 + $0x29e8] sm:$0xff]  ;;  %526 = vst [vmem:[%s20973_s9 + $0xdc8] sm:$0xff] %v525_v19  ;;  %v531_v22 = vld [vmem:[%s20977_s10 + $0x2a30] sm:$0xff] }
  0x5d   : >> { %528 = vst [vmem:[%s20973_s9 + $0xde0] sm:$0xff] %v527_v20  ;;  %530 = vst [vmem:[%s20973_s9 + $0xdf8] sm:$0xff] %v529_v21  ;;  %v533_v23 = vld [vmem:[%s20977_s10 + $0x2a78] sm:$0xff]  ;;  %v535_v24 = vld [vmem:[%s20977_s10 + $0x2ac0] sm:$0xff] }
  0x5e   : >> { %532 = vst [vmem:[%s20973_s9 + $0xe10] sm:$0xff] %v531_v22  ;;  %534 = vst [vmem:[%s20973_s9 + $0xe28] sm:$0xff] %v533_v23  ;;  %v537_v25 = vld [vmem:[%s20977_s10 + $0x2b08] sm:$0xff]  ;;  %v539_v26 = vld [vmem:[%s20977_s10 + $0x2b50] sm:$0xff] }
  0x5f   : >> { %536 = vst [vmem:[%s20973_s9 + $0xe40] sm:$0xff] %v535_v24  ;;  %v541_v27 = vld [vmem:[%s20977_s10 + $0x2b98] sm:$0xff]  ;;  %538 = vst [vmem:[%s20973_s9 + $0xe58] sm:$0xff] %v537_v25  ;;  %v543_v28 = vld [vmem:[%s20977_s10 + $0x2be0] sm:$0xff] }
  0x60   : >> { %540 = vst [vmem:[%s20973_s9 + $0xe70] sm:$0xff] %v539_v26  ;;  %542 = vst [vmem:[%s20973_s9 + $0xe88] sm:$0xff] %v541_v27  ;;  %v545_v29 = vld [vmem:[%s20977_s10 + $0x2c28] sm:$0xff]  ;;  %v547_v30 = vld [vmem:[%s20977_s10 + $0x2c70] sm:$0xff] }
  0x61   : >> { %544 = vst [vmem:[%s20973_s9 + $0xea0] sm:$0xff] %v543_v28  ;;  %546 = vst [vmem:[%s20973_s9 + $0xeb8] sm:$0xff] %v545_v29  ;;  %v549_v31 = vld [vmem:[%s20977_s10 + $0x2cb8] sm:$0xff]  ;;  %v551_v32 = vld [vmem:[%s20977_s10 + $0x2d00] sm:$0xff] }
  0x62   : >> { %548 = vst [vmem:[%s20973_s9 + $0xed0] sm:$0xff] %v547_v30  ;;  %v553_v33 = vld [vmem:[%s20977_s10 + $0x2d48] sm:$0xff]  ;;  %550 = vst [vmem:[%s20973_s9 + $0xee8] sm:$0xff] %v549_v31  ;;  %v555_v34 = vld [vmem:[%s20977_s10 + $0x2d90] sm:$0xff] }
  0x63   : >> { %552 = vst [vmem:[%s20973_s9 + $0xf00] sm:$0xff] %v551_v32  ;;  %554 = vst [vmem:[%s20973_s9 + $0xf18] sm:$0xff] %v553_v33  ;;  %v557_v35 = vld [vmem:[%s20977_s10 + $0x2dd8] sm:$0xff]  ;;  %v559_v36 = vld [vmem:[%s20977_s10 + $0x2e20] sm:$0xff] }
  0x64   : >> { %556 = vst [vmem:[%s20973_s9 + $0xf30] sm:$0xff] %v555_v34  ;;  %558 = vst [vmem:[%s20973_s9 + $0xf48] sm:$0xff] %v557_v35  ;;  %v561_v37 = vld [vmem:[%s20977_s10 + $0x2e68] sm:$0xff]  ;;  %v563_v38 = vld [vmem:[%s20977_s10 + $0x2eb0] sm:$0xff] }
  0x65   : >> { %560 = vst [vmem:[%s20973_s9 + $0xf60] sm:$0xff] %v559_v36  ;;  %v565_v39 = vld [vmem:[%s20977_s10 + $0x2ef8] sm:$0xff]  ;;  %562 = vst [vmem:[%s20973_s9 + $0xf78] sm:$0xff] %v561_v37  ;;  %v567_v40 = vld [vmem:[%s20977_s10 + $0x2f40] sm:$0xff] }
  0x66   : >> { %564 = vst [vmem:[%s20973_s9 + $0xf90] sm:$0xff] %v563_v38  ;;  %566 = vst [vmem:[%s20973_s9 + $0xfa8] sm:$0xff] %v565_v39  ;;  %v569_v41 = vld [vmem:[%s20977_s10 + $0x2f88] sm:$0xff]  ;;  %v571_v42 = vld [vmem:[%s20977_s10 + $0x2fd0] sm:$0xff] }
  0x67   : >> { %568 = vst [vmem:[%s20973_s9 + $0xfc0] sm:$0xff] %v567_v40  ;;  %570 = vst [vmem:[%s20973_s9 + $0xfd8] sm:$0xff] %v569_v41  ;;  %v573_v43 = vld [vmem:[%s20977_s10 + $0x3018] sm:$0xff]  ;;  %v575_v44 = vld [vmem:[%s20977_s10 + $0x3060] sm:$0xff] }
  0x68   : >> { %572 = vst [vmem:[%s20973_s9 + $0xff0] sm:$0xff] %v571_v42  ;;  %v577_v45 = vld [vmem:[%s20977_s10 + $0x30a8] sm:$0xff]  ;;  %574 = vst [vmem:[%s20973_s9 + $0x1008] sm:$0xff] %v573_v43  ;;  %v579_v46 = vld [vmem:[%s20977_s10 + $0x30f0] sm:$0xff] }
  0x69   : >> { %576 = vst [vmem:[%s20973_s9 + $0x1020] sm:$0xff] %v575_v44  ;;  %578 = vst [vmem:[%s20973_s9 + $0x1038] sm:$0xff] %v577_v45  ;;  %v581_v47 = vld [vmem:[%s20977_s10 + $0x3138] sm:$0xff]  ;;  %v583_v48 = vld [vmem:[%s20977_s10 + $0x3180] sm:$0xff] }
  0x6a   : >> { %580 = vst [vmem:[%s20973_s9 + $0x1050] sm:$0xff] %v579_v46  ;;  %582 = vst [vmem:[%s20973_s9 + $0x1068] sm:$0xff] %v581_v47  ;;  %v585_v49 = vld [vmem:[%s20977_s10 + $0x31c8] sm:$0xff]  ;;  %v587_v50 = vld [vmem:[%s20977_s10 + $0x3210] sm:$0xff] }
  0x6b   : >> { %584 = vst [vmem:[%s20973_s9 + $0x1080] sm:$0xff] %v583_v48  ;;  %v589_v51 = vld [vmem:[%s20977_s10 + $0x3258] sm:$0xff]  ;;  %586 = vst [vmem:[%s20973_s9 + $0x1098] sm:$0xff] %v585_v49  ;;  %v591_v52 = vld [vmem:[%s20977_s10 + $0x32a0] sm:$0xff] }
  0x6c   : >> { %588 = vst [vmem:[%s20973_s9 + $0x10b0] sm:$0xff] %v587_v50  ;;  %590 = vst [vmem:[%s20973_s9 + $0x10c8] sm:$0xff] %v589_v51  ;;  %v593_v53 = vld [vmem:[%s20977_s10 + $0x32e8] sm:$0xff]  ;;  %v595_v54 = vld [vmem:[%s20977_s10 + $0x3330] sm:$0xff] }
  0x6d   : >> { %592 = vst [vmem:[%s20973_s9 + $0x10e0] sm:$0xff] %v591_v52  ;;  %594 = vst [vmem:[%s20973_s9 + $0x10f8] sm:$0xff] %v593_v53  ;;  %v597_v55 = vld [vmem:[%s20977_s10 + $0x3378] sm:$0xff]  ;;  %v599_v56 = vld [vmem:[%s20977_s10 + $0x33c0] sm:$0xff] }
  0x6e   : >> { %596 = vst [vmem:[%s20973_s9 + $0x1110] sm:$0xff] %v595_v54  ;;  %v601_v57 = vld [vmem:[%s20977_s10 + $0x3408] sm:$0xff]  ;;  %598 = vst [vmem:[%s20973_s9 + $0x1128] sm:$0xff] %v597_v55  ;;  %v603_v58 = vld [vmem:[%s20977_s10 + $0x3450] sm:$0xff] }
  0x6f   : >> { %600 = vst [vmem:[%s20973_s9 + $0x1140] sm:$0xff] %v599_v56  ;;  %602 = vst [vmem:[%s20973_s9 + $0x1158] sm:$0xff] %v601_v57  ;;  %v605_v59 = vld [vmem:[%s20977_s10 + $0x3498] sm:$0xff]  ;;  %v607_v60 = vld [vmem:[%s20977_s10 + $0x34e0] sm:$0xff] }
  0x70   : >> { %604 = vst [vmem:[%s20973_s9 + $0x1170] sm:$0xff] %v603_v58  ;;  %606 = vst [vmem:[%s20973_s9 + $0x1188] sm:$0xff] %v605_v59  ;;  %v609_v61 = vld [vmem:[%s20977_s10 + $0x3528] sm:$0xff]  ;;  %v611_v62 = vld [vmem:[%s20977_s10 + $0x3570] sm:$0xff] }
  0x71   : >> { %608 = vst [vmem:[%s20973_s9 + $0x11a0] sm:$0xff] %v607_v60  ;;  %v613_v63 = vld [vmem:[%s20977_s10 + $0x35b8] sm:$0xff]  ;;  %610 = vst [vmem:[%s20973_s9 + $0x11b8] sm:$0xff] %v609_v61  ;;  %v615_v0 = vld [vmem:[%s20977_s10 + $0x3600] sm:$0xff] }
  0x72   : >> { %612 = vst [vmem:[%s20973_s9 + $0x11d0] sm:$0xff] %v611_v62  ;;  %614 = vst [vmem:[%s20973_s9 + $0x11e8] sm:$0xff] %v613_v63  ;;  %v617_v1 = vld [vmem:[%s20977_s10 + $0x3648] sm:$0xff]  ;;  %v619_v2 = vld [vmem:[%s20977_s10 + $0x3690] sm:$0xff] }
  0x73   : >> { %616 = vst [vmem:[%s20973_s9 + $0x1200] sm:$0xff] %v615_v0  ;;  %618 = vst [vmem:[%s20973_s9 + $0x1218] sm:$0xff] %v617_v1  ;;  %v621_v3 = vld [vmem:[%s20977_s10 + $0x36d8] sm:$0xff]  ;;  %v623_v4 = vld [vmem:[%s20977_s10 + $0x3720] sm:$0xff] }
  0x74   : >> { %620 = vst [vmem:[%s20973_s9 + $0x1230] sm:$0xff] %v619_v2  ;;  %v625_v5 = vld [vmem:[%s20977_s10 + $0x3768] sm:$0xff]  ;;  %622 = vst [vmem:[%s20973_s9 + $0x1248] sm:$0xff] %v621_v3  ;;  %v627_v6 = vld [vmem:[%s20977_s10 + $0x37b0] sm:$0xff] }
  0x75   : >> { %624 = vst [vmem:[%s20973_s9 + $0x1260] sm:$0xff] %v623_v4  ;;  %626 = vst [vmem:[%s20973_s9 + $0x1278] sm:$0xff] %v625_v5  ;;  %v629_v7 = vld [vmem:[%s20977_s10 + $0x37f8] sm:$0xff]  ;;  %v631_v8 = vld [vmem:[%s20977_s10 + $0x3840] sm:$0xff] }
  0x76   : >> { %628 = vst [vmem:[%s20973_s9 + $0x1290] sm:$0xff] %v627_v6  ;;  %630 = vst [vmem:[%s20973_s9 + $0x12a8] sm:$0xff] %v629_v7  ;;  %v633_v9 = vld [vmem:[%s20977_s10 + $0x3888] sm:$0xff]  ;;  %v635_v10 = vld [vmem:[%s20977_s10 + $0x38d0] sm:$0xff] }
  0x77   : >> { %632 = vst [vmem:[%s20973_s9 + $0x12c0] sm:$0xff] %v631_v8  ;;  %v637_v11 = vld [vmem:[%s20977_s10 + $0x3918] sm:$0xff]  ;;  %634 = vst [vmem:[%s20973_s9 + $0x12d8] sm:$0xff] %v633_v9  ;;  %v639_v12 = vld [vmem:[%s20977_s10 + $0x3960] sm:$0xff] }
  0x78   : >> { %636 = vst [vmem:[%s20973_s9 + $0x12f0] sm:$0xff] %v635_v10  ;;  %638 = vst [vmem:[%s20973_s9 + $0x1308] sm:$0xff] %v637_v11  ;;  %v641_v13 = vld [vmem:[%s20977_s10 + $0x39a8] sm:$0xff]  ;;  %v643_v14 = vld [vmem:[%s20977_s10 + $0x39f0] sm:$0xff] }
  0x79   : >> { %640 = vst [vmem:[%s20973_s9 + $0x1320] sm:$0xff] %v639_v12  ;;  %642 = vst [vmem:[%s20973_s9 + $0x1338] sm:$0xff] %v641_v13  ;;  %v645_v15 = vld [vmem:[%s20977_s10 + $0x3a38] sm:$0xff]  ;;  %v647_v16 = vld [vmem:[%s20977_s10 + $0x3a80] sm:$0xff] }
  0x7a   : >> { %644 = vst [vmem:[%s20973_s9 + $0x1350] sm:$0xff] %v643_v14  ;;  %v649_v17 = vld [vmem:[%s20977_s10 + $0x3ac8] sm:$0xff]  ;;  %646 = vst [vmem:[%s20973_s9 + $0x1368] sm:$0xff] %v645_v15  ;;  %v651_v18 = vld [vmem:[%s20977_s10 + $0x3b10] sm:$0xff] }
  0x7b   : >> { %648 = vst [vmem:[%s20973_s9 + $0x1380] sm:$0xff] %v647_v16  ;;  %650 = vst [vmem:[%s20973_s9 + $0x1398] sm:$0xff] %v649_v17  ;;  %v653_v19 = vld [vmem:[%s20977_s10 + $0x3b58] sm:$0xff]  ;;  %v655_v20 = vld [vmem:[%s20977_s10 + $0x3ba0] sm:$0xff] }
  0x7c   : >> { %652 = vst [vmem:[%s20973_s9 + $0x13b0] sm:$0xff] %v651_v18  ;;  %654 = vst [vmem:[%s20973_s9 + $0x13c8] sm:$0xff] %v653_v19  ;;  %v657_v21 = vld [vmem:[%s20977_s10 + $0x3be8] sm:$0xff]  ;;  %v659_v22 = vld [vmem:[%s20977_s10 + $0x3c30] sm:$0xff] }
  0x7d   : >> { %656 = vst [vmem:[%s20973_s9 + $0x13e0] sm:$0xff] %v655_v20  ;;  %v661_v23 = vld [vmem:[%s20977_s10 + $0x3c78] sm:$0xff]  ;;  %658 = vst [vmem:[%s20973_s9 + $0x13f8] sm:$0xff] %v657_v21  ;;  %v663_v24 = vld [vmem:[%s20977_s10 + $0x3cc0] sm:$0xff] }
  0x7e   : >> { %660 = vst [vmem:[%s20973_s9 + $0x1410] sm:$0xff] %v659_v22  ;;  %662 = vst [vmem:[%s20973_s9 + $0x1428] sm:$0xff] %v661_v23  ;;  %v665_v25 = vld [vmem:[%s20977_s10 + $0x3d08] sm:$0xff]  ;;  %v667_v26 = vld [vmem:[%s20977_s10 + $0x3d50] sm:$0xff] }
  0x7f   : >> { %664 = vst [vmem:[%s20973_s9 + $0x1440] sm:$0xff] %v663_v24  ;;  %666 = vst [vmem:[%s20973_s9 + $0x1458] sm:$0xff] %v665_v25  ;;  %v669_v27 = vld [vmem:[%s20977_s10 + $0x3d98] sm:$0xff]  ;;  %v671_v28 = vld [vmem:[%s20977_s10 + $0x3de0] sm:$0xff] }
  0x80   : >> { %668 = vst [vmem:[%s20973_s9 + $0x1470] sm:$0xff] %v667_v26  ;;  %v673_v29 = vld [vmem:[%s20977_s10 + $0x3e28] sm:$0xff]  ;;  %670 = vst [vmem:[%s20973_s9 + $0x1488] sm:$0xff] %v669_v27  ;;  %v675_v30 = vld [vmem:[%s20977_s10 + $0x3e70] sm:$0xff] }
  0x81   : >> { %672 = vst [vmem:[%s20973_s9 + $0x14a0] sm:$0xff] %v671_v28  ;;  %674 = vst [vmem:[%s20973_s9 + $0x14b8] sm:$0xff] %v673_v29  ;;  %v677_v31 = vld [vmem:[%s20977_s10 + $0x3eb8] sm:$0xff]  ;;  %v679_v32 = vld [vmem:[%s20977_s10 + $0x3f00] sm:$0xff] }
  0x82   : >> { %676 = vst [vmem:[%s20973_s9 + $0x14d0] sm:$0xff] %v675_v30  ;;  %678 = vst [vmem:[%s20973_s9 + $0x14e8] sm:$0xff] %v677_v31  ;;  %v681_v33 = vld [vmem:[%s20977_s10 + $0x3f48] sm:$0xff]  ;;  %v683_v34 = vld [vmem:[%s20977_s10 + $0x3f90] sm:$0xff] }
  0x83   : >> { %680 = vst [vmem:[%s20973_s9 + $0x1500] sm:$0xff] %v679_v32  ;;  %v685_v35 = vld [vmem:[%s20977_s10 + $0x3fd8] sm:$0xff]  ;;  %682 = vst [vmem:[%s20973_s9 + $0x1518] sm:$0xff] %v681_v33  ;;  %v687_v36 = vld [vmem:[%s20977_s10 + $0x4020] sm:$0xff] }
  0x84   : >> { %684 = vst [vmem:[%s20973_s9 + $0x1530] sm:$0xff] %v683_v34  ;;  %686 = vst [vmem:[%s20973_s9 + $0x1548] sm:$0xff] %v685_v35  ;;  %v689_v37 = vld [vmem:[%s20977_s10 + $0x4068] sm:$0xff]  ;;  %v691_v38 = vld [vmem:[%s20977_s10 + $0x40b0] sm:$0xff] }
  0x85   : >> { %688 = vst [vmem:[%s20973_s9 + $0x1560] sm:$0xff] %v687_v36  ;;  %690 = vst [vmem:[%s20973_s9 + $0x1578] sm:$0xff] %v689_v37  ;;  %v693_v39 = vld [vmem:[%s20977_s10 + $0x40f8] sm:$0xff]  ;;  %v695_v40 = vld [vmem:[%s20977_s10 + $0x4140] sm:$0xff] }
  0x86   : >> { %692 = vst [vmem:[%s20973_s9 + $0x1590] sm:$0xff] %v691_v38  ;;  %v697_v41 = vld [vmem:[%s20977_s10 + $0x4188] sm:$0xff]  ;;  %694 = vst [vmem:[%s20973_s9 + $0x15a8] sm:$0xff] %v693_v39  ;;  %v699_v42 = vld [vmem:[%s20977_s10 + $0x41d0] sm:$0xff] }
  0x87   : >> { %696 = vst [vmem:[%s20973_s9 + $0x15c0] sm:$0xff] %v695_v40  ;;  %698 = vst [vmem:[%s20973_s9 + $0x15d8] sm:$0xff] %v697_v41  ;;  %v701_v43 = vld [vmem:[%s20977_s10 + $0x4218] sm:$0xff]  ;;  %v703_v44 = vld [vmem:[%s20977_s10 + $0x4260] sm:$0xff] }
  0x88   : >> { %700 = vst [vmem:[%s20973_s9 + $0x15f0] sm:$0xff] %v699_v42  ;;  %702 = vst [vmem:[%s20973_s9 + $0x1608] sm:$0xff] %v701_v43  ;;  %v705_v45 = vld [vmem:[%s20977_s10 + $0x42a8] sm:$0xff]  ;;  %v707_v46 = vld [vmem:[%s20977_s10 + $0x42f0] sm:$0xff] }
  0x89   : >> { %704 = vst [vmem:[%s20973_s9 + $0x1620] sm:$0xff] %v703_v44  ;;  %v709_v47 = vld [vmem:[%s20977_s10 + $0x4338] sm:$0xff]  ;;  %706 = vst [vmem:[%s20973_s9 + $0x1638] sm:$0xff] %v705_v45  ;;  %v711_v48 = vld [vmem:[%s20977_s10 + $0x4380] sm:$0xff] }
  0x8a   : >> { %708 = vst [vmem:[%s20973_s9 + $0x1650] sm:$0xff] %v707_v46  ;;  %710 = vst [vmem:[%s20973_s9 + $0x1668] sm:$0xff] %v709_v47  ;;  %v713_v49 = vld [vmem:[%s20977_s10 + $0x43c8] sm:$0xff]  ;;  %v715_v50 = vld [vmem:[%s20977_s10 + $0x4410] sm:$0xff] }
  0x8b   : >> { %712 = vst [vmem:[%s20973_s9 + $0x1680] sm:$0xff] %v711_v48  ;;  %714 = vst [vmem:[%s20973_s9 + $0x1698] sm:$0xff] %v713_v49  ;;  %v717_v51 = vld [vmem:[%s20977_s10 + $0x4458] sm:$0xff]  ;;  %v719_v52 = vld [vmem:[%s20977_s10 + $0x44a0] sm:$0xff] }
  0x8c   : >> { %716 = vst [vmem:[%s20973_s9 + $0x16b0] sm:$0xff] %v715_v50  ;;  %v721_v53 = vld [vmem:[%s20977_s10 + $0x44e8] sm:$0xff]  ;;  %718 = vst [vmem:[%s20973_s9 + $0x16c8] sm:$0xff] %v717_v51  ;;  %v723_v54 = vld [vmem:[%s20977_s10 + $0x4530] sm:$0xff] }
  0x8d   : >> { %720 = vst [vmem:[%s20973_s9 + $0x16e0] sm:$0xff] %v719_v52  ;;  %722 = vst [vmem:[%s20973_s9 + $0x16f8] sm:$0xff] %v721_v53  ;;  %v725_v55 = vld [vmem:[%s20977_s10 + $0x4578] sm:$0xff]  ;;  %v727_v56 = vld [vmem:[%s20977_s10 + $0x45c0] sm:$0xff] }
  0x8e   : >> { %724 = vst [vmem:[%s20973_s9 + $0x1710] sm:$0xff] %v723_v54  ;;  %726 = vst [vmem:[%s20973_s9 + $0x1728] sm:$0xff] %v725_v55  ;;  %v729_v57 = vld [vmem:[%s20977_s10 + $0x4608] sm:$0xff]  ;;  %v731_v58 = vld [vmem:[%s20977_s10 + $0x4650] sm:$0xff] }
  0x8f   : >> { %728 = vst [vmem:[%s20973_s9 + $0x1740] sm:$0xff] %v727_v56  ;;  %v733_v59 = vld [vmem:[%s20977_s10 + $0x4698] sm:$0xff]  ;;  %730 = vst [vmem:[%s20973_s9 + $0x1758] sm:$0xff] %v729_v57  ;;  %v735_v60 = vld [vmem:[%s20977_s10 + $0x46e0] sm:$0xff] }
  0x90   : >> { %732 = vst [vmem:[%s20973_s9 + $0x1770] sm:$0xff] %v731_v58  ;;  %734 = vst [vmem:[%s20973_s9 + $0x1788] sm:$0xff] %v733_v59  ;;  %v737_v61 = vld [vmem:[%s20977_s10 + $0x4728] sm:$0xff]  ;;  %v739_v62 = vld [vmem:[%s20977_s10 + $0x4770] sm:$0xff] }
  0x91   : >> { %736 = vst [vmem:[%s20973_s9 + $0x17a0] sm:$0xff] %v735_v60  ;;  %738 = vst [vmem:[%s20973_s9 + $0x17b8] sm:$0xff] %v737_v61  ;;  %v741_v63 = vld [vmem:[%s20977_s10 + $0x47b8] sm:$0xff]  ;;  %v743_v0 = vld [vmem:[%s20977_s10 + $0x4800] sm:$0xff] }
  0x92   : >> { %740 = vst [vmem:[%s20973_s9 + $0x17d0] sm:$0xff] %v739_v62  ;;  %v745_v1 = vld [vmem:[%s20977_s10 + $0x4848] sm:$0xff]  ;;  %742 = vst [vmem:[%s20973_s9 + $0x17e8] sm:$0xff] %v741_v63  ;;  %v747_v2 = vld [vmem:[%s20977_s10 + $0x4890] sm:$0xff] }
  0x93   : >> { %744 = vst [vmem:[%s20973_s9 + $0x1800] sm:$0xff] %v743_v0  ;;  %746 = vst [vmem:[%s20973_s9 + $0x1818] sm:$0xff] %v745_v1  ;;  %v749_v3 = vld [vmem:[%s20977_s10 + $0x48d8] sm:$0xff]  ;;  %v751_v4 = vld [vmem:[%s20977_s10 + $0x4920] sm:$0xff] }
  0x94   : >> { %748 = vst [vmem:[%s20973_s9 + $0x1830] sm:$0xff] %v747_v2  ;;  %750 = vst [vmem:[%s20973_s9 + $0x1848] sm:$0xff] %v749_v3  ;;  %v753_v5 = vld [vmem:[%s20977_s10 + $0x4968] sm:$0xff]  ;;  %v755_v6 = vld [vmem:[%s20977_s10 + $0x49b0] sm:$0xff] }
  0x95   : >> { %752 = vst [vmem:[%s20973_s9 + $0x1860] sm:$0xff] %v751_v4  ;;  %v757_v7 = vld [vmem:[%s20977_s10 + $0x49f8] sm:$0xff]  ;;  %754 = vst [vmem:[%s20973_s9 + $0x1878] sm:$0xff] %v753_v5  ;;  %v759_v8 = vld [vmem:[%s20977_s10 + $0x4a40] sm:$0xff] }
  0x96   : >> { %756 = vst [vmem:[%s20973_s9 + $0x1890] sm:$0xff] %v755_v6  ;;  %758 = vst [vmem:[%s20973_s9 + $0x18a8] sm:$0xff] %v757_v7  ;;  %v761_v9 = vld [vmem:[%s20977_s10 + $0x4a88] sm:$0xff]  ;;  %v763_v10 = vld [vmem:[%s20977_s10 + $0x4ad0] sm:$0xff] }
  0x97   : >> { %760 = vst [vmem:[%s20973_s9 + $0x18c0] sm:$0xff] %v759_v8  ;;  %762 = vst [vmem:[%s20973_s9 + $0x18d8] sm:$0xff] %v761_v9  ;;  %v765_v11 = vld [vmem:[%s20977_s10 + $0x4b18] sm:$0xff]  ;;  %v767_v12 = vld [vmem:[%s20977_s10 + $0x4b60] sm:$0xff] }
  0x98   : >> { %764 = vst [vmem:[%s20973_s9 + $0x18f0] sm:$0xff] %v763_v10  ;;  %v769_v13 = vld [vmem:[%s20977_s10 + $0x4ba8] sm:$0xff]  ;;  %766 = vst [vmem:[%s20973_s9 + $0x1908] sm:$0xff] %v765_v11  ;;  %v771_v14 = vld [vmem:[%s20977_s10 + $0x4bf0] sm:$0xff] }
  0x99   : >> { %768 = vst [vmem:[%s20973_s9 + $0x1920] sm:$0xff] %v767_v12  ;;  %770 = vst [vmem:[%s20973_s9 + $0x1938] sm:$0xff] %v769_v13  ;;  %v773_v15 = vld [vmem:[%s20977_s10 + $0x4c38] sm:$0xff]  ;;  %v775_v16 = vld [vmem:[%s20977_s10 + $0x4c80] sm:$0xff] }
  0x9a   : >> { %772 = vst [vmem:[%s20973_s9 + $0x1950] sm:$0xff] %v771_v14  ;;  %774 = vst [vmem:[%s20973_s9 + $0x1968] sm:$0xff] %v773_v15  ;;  %v777_v17 = vld [vmem:[%s20977_s10 + $0x4cc8] sm:$0xff]  ;;  %v779_v18 = vld [vmem:[%s20977_s10 + $0x4d10] sm:$0xff] }
  0x9b   : >> { %776 = vst [vmem:[%s20973_s9 + $0x1980] sm:$0xff] %v775_v16  ;;  %v781_v19 = vld [vmem:[%s20977_s10 + $0x4d58] sm:$0xff]  ;;  %778 = vst [vmem:[%s20973_s9 + $0x1998] sm:$0xff] %v777_v17  ;;  %v783_v20 = vld [vmem:[%s20977_s10 + $0x4da0] sm:$0xff] }
  0x9c   : >> { %780 = vst [vmem:[%s20973_s9 + $0x19b0] sm:$0xff] %v779_v18  ;;  %782 = vst [vmem:[%s20973_s9 + $0x19c8] sm:$0xff] %v781_v19  ;;  %v785_v21 = vld [vmem:[%s20977_s10 + $0x4de8] sm:$0xff]  ;;  %v787_v22 = vld [vmem:[%s20977_s10 + $0x4e30] sm:$0xff] }
  0x9d   : >> { %784 = vst [vmem:[%s20973_s9 + $0x19e0] sm:$0xff] %v783_v20  ;;  %786 = vst [vmem:[%s20973_s9 + $0x19f8] sm:$0xff] %v785_v21  ;;  %v789_v23 = vld [vmem:[%s20977_s10 + $0x4e78] sm:$0xff]  ;;  %v791_v24 = vld [vmem:[%s20977_s10 + $0x4ec0] sm:$0xff] }
  0x9e   : >> { %788 = vst [vmem:[%s20973_s9 + $0x1a10] sm:$0xff] %v787_v22  ;;  %v793_v25 = vld [vmem:[%s20977_s10 + $0x4f08] sm:$0xff]  ;;  %790 = vst [vmem:[%s20973_s9 + $0x1a28] sm:$0xff] %v789_v23  ;;  %v795_v26 = vld [vmem:[%s20977_s10 + $0x4f50] sm:$0xff] }
  0x9f   : >> { %792 = vst [vmem:[%s20973_s9 + $0x1a40] sm:$0xff] %v791_v24  ;;  %794 = vst [vmem:[%s20973_s9 + $0x1a58] sm:$0xff] %v793_v25  ;;  %v797_v27 = vld [vmem:[%s20977_s10 + $0x4f98] sm:$0xff]  ;;  %v799_v28 = vld [vmem:[%s20977_s10 + $0x4fe0] sm:$0xff] }
  0xa0   : >> { %796 = vst [vmem:[%s20973_s9 + $0x1a70] sm:$0xff] %v795_v26  ;;  %798 = vst [vmem:[%s20973_s9 + $0x1a88] sm:$0xff] %v797_v27  ;;  %v801_v29 = vld [vmem:[%s20977_s10 + $0x5028] sm:$0xff]  ;;  %v803_v30 = vld [vmem:[%s20977_s10 + $0x5070] sm:$0xff] }
  0xa1   : >> { %800 = vst [vmem:[%s20973_s9 + $0x1aa0] sm:$0xff] %v799_v28  ;;  %v805_v31 = vld [vmem:[%s20977_s10 + $0x50b8] sm:$0xff]  ;;  %802 = vst [vmem:[%s20973_s9 + $0x1ab8] sm:$0xff] %v801_v29  ;;  %v807_v32 = vld [vmem:[%s20977_s10 + $0x5100] sm:$0xff] }
  0xa2   : >> { %804 = vst [vmem:[%s20973_s9 + $0x1ad0] sm:$0xff] %v803_v30  ;;  %806 = vst [vmem:[%s20973_s9 + $0x1ae8] sm:$0xff] %v805_v31  ;;  %v809_v33 = vld [vmem:[%s20977_s10 + $0x5148] sm:$0xff]  ;;  %v811_v34 = vld [vmem:[%s20977_s10 + $0x5190] sm:$0xff] }
  0xa3   : >> { %808 = vst [vmem:[%s20973_s9 + $0x1b00] sm:$0xff] %v807_v32  ;;  %810 = vst [vmem:[%s20973_s9 + $0x1b18] sm:$0xff] %v809_v33  ;;  %v813_v35 = vld [vmem:[%s20977_s10 + $0x51d8] sm:$0xff]  ;;  %v815_v36 = vld [vmem:[%s20977_s10 + $0x5220] sm:$0xff] }
  0xa4   : >> { %812 = vst [vmem:[%s20973_s9 + $0x1b30] sm:$0xff] %v811_v34  ;;  %v817_v37 = vld [vmem:[%s20977_s10 + $0x5268] sm:$0xff]  ;;  %814 = vst [vmem:[%s20973_s9 + $0x1b48] sm:$0xff] %v813_v35  ;;  %v819_v38 = vld [vmem:[%s20977_s10 + $0x52b0] sm:$0xff] }
  0xa5   : >> { %816 = vst [vmem:[%s20973_s9 + $0x1b60] sm:$0xff] %v815_v36  ;;  %818 = vst [vmem:[%s20973_s9 + $0x1b78] sm:$0xff] %v817_v37  ;;  %v821_v39 = vld [vmem:[%s20977_s10 + $0x52f8] sm:$0xff]  ;;  %v823_v40 = vld [vmem:[%s20977_s10 + $0x5340] sm:$0xff] }
  0xa6   : >> { %820 = vst [vmem:[%s20973_s9 + $0x1b90] sm:$0xff] %v819_v38  ;;  %822 = vst [vmem:[%s20973_s9 + $0x1ba8] sm:$0xff] %v821_v39  ;;  %v825_v41 = vld [vmem:[%s20977_s10 + $0x5388] sm:$0xff]  ;;  %v827_v42 = vld [vmem:[%s20977_s10 + $0x53d0] sm:$0xff] }
  0xa7   : >> { %824 = vst [vmem:[%s20973_s9 + $0x1bc0] sm:$0xff] %v823_v40  ;;  %v829_v43 = vld [vmem:[%s20977_s10 + $0x5418] sm:$0xff]  ;;  %826 = vst [vmem:[%s20973_s9 + $0x1bd8] sm:$0xff] %v825_v41  ;;  %v831_v44 = vld [vmem:[%s20977_s10 + $0x5460] sm:$0xff] }
  0xa8   : >> { %828 = vst [vmem:[%s20973_s9 + $0x1bf0] sm:$0xff] %v827_v42  ;;  %830 = vst [vmem:[%s20973_s9 + $0x1c08] sm:$0xff] %v829_v43  ;;  %v833_v45 = vld [vmem:[%s20977_s10 + $0x54a8] sm:$0xff]  ;;  %v835_v46 = vld [vmem:[%s20977_s10 + $0x54f0] sm:$0xff] }
  0xa9   : >> { %832 = vst [vmem:[%s20973_s9 + $0x1c20] sm:$0xff] %v831_v44  ;;  %834 = vst [vmem:[%s20973_s9 + $0x1c38] sm:$0xff] %v833_v45  ;;  %v837_v47 = vld [vmem:[%s20977_s10 + $0x5538] sm:$0xff]  ;;  %v839_v48 = vld [vmem:[%s20977_s10 + $0x5580] sm:$0xff] }
  0xaa   : >> { %836 = vst [vmem:[%s20973_s9 + $0x1c50] sm:$0xff] %v835_v46  ;;  %v841_v49 = vld [vmem:[%s20977_s10 + $0x55c8] sm:$0xff]  ;;  %838 = vst [vmem:[%s20973_s9 + $0x1c68] sm:$0xff] %v837_v47  ;;  %v843_v50 = vld [vmem:[%s20977_s10 + $0x5610] sm:$0xff] }
  0xab   : >> { %840 = vst [vmem:[%s20973_s9 + $0x1c80] sm:$0xff] %v839_v48  ;;  %842 = vst [vmem:[%s20973_s9 + $0x1c98] sm:$0xff] %v841_v49  ;;  %v845_v51 = vld [vmem:[%s20977_s10 + $0x5658] sm:$0xff]  ;;  %v847_v52 = vld [vmem:[%s20977_s10 + $0x56a0] sm:$0xff] }
  0xac   : >> { %844 = vst [vmem:[%s20973_s9 + $0x1cb0] sm:$0xff] %v843_v50  ;;  %846 = vst [vmem:[%s20973_s9 + $0x1cc8] sm:$0xff] %v845_v51  ;;  %v849_v53 = vld [vmem:[%s20977_s10 + $0x56e8] sm:$0xff]  ;;  %v851_v54 = vld [vmem:[%s20977_s10 + $0x5730] sm:$0xff] }
  0xad   : >> { %848 = vst [vmem:[%s20973_s9 + $0x1ce0] sm:$0xff] %v847_v52  ;;  %v853_v55 = vld [vmem:[%s20977_s10 + $0x5778] sm:$0xff]  ;;  %850 = vst [vmem:[%s20973_s9 + $0x1cf8] sm:$0xff] %v849_v53  ;;  %v855_v56 = vld [vmem:[%s20977_s10 + $0x57c0] sm:$0xff] }
  0xae   : >> { %852 = vst [vmem:[%s20973_s9 + $0x1d10] sm:$0xff] %v851_v54  ;;  %854 = vst [vmem:[%s20973_s9 + $0x1d28] sm:$0xff] %v853_v55  ;;  %v857_v57 = vld [vmem:[%s20977_s10 + $0x5808] sm:$0xff]  ;;  %v859_v58 = vld [vmem:[%s20977_s10 + $0x5850] sm:$0xff] }
  0xaf   : >> { %856 = vst [vmem:[%s20973_s9 + $0x1d40] sm:$0xff] %v855_v56  ;;  %858 = vst [vmem:[%s20973_s9 + $0x1d58] sm:$0xff] %v857_v57  ;;  %v861_v59 = vld [vmem:[%s20977_s10 + $0x5898] sm:$0xff]  ;;  %v863_v60 = vld [vmem:[%s20977_s10 + $0x58e0] sm:$0xff] }
  0xb0   : >> { %860 = vst [vmem:[%s20973_s9 + $0x1d70] sm:$0xff] %v859_v58  ;;  %v865_v61 = vld [vmem:[%s20977_s10 + $0x5928] sm:$0xff]  ;;  %862 = vst [vmem:[%s20973_s9 + $0x1d88] sm:$0xff] %v861_v59  ;;  %v867_v62 = vld [vmem:[%s20977_s10 + $0x5970] sm:$0xff] }
  0xb1   : >> { %864 = vst [vmem:[%s20973_s9 + $0x1da0] sm:$0xff] %v863_v60  ;;  %866 = vst [vmem:[%s20973_s9 + $0x1db8] sm:$0xff] %v865_v61  ;;  %v869_v63 = vld [vmem:[%s20977_s10 + $0x59b8] sm:$0xff]  ;;  %v871_v0 = vld [vmem:[%s20977_s10 + $0x5a00] sm:$0xff] }
  0xb2   : >> { %868 = vst [vmem:[%s20973_s9 + $0x1dd0] sm:$0xff] %v867_v62  ;;  %870 = vst [vmem:[%s20973_s9 + $0x1de8] sm:$0xff] %v869_v63  ;;  %v873_v1 = vld [vmem:[%s20977_s10 + $0x5a48] sm:$0xff]  ;;  %v875_v2 = vld [vmem:[%s20977_s10 + $0x5a90] sm:$0xff] }
  0xb3   : >> { %872 = vst [vmem:[%s20973_s9 + $0x1e00] sm:$0xff] %v871_v0  ;;  %v877_v3 = vld [vmem:[%s20977_s10 + $0x5ad8] sm:$0xff]  ;;  %874 = vst [vmem:[%s20973_s9 + $0x1e18] sm:$0xff] %v873_v1  ;;  %v879_v4 = vld [vmem:[%s20977_s10 + $0x5b20] sm:$0xff] }
  0xb4   : >> { %876 = vst [vmem:[%s20973_s9 + $0x1e30] sm:$0xff] %v875_v2  ;;  %878 = vst [vmem:[%s20973_s9 + $0x1e48] sm:$0xff] %v877_v3  ;;  %v881_v5 = vld [vmem:[%s20977_s10 + $0x5b68] sm:$0xff]  ;;  %v883_v6 = vld [vmem:[%s20977_s10 + $0x5bb0] sm:$0xff] }
  0xb5   : >> { %880 = vst [vmem:[%s20973_s9 + $0x1e60] sm:$0xff] %v879_v4  ;;  %882 = vst [vmem:[%s20973_s9 + $0x1e78] sm:$0xff] %v881_v5  ;;  %v885_v7 = vld [vmem:[%s20977_s10 + $0x5bf8] sm:$0xff]  ;;  %v887_v8 = vld [vmem:[%s20977_s10 + $0x5c40] sm:$0xff] }
  0xb6   : >> { %884 = vst [vmem:[%s20973_s9 + $0x1e90] sm:$0xff] %v883_v6  ;;  %v889_v9 = vld [vmem:[%s20977_s10 + $0x5c88] sm:$0xff]  ;;  %886 = vst [vmem:[%s20973_s9 + $0x1ea8] sm:$0xff] %v885_v7  ;;  %v891_v10 = vld [vmem:[%s20977_s10 + $0x5cd0] sm:$0xff] }
  0xb7   : >> { %888 = vst [vmem:[%s20973_s9 + $0x1ec0] sm:$0xff] %v887_v8  ;;  %890 = vst [vmem:[%s20973_s9 + $0x1ed8] sm:$0xff] %v889_v9  ;;  %v893_v11 = vld [vmem:[%s20977_s10 + $0x5d18] sm:$0xff]  ;;  %v895_v12 = vld [vmem:[%s20977_s10 + $0x5d60] sm:$0xff] }
  0xb8   : >> { %892 = vst [vmem:[%s20973_s9 + $0x1ef0] sm:$0xff] %v891_v10  ;;  %894 = vst [vmem:[%s20973_s9 + $0x1f08] sm:$0xff] %v893_v11  ;;  %v897_v13 = vld [vmem:[%s20977_s10 + $0x5da8] sm:$0xff]  ;;  %v899_v14 = vld [vmem:[%s20977_s10 + $0x5df0] sm:$0xff] }
  0xb9   : >> { %896 = vst [vmem:[%s20973_s9 + $0x1f20] sm:$0xff] %v895_v12  ;;  %v901_v15 = vld [vmem:[%s20977_s10 + $0x5e38] sm:$0xff]  ;;  %898 = vst [vmem:[%s20973_s9 + $0x1f38] sm:$0xff] %v897_v13  ;;  %v903_v16 = vld [vmem:[%s20977_s10 + $0x5e80] sm:$0xff] }
  0xba   : >> { %900 = vst [vmem:[%s20973_s9 + $0x1f50] sm:$0xff] %v899_v14  ;;  %902 = vst [vmem:[%s20973_s9 + $0x1f68] sm:$0xff] %v901_v15  ;;  %v905_v17 = vld [vmem:[%s20977_s10 + $0x5ec8] sm:$0xff]  ;;  %v907_v18 = vld [vmem:[%s20977_s10 + $0x5f10] sm:$0xff] }
  0xbb   : >> { %904 = vst [vmem:[%s20973_s9 + $0x1f80] sm:$0xff] %v903_v16  ;;  %906 = vst [vmem:[%s20973_s9 + $0x1f98] sm:$0xff] %v905_v17  ;;  %v909_v19 = vld [vmem:[%s20977_s10 + $0x5f58] sm:$0xff]  ;;  %v911_v20 = vld [vmem:[%s20977_s10 + $0x5fa0] sm:$0xff] }
  0xbc   : >> { %908 = vst [vmem:[%s20973_s9 + $0x1fb0] sm:$0xff] %v907_v18  ;;  %v913_v21 = vld [vmem:[%s20977_s10 + $0x5fe8] sm:$0xff]  ;;  %910 = vst [vmem:[%s20973_s9 + $0x1fc8] sm:$0xff] %v909_v19  ;;  %v915_v22 = vld [vmem:[%s20977_s10 + $0x6030] sm:$0xff] }
  0xbd   : >> { %912 = vst [vmem:[%s20973_s9 + $0x1fe0] sm:$0xff] %v911_v20  ;;  %914 = vst [vmem:[%s20973_s9 + $0x1ff8] sm:$0xff] %v913_v21  ;;  %v917_v23 = vld [vmem:[%s20977_s10 + $0x6078] sm:$0xff]  ;;  %v919_v24 = vld [vmem:[%s20977_s10 + $0x60c0] sm:$0xff] }
  0xbe   : >> { %916 = vst [vmem:[%s20973_s9 + $0x2010] sm:$0xff] %v915_v22  ;;  %918 = vst [vmem:[%s20973_s9 + $0x2028] sm:$0xff] %v917_v23  ;;  %v921_v25 = vld [vmem:[%s20977_s10 + $0x6108] sm:$0xff]  ;;  %v923_v26 = vld [vmem:[%s20977_s10 + $0x6150] sm:$0xff] }
  0xbf   : >> { %920 = vst [vmem:[%s20973_s9 + $0x2040] sm:$0xff] %v919_v24  ;;  %v925_v27 = vld [vmem:[%s20977_s10 + $0x6198] sm:$0xff]  ;;  %922 = vst [vmem:[%s20973_s9 + $0x2058] sm:$0xff] %v921_v25  ;;  %v927_v28 = vld [vmem:[%s20977_s10 + $0x61e0] sm:$0xff] }
  0xc0   : >> { %924 = vst [vmem:[%s20973_s9 + $0x2070] sm:$0xff] %v923_v26  ;;  %926 = vst [vmem:[%s20973_s9 + $0x2088] sm:$0xff] %v925_v27  ;;  %v929_v29 = vld [vmem:[%s20977_s10 + $0x6228] sm:$0xff]  ;;  %v931_v30 = vld [vmem:[%s20977_s10 + $0x6270] sm:$0xff] }
  0xc1   : >> { %928 = vst [vmem:[%s20973_s9 + $0x20a0] sm:$0xff] %v927_v28  ;;  %930 = vst [vmem:[%s20973_s9 + $0x20b8] sm:$0xff] %v929_v29  ;;  %v933_v31 = vld [vmem:[%s20977_s10 + $0x62b8] sm:$0xff]  ;;  %v935_v32 = vld [vmem:[%s20977_s10 + $0x6300] sm:$0xff] }
  0xc2   : >> { %932 = vst [vmem:[%s20973_s9 + $0x20d0] sm:$0xff] %v931_v30  ;;  %v937_v33 = vld [vmem:[%s20977_s10 + $0x6348] sm:$0xff]  ;;  %934 = vst [vmem:[%s20973_s9 + $0x20e8] sm:$0xff] %v933_v31  ;;  %v939_v34 = vld [vmem:[%s20977_s10 + $0x6390] sm:$0xff] }
  0xc3   : >> { %936 = vst [vmem:[%s20973_s9 + $0x2100] sm:$0xff] %v935_v32  ;;  %938 = vst [vmem:[%s20973_s9 + $0x2118] sm:$0xff] %v937_v33  ;;  %v941_v35 = vld [vmem:[%s20977_s10 + $0x63d8] sm:$0xff]  ;;  %v943_v36 = vld [vmem:[%s20977_s10 + $0x6420] sm:$0xff] }
  0xc4   : >> { %940 = vst [vmem:[%s20973_s9 + $0x2130] sm:$0xff] %v939_v34  ;;  %942 = vst [vmem:[%s20973_s9 + $0x2148] sm:$0xff] %v941_v35  ;;  %v945_v37 = vld [vmem:[%s20977_s10 + $0x6468] sm:$0xff]  ;;  %v947_v38 = vld [vmem:[%s20977_s10 + $0x64b0] sm:$0xff] }
  0xc5   : >> { %944 = vst [vmem:[%s20973_s9 + $0x2160] sm:$0xff] %v943_v36  ;;  %v949_v39 = vld [vmem:[%s20977_s10 + $0x64f8] sm:$0xff]  ;;  %946 = vst [vmem:[%s20973_s9 + $0x2178] sm:$0xff] %v945_v37  ;;  %v951_v40 = vld [vmem:[%s20977_s10 + $0x6540] sm:$0xff] }
  0xc6   : >> { %948 = vst [vmem:[%s20973_s9 + $0x2190] sm:$0xff] %v947_v38  ;;  %950 = vst [vmem:[%s20973_s9 + $0x21a8] sm:$0xff] %v949_v39  ;;  %v953_v41 = vld [vmem:[%s20977_s10 + $0x6588] sm:$0xff]  ;;  %v955_v42 = vld [vmem:[%s20977_s10 + $0x65d0] sm:$0xff] }
  0xc7   : >> { %952 = vst [vmem:[%s20973_s9 + $0x21c0] sm:$0xff] %v951_v40  ;;  %954 = vst [vmem:[%s20973_s9 + $0x21d8] sm:$0xff] %v953_v41  ;;  %v957_v43 = vld [vmem:[%s20977_s10 + $0x6618] sm:$0xff]  ;;  %v959_v44 = vld [vmem:[%s20977_s10 + $0x6660] sm:$0xff] }
  0xc8   : >> { %956 = vst [vmem:[%s20973_s9 + $0x21f0] sm:$0xff] %v955_v42  ;;  %v961_v45 = vld [vmem:[%s20977_s10 + $0x66a8] sm:$0xff]  ;;  %958 = vst [vmem:[%s20973_s9 + $0x2208] sm:$0xff] %v957_v43  ;;  %v963_v46 = vld [vmem:[%s20977_s10 + $0x66f0] sm:$0xff] }
  0xc9   : >> { %960 = vst [vmem:[%s20973_s9 + $0x2220] sm:$0xff] %v959_v44  ;;  %962 = vst [vmem:[%s20973_s9 + $0x2238] sm:$0xff] %v961_v45  ;;  %v965_v47 = vld [vmem:[%s20977_s10 + $0x6738] sm:$0xff]  ;;  %v967_v48 = vld [vmem:[%s20977_s10 + $0x6780] sm:$0xff] }
  0xca   : >> { %964 = vst [vmem:[%s20973_s9 + $0x2250] sm:$0xff] %v963_v46  ;;  %966 = vst [vmem:[%s20973_s9 + $0x2268] sm:$0xff] %v965_v47  ;;  %v969_v49 = vld [vmem:[%s20977_s10 + $0x67c8] sm:$0xff]  ;;  %v971_v50 = vld [vmem:[%s20977_s10 + $0x6810] sm:$0xff] }
  0xcb   : >> { %968 = vst [vmem:[%s20973_s9 + $0x2280] sm:$0xff] %v967_v48  ;;  %v973_v51 = vld [vmem:[%s20977_s10 + $0x6858] sm:$0xff]  ;;  %970 = vst [vmem:[%s20973_s9 + $0x2298] sm:$0xff] %v969_v49  ;;  %v975_v52 = vld [vmem:[%s20977_s10 + $0x68a0] sm:$0xff] }
  0xcc   : >> { %972 = vst [vmem:[%s20973_s9 + $0x22b0] sm:$0xff] %v971_v50  ;;  %974 = vst [vmem:[%s20973_s9 + $0x22c8] sm:$0xff] %v973_v51  ;;  %v977_v53 = vld [vmem:[%s20977_s10 + $0x68e8] sm:$0xff]  ;;  %v979_v54 = vld [vmem:[%s20977_s10 + $0x6930] sm:$0xff] }
  0xcd   : >> { %976 = vst [vmem:[%s20973_s9 + $0x22e0] sm:$0xff] %v975_v52  ;;  %978 = vst [vmem:[%s20973_s9 + $0x22f8] sm:$0xff] %v977_v53  ;;  %v981_v55 = vld [vmem:[%s20977_s10 + $0x6978] sm:$0xff]  ;;  %v983_v56 = vld [vmem:[%s20977_s10 + $0x69c0] sm:$0xff] }
  0xce   : >> { %980 = vst [vmem:[%s20973_s9 + $0x2310] sm:$0xff] %v979_v54  ;;  %v985_v57 = vld [vmem:[%s20977_s10 + $0x6a08] sm:$0xff]  ;;  %982 = vst [vmem:[%s20973_s9 + $0x2328] sm:$0xff] %v981_v55  ;;  %v987_v58 = vld [vmem:[%s20977_s10 + $0x6a50] sm:$0xff] }
  0xcf   : >> { %984 = vst [vmem:[%s20973_s9 + $0x2340] sm:$0xff] %v983_v56  ;;  %986 = vst [vmem:[%s20973_s9 + $0x2358] sm:$0xff] %v985_v57  ;;  %v989_v59 = vld [vmem:[%s20977_s10 + $0x6a98] sm:$0xff]  ;;  %v991_v60 = vld [vmem:[%s20977_s10 + $0x6ae0] sm:$0xff] }
  0xd0   : >> { %988 = vst [vmem:[%s20973_s9 + $0x2370] sm:$0xff] %v987_v58  ;;  %990 = vst [vmem:[%s20973_s9 + $0x2388] sm:$0xff] %v989_v59  ;;  %v993_v61 = vld [vmem:[%s20977_s10 + $0x6b28] sm:$0xff]  ;;  %v995_v62 = vld [vmem:[%s20977_s10 + $0x6b70] sm:$0xff] }
  0xd1   : >> { %992 = vst [vmem:[%s20973_s9 + $0x23a0] sm:$0xff] %v991_v60  ;;  %v997_v63 = vld [vmem:[%s20977_s10 + $0x6bb8] sm:$0xff]  ;;  %994 = vst [vmem:[%s20973_s9 + $0x23b8] sm:$0xff] %v993_v61  ;;  %v999_v0 = vld [vmem:[%s20977_s10 + $0x6c00] sm:$0xff] }
  0xd2   : >> { %996 = vst [vmem:[%s20973_s9 + $0x23d0] sm:$0xff] %v995_v62  ;;  %998 = vst [vmem:[%s20973_s9 + $0x23e8] sm:$0xff] %v997_v63  ;;  %v1001_v1 = vld [vmem:[%s20977_s10 + $0x6c48] sm:$0xff]  ;;  %v1003_v2 = vld [vmem:[%s20977_s10 + $0x6c90] sm:$0xff] }
  0xd3   : >> { %1000 = vst [vmem:[%s20973_s9 + $0x2400] sm:$0xff] %v999_v0  ;;  %1002 = vst [vmem:[%s20973_s9 + $0x2418] sm:$0xff] %v1001_v1  ;;  %v1005_v3 = vld [vmem:[%s20977_s10 + $0x6cd8] sm:$0xff]  ;;  %v1007_v4 = vld [vmem:[%s20977_s10 + $0x6d20] sm:$0xff] }
  0xd4   : >> { %1004 = vst [vmem:[%s20973_s9 + $0x2430] sm:$0xff] %v1003_v2  ;;  %v1009_v5 = vld [vmem:[%s20977_s10 + $0x6d68] sm:$0xff]  ;;  %1006 = vst [vmem:[%s20973_s9 + $0x2448] sm:$0xff] %v1005_v3  ;;  %v1011_v6 = vld [vmem:[%s20977_s10 + $0x6db0] sm:$0xff] }
  0xd5   : >> { %1008 = vst [vmem:[%s20973_s9 + $0x2460] sm:$0xff] %v1007_v4  ;;  %1010 = vst [vmem:[%s20973_s9 + $0x2478] sm:$0xff] %v1009_v5  ;;  %v1013_v7 = vld [vmem:[%s20977_s10 + $0x6df8] sm:$0xff]  ;;  %v1015_v8 = vld [vmem:[%s20977_s10 + $0x6e40] sm:$0xff] }
  0xd6   : >> { %1012 = vst [vmem:[%s20973_s9 + $0x2490] sm:$0xff] %v1011_v6  ;;  %1014 = vst [vmem:[%s20973_s9 + $0x24a8] sm:$0xff] %v1013_v7  ;;  %v1017_v9 = vld [vmem:[%s20977_s10 + $0x6e88] sm:$0xff]  ;;  %v1019_v10 = vld [vmem:[%s20977_s10 + $0x6ed0] sm:$0xff] }
  0xd7   : >> { %1016 = vst [vmem:[%s20973_s9 + $0x24c0] sm:$0xff] %v1015_v8  ;;  %v1021_v11 = vld [vmem:[%s20977_s10 + $0x6f18] sm:$0xff]  ;;  %1018 = vst [vmem:[%s20973_s9 + $0x24d8] sm:$0xff] %v1017_v9  ;;  %v1023_v12 = vld [vmem:[%s20977_s10 + $0x6f60] sm:$0xff] }
  0xd8   : >> { %1020 = vst [vmem:[%s20973_s9 + $0x24f0] sm:$0xff] %v1019_v10  ;;  %1022 = vst [vmem:[%s20973_s9 + $0x2508] sm:$0xff] %v1021_v11  ;;  %v1025_v13 = vld [vmem:[%s20977_s10 + $0x6fa8] sm:$0xff]  ;;  %v1027_v14 = vld [vmem:[%s20977_s10 + $0x6ff0] sm:$0xff] }
  0xd9   : >> { %1024 = vst [vmem:[%s20973_s9 + $0x2520] sm:$0xff] %v1023_v12  ;;  %1026 = vst [vmem:[%s20973_s9 + $0x2538] sm:$0xff] %v1025_v13  ;;  %v1029_v15 = vld [vmem:[%s20977_s10 + $0x7038] sm:$0xff]  ;;  %v1031_v16 = vld [vmem:[%s20977_s10 + $0x7080] sm:$0xff] }
  0xda   : >> { %1028 = vst [vmem:[%s20973_s9 + $0x2550] sm:$0xff] %v1027_v14  ;;  %v1033_v17 = vld [vmem:[%s20977_s10 + $0x70c8] sm:$0xff]  ;;  %1030 = vst [vmem:[%s20973_s9 + $0x2568] sm:$0xff] %v1029_v15  ;;  %v1035_v18 = vld [vmem:[%s20977_s10 + $0x7110] sm:$0xff] }
  0xdb   : >> { %1032 = vst [vmem:[%s20973_s9 + $0x2580] sm:$0xff] %v1031_v16  ;;  %1034 = vst [vmem:[%s20973_s9 + $0x2598] sm:$0xff] %v1033_v17  ;;  %v1037_v19 = vld [vmem:[%s20977_s10 + $0x7158] sm:$0xff]  ;;  %v1039_v20 = vld [vmem:[%s20977_s10 + $0x71a0] sm:$0xff] }
  0xdc   : >> { %1036 = vst [vmem:[%s20973_s9 + $0x25b0] sm:$0xff] %v1035_v18  ;;  %1038 = vst [vmem:[%s20973_s9 + $0x25c8] sm:$0xff] %v1037_v19  ;;  %v1041_v21 = vld [vmem:[%s20977_s10 + $0x71e8] sm:$0xff]  ;;  %v1043_v22 = vld [vmem:[%s20977_s10 + $0x7230] sm:$0xff] }
  0xdd   : >> { %1040 = vst [vmem:[%s20973_s9 + $0x25e0] sm:$0xff] %v1039_v20  ;;  %v1045_v23 = vld [vmem:[%s20977_s10 + $0x7278] sm:$0xff]  ;;  %1042 = vst [vmem:[%s20973_s9 + $0x25f8] sm:$0xff] %v1041_v21  ;;  %v1047_v24 = vld [vmem:[%s20977_s10 + $0x72c0] sm:$0xff] }
  0xde   : >> { %1044 = vst [vmem:[%s20973_s9 + $0x2610] sm:$0xff] %v1043_v22  ;;  %1046 = vst [vmem:[%s20973_s9 + $0x2628] sm:$0xff] %v1045_v23  ;;  %v1049_v25 = vld [vmem:[%s20977_s10 + $0x7308] sm:$0xff]  ;;  %v1051_v26 = vld [vmem:[%s20977_s10 + $0x7350] sm:$0xff] }
  0xdf   : >> { %1048 = vst [vmem:[%s20973_s9 + $0x2640] sm:$0xff] %v1047_v24  ;;  %1050 = vst [vmem:[%s20973_s9 + $0x2658] sm:$0xff] %v1049_v25  ;;  %v1053_v27 = vld [vmem:[%s20977_s10 + $0x7398] sm:$0xff]  ;;  %v1055_v28 = vld [vmem:[%s20977_s10 + $0x73e0] sm:$0xff] }
  0xe0   : >> { %1052 = vst [vmem:[%s20973_s9 + $0x2670] sm:$0xff] %v1051_v26  ;;  %v1057_v29 = vld [vmem:[%s20977_s10 + $0x7428] sm:$0xff]  ;;  %1054 = vst [vmem:[%s20973_s9 + $0x2688] sm:$0xff] %v1053_v27  ;;  %v1059_v30 = vld [vmem:[%s20977_s10 + $0x7470] sm:$0xff] }
  0xe1   : >> { %1056 = vst [vmem:[%s20973_s9 + $0x26a0] sm:$0xff] %v1055_v28  ;;  %1058 = vst [vmem:[%s20973_s9 + $0x26b8] sm:$0xff] %v1057_v29  ;;  %v1061_v31 = vld [vmem:[%s20977_s10 + $0x74b8] sm:$0xff]  ;;  %v1063_v32 = vld [vmem:[%s20977_s10 + $0x7500] sm:$0xff] }
  0xe2   : >> { %1060 = vst [vmem:[%s20973_s9 + $0x26d0] sm:$0xff] %v1059_v30  ;;  %1062 = vst [vmem:[%s20973_s9 + $0x26e8] sm:$0xff] %v1061_v31  ;;  %v1065_v33 = vld [vmem:[%s20977_s10 + $0x7548] sm:$0xff]  ;;  %v1067_v34 = vld [vmem:[%s20977_s10 + $0x7590] sm:$0xff] }
  0xe3   : >> { %1064 = vst [vmem:[%s20973_s9 + $0x2700] sm:$0xff] %v1063_v32  ;;  %v1069_v35 = vld [vmem:[%s20977_s10 + $0x75d8] sm:$0xff]  ;;  %1066 = vst [vmem:[%s20973_s9 + $0x2718] sm:$0xff] %v1065_v33  ;;  %v1071_v36 = vld [vmem:[%s20977_s10 + $0x7620] sm:$0xff] }
  0xe4   : >> { %1068 = vst [vmem:[%s20973_s9 + $0x2730] sm:$0xff] %v1067_v34  ;;  %1070 = vst [vmem:[%s20973_s9 + $0x2748] sm:$0xff] %v1069_v35  ;;  %v1073_v37 = vld [vmem:[%s20977_s10 + $0x7668] sm:$0xff]  ;;  %v1075_v38 = vld [vmem:[%s20977_s10 + $0x76b0] sm:$0xff] }
  0xe5   : >> { %1072 = vst [vmem:[%s20973_s9 + $0x2760] sm:$0xff] %v1071_v36  ;;  %1074 = vst [vmem:[%s20973_s9 + $0x2778] sm:$0xff] %v1073_v37  ;;  %v1077_v39 = vld [vmem:[%s20977_s10 + $0x76f8] sm:$0xff]  ;;  %v1079_v40 = vld [vmem:[%s20977_s10 + $0x7740] sm:$0xff] }
  0xe6   : >> { %1076 = vst [vmem:[%s20973_s9 + $0x2790] sm:$0xff] %v1075_v38  ;;  %v1081_v41 = vld [vmem:[%s20977_s10 + $0x7788] sm:$0xff]  ;;  %1078 = vst [vmem:[%s20973_s9 + $0x27a8] sm:$0xff] %v1077_v39  ;;  %v1083_v42 = vld [vmem:[%s20977_s10 + $0x77d0] sm:$0xff] }
  0xe7   : >> { %1080 = vst [vmem:[%s20973_s9 + $0x27c0] sm:$0xff] %v1079_v40  ;;  %1082 = vst [vmem:[%s20973_s9 + $0x27d8] sm:$0xff] %v1081_v41  ;;  %v1085_v43 = vld [vmem:[%s20977_s10 + $0x7818] sm:$0xff]  ;;  %v1087_v44 = vld [vmem:[%s20977_s10 + $0x7860] sm:$0xff] }
  0xe8   : >> { %1084 = vst [vmem:[%s20973_s9 + $0x27f0] sm:$0xff] %v1083_v42  ;;  %1086 = vst [vmem:[%s20973_s9 + $0x2808] sm:$0xff] %v1085_v43  ;;  %v1089_v45 = vld [vmem:[%s20977_s10 + $0x78a8] sm:$0xff]  ;;  %v1091_v46 = vld [vmem:[%s20977_s10 + $0x78f0] sm:$0xff] }
  0xe9   : >> { %1088 = vst [vmem:[%s20973_s9 + $0x2820] sm:$0xff] %v1087_v44  ;;  %v1093_v47 = vld [vmem:[%s20977_s10 + $0x7938] sm:$0xff]  ;;  %1090 = vst [vmem:[%s20973_s9 + $0x2838] sm:$0xff] %v1089_v45  ;;  %v1095_v48 = vld [vmem:[%s20977_s10 + $0x7980] sm:$0xff] }
  0xea   : >> { %1092 = vst [vmem:[%s20973_s9 + $0x2850] sm:$0xff] %v1091_v46  ;;  %1094 = vst [vmem:[%s20973_s9 + $0x2868] sm:$0xff] %v1093_v47  ;;  %v1097_v49 = vld [vmem:[%s20977_s10 + $0x79c8] sm:$0xff]  ;;  %v1099_v50 = vld [vmem:[%s20977_s10 + $0x7a10] sm:$0xff] }
  0xeb   : >> { %1096 = vst [vmem:[%s20973_s9 + $0x2880] sm:$0xff] %v1095_v48  ;;  %1098 = vst [vmem:[%s20973_s9 + $0x2898] sm:$0xff] %v1097_v49  ;;  %v1101_v51 = vld [vmem:[%s20977_s10 + $0x7a58] sm:$0xff]  ;;  %v1103_v52 = vld [vmem:[%s20977_s10 + $0x7aa0] sm:$0xff] }
  0xec   : >> { %1100 = vst [vmem:[%s20973_s9 + $0x28b0] sm:$0xff] %v1099_v50  ;;  %v1105_v53 = vld [vmem:[%s20977_s10 + $0x7ae8] sm:$0xff]  ;;  %1102 = vst [vmem:[%s20973_s9 + $0x28c8] sm:$0xff] %v1101_v51  ;;  %v1107_v54 = vld [vmem:[%s20977_s10 + $0x7b30] sm:$0xff] }
  0xed   : >> { %1104 = vst [vmem:[%s20973_s9 + $0x28e0] sm:$0xff] %v1103_v52  ;;  %1106 = vst [vmem:[%s20973_s9 + $0x28f8] sm:$0xff] %v1105_v53  ;;  %v1109_v55 = vld [vmem:[%s20977_s10 + $0x7b78] sm:$0xff]  ;;  %v1111_v56 = vld [vmem:[%s20977_s10 + $0x7bc0] sm:$0xff] }
  0xee   : >> { %1108 = vst [vmem:[%s20973_s9 + $0x2910] sm:$0xff] %v1107_v54  ;;  %1110 = vst [vmem:[%s20973_s9 + $0x2928] sm:$0xff] %v1109_v55  ;;  %v1113_v57 = vld [vmem:[%s20977_s10 + $0x7c08] sm:$0xff]  ;;  %v1115_v58 = vld [vmem:[%s20977_s10 + $0x7c50] sm:$0xff] }
  0xef   : >> { %1112 = vst [vmem:[%s20973_s9 + $0x2940] sm:$0xff] %v1111_v56  ;;  %v1117_v59 = vld [vmem:[%s20977_s10 + $0x7c98] sm:$0xff]  ;;  %1114 = vst [vmem:[%s20973_s9 + $0x2958] sm:$0xff] %v1113_v57  ;;  %v1119_v60 = vld [vmem:[%s20977_s10 + $0x7ce0] sm:$0xff] }
  0xf0   : >> { %1116 = vst [vmem:[%s20973_s9 + $0x2970] sm:$0xff] %v1115_v58  ;;  %1118 = vst [vmem:[%s20973_s9 + $0x2988] sm:$0xff] %v1117_v59  ;;  %v1121_v61 = vld [vmem:[%s20977_s10 + $0x7d28] sm:$0xff]  ;;  %v1123_v62 = vld [vmem:[%s20977_s10 + $0x7d70] sm:$0xff] }
  0xf1   : >> { %1120 = vst [vmem:[%s20973_s9 + $0x29a0] sm:$0xff] %v1119_v60  ;;  %1122 = vst [vmem:[%s20973_s9 + $0x29b8] sm:$0xff] %v1121_v61  ;;  %v1125_v63 = vld [vmem:[%s20977_s10 + $0x7db8] sm:$0xff]  ;;  %v1127_v0 = vld [vmem:[%s20977_s10 + $0x7e00] sm:$0xff] }
  0xf2   : >> { %1124 = vst [vmem:[%s20973_s9 + $0x29d0] sm:$0xff] %v1123_v62  ;;  %v1129_v1 = vld [vmem:[%s20977_s10 + $0x7e48] sm:$0xff]  ;;  %1126 = vst [vmem:[%s20973_s9 + $0x29e8] sm:$0xff] %v1125_v63  ;;  %v1131_v2 = vld [vmem:[%s20977_s10 + $0x7e90] sm:$0xff] }
  0xf3   : >> { %1128 = vst [vmem:[%s20973_s9 + $0x2a00] sm:$0xff] %v1127_v0  ;;  %1130 = vst [vmem:[%s20973_s9 + $0x2a18] sm:$0xff] %v1129_v1  ;;  %v1133_v3 = vld [vmem:[%s20977_s10 + $0x7ed8] sm:$0xff]  ;;  %v1135_v4 = vld [vmem:[%s20977_s10 + $0x7f20] sm:$0xff] }
  0xf4   : >> { %1132 = vst [vmem:[%s20973_s9 + $0x2a30] sm:$0xff] %v1131_v2  ;;  %1134 = vst [vmem:[%s20973_s9 + $0x2a48] sm:$0xff] %v1133_v3  ;;  %v1137_v5 = vld [vmem:[%s20977_s10 + $0x7f68] sm:$0xff]  ;;  %v1139_v6 = vld [vmem:[%s20977_s10 + $0x7fb0] sm:$0xff] }
  0xf5   : >> { %1136 = vst [vmem:[%s20973_s9 + $0x2a60] sm:$0xff] %v1135_v4  ;;  %v1141_v7 = vld [vmem:[%s20977_s10 + $0x7ff8] sm:$0xff]  ;;  %1138 = vst [vmem:[%s20973_s9 + $0x2a78] sm:$0xff] %v1137_v5  ;;  %v1143_v8 = vld [vmem:[%s20977_s10 + $0x8040] sm:$0xff] }
  0xf6   : >> { %1140 = vst [vmem:[%s20973_s9 + $0x2a90] sm:$0xff] %v1139_v6  ;;  %1142 = vst [vmem:[%s20973_s9 + $0x2aa8] sm:$0xff] %v1141_v7  ;;  %v1145_v9 = vld [vmem:[%s20977_s10 + $0x8088] sm:$0xff]  ;;  %v1147_v10 = vld [vmem:[%s20977_s10 + $0x80d0] sm:$0xff] }
  0xf7   : >> { %1144 = vst [vmem:[%s20973_s9 + $0x2ac0] sm:$0xff] %v1143_v8  ;;  %1146 = vst [vmem:[%s20973_s9 + $0x2ad8] sm:$0xff] %v1145_v9  ;;  %v1149_v11 = vld [vmem:[%s20977_s10 + $0x8118] sm:$0xff]  ;;  %v1151_v12 = vld [vmem:[%s20977_s10 + $0x8160] sm:$0xff] }
  0xf8   : >> { %1148 = vst [vmem:[%s20973_s9 + $0x2af0] sm:$0xff] %v1147_v10  ;;  %v1153_v13 = vld [vmem:[%s20977_s10 + $0x81a8] sm:$0xff]  ;;  %1150 = vst [vmem:[%s20973_s9 + $0x2b08] sm:$0xff] %v1149_v11  ;;  %v1155_v14 = vld [vmem:[%s20977_s10 + $0x81f0] sm:$0xff] }
  0xf9   : >> { %1152 = vst [vmem:[%s20973_s9 + $0x2b20] sm:$0xff] %v1151_v12  ;;  %1154 = vst [vmem:[%s20973_s9 + $0x2b38] sm:$0xff] %v1153_v13  ;;  %v1157_v15 = vld [vmem:[%s20977_s10 + $0x8238] sm:$0xff]  ;;  %v1159_v16 = vld [vmem:[%s20977_s10 + $0x8280] sm:$0xff] }
  0xfa   : >> { %1156 = vst [vmem:[%s20973_s9 + $0x2b50] sm:$0xff] %v1155_v14  ;;  %1158 = vst [vmem:[%s20973_s9 + $0x2b68] sm:$0xff] %v1157_v15  ;;  %v1161_v17 = vld [vmem:[%s20977_s10 + $0x82c8] sm:$0xff]  ;;  %v1163_v18 = vld [vmem:[%s20977_s10 + $0x8310] sm:$0xff] }
  0xfb   : >> { %1160 = vst [vmem:[%s20973_s9 + $0x2b80] sm:$0xff] %v1159_v16  ;;  %v1165_v19 = vld [vmem:[%s20977_s10 + $0x8358] sm:$0xff]  ;;  %1162 = vst [vmem:[%s20973_s9 + $0x2b98] sm:$0xff] %v1161_v17  ;;  %v1167_v20 = vld [vmem:[%s20977_s10 + $0x83a0] sm:$0xff] }
  0xfc   : >> { %1164 = vst [vmem:[%s20973_s9 + $0x2bb0] sm:$0xff] %v1163_v18  ;;  %1166 = vst [vmem:[%s20973_s9 + $0x2bc8] sm:$0xff] %v1165_v19  ;;  %v1169_v21 = vld [vmem:[%s20977_s10 + $0x83e8] sm:$0xff]  ;;  %v1171_v22 = vld [vmem:[%s20977_s10 + $0x8430] sm:$0xff] }
  0xfd   : >> { %1168 = vst [vmem:[%s20973_s9 + $0x2be0] sm:$0xff] %v1167_v20  ;;  %1170 = vst [vmem:[%s20973_s9 + $0x2bf8] sm:$0xff] %v1169_v21  ;;  %v1173_v23 = vld [vmem:[%s20977_s10 + $0x8478] sm:$0xff]  ;;  %v1175_v24 = vld [vmem:[%s20977_s10 + $0x84c0] sm:$0xff] }
  0xfe   : >> { %1172 = vst [vmem:[%s20973_s9 + $0x2c10] sm:$0xff] %v1171_v22  ;;  %v1177_v25 = vld [vmem:[%s20977_s10 + $0x8508] sm:$0xff]  ;;  %1174 = vst [vmem:[%s20973_s9 + $0x2c28] sm:$0xff] %v1173_v23  ;;  %v1179_v26 = vld [vmem:[%s20977_s10 + $0x8550] sm:$0xff] }
  0xff   : >> { %1176 = vst [vmem:[%s20973_s9 + $0x2c40] sm:$0xff] %v1175_v24  ;;  %1178 = vst [vmem:[%s20973_s9 + $0x2c58] sm:$0xff] %v1177_v25  ;;  %v1181_v27 = vld [vmem:[%s20977_s10 + $0x8598] sm:$0xff]  ;;  %v1183_v28 = vld [vmem:[%s20977_s10 + $0x85e0] sm:$0xff] }
 0x100   : >> { %1180 = vst [vmem:[%s20973_s9 + $0x2c70] sm:$0xff] %v1179_v26  ;;  %1182 = vst [vmem:[%s20973_s9 + $0x2c88] sm:$0xff] %v1181_v27  ;;  %v1185_v29 = vld [vmem:[%s20977_s10 + $0x8628] sm:$0xff]  ;;  %v1187_v30 = vld [vmem:[%s20977_s10 + $0x8670] sm:$0xff] }
 0x101   : >> { %1184 = vst [vmem:[%s20973_s9 + $0x2ca0] sm:$0xff] %v1183_v28  ;;  %v1189_v31 = vld [vmem:[%s20977_s10 + $0x86b8] sm:$0xff]  ;;  %1186 = vst [vmem:[%s20973_s9 + $0x2cb8] sm:$0xff] %v1185_v29  ;;  %v1191_v32 = vld [vmem:[%s20977_s10 + $0x8700] sm:$0xff] }
 0x102   : >> { %1188 = vst [vmem:[%s20973_s9 + $0x2cd0] sm:$0xff] %v1187_v30  ;;  %1190 = vst [vmem:[%s20973_s9 + $0x2ce8] sm:$0xff] %v1189_v31  ;;  %v1193_v33 = vld [vmem:[%s20977_s10 + $0x8748] sm:$0xff]  ;;  %v1195_v34 = vld [vmem:[%s20977_s10 + $0x8790] sm:$0xff] }
 0x103   : >> { %1192 = vst [vmem:[%s20973_s9 + $0x2d00] sm:$0xff] %v1191_v32  ;;  %1194 = vst [vmem:[%s20973_s9 + $0x2d18] sm:$0xff] %v1193_v33  ;;  %v1197_v35 = vld [vmem:[%s20977_s10 + $0x87d8] sm:$0xff]  ;;  %v1199_v36 = vld [vmem:[%s20977_s10 + $0x8820] sm:$0xff] }
 0x104   : >> { %1196 = vst [vmem:[%s20973_s9 + $0x2d30] sm:$0xff] %v1195_v34  ;;  %v1201_v37 = vld [vmem:[%s20977_s10 + $0x8868] sm:$0xff]  ;;  %1198 = vst [vmem:[%s20973_s9 + $0x2d48] sm:$0xff] %v1197_v35  ;;  %v1203_v38 = vld [vmem:[%s20977_s10 + $0x88b0] sm:$0xff] }
 0x105   : >> { %1200 = vst [vmem:[%s20973_s9 + $0x2d60] sm:$0xff] %v1199_v36  ;;  %1202 = vst [vmem:[%s20973_s9 + $0x2d78] sm:$0xff] %v1201_v37  ;;  %v1205_v39 = vld [vmem:[%s20977_s10 + $0x88f8] sm:$0xff]  ;;  %v1207_v40 = vld [vmem:[%s20977_s10 + $0x8940] sm:$0xff] }
 0x106   : >> { %1204 = vst [vmem:[%s20973_s9 + $0x2d90] sm:$0xff] %v1203_v38  ;;  %1206 = vst [vmem:[%s20973_s9 + $0x2da8] sm:$0xff] %v1205_v39  ;;  %v1209_v41 = vld [vmem:[%s20977_s10 + $0x8988] sm:$0xff]  ;;  %v1211_v42 = vld [vmem:[%s20977_s10 + $0x89d0] sm:$0xff] }
 0x107   : >> { %1208 = vst [vmem:[%s20973_s9 + $0x2dc0] sm:$0xff] %v1207_v40  ;;  %v1213_v43 = vld [vmem:[%s20977_s10 + $0x8a18] sm:$0xff]  ;;  %1210 = vst [vmem:[%s20973_s9 + $0x2dd8] sm:$0xff] %v1209_v41  ;;  %v1215_v44 = vld [vmem:[%s20977_s10 + $0x8a60] sm:$0xff] }
 0x108   : >> { %1212 = vst [vmem:[%s20973_s9 + $0x2df0] sm:$0xff] %v1211_v42  ;;  %1214 = vst [vmem:[%s20973_s9 + $0x2e08] sm:$0xff] %v1213_v43  ;;  %v1217_v45 = vld [vmem:[%s20977_s10 + $0x8aa8] sm:$0xff]  ;;  %v1219_v46 = vld [vmem:[%s20977_s10 + $0x8af0] sm:$0xff] }
 0x109   : >> { %1216 = vst [vmem:[%s20973_s9 + $0x2e20] sm:$0xff] %v1215_v44  ;;  %1218 = vst [vmem:[%s20973_s9 + $0x2e38] sm:$0xff] %v1217_v45  ;;  %v1221_v47 = vld [vmem:[%s20977_s10 + $0x8b38] sm:$0xff]  ;;  %v1223_v48 = vld [vmem:[%s20977_s10 + $0x8b80] sm:$0xff] }
 0x10a   : >> { %1220 = vst [vmem:[%s20973_s9 + $0x2e50] sm:$0xff] %v1219_v46  ;;  %v1225_v49 = vld [vmem:[%s20977_s10 + $0x8bc8] sm:$0xff]  ;;  %1222 = vst [vmem:[%s20973_s9 + $0x2e68] sm:$0xff] %v1221_v47  ;;  %v1227_v50 = vld [vmem:[%s20977_s10 + $0x8c10] sm:$0xff] }
 0x10b   : >> { %1224 = vst [vmem:[%s20973_s9 + $0x2e80] sm:$0xff] %v1223_v48  ;;  %1226 = vst [vmem:[%s20973_s9 + $0x2e98] sm:$0xff] %v1225_v49  ;;  %v1229_v51 = vld [vmem:[%s20977_s10 + $0x8c58] sm:$0xff]  ;;  %v1231_v52 = vld [vmem:[%s20977_s10 + $0x8ca0] sm:$0xff] }
 0x10c   : >> { %1228 = vst [vmem:[%s20973_s9 + $0x2eb0] sm:$0xff] %v1227_v50  ;;  %1230 = vst [vmem:[%s20973_s9 + $0x2ec8] sm:$0xff] %v1229_v51  ;;  %v1233_v53 = vld [vmem:[%s20977_s10 + $0x8ce8] sm:$0xff]  ;;  %v1235_v54 = vld [vmem:[%s20977_s10 + $0x8d30] sm:$0xff] }
 0x10d   : >> { %1232 = vst [vmem:[%s20973_s9 + $0x2ee0] sm:$0xff] %v1231_v52  ;;  %v1237_v55 = vld [vmem:[%s20977_s10 + $0x8d78] sm:$0xff]  ;;  %1234 = vst [vmem:[%s20973_s9 + $0x2ef8] sm:$0xff] %v1233_v53  ;;  %v1239_v56 = vld [vmem:[%s20977_s10 + $0x8dc0] sm:$0xff] }
 0x10e   : >> { %1236 = vst [vmem:[%s20973_s9 + $0x2f10] sm:$0xff] %v1235_v54  ;;  %1238 = vst [vmem:[%s20973_s9 + $0x2f28] sm:$0xff] %v1237_v55  ;;  %v1241_v57 = vld [vmem:[%s20977_s10 + $0x8e08] sm:$0xff]  ;;  %v1243_v58 = vld [vmem:[%s20977_s10 + $0x8e50] sm:$0xff] }
 0x10f   : >> { %1240 = vst [vmem:[%s20973_s9 + $0x2f40] sm:$0xff] %v1239_v56  ;;  %1242 = vst [vmem:[%s20973_s9 + $0x2f58] sm:$0xff] %v1241_v57  ;;  %v1245_v59 = vld [vmem:[%s20977_s10 + $0x8e98] sm:$0xff]  ;;  %v1247_v60 = vld [vmem:[%s20977_s10 + $0x8ee0] sm:$0xff] }
 0x110   : >> { %1244 = vst [vmem:[%s20973_s9 + $0x2f70] sm:$0xff] %v1243_v58  ;;  %v1249_v61 = vld [vmem:[%s20977_s10 + $0x8f28] sm:$0xff]  ;;  %1246 = vst [vmem:[%s20973_s9 + $0x2f88] sm:$0xff] %v1245_v59  ;;  %v1251_v62 = vld [vmem:[%s20977_s10 + $0x8f70] sm:$0xff] }
 0x111   : >> { %1248 = vst [vmem:[%s20973_s9 + $0x2fa0] sm:$0xff] %v1247_v60  ;;  %1250 = vst [vmem:[%s20973_s9 + $0x2fb8] sm:$0xff] %v1249_v61  ;;  %v1253_v63 = vld [vmem:[%s20977_s10 + $0x8fb8] sm:$0xff]  ;;  %v1255_v0 = vld [vmem:[%s20977_s10 + $0x9000] sm:$0xff] }
 0x112   : >> { %1252 = vst [vmem:[%s20973_s9 + $0x2fd0] sm:$0xff] %v1251_v62  ;;  %1254 = vst [vmem:[%s20973_s9 + $0x2fe8] sm:$0xff] %v1253_v63  ;;  %v1257_v1 = vld [vmem:[%s20977_s10 + $0x9048] sm:$0xff]  ;;  %v1259_v2 = vld [vmem:[%s20977_s10 + $0x9090] sm:$0xff] }
 0x113   : >> { %1256 = vst [vmem:[%s20973_s9 + $0x3000] sm:$0xff] %v1255_v0  ;;  %v1261_v3 = vld [vmem:[%s20977_s10 + $0x90d8] sm:$0xff]  ;;  %1258 = vst [vmem:[%s20973_s9 + $0x3018] sm:$0xff] %v1257_v1  ;;  %v1263_v4 = vld [vmem:[%s20977_s10 + $0x9120] sm:$0xff] }
 0x114   : >> { %1260 = vst [vmem:[%s20973_s9 + $0x3030] sm:$0xff] %v1259_v2  ;;  %1262 = vst [vmem:[%s20973_s9 + $0x3048] sm:$0xff] %v1261_v3  ;;  %v1265_v5 = vld [vmem:[%s20977_s10 + $0x9168] sm:$0xff]  ;;  %v1267_v6 = vld [vmem:[%s20977_s10 + $0x91b0] sm:$0xff] }
 0x115   : >> { %1264 = vst [vmem:[%s20973_s9 + $0x3060] sm:$0xff] %v1263_v4  ;;  %1266 = vst [vmem:[%s20973_s9 + $0x3078] sm:$0xff] %v1265_v5  ;;  %v1269_v7 = vld [vmem:[%s20977_s10 + $0x91f8] sm:$0xff]  ;;  %v1271_v8 = vld [vmem:[%s20977_s10 + $0x9240] sm:$0xff] }
 0x116   : >> { %1268 = vst [vmem:[%s20973_s9 + $0x3090] sm:$0xff] %v1267_v6  ;;  %v1273_v9 = vld [vmem:[%s20977_s10 + $0x9288] sm:$0xff]  ;;  %1270 = vst [vmem:[%s20973_s9 + $0x30a8] sm:$0xff] %v1269_v7  ;;  %v1275_v10 = vld [vmem:[%s20977_s10 + $0x92d0] sm:$0xff] }
 0x117   : >> { %1272 = vst [vmem:[%s20973_s9 + $0x30c0] sm:$0xff] %v1271_v8  ;;  %1274 = vst [vmem:[%s20973_s9 + $0x30d8] sm:$0xff] %v1273_v9  ;;  %v1277_v11 = vld [vmem:[%s20977_s10 + $0x9318] sm:$0xff]  ;;  %v1279_v12 = vld [vmem:[%s20977_s10 + $0x9360] sm:$0xff] }
 0x118   : >> { %1276 = vst [vmem:[%s20973_s9 + $0x30f0] sm:$0xff] %v1275_v10  ;;  %1278 = vst [vmem:[%s20973_s9 + $0x3108] sm:$0xff] %v1277_v11  ;;  %v1281_v13 = vld [vmem:[%s20977_s10 + $0x93a8] sm:$0xff]  ;;  %v1283_v14 = vld [vmem:[%s20977_s10 + $0x93f0] sm:$0xff] }
 0x119   : >> { %1280 = vst [vmem:[%s20973_s9 + $0x3120] sm:$0xff] %v1279_v12  ;;  %v1285_v15 = vld [vmem:[%s20977_s10 + $0x9438] sm:$0xff]  ;;  %1282 = vst [vmem:[%s20973_s9 + $0x3138] sm:$0xff] %v1281_v13  ;;  %v1287_v16 = vld [vmem:[%s20977_s10 + $0x9480] sm:$0xff] }
 0x11a   : >> { %1284 = vst [vmem:[%s20973_s9 + $0x3150] sm:$0xff] %v1283_v14  ;;  %1286 = vst [vmem:[%s20973_s9 + $0x3168] sm:$0xff] %v1285_v15  ;;  %v1289_v17 = vld [vmem:[%s20977_s10 + $0x94c8] sm:$0xff]  ;;  %v1291_v18 = vld [vmem:[%s20977_s10 + $0x9510] sm:$0xff] }
 0x11b   : >> { %1288 = vst [vmem:[%s20973_s9 + $0x3180] sm:$0xff] %v1287_v16  ;;  %1290 = vst [vmem:[%s20973_s9 + $0x3198] sm:$0xff] %v1289_v17  ;;  %v1293_v19 = vld [vmem:[%s20977_s10 + $0x9558] sm:$0xff]  ;;  %v1295_v20 = vld [vmem:[%s20977_s10 + $0x95a0] sm:$0xff] }
 0x11c   : >> { %1292 = vst [vmem:[%s20973_s9 + $0x31b0] sm:$0xff] %v1291_v18  ;;  %v1297_v21 = vld [vmem:[%s20977_s10 + $0x95e8] sm:$0xff]  ;;  %1294 = vst [vmem:[%s20973_s9 + $0x31c8] sm:$0xff] %v1293_v19  ;;  %v1299_v22 = vld [vmem:[%s20977_s10 + $0x9630] sm:$0xff]  ;;  %226 = sbr.rel (!%p224_p7) target bundleno = 18 (0x12), region = 131 }
 0x11d   : >> { %1296 = vst [vmem:[%s20973_s9 + $0x31e0] sm:$0xff] %v1295_v20  ;;  %1298 = vst [vmem:[%s20973_s9 + $0x31f8] sm:$0xff] %v1297_v21  ;;  %v1301_v23 = vld [vmem:[%s20977_s10 + $0x9678] sm:$0xff]  ;;  %v1303_v24 = vld [vmem:[%s20977_s10 + $0x96c0] sm:$0xff] }
 0x11e   : >> { %1300 = vst [vmem:[%s20973_s9 + $0x3210] sm:$0xff] %v1299_v22  ;;  %1302 = vst [vmem:[%s20973_s9 + $0x3228] sm:$0xff] %v1301_v23  ;;  %v1305_v25 = vld [vmem:[%s20977_s10 + $0x9708] sm:$0xff]  ;;  %v1307_v26 = vld [vmem:[%s20977_s10 + $0x9750] sm:$0xff] }
 0x11f   : >> { %1304 = vst [vmem:[%s20973_s9 + $0x3240] sm:$0xff] %v1303_v24  ;;  %v1309_v27 = vld [vmem:[%s20977_s10 + $0x9798] sm:$0xff]  ;;  %1306 = vst [vmem:[%s20973_s9 + $0x3258] sm:$0xff] %v1305_v25  ;;  %s24564_s10 = smov %s21408_s15 }
 0x120   : >> { %1308 = vst [vmem:[%s20973_s9 + $0x3270] sm:$0xff] %v1307_v26  ;;  %1310 = vst [vmem:[%s20973_s9 + $0x3288] sm:$0xff] %v1309_v27  ;;  %s24563_s9 = smov %s21412_s16 }
 0x121 PF: > { %p16437_p8 = scmp.ge.s32.totalorder %s20969_s22, 1  ;;  %p3529_p9 = scmp.lt.s32.totalorder %s20969_s22, 4 }
 0x123   : > { %p3530_p10 = pnand %p16437_p8, %p3529_p9 }
 0x124   : > { %s3536_s17 = sand.u32 (!%p3530_p10), 1, %s20953_s18   ;;  %s3586_s24 = smul.u32 (!%p3530_p10), 6, %s20961_s20 }
 0x125   : > { %3533 = sbr.rel (%p3530_p10) target bundleno = 2386 (0x952), region = 73  ;;  %p16439_p13 = scmp.ne.s32.totalorder (!%p3530_p10), %s20961_s20, 0 }
 0x126   : > { %s18219_s25 = smul.u32 (!%p3530_p10), 12960, %s3536_s17  ;;  %p3587_p11 = scmp.lt.s32.totalorder (!%p3530_p10), %s3586_s24, 17 }
 0x127   : > { %s3591_s27 = smul.u32 (!%p3530_p10), 96, %s20961_s20 }
 0x128   : > { %s22206_s10 = scalar_lea.vmem (!%p3530_p10), [#allocation3], %s18219_s25 }
 0x129   : > { %p3592_p12 = scmp.lt.s32.totalorder (!%p3530_p10), %s3591_s27, 287 }
 0x12a   : > { %s24576_s24 = smov (!%p3587_p11, %s3586_s24), 17  ;;  %3607 = sbr.rel (%p16439_p13) target bundleno = 305 (0x131), region = 81 }
 0x12b   : > { %s22199_s29 = scalar_lea.vmem %s24557_s2, %s24576_s24  ;;  %s24578_s27 = smov (!%p3592_p12, %s3591_s27), 287 }
 0x12c   : > { %s16438_s6 = sshll.u32 %s24578_s27, 2 }
 0x12d   : > { %s22204_s9 = scalar_lea.vmem %s24558_s3, %s16438_s6 }
 0x12f   : > { %v16440_v28 = vld [vmem:[%s24559_s4] ss:$0 sm:$0xff] }
 0x130   : > { %3615 = vst [vmem:[#allocation2] sm:$0xff] %v16440_v28  ;;  %3616 = vst [vmem:[#allocation2 + $0x8] sm:$0xff] %v16440_v28 }
 0x131 PF: > { %v18292_v29 = vld [vmem:[%s22206_s10 + $0x154] ss:$24 sps:$4 sm:$0xff]   ;;  %v18296_v31 = vld [vmem:[%s22206_s10 + $0x150] ss:$24 sps:$4 sm:$0xff]   ;;  %v18298_v33 = vld [vmem:[%s22206_s10 + $0x124] ss:$24 sps:$4 sm:$0xff]  }
 0x132   : > { %v18294_v30 = vld [vmem:[%s22206_s10 + $0x454] ss:$24 sps:$4 sm:$0xff]   ;;  %13576 = vmatprep.subr.bf16.mxu0 %v18292_v29  ;;  %v18297_v32 = vld [vmem:[%s22206_s10 + $0x450] ss:$24 sps:$4 sm:$0xff]   ;;  %v18300_v34 = vld [vmem:[%s22206_s10 + $0x424] ss:$24 sps:$4 sm:$0xff]  }
 0x133   : > { %13619 = vmatprep.subr.bf16.mxu1 %v18294_v30  ;;  %13577 = vmatpush1.bf16.msra.mxu0 %v18296_v31  ;;  %v18302_v35 = vld [vmem:[%s22206_s10 + $0x120] ss:$24 sps:$4 sm:$0xff]   ;;  %v18304_v37 = vld [vmem:[%s22206_s10 + $0xf4] ss:$24 sps:$4 sm:$0xff]   ;;  %v18308_v39 = vld [vmem:[%s22206_s10 + $0xf0] ss:$24 sps:$4 sm:$0xff]  }
 0x134   : > { %13620 = vmatpush1.bf16.msra.mxu1 %v18297_v32  ;;  %13578 = vmatprep.subr.bf16.mxu0 %v18298_v33  ;;  %v18303_v36 = vld [vmem:[%s22206_s10 + $0x420] ss:$24 sps:$4 sm:$0xff]   ;;  %v18306_v38 = vld [vmem:[%s22206_s10 + $0x3f4] ss:$24 sps:$4 sm:$0xff]   ;;  %v18309_v40 = vld [vmem:[%s22206_s10 + $0x3f0] ss:$24 sps:$4 sm:$0xff]  }
 0x135   : > { %13621 = vmatprep.subr.bf16.mxu1 %v18300_v34  ;;  %v18310_v41 = vld [vmem:[%s22206_s10 + $0xc4] ss:$24 sps:$4 sm:$0xff]   ;;  %v18314_v43 = vld [vmem:[%s22206_s10 + $0xc0] ss:$24 sps:$4 sm:$0xff]   ;;  %v18316_v45 = vld [vmem:[%s22206_s10 + $0x94] ss:$24 sps:$4 sm:$0xff]  }
 0x136   : > { %v18312_v42 = vld [vmem:[%s22206_s10 + $0x3c4] ss:$24 sps:$4 sm:$0xff]   ;;  %v18315_v44 = vld [vmem:[%s22206_s10 + $0x3c0] ss:$24 sps:$4 sm:$0xff]   ;;  %v18318_v46 = vld [vmem:[%s22206_s10 + $0x394] ss:$24 sps:$4 sm:$0xff]  }
 0x137   : > { %13579 = vmatpush1.bf16.msra.mxu0 %v18302_v35  ;;  %v18320_v47 = vld [vmem:[%s22206_s10 + $0x90] ss:$24 sps:$4 sm:$0xff]   ;;  %v18322_v49 = vld [vmem:[%s22206_s10 + $0x64] ss:$24 sps:$4 sm:$0xff]   ;;  %v18326_v51 = vld [vmem:[%s22206_s10 + $0x60] ss:$24 sps:$4 sm:$0xff]  }
 0x138   : > { %13622 = vmatpush1.bf16.msra.mxu1 %v18303_v36  ;;  %13580 = vmatprep.subr.bf16.mxu0 %v18304_v37  ;;  %v18321_v48 = vld [vmem:[%s22206_s10 + $0x390] ss:$24 sps:$4 sm:$0xff]   ;;  %v18324_v50 = vld [vmem:[%s22206_s10 + $0x364] ss:$24 sps:$4 sm:$0xff]   ;;  %v18327_v52 = vld [vmem:[%s22206_s10 + $0x360] ss:$24 sps:$4 sm:$0xff]  }
 0x139   : > { %13623 = vmatprep.subr.bf16.mxu1 %v18306_v38  ;;  %v18328_v53 = vld [vmem:[%s22206_s10 + $0x34] ss:$24 sps:$4 sm:$0xff]   ;;  %v18332_v55 = vld [vmem:[%s22206_s10 + $0x30] ss:$24 sps:$4 sm:$0xff]   ;;  %v18334_v57 = vld [vmem:[%s22206_s10 + $0x4] ss:$24 sps:$4 sm:$0xff]  }
 0x13a   : > { %v18330_v54 = vld [vmem:[%s22206_s10 + $0x334] ss:$24 sps:$4 sm:$0xff]   ;;  %v18333_v56 = vld [vmem:[%s22206_s10 + $0x330] ss:$24 sps:$4 sm:$0xff]   ;;  %v18336_v58 = vld [vmem:[%s22206_s10 + $0x304] ss:$24 sps:$4 sm:$0xff]  }
 0x13b   : > { %13581 = vmatpush1.bf16.msra.mxu0 %v18308_v39  ;;  %v18338_v59 = vld [vmem:[%s22206_s10] ss:$24 sps:$4 sm:$0xff]   ;;  %v18340_v61 = vld [vmem:[%s22206_s10 + $0x2d4] ss:$24 sps:$4 sm:$0xff]   ;;  %v18344_v63 = vld [vmem:[%s22206_s10 + $0x2d0] ss:$24 sps:$4 sm:$0xff]  }
 0x13c   : > { %13624 = vmatpush1.bf16.msra.mxu1 %v18309_v40  ;;  %13582 = vmatprep.subr.bf16.mxu0 %v18310_v41  ;;  %v18339_v60 = vld [vmem:[%s22206_s10 + $0x300] ss:$24 sps:$4 sm:$0xff]   ;;  %v18342_v62 = vld [vmem:[%s22206_s10 + $0x5d4] ss:$24 sps:$4 sm:$0xff]   ;;  %v18345_v0 = vld [vmem:[%s22206_s10 + $0x5d0] ss:$24 sps:$4 sm:$0xff]  }
 0x13d   : > { %13625 = vmatprep.subr.bf16.mxu1 %v18312_v42  ;;  %v18346_v1 = vld [vmem:[%s22206_s10 + $0x2a4] ss:$24 sps:$4 sm:$0xff]   ;;  %v18350_v3 = vld [vmem:[%s22206_s10 + $0x2a0] ss:$24 sps:$4 sm:$0xff]   ;;  %v18352_v5 = vld [vmem:[%s22206_s10 + $0x274] ss:$24 sps:$4 sm:$0xff]  }
 0x13e   : > { %v18348_v2 = vld [vmem:[%s22206_s10 + $0x5a4] ss:$24 sps:$4 sm:$0xff]   ;;  %v18351_v4 = vld [vmem:[%s22206_s10 + $0x5a0] ss:$24 sps:$4 sm:$0xff]   ;;  %v18354_v6 = vld [vmem:[%s22206_s10 + $0x574] ss:$24 sps:$4 sm:$0xff]  }
 0x13f   : > { %13583 = vmatpush1.bf16.msra.mxu0 %v18314_v43  ;;  %v18356_v7 = vld [vmem:[%s22206_s10 + $0x270] ss:$24 sps:$4 sm:$0xff]   ;;  %v18358_v9 = vld [vmem:[%s22206_s10 + $0x244] ss:$24 sps:$4 sm:$0xff]   ;;  %v18362_v11 = vld [vmem:[%s22206_s10 + $0x240] ss:$24 sps:$4 sm:$0xff]  }
 0x140   : > { %13626 = vmatpush1.bf16.msra.mxu1 %v18315_v44  ;;  %13584 = vmatprep.subr.bf16.mxu0 %v18316_v45  ;;  %v18357_v8 = vld [vmem:[%s22206_s10 + $0x570] ss:$24 sps:$4 sm:$0xff]   ;;  %v18360_v10 = vld [vmem:[%s22206_s10 + $0x544] ss:$24 sps:$4 sm:$0xff]   ;;  %v18363_v12 = vld [vmem:[%s22206_s10 + $0x540] ss:$24 sps:$4 sm:$0xff]  }
 0x141   : > { %13627 = vmatprep.subr.bf16.mxu1 %v18318_v46  ;;  %v18364_v13 = vld [vmem:[%s22206_s10 + $0x214] ss:$24 sps:$4 sm:$0xff]   ;;  %v18391_v15 = vld [vmem:[%s24555_s0 + $0xc] ss:$136 sps:$4 sm:$0xff]   ;;  %v18368_v17 = vld [vmem:[%s22206_s10 + $0x210] ss:$24 sps:$4 sm:$0xff]  }
 0x142   : > { %v18388_v14 = vld [vmem:[%s24555_s0 + $0x4] ss:$136 sps:$4 sm:$0xff]   ;;  %13651 = vmatprep.mubr.bf16.mxu1 %v18391_v15  ;;  %v18369_v18 = vld [vmem:[%s22206_s10 + $0x510] ss:$24 sps:$4 sm:$0xff]   ;;  %v18374_v21 = vld [vmem:[%s22206_s10 + $0x1e0] ss:$24 sps:$4 sm:$0xff]  }
 0x143   : > { %13585 = vmatpush1.bf16.msra.mxu0 %v18320_v47  ;;  %v18366_v16 = vld [vmem:[%s22206_s10 + $0x514] ss:$24 sps:$4 sm:$0xff]   ;;  %13608 = vmatprep.mubr.bf16.mxu0 %v18388_v14  ;;  %v18370_v19 = vld [vmem:[%s22206_s10 + $0x1e4] ss:$24 sps:$4 sm:$0xff]   ;;  %v18375_v22 = vld [vmem:[%s22206_s10 + $0x4e0] ss:$24 sps:$4 sm:$0xff]  }
 0x144   : > { %13628 = vmatpush1.bf16.msra.mxu1 %v18321_v48  ;;  %13586 = vmatprep.subr.bf16.mxu0 %v18322_v49  ;;  %v18372_v20 = vld [vmem:[%s22206_s10 + $0x4e4] ss:$24 sps:$4 sm:$0xff]   ;;  %v18376_v23 = vld [vmem:[%s22206_s10 + $0x1b4] ss:$24 sps:$4 sm:$0xff]   ;;  %v18380_v25 = vld [vmem:[%s22206_s10 + $0x1b0] ss:$24 sps:$4 sm:$0xff]  }
 0x145   : > { %13629 = vmatprep.subr.bf16.mxu1 %v18324_v50  ;;  %v18378_v24 = vld [vmem:[%s22206_s10 + $0x4b4] ss:$24 sps:$4 sm:$0xff]   ;;  %v18381_v26 = vld [vmem:[%s22206_s10 + $0x4b0] ss:$24 sps:$4 sm:$0xff]   ;;  %v18382_v27 = vld [vmem:[%s22206_s10 + $0x184] ss:$24 sps:$4 sm:$0xff]  }
 0x146   : > { %v18384_v28 = vld [vmem:[%s22206_s10 + $0x484] ss:$24 sps:$4 sm:$0xff]   ;;  %v18386_v29 = vld [vmem:[%s22206_s10 + $0x180] ss:$24 sps:$4 sm:$0xff]   ;;  %v18395_v31 = vld [vmem:[%s22206_s10 + $0x754] ss:$24 sps:$4 sm:$0xff]  }
 0x147   : > { %13587 = vmatpush1.bf16.msra.mxu0 %v18326_v51  ;;  %v18387_v30 = vld [vmem:[%s22206_s10 + $0x480] ss:$24 sps:$4 sm:$0xff]   ;;  %v18398_v32 = vld [vmem:[%s22206_s10 + $0xa54] ss:$24 sps:$4 sm:$0xff]   ;;  %v18393_v34 = vld [vmem:[%s22206_s10 + $0x750] ss:$24 sps:$4 sm:$0xff]  }
 0x148   : > { %13630 = vmatpush1.bf16.msra.mxu1 %v18327_v52  ;;  %13588 = vmatprep.subr.bf16.mxu0 %v18328_v53  ;;  %v18390_v33 = vld [vmem:[%s24555_s0] ss:$136 sps:$4 sm:$0xff]   ;;  %v18402_v37 = vld [vmem:[%s22206_s10 + $0x724] ss:$24 sps:$4 sm:$0xff]   ;;  %v18408_v41 = vld [vmem:[%s22206_s10 + $0x6f4] ss:$24 sps:$4 sm:$0xff]  }
 0x149   : > { %13631 = vmatprep.subr.bf16.mxu1 %v18330_v54  ;;  %v18396_v35 = vld [vmem:[%s22206_s10 + $0xa50] ss:$24 sps:$4 sm:$0xff]   ;;  %v18399_v36 = vld [vmem:[%s24555_s0 + $0x8] ss:$136 sps:$4 sm:$0xff]   ;;  %v18405_v38 = vld [vmem:[%s22206_s10 + $0xa24] ss:$24 sps:$4 sm:$0xff]  }
 0x14a   : > { %v18400_v39 = vld [vmem:[%s22206_s10 + $0x720] ss:$24 sps:$4 sm:$0xff]   ;;  %v18411_v42 = vld [vmem:[%s22206_s10 + $0x9f4] ss:$24 sps:$4 sm:$0xff]   ;;  %v18406_v43 = vld [vmem:[%s22206_s10 + $0x6f0] ss:$24 sps:$4 sm:$0xff]  }
 0x14b   : > { %13589 = vmatpush1.bf16.msra.mxu0 %v18332_v55  ;;  %v18403_v40 = vld [vmem:[%s22206_s10 + $0xa20] ss:$24 sps:$4 sm:$0xff]   ;;  %v18409_v44 = vld [vmem:[%s22206_s10 + $0x9f0] ss:$24 sps:$4 sm:$0xff]   ;;  %v18414_v45 = vld [vmem:[%s22206_s10 + $0x6c4] ss:$24 sps:$4 sm:$0xff]  }
 0x14c   : > { %13632 = vmatpush1.bf16.msra.mxu1 %v18333_v56  ;;  %13590 = vmatprep.subr.bf16.mxu0 %v18334_v57  ;;  %v18417_v46 = vld [vmem:[%s22206_s10 + $0x9c4] ss:$24 sps:$4 sm:$0xff]   ;;  %v18412_v47 = vld [vmem:[%s22206_s10 + $0x6c0] ss:$24 sps:$4 sm:$0xff]   ;;  %v18420_v49 = vld [vmem:[%s22206_s10 + $0x694] ss:$24 sps:$4 sm:$0xff]  }
 0x14d   : > { %13633 = vmatprep.subr.bf16.mxu1 %v18336_v58  ;;  %v18415_v48 = vld [vmem:[%s22206_s10 + $0x9c0] ss:$24 sps:$4 sm:$0xff]   ;;  %v18423_v50 = vld [vmem:[%s22206_s10 + $0x994] ss:$24 sps:$4 sm:$0xff]   ;;  %v18418_v51 = vld [vmem:[%s22206_s10 + $0x690] ss:$24 sps:$4 sm:$0xff]  }
 0x14e   : > { %v18421_v52 = vld [vmem:[%s22206_s10 + $0x990] ss:$24 sps:$4 sm:$0xff]   ;;  %v18426_v53 = vld [vmem:[%s22206_s10 + $0x664] ss:$24 sps:$4 sm:$0xff]   ;;  %v18424_v55 = vld [vmem:[%s22206_s10 + $0x660] ss:$24 sps:$4 sm:$0xff]  }
 0x14f   : > { %13591 = vmatpush1.bf16.msra.mxu0 %v18338_v59  ;;  %v18429_v54 = vld [vmem:[%s22206_s10 + $0x964] ss:$24 sps:$4 sm:$0xff]   ;;  %v18427_v56 = vld [vmem:[%s22206_s10 + $0x960] ss:$24 sps:$4 sm:$0xff]   ;;  %v18432_v57 = vld [vmem:[%s22206_s10 + $0x634] ss:$24 sps:$4 sm:$0xff]  }
 0x150   : > { %13634 = vmatpush1.bf16.msra.mxu1 %v18339_v60  ;;  %13592 = vmatprep.subr.bf16.mxu0 %v18340_v61  ;;  %v18435_v58 = vld [vmem:[%s22206_s10 + $0x934] ss:$24 sps:$4 sm:$0xff]   ;;  %v18430_v59 = vld [vmem:[%s22206_s10 + $0x630] ss:$24 sps:$4 sm:$0xff]   ;;  %v18438_v61 = vld [vmem:[%s22206_s10 + $0x604] ss:$24 sps:$4 sm:$0xff]  }
 0x151   : > { %13635 = vmatprep.subr.bf16.mxu1 %v18342_v62  ;;  %v18433_v60 = vld [vmem:[%s22206_s10 + $0x930] ss:$24 sps:$4 sm:$0xff]   ;;  %v18441_v62 = vld [vmem:[%s22206_s10 + $0x904] ss:$24 sps:$4 sm:$0xff]   ;;  %vm13572_vm0 = vcmask 785408   ;;  %p18146_p0 = scmp.ne.s32.totalorder %s20961_s20, 2 }
 0x152   : > { %v18457_v14 = vld [vmem:[%s22206_s10 + $0xb70] ss:$24 sps:$4 sm:$0xff]   ;;  %v18462_v15 = vld [vmem:[%s22206_s10 + $0x844] ss:$24 sps:$4 sm:$0xff]  }
 0x153   : > { %13593 = vmatpush2.bf16.msra.mxu0 %v18344_v63  ;;  %v18492_v63 = vld [vmem:[%s24555_s0 + $0x14] ss:$136 sps:$4 sm:$0xff]  }
 0x154   : > { %13636 = vmatpush2.bf16.msra.mxu1 %v18345_v0  ;;  %13594 = vmatprep.subr.bf16.mxu0 %v18346_v1  ;;  %v18495_v0 = vld [vmem:[%s24555_s0 + $0x1c] ss:$136 sps:$4 sm:$0xff]   ;;  %v18436_v1 = vld [vmem:[%s22206_s10 + $0x600] ss:$24 sps:$4 sm:$0xff]  }
 0x155   : > { %13637 = vmatprep.subr.bf16.mxu1 %v18348_v2  ;;  %v18439_v2 = vld [vmem:[%s22206_s10 + $0x900] ss:$24 sps:$4 sm:$0xff]  }
 0x157   : > { %13595 = vmatpush2.bf16.msra.mxu0 %v18350_v3  ;;  %v18444_v3 = vld [vmem:[%s22206_s10 + $0x8d4] ss:$24 sps:$4 sm:$0xff]  }
 0x158   : > { %13638 = vmatpush2.bf16.msra.mxu1 %v18351_v4  ;;  %13596 = vmatprep.subr.bf16.mxu0 %v18352_v5  ;;  %v18447_v4 = vld [vmem:[%s22206_s10 + $0xbd4] ss:$24 sps:$4 sm:$0xff]   ;;  %v18442_v5 = vld [vmem:[%s22206_s10 + $0x8d0] ss:$24 sps:$4 sm:$0xff]  }
 0x159   : > { %13639 = vmatprep.subr.bf16.mxu1 %v18354_v6  ;;  %v18445_v6 = vld [vmem:[%s22206_s10 + $0xbd0] ss:$24 sps:$4 sm:$0xff]  }
 0x15b   : > { %13597 = vmatpush2.bf16.msra.mxu0 %v18356_v7  ;;  %v18450_v7 = vld [vmem:[%s22206_s10 + $0x8a4] ss:$24 sps:$4 sm:$0xff]  }
 0x15c   : > { %13640 = vmatpush2.bf16.msra.mxu1 %v18357_v8  ;;  %13598 = vmatprep.subr.bf16.mxu0 %v18358_v9  ;;  %v18453_v8 = vld [vmem:[%s22206_s10 + $0xba4] ss:$24 sps:$4 sm:$0xff]   ;;  %v18448_v9 = vld [vmem:[%s22206_s10 + $0x8a0] ss:$24 sps:$4 sm:$0xff]  }
 0x15d   : > { %13641 = vmatprep.subr.bf16.mxu1 %v18360_v10  ;;  %v18451_v10 = vld [vmem:[%s22206_s10 + $0xba0] ss:$24 sps:$4 sm:$0xff]  }
 0x15f   : > { %13599 = vmatpush2.bf16.msra.mxu0 %v18362_v11  ;;  %v18456_v11 = vld [vmem:[%s22206_s10 + $0x874] ss:$24 sps:$4 sm:$0xff]  }
 0x160   : > { %13642 = vmatpush2.bf16.msra.mxu1 %v18363_v12  ;;  %13600 = vmatprep.subr.bf16.mxu0 %v18364_v13  ;;  %v18459_v12 = vld [vmem:[%s22206_s10 + $0xb74] ss:$24 sps:$4 sm:$0xff]   ;;  %v18454_v13 = vld [vmem:[%s22206_s10 + $0x870] ss:$24 sps:$4 sm:$0xff]  }
 0x161   : > { %13643 = vmatprep.subr.bf16.mxu1 %v18366_v16  ;;  %v18465_v16 = vld [vmem:[%s22206_s10 + $0xb44] ss:$24 sps:$4 sm:$0xff]  }
 0x163   : > { %13601 = vmatpush2.bf16.msra.mxu0 %v18368_v17  ;;  %v18460_v17 = vld [vmem:[%s22206_s10 + $0x840] ss:$24 sps:$4 sm:$0xff]  }
 0x164   : > { %13644 = vmatpush2.bf16.msra.mxu1 %v18369_v18  ;;  %13602 = vmatprep.subr.bf16.mxu0 %v18370_v19  ;;  %v18463_v18 = vld [vmem:[%s22206_s10 + $0xb40] ss:$24 sps:$4 sm:$0xff]   ;;  %v18468_v19 = vld [vmem:[%s22206_s10 + $0x814] ss:$24 sps:$4 sm:$0xff]  }
 0x165   : > { %13645 = vmatprep.subr.bf16.mxu1 %v18372_v20  ;;  %v18471_v20 = vld [vmem:[%s22206_s10 + $0xb14] ss:$24 sps:$4 sm:$0xff]  }
 0x167   : > { %13603 = vmatpush2.bf16.msra.mxu0 %v18374_v21  ;;  %v18466_v21 = vld [vmem:[%s22206_s10 + $0x810] ss:$24 sps:$4 sm:$0xff]  }
 0x168   : > { %13646 = vmatpush2.bf16.msra.mxu1 %v18375_v22  ;;  %13604 = vmatprep.subr.bf16.mxu0 %v18376_v23  ;;  %v18469_v22 = vld [vmem:[%s22206_s10 + $0xb10] ss:$24 sps:$4 sm:$0xff]   ;;  %v18474_v23 = vld [vmem:[%s22206_s10 + $0x7e4] ss:$24 sps:$4 sm:$0xff]  }
 0x169   : > { %13647 = vmatprep.subr.bf16.mxu1 %v18378_v24  ;;  %v18477_v24 = vld [vmem:[%s22206_s10 + $0xae4] ss:$24 sps:$4 sm:$0xff]  }
 0x16b   : > { %13605 = vmatpush2.bf16.msra.mxu0 %v18380_v25  ;;  %v18472_v25 = vld [vmem:[%s22206_s10 + $0x7e0] ss:$24 sps:$4 sm:$0xff]  }
 0x16c   : > { %13648 = vmatpush2.bf16.msra.mxu1 %v18381_v26  ;;  %13606 = vmatprep.subr.bf16.mxu0 %v18382_v27  ;;  %v18475_v26 = vld [vmem:[%s22206_s10 + $0xae0] ss:$24 sps:$4 sm:$0xff]   ;;  %v18480_v27 = vld [vmem:[%s22206_s10 + $0x7b4] ss:$24 sps:$4 sm:$0xff]  }
 0x16d   : > { %13649 = vmatprep.subr.bf16.mxu1 %v18384_v28  ;;  %v18483_v28 = vld [vmem:[%s22206_s10 + $0xab4] ss:$24 sps:$4 sm:$0xff]  }
 0x16f   : > { %13607 = vmatpush2.bf16.msra.mxu0 %v18386_v29  ;;  %v18478_v29 = vld [vmem:[%s22206_s10 + $0x7b0] ss:$24 sps:$4 sm:$0xff]  }
 0x170   : > { %13650 = vmatpush2.bf16.msra.mxu1 %v18387_v30  ;;  %13662 = vmatprep.subr.bf16.mxu0 %v18395_v31  ;;  %v18481_v30 = vld [vmem:[%s22206_s10 + $0xab0] ss:$24 sps:$4 sm:$0xff]   ;;  %v18486_v31 = vld [vmem:[%s22206_s10 + $0x784] ss:$24 sps:$4 sm:$0xff]  }
 0x171   : > { %13705 = vmatprep.subr.bf16.mxu1 %v18398_v32  ;;  %v18489_v32 = vld [vmem:[%s22206_s10 + $0xa84] ss:$24 sps:$4 sm:$0xff]  }
 0x172   : > { %13609 = vmatmul.mubr.bf16.vlgmr.msra.gmra.mxu0 %v18390_v33  ;;  %v18484_v33 = vld [vmem:[%s22206_s10 + $0x780] ss:$24 sps:$4 sm:$0xff]  }
 0x173   : > { %13652 = vmatmul.mubr.bf16.vlgmr.msra.gmra.mxu1 %v18399_v36  ;;  %13663 = vmatpush1.bf16.msra.mxu0 %v18393_v34  ;;  %v18487_v34 = vld [vmem:[%s22206_s10 + $0xa80] ss:$24 sps:$4 sm:$0xff]   ;;  %v18501_v36 = vld [vmem:[%s22206_s10 + $0x1054] ss:$24 sps:$4 sm:$0xff]  }
 0x174   : > { %13706 = vmatpush1.bf16.msra.mxu1 %v18396_v35  ;;  %13664 = vmatprep.subr.bf16.mxu0 %v18402_v37  ;;  %v18498_v35 = vld [vmem:[%s22206_s10 + $0xd54] ss:$24 sps:$4 sm:$0xff]   ;;  %v18490_v37 = vld [vmem:[%s24555_s0 + $0x10] ss:$136 sps:$4 sm:$0xff]  }
 0x175   : > { %13707 = vmatprep.subr.bf16.mxu1 %v18405_v38  ;;  %13694 = vmatprep.mubr.bf16.mxu0 %v18492_v63  ;;  %v18493_v38 = vld [vmem:[%s24555_s0 + $0x18] ss:$136 sps:$4 sm:$0xff]   ;;  %v18534_v63 = vld [vmem:[%s22206_s10 + $0xc34] ss:$24 sps:$4 sm:$0xff]  }
 0x176   : > { %13737 = vmatprep.mubr.bf16.mxu1 %v18495_v0  ;;  %v18537_v0 = vld [vmem:[%s22206_s10 + $0xf34] ss:$24 sps:$4 sm:$0xff]  }
 0x177   : > { %13665 = vmatpush1.bf16.msra.mxu0 %v18400_v39  ;;  %v18496_v39 = vld [vmem:[%s22206_s10 + $0xd50] ss:$24 sps:$4 sm:$0xff]  }
 0x178   : > { %13708 = vmatpush1.bf16.msra.mxu1 %v18403_v40  ;;  %13666 = vmatprep.subr.bf16.mxu0 %v18408_v41  ;;  %v18499_v40 = vld [vmem:[%s22206_s10 + $0x1050] ss:$24 sps:$4 sm:$0xff]   ;;  %v18504_v41 = vld [vmem:[%s22206_s10 + $0xd24] ss:$24 sps:$4 sm:$0xff]  }
 0x179   : > { %13709 = vmatprep.subr.bf16.mxu1 %v18411_v42  ;;  %v18507_v42 = vld [vmem:[%s22206_s10 + $0x1024] ss:$24 sps:$4 sm:$0xff]  }
 0x17b   : > { %13667 = vmatpush1.bf16.msra.mxu0 %v18406_v43  ;;  %v18502_v43 = vld [vmem:[%s22206_s10 + $0xd20] ss:$24 sps:$4 sm:$0xff]  }
 0x17c   : > { %13710 = vmatpush1.bf16.msra.mxu1 %v18409_v44  ;;  %13668 = vmatprep.subr.bf16.mxu0 %v18414_v45  ;;  %v18505_v44 = vld [vmem:[%s22206_s10 + $0x1020] ss:$24 sps:$4 sm:$0xff]   ;;  %v18510_v45 = vld [vmem:[%s22206_s10 + $0xcf4] ss:$24 sps:$4 sm:$0xff]  }
 0x17d   : > { %13711 = vmatprep.subr.bf16.mxu1 %v18417_v46  ;;  %v18513_v46 = vld [vmem:[%s22206_s10 + $0xff4] ss:$24 sps:$4 sm:$0xff]  }
 0x17f   : > { %13669 = vmatpush1.bf16.msra.mxu0 %v18412_v47  ;;  %v18508_v47 = vld [vmem:[%s22206_s10 + $0xcf0] ss:$24 sps:$4 sm:$0xff]  }
 0x180   : > { %13712 = vmatpush1.bf16.msra.mxu1 %v18415_v48  ;;  %13670 = vmatprep.subr.bf16.mxu0 %v18420_v49  ;;  %v18594_v48 = vld [vmem:[%s24555_s0 + $0x24] ss:$136 sps:$4 sm:$0xff]   ;;  %v18511_v49 = vld [vmem:[%s22206_s10 + $0xff0] ss:$24 sps:$4 sm:$0xff]  }
 0x181   : > { %13713 = vmatprep.subr.bf16.mxu1 %v18423_v50  ;;  %v18597_v50 = vld [vmem:[%s24555_s0 + $0x2c] ss:$136 sps:$4 sm:$0xff]  }
 0x183   : > { %13671 = vmatpush1.bf16.msra.mxu0 %v18418_v51  ;;  %v18516_v51 = vld [vmem:[%s22206_s10 + $0xcc4] ss:$24 sps:$4 sm:$0xff]  }
 0x184   : > { %13714 = vmatpush1.bf16.msra.mxu1 %v18421_v52  ;;  %13672 = vmatprep.subr.bf16.mxu0 %v18426_v53  ;;  %v18519_v52 = vld [vmem:[%s22206_s10 + $0xfc4] ss:$24 sps:$4 sm:$0xff]   ;;  %v18514_v53 = vld [vmem:[%s22206_s10 + $0xcc0] ss:$24 sps:$4 sm:$0xff]  }
 0x185   : > { %13715 = vmatprep.subr.bf16.mxu1 %v18429_v54  ;;  %v18517_v54 = vld [vmem:[%s22206_s10 + $0xfc0] ss:$24 sps:$4 sm:$0xff]  }
 0x187   : > { %13673 = vmatpush1.bf16.msra.mxu0 %v18424_v55  ;;  %v18522_v55 = vld [vmem:[%s22206_s10 + $0xc94] ss:$24 sps:$4 sm:$0xff]  }
 0x188   : > { %13716 = vmatpush1.bf16.msra.mxu1 %v18427_v56  ;;  %13674 = vmatprep.subr.bf16.mxu0 %v18432_v57  ;;  %v18525_v56 = vld [vmem:[%s22206_s10 + $0xf94] ss:$24 sps:$4 sm:$0xff]   ;;  %v18520_v57 = vld [vmem:[%s22206_s10 + $0xc90] ss:$24 sps:$4 sm:$0xff]  }
 0x189   : > { %13717 = vmatprep.subr.bf16.mxu1 %v18435_v58  ;;  %v18523_v58 = vld [vmem:[%s22206_s10 + $0xf90] ss:$24 sps:$4 sm:$0xff]  }
 0x18b   : > { %13675 = vmatpush1.bf16.msra.mxu0 %v18430_v59  ;;  %v18528_v59 = vld [vmem:[%s22206_s10 + $0xc64] ss:$24 sps:$4 sm:$0xff]  }
 0x18c   : > { %13718 = vmatpush1.bf16.msra.mxu1 %v18433_v60  ;;  %13676 = vmatprep.subr.bf16.mxu0 %v18438_v61  ;;  %v18531_v60 = vld [vmem:[%s22206_s10 + $0xf64] ss:$24 sps:$4 sm:$0xff]   ;;  %v18526_v61 = vld [vmem:[%s22206_s10 + $0xc60] ss:$24 sps:$4 sm:$0xff]  }
 0x18d   : > { %13719 = vmatprep.subr.bf16.mxu1 %v18441_v62  ;;  %v18529_v62 = vld [vmem:[%s22206_s10 + $0xf60] ss:$24 sps:$4 sm:$0xff]  }
 0x18f   : > { %13677 = vmatpush1.bf16.msra.mxu0 %v18436_v1  ;;  %v18532_v1 = vld [vmem:[%s22206_s10 + $0xc30] ss:$24 sps:$4 sm:$0xff]  }
 0x190   : > { %13720 = vmatpush1.bf16.msra.mxu1 %v18439_v2  ;;  %13678 = vmatprep.subr.bf16.mxu0 %v18444_v3  ;;  %v18535_v2 = vld [vmem:[%s22206_s10 + $0xf30] ss:$24 sps:$4 sm:$0xff]   ;;  %v18540_v3 = vld [vmem:[%s22206_s10 + $0xc04] ss:$24 sps:$4 sm:$0xff]  }
 0x191   : > { %13721 = vmatprep.subr.bf16.mxu1 %v18447_v4  ;;  %v18543_v4 = vld [vmem:[%s22206_s10 + $0xf04] ss:$24 sps:$4 sm:$0xff]  }
 0x193   : > { %13679 = vmatpush2.bf16.msra.mxu0 %v18442_v5  ;;  %v18538_v5 = vld [vmem:[%s22206_s10 + $0xc00] ss:$24 sps:$4 sm:$0xff]  }
 0x194   : > { %13722 = vmatpush2.bf16.msra.mxu1 %v18445_v6  ;;  %13680 = vmatprep.subr.bf16.mxu0 %v18450_v7  ;;  %v18541_v6 = vld [vmem:[%s22206_s10 + $0xf00] ss:$24 sps:$4 sm:$0xff]   ;;  %v18546_v7 = vld [vmem:[%s22206_s10 + $0xed4] ss:$24 sps:$4 sm:$0xff]  }
 0x195   : > { %13723 = vmatprep.subr.bf16.mxu1 %v18453_v8  ;;  %v18549_v8 = vld [vmem:[%s22206_s10 + $0x11d4] ss:$24 sps:$4 sm:$0xff]  }
 0x197   : > { %13681 = vmatpush2.bf16.msra.mxu0 %v18448_v9  ;;  %v18544_v9 = vld [vmem:[%s22206_s10 + $0xed0] ss:$24 sps:$4 sm:$0xff]  }
 0x198   : > { %13724 = vmatpush2.bf16.msra.mxu1 %v18451_v10  ;;  %13682 = vmatprep.subr.bf16.mxu0 %v18456_v11  ;;  %v18547_v10 = vld [vmem:[%s22206_s10 + $0x11d0] ss:$24 sps:$4 sm:$0xff]   ;;  %v18552_v11 = vld [vmem:[%s22206_s10 + $0xea4] ss:$24 sps:$4 sm:$0xff]  }
 0x199   : > { %13725 = vmatprep.subr.bf16.mxu1 %v18459_v12  ;;  %v18555_v12 = vld [vmem:[%s22206_s10 + $0x11a4] ss:$24 sps:$4 sm:$0xff]  }
 0x19b   : > { %13683 = vmatpush2.bf16.msra.mxu0 %v18454_v13  ;;  %v18550_v13 = vld [vmem:[%s22206_s10 + $0xea0] ss:$24 sps:$4 sm:$0xff]  }
 0x19c   : > { %13726 = vmatpush2.bf16.msra.mxu1 %v18457_v14  ;;  %13684 = vmatprep.subr.bf16.mxu0 %v18462_v15  ;;  %v18553_v14 = vld [vmem:[%s22206_s10 + $0x11a0] ss:$24 sps:$4 sm:$0xff]   ;;  %v18558_v15 = vld [vmem:[%s22206_s10 + $0xe74] ss:$24 sps:$4 sm:$0xff]  }
 0x19d   : > { %13727 = vmatprep.subr.bf16.mxu1 %v18465_v16  ;;  %v18561_v16 = vld [vmem:[%s22206_s10 + $0x1174] ss:$24 sps:$4 sm:$0xff]  }
 0x19f   : > { %13685 = vmatpush2.bf16.msra.mxu0 %v18460_v17  ;;  %v18556_v17 = vld [vmem:[%s22206_s10 + $0xe70] ss:$24 sps:$4 sm:$0xff]  }
 0x1a0   : > { %13728 = vmatpush2.bf16.msra.mxu1 %v18463_v18  ;;  %13686 = vmatprep.subr.bf16.mxu0 %v18468_v19  ;;  %v18559_v18 = vld [vmem:[%s22206_s10 + $0x1170] ss:$24 sps:$4 sm:$0xff]   ;;  %v18564_v19 = vld [vmem:[%s22206_s10 + $0xe44] ss:$24 sps:$4 sm:$0xff]  }
 0x1a1   : > { %13729 = vmatprep.subr.bf16.mxu1 %v18471_v20  ;;  %v18567_v20 = vld [vmem:[%s22206_s10 + $0x1144] ss:$24 sps:$4 sm:$0xff]  }
 0x1a3   : > { %13687 = vmatpush2.bf16.msra.mxu0 %v18466_v21  ;;  %v18562_v21 = vld [vmem:[%s22206_s10 + $0xe40] ss:$24 sps:$4 sm:$0xff]  }
 0x1a4   : > { %13730 = vmatpush2.bf16.msra.mxu1 %v18469_v22  ;;  %13688 = vmatprep.subr.bf16.mxu0 %v18474_v23  ;;  %v18565_v22 = vld [vmem:[%s22206_s10 + $0x1140] ss:$24 sps:$4 sm:$0xff]   ;;  %v18570_v23 = vld [vmem:[%s22206_s10 + $0xe14] ss:$24 sps:$4 sm:$0xff]  }
 0x1a5   : > { %13731 = vmatprep.subr.bf16.mxu1 %v18477_v24  ;;  %v18573_v24 = vld [vmem:[%s22206_s10 + $0x1114] ss:$24 sps:$4 sm:$0xff]  }
 0x1a7   : > { %13689 = vmatpush2.bf16.msra.mxu0 %v18472_v25  ;;  %v18568_v25 = vld [vmem:[%s22206_s10 + $0xe10] ss:$24 sps:$4 sm:$0xff]  }
 0x1a8   : > { %13732 = vmatpush2.bf16.msra.mxu1 %v18475_v26  ;;  %13690 = vmatprep.subr.bf16.mxu0 %v18480_v27  ;;  %v18571_v26 = vld [vmem:[%s22206_s10 + $0x1110] ss:$24 sps:$4 sm:$0xff]   ;;  %v18576_v27 = vld [vmem:[%s22206_s10 + $0xde4] ss:$24 sps:$4 sm:$0xff]  }
 0x1a9   : > { %13733 = vmatprep.subr.bf16.mxu1 %v18483_v28  ;;  %v18579_v28 = vld [vmem:[%s22206_s10 + $0x10e4] ss:$24 sps:$4 sm:$0xff]  }
 0x1ab   : > { %13691 = vmatpush2.bf16.msra.mxu0 %v18478_v29  ;;  %v18574_v29 = vld [vmem:[%s22206_s10 + $0xde0] ss:$24 sps:$4 sm:$0xff]  }
 0x1ac   : > { %13734 = vmatpush2.bf16.msra.mxu1 %v18481_v30  ;;  %13692 = vmatprep.subr.bf16.mxu0 %v18486_v31  ;;  %v18577_v30 = vld [vmem:[%s22206_s10 + $0x10e0] ss:$24 sps:$4 sm:$0xff]   ;;  %v18582_v31 = vld [vmem:[%s22206_s10 + $0xdb4] ss:$24 sps:$4 sm:$0xff]  }
 0x1ad   : > { %13735 = vmatprep.subr.bf16.mxu1 %v18489_v32  ;;  %v18585_v32 = vld [vmem:[%s22206_s10 + $0x10b4] ss:$24 sps:$4 sm:$0xff]  }
 0x1af   : > { %13693 = vmatpush2.bf16.msra.mxu0 %v18484_v33  ;;  %v18580_v33 = vld [vmem:[%s22206_s10 + $0xdb0] ss:$24 sps:$4 sm:$0xff]  }
 0x1b0   : > { %13736 = vmatpush2.bf16.msra.mxu1 %v18487_v34  ;;  %13748 = vmatprep.subr.bf16.mxu0 %v18498_v35  ;;  %v18583_v34 = vld [vmem:[%s22206_s10 + $0x10b0] ss:$24 sps:$4 sm:$0xff]   ;;  %v18588_v35 = vld [vmem:[%s22206_s10 + $0xd84] ss:$24 sps:$4 sm:$0xff]  }
 0x1b1   : > { %13791 = vmatprep.subr.bf16.mxu1 %v18501_v36  ;;  %v18591_v36 = vld [vmem:[%s22206_s10 + $0x1084] ss:$24 sps:$4 sm:$0xff]  }
 0x1b2   : > { %13695 = vmatmul.mubr.bf16.vlgmr.msra.gmra.mxu0 %v18490_v37  ;;  %v18586_v37 = vld [vmem:[%s22206_s10 + $0xd80] ss:$24 sps:$4 sm:$0xff]  }
 0x1b3   : > { %13738 = vmatmul.mubr.bf16.vlgmr.msra.gmra.mxu1 %v18493_v38  ;;  %13749 = vmatpush1.bf16.msra.mxu0 %v18496_v39  ;;  %v18589_v38 = vld [vmem:[%s22206_s10 + $0x1080] ss:$24 sps:$4 sm:$0xff]   ;;  %v18600_v39 = vld [vmem:[%s22206_s10 + $0x1354] ss:$24 sps:$4 sm:$0xff]  }
 0x1b4   : > { %13792 = vmatpush1.bf16.msra.mxu1 %v18499_v40  ;;  %13750 = vmatprep.subr.bf16.mxu0 %v18504_v41  ;;  %v18603_v40 = vld [vmem:[%s22206_s10 + $0x1654] ss:$24 sps:$4 sm:$0xff]   ;;  %v18592_v41 = vld [vmem:[%s24555_s0 + $0x20] ss:$136 sps:$4 sm:$0xff]  }
 0x1b5   : > { %13793 = vmatprep.subr.bf16.mxu1 %v18507_v42  ;;  %13780 = vmatprep.mubr.bf16.mxu0 %v18594_v48  ;;  %v18595_v42 = vld [vmem:[%s24555_s0 + $0x28] ss:$136 sps:$4 sm:$0xff]   ;;  %v18699_v48 = vld [vmem:[%s24555_s0 + $0x3c] ss:$136 sps:$4 sm:$0xff]  }
 0x1b6   : > { %13823 = vmatprep.mubr.bf16.mxu1 %v18597_v50  ;;  %v18607_v50 = vld [vmem:[%s22206_s10 + $0x1620] ss:$24 sps:$4 sm:$0xff]  }
 0x1b7   : > { %13751 = vmatpush1.bf16.msra.mxu0 %v18502_v43  ;;  %v18598_v43 = vld [vmem:[%s22206_s10 + $0x1350] ss:$24 sps:$4 sm:$0xff]  }
 0x1b8   : > { %13794 = vmatpush1.bf16.msra.mxu1 %v18505_v44  ;;  %13752 = vmatprep.subr.bf16.mxu0 %v18510_v45  ;;  %v18601_v44 = vld [vmem:[%s22206_s10 + $0x1650] ss:$24 sps:$4 sm:$0xff]   ;;  %v18606_v45 = vld [vmem:[%s22206_s10 + $0x1324] ss:$24 sps:$4 sm:$0xff]  }
 0x1b9   : > { %13795 = vmatprep.subr.bf16.mxu1 %v18513_v46  ;;  %v18609_v46 = vld [vmem:[%s22206_s10 + $0x1624] ss:$24 sps:$4 sm:$0xff]  }
 0x1bb   : > { %13753 = vmatpush1.bf16.msra.mxu0 %v18508_v47  ;;  %v18696_v47 = vld [vmem:[%s24555_s0 + $0x34] ss:$136 sps:$4 sm:$0xff]  }
 0x1bc   : > { %13796 = vmatpush1.bf16.msra.mxu1 %v18511_v49  ;;  %13754 = vmatprep.subr.bf16.mxu0 %v18516_v51  ;;  %v18604_v49 = vld [vmem:[%s22206_s10 + $0x1320] ss:$24 sps:$4 sm:$0xff]   ;;  %v18612_v51 = vld [vmem:[%s22206_s10 + $0x12f4] ss:$24 sps:$4 sm:$0xff]  }
 0x1bd   : > { %13797 = vmatprep.subr.bf16.mxu1 %v18519_v52  ;;  %v18615_v52 = vld [vmem:[%s22206_s10 + $0x15f4] ss:$24 sps:$4 sm:$0xff]  }
 0x1bf   : > { %13755 = vmatpush1.bf16.msra.mxu0 %v18514_v53  ;;  %v18610_v53 = vld [vmem:[%s22206_s10 + $0x12f0] ss:$24 sps:$4 sm:$0xff]  }
 0x1c0   : > { %13798 = vmatpush1.bf16.msra.mxu1 %v18517_v54  ;;  %13756 = vmatprep.subr.bf16.mxu0 %v18522_v55  ;;  %v18613_v54 = vld [vmem:[%s22206_s10 + $0x15f0] ss:$24 sps:$4 sm:$0xff]   ;;  %v18618_v55 = vld [vmem:[%s22206_s10 + $0x12c4] ss:$24 sps:$4 sm:$0xff]  }
 0x1c1   : > { %13799 = vmatprep.subr.bf16.mxu1 %v18525_v56  ;;  %v18621_v56 = vld [vmem:[%s22206_s10 + $0x15c4] ss:$24 sps:$4 sm:$0xff]  }
 0x1c3   : > { %13757 = vmatpush1.bf16.msra.mxu0 %v18520_v57  ;;  %v18616_v57 = vld [vmem:[%s22206_s10 + $0x12c0] ss:$24 sps:$4 sm:$0xff]  }
 0x1c4   : > { %13800 = vmatpush1.bf16.msra.mxu1 %v18523_v58  ;;  %13758 = vmatprep.subr.bf16.mxu0 %v18528_v59  ;;  %v18619_v58 = vld [vmem:[%s22206_s10 + $0x15c0] ss:$24 sps:$4 sm:$0xff]   ;;  %v18624_v59 = vld [vmem:[%s22206_s10 + $0x1294] ss:$24 sps:$4 sm:$0xff]  }
 0x1c5   : > { %13801 = vmatprep.subr.bf16.mxu1 %v18531_v60  ;;  %v18627_v60 = vld [vmem:[%s22206_s10 + $0x1594] ss:$24 sps:$4 sm:$0xff]  }
 0x1c7   : > { %13759 = vmatpush1.bf16.msra.mxu0 %v18526_v61  ;;  %v18622_v61 = vld [vmem:[%s22206_s10 + $0x1290] ss:$24 sps:$4 sm:$0xff]  }
 0x1c8   : > { %13802 = vmatpush1.bf16.msra.mxu1 %v18529_v62  ;;  %13760 = vmatprep.subr.bf16.mxu0 %v18534_v63  ;;  %v18625_v62 = vld [vmem:[%s22206_s10 + $0x1590] ss:$24 sps:$4 sm:$0xff]   ;;  %v18630_v63 = vld [vmem:[%s22206_s10 + $0x1264] ss:$24 sps:$4 sm:$0xff]  }
 0x1c9   : > { %13803 = vmatprep.subr.bf16.mxu1 %v18537_v0  ;;  %v18633_v0 = vld [vmem:[%s22206_s10 + $0x1564] ss:$24 sps:$4 sm:$0xff]  }
 0x1cb   : > { %13761 = vmatpush1.bf16.msra.mxu0 %v18532_v1  ;;  %v18628_v1 = vld [vmem:[%s22206_s10 + $0x1260] ss:$24 sps:$4 sm:$0xff]  }
 0x1cc   : > { %13804 = vmatpush1.bf16.msra.mxu1 %v18535_v2  ;;  %13762 = vmatprep.subr.bf16.mxu0 %v18540_v3  ;;  %v18631_v2 = vld [vmem:[%s22206_s10 + $0x1560] ss:$24 sps:$4 sm:$0xff]   ;;  %v18636_v3 = vld [vmem:[%s22206_s10 + $0x1234] ss:$24 sps:$4 sm:$0xff]  }
 0x1cd   : > { %13805 = vmatprep.subr.bf16.mxu1 %v18543_v4  ;;  %v18639_v4 = vld [vmem:[%s22206_s10 + $0x1534] ss:$24 sps:$4 sm:$0xff]  }
 0x1cf   : > { %13763 = vmatpush1.bf16.msra.mxu0 %v18538_v5  ;;  %v18634_v5 = vld [vmem:[%s22206_s10 + $0x1230] ss:$24 sps:$4 sm:$0xff]  }
 0x1d0   : > { %13806 = vmatpush1.bf16.msra.mxu1 %v18541_v6  ;;  %13764 = vmatprep.subr.bf16.mxu0 %v18546_v7  ;;  %v18637_v6 = vld [vmem:[%s22206_s10 + $0x1530] ss:$24 sps:$4 sm:$0xff]   ;;  %v18642_v7 = vld [vmem:[%s22206_s10 + $0x1204] ss:$24 sps:$4 sm:$0xff]  }
 0x1d1   : > { %13807 = vmatprep.subr.bf16.mxu1 %v18549_v8  ;;  %v18645_v8 = vld [vmem:[%s22206_s10 + $0x1504] ss:$24 sps:$4 sm:$0xff]  }
 0x1d3   : > { %13765 = vmatpush2.bf16.msra.mxu0 %v18544_v9  ;;  %v18640_v9 = vld [vmem:[%s22206_s10 + $0x1200] ss:$24 sps:$4 sm:$0xff]  }
 0x1d4   : > { %13808 = vmatpush2.bf16.msra.mxu1 %v18547_v10  ;;  %13766 = vmatprep.subr.bf16.mxu0 %v18552_v11  ;;  %v18643_v10 = vld [vmem:[%s22206_s10 + $0x1500] ss:$24 sps:$4 sm:$0xff]   ;;  %v18648_v11 = vld [vmem:[%s22206_s10 + $0x14d4] ss:$24 sps:$4 sm:$0xff]  }
 0x1d5   : > { %13809 = vmatprep.subr.bf16.mxu1 %v18555_v12  ;;  %v18651_v12 = vld [vmem:[%s22206_s10 + $0x17d4] ss:$24 sps:$4 sm:$0xff]  }
 0x1d7   : > { %13767 = vmatpush2.bf16.msra.mxu0 %v18550_v13  ;;  %v18646_v13 = vld [vmem:[%s22206_s10 + $0x14d0] ss:$24 sps:$4 sm:$0xff]  }
 0x1d8   : > { %13810 = vmatpush2.bf16.msra.mxu1 %v18553_v14  ;;  %13768 = vmatprep.subr.bf16.mxu0 %v18558_v15  ;;  %v18649_v14 = vld [vmem:[%s22206_s10 + $0x17d0] ss:$24 sps:$4 sm:$0xff]   ;;  %v18654_v15 = vld [vmem:[%s22206_s10 + $0x14a4] ss:$24 sps:$4 sm:$0xff]  }
 0x1d9   : > { %13811 = vmatprep.subr.bf16.mxu1 %v18561_v16  ;;  %v18657_v16 = vld [vmem:[%s22206_s10 + $0x17a4] ss:$24 sps:$4 sm:$0xff]  }
 0x1db   : > { %13769 = vmatpush2.bf16.msra.mxu0 %v18556_v17  ;;  %v18652_v17 = vld [vmem:[%s22206_s10 + $0x14a0] ss:$24 sps:$4 sm:$0xff]  }
 0x1dc   : > { %13812 = vmatpush2.bf16.msra.mxu1 %v18559_v18  ;;  %13770 = vmatprep.subr.bf16.mxu0 %v18564_v19  ;;  %v18655_v18 = vld [vmem:[%s22206_s10 + $0x17a0] ss:$24 sps:$4 sm:$0xff]   ;;  %v18660_v19 = vld [vmem:[%s22206_s10 + $0x1474] ss:$24 sps:$4 sm:$0xff]  }
 0x1dd   : > { %13813 = vmatprep.subr.bf16.mxu1 %v18567_v20  ;;  %v18663_v20 = vld [vmem:[%s22206_s10 + $0x1774] ss:$24 sps:$4 sm:$0xff]  }
 0x1df   : > { %13771 = vmatpush2.bf16.msra.mxu0 %v18562_v21  ;;  %v18658_v21 = vld [vmem:[%s22206_s10 + $0x1470] ss:$24 sps:$4 sm:$0xff]  }
 0x1e0   : > { %13814 = vmatpush2.bf16.msra.mxu1 %v18565_v22  ;;  %13772 = vmatprep.subr.bf16.mxu0 %v18570_v23  ;;  %v18661_v22 = vld [vmem:[%s22206_s10 + $0x1770] ss:$24 sps:$4 sm:$0xff]   ;;  %v18666_v23 = vld [vmem:[%s22206_s10 + $0x1444] ss:$24 sps:$4 sm:$0xff]  }
 0x1e1   : > { %13815 = vmatprep.subr.bf16.mxu1 %v18573_v24  ;;  %v18669_v24 = vld [vmem:[%s22206_s10 + $0x1744] ss:$24 sps:$4 sm:$0xff]  }
 0x1e3   : > { %13773 = vmatpush2.bf16.msra.mxu0 %v18568_v25  ;;  %v18664_v25 = vld [vmem:[%s22206_s10 + $0x1440] ss:$24 sps:$4 sm:$0xff]  }
 0x1e4   : > { %13816 = vmatpush2.bf16.msra.mxu1 %v18571_v26  ;;  %13774 = vmatprep.subr.bf16.mxu0 %v18576_v27  ;;  %v18667_v26 = vld [vmem:[%s22206_s10 + $0x1740] ss:$24 sps:$4 sm:$0xff]   ;;  %v18672_v27 = vld [vmem:[%s22206_s10 + $0x1414] ss:$24 sps:$4 sm:$0xff]  }
 0x1e5   : > { %13817 = vmatprep.subr.bf16.mxu1 %v18579_v28  ;;  %v18675_v28 = vld [vmem:[%s22206_s10 + $0x1714] ss:$24 sps:$4 sm:$0xff]  }
 0x1e7   : > { %13775 = vmatpush2.bf16.msra.mxu0 %v18574_v29  ;;  %v18670_v29 = vld [vmem:[%s22206_s10 + $0x1410] ss:$24 sps:$4 sm:$0xff]  }
 0x1e8   : > { %13818 = vmatpush2.bf16.msra.mxu1 %v18577_v30  ;;  %13776 = vmatprep.subr.bf16.mxu0 %v18582_v31  ;;  %v18673_v30 = vld [vmem:[%s22206_s10 + $0x1710] ss:$24 sps:$4 sm:$0xff]   ;;  %v18678_v31 = vld [vmem:[%s22206_s10 + $0x13e4] ss:$24 sps:$4 sm:$0xff]  }
 0x1e9   : > { %13819 = vmatprep.subr.bf16.mxu1 %v18585_v32  ;;  %v18681_v32 = vld [vmem:[%s22206_s10 + $0x16e4] ss:$24 sps:$4 sm:$0xff]  }
 0x1eb   : > { %13777 = vmatpush2.bf16.msra.mxu0 %v18580_v33  ;;  %v18676_v33 = vld [vmem:[%s22206_s10 + $0x13e0] ss:$24 sps:$4 sm:$0xff]  }
 0x1ec   : > { %13820 = vmatpush2.bf16.msra.mxu1 %v18583_v34  ;;  %13778 = vmatprep.subr.bf16.mxu0 %v18588_v35  ;;  %v18679_v34 = vld [vmem:[%s22206_s10 + $0x16e0] ss:$24 sps:$4 sm:$0xff]   ;;  %v5273_v35 = vlaneseq }
 0x1ed   : > { %13821 = vmatprep.subr.bf16.mxu1 %v18591_v36  ;;  %v18684_v36 = vld [vmem:[%s22206_s10 + $0x13b4] ss:$24 sps:$4 sm:$0xff]  }
 0x1ef   : > { %13779 = vmatpush2.bf16.msra.mxu0 %v18586_v37  ;;  %v18687_v37 = vld [vmem:[%s22206_s10 + $0x16b4] ss:$24 sps:$4 sm:$0xff]  }
 0x1f0   : > { %13822 = vmatpush2.bf16.msra.mxu1 %v18589_v38  ;;  %13834 = vmatprep.subr.bf16.mxu0 %v18600_v39  ;;  %v18682_v38 = vld [vmem:[%s22206_s10 + $0x13b0] ss:$24 sps:$4 sm:$0xff]  }
 0x1f1   : > { %13877 = vmatprep.subr.bf16.mxu1 %v18603_v40  ;;  %v18685_v39 = vld [vmem:[%s22206_s10 + $0x16b0] ss:$24 sps:$4 sm:$0xff]   ;;  %v22506_v40 = vshrl.u32 %v5273_v35, 7  ;;  %v18747_v35 = vld [vmem:[%s22206_s10 + $0x1b04] ss:$24 sps:$4 sm:$0xff]  }
 0x1f2   : > { %13781 = vmatmul.mubr.bf16.vlgmr.msra.gmra.mxu0 %v18592_v41  ;;  %v18690_v41 = vld [vmem:[%s22206_s10 + $0x1384] ss:$24 sps:$4 sm:$0xff]  }
 0x1f3   : > { %13824 = vmatmul.mubr.bf16.vlgmr.msra.gmra.mxu1 %v18595_v42  ;;  %13835 = vmatpush1.bf16.msra.mxu0 %v18598_v43  ;;  %v18693_v42 = vld [vmem:[%s22206_s10 + $0x1684] ss:$24 sps:$4 sm:$0xff]   ;;  %v18688_v43 = vld [vmem:[%s22206_s10 + $0x1380] ss:$24 sps:$4 sm:$0xff]  }
 0x1f4   : > { %13878 = vmatpush1.bf16.msra.mxu1 %v18601_v44  ;;  %13836 = vmatprep.subr.bf16.mxu0 %v18606_v45  ;;  %v18691_v44 = vld [vmem:[%s22206_s10 + $0x1680] ss:$24 sps:$4 sm:$0xff]   ;;  %v5271_v45 = vld [vmem:[%s22199_s29] sm:$0x3f] }
 0x1f5   : > { %13879 = vmatprep.subr.bf16.mxu1 %v18609_v46  ;;  %13866 = vmatprep.mubr.bf16.mxu0 %v18696_v47  ;;  %v5275_v46 = vsub.s32 0, %v22506_v40  ;;  %v18702_v47 = vld [vmem:[%s22206_s10 + $0x1954] ss:$24 sps:$4 sm:$0xff]  }
 0x1f6   : > { %13909 = vmatprep.mubr.bf16.mxu1 %v18699_v48  ;;  %v18705_v48 = vld [vmem:[%s22206_s10 + $0x1c54] ss:$24 sps:$4 sm:$0xff]  }
 0x1f7   : > { %13837 = vmatpush1.bf16.msra.mxu0 %v18604_v49  ;;  %v18694_v49 = vld [vmem:[%s24555_s0 + $0x30] ss:$136 sps:$4 sm:$0xff]  }
 0x1f8   : > { %13880 = vmatpush1.bf16.msra.mxu1 %v18607_v50  ;;  %13838 = vmatprep.subr.bf16.mxu0 %v18612_v51  ;;  %v18697_v50 = vld [vmem:[%s24555_s0 + $0x38] ss:$136 sps:$4 sm:$0xff]   ;;  %v5279_v51 = vsub.s32 1, %v22506_v40 }
 0x1f9   : > { %13881 = vmatprep.subr.bf16.mxu1 %v18615_v52  ;;  %v18700_v52 = vld [vmem:[%s22206_s10 + $0x1950] ss:$24 sps:$4 sm:$0xff]  }
 0x1fb   : > { %13839 = vmatpush1.bf16.msra.mxu0 %v18610_v53  ;;  %v5276_v53 = vrot.slane %v5271_v45, %v5275_v46  ;;  %v18757_v46 = vld [vmem:[%s22206_s10 + $0x1da0] ss:$24 sps:$4 sm:$0xff]  }
 0x1fc   : > { %13882 = vmatpush1.bf16.msra.mxu1 %v18613_v54  ;;  %13840 = vmatprep.subr.bf16.mxu0 %v18618_v55  ;;  %v18703_v54 = vld [vmem:[%s22206_s10 + $0x1c50] ss:$24 sps:$4 sm:$0xff]   ;;  %v18708_v55 = vld [vmem:[%s22206_s10 + $0x1924] ss:$24 sps:$4 sm:$0xff]  }
 0x1fd   : > { %13883 = vmatprep.subr.bf16.mxu1 %v18621_v56  ;;  %v18711_v56 = vld [vmem:[%s22206_s10 + $0x1c24] ss:$24 sps:$4 sm:$0xff]  }
 0x1ff   : > { %13841 = vmatpush1.bf16.msra.mxu0 %v18616_v57  ;;  %v5280_v57 = vrot.slane %v5271_v45, %v5279_v51  ;;  %v18754_v45 = vld [vmem:[%s22206_s10 + $0x1aa0] ss:$24 sps:$4 sm:$0xff]   ;;  %v18768_v51 = vld [vmem:[%s22206_s10 + $0x1a44] ss:$24 sps:$4 sm:$0xff]  }
 0x200   : > { %13884 = vmatpush1.bf16.msra.mxu1 %v18619_v58  ;;  %13842 = vmatprep.subr.bf16.mxu0 %v18624_v59  ;;  %v18798_v58 = vld [vmem:[%s24555_s0 + $0x44] ss:$136 sps:$4 sm:$0xff]  }
 0x201   : > { %13885 = vmatprep.subr.bf16.mxu1 %v18627_v60  ;;  %v18801_v59 = vld [vmem:[%s24555_s0 + $0x4c] ss:$136 sps:$4 sm:$0xff]  }
 0x203   : > { %13843 = vmatpush1.bf16.msra.mxu0 %v18622_v61 }
 0x204   : > { %13886 = vmatpush1.bf16.msra.mxu1 %v18625_v62  ;;  %13844 = vmatprep.subr.bf16.mxu0 %v18630_v63  ;;  %v18706_v62 = vld [vmem:[%s22206_s10 + $0x1920] ss:$24 sps:$4 sm:$0xff]  }
 0x205   : > { %13887 = vmatprep.subr.bf16.mxu1 %v18633_v0  ;;  %v18709_v0 = vld [vmem:[%s22206_s10 + $0x1c20] ss:$24 sps:$4 sm:$0xff]  }
 0x207   : > { %13845 = vmatpush1.bf16.msra.mxu0 %v18628_v1 }
 0x208   : > { %13888 = vmatpush1.bf16.msra.mxu1 %v18631_v2  ;;  %13846 = vmatprep.subr.bf16.mxu0 %v18636_v3  ;;  %v18714_v3 = vld [vmem:[%s22206_s10 + $0x18f4] ss:$24 sps:$4 sm:$0xff]  }
 0x209   : > { %13889 = vmatprep.subr.bf16.mxu1 %v18639_v4  ;;  %v18717_v4 = vld [vmem:[%s22206_s10 + $0x1bf4] ss:$24 sps:$4 sm:$0xff]  }
 0x20b   : > { %13847 = vmatpush1.bf16.msra.mxu0 %v18634_v5 }
 0x20c   : > { %13890 = vmatpush1.bf16.msra.mxu1 %v18637_v6  ;;  %13848 = vmatprep.subr.bf16.mxu0 %v18642_v7 }
 0x20d   : > { %13891 = vmatprep.subr.bf16.mxu1 %v18645_v8 }
 0x20f   : > { %13849 = vmatpush1.bf16.msra.mxu0 %v18640_v9  ;;  %v18712_v9 = vld [vmem:[%s22206_s10 + $0x18f0] ss:$24 sps:$4 sm:$0xff]  }
 0x210   : > { %13892 = vmatpush1.bf16.msra.mxu1 %v18643_v10  ;;  %13850 = vmatprep.subr.bf16.mxu0 %v18648_v11 }
 0x211   : > { %13893 = vmatprep.subr.bf16.mxu1 %v18651_v12  ;;  %v18715_v12 = vld [vmem:[%s22206_s10 + $0x1bf0] ss:$24 sps:$4 sm:$0xff]  }
 0x213   : > { %13851 = vmatpush2.bf16.msra.mxu0 %v18646_v13 }
 0x214   : > { %13894 = vmatpush2.bf16.msra.mxu1 %v18649_v14  ;;  %13852 = vmatprep.subr.bf16.mxu0 %v18654_v15  ;;  %v18720_v15 = vld [vmem:[%s22206_s10 + $0x18c4] ss:$24 sps:$4 sm:$0xff]  }
 0x215   : > { %13895 = vmatprep.subr.bf16.mxu1 %v18657_v16  ;;  %v18723_v16 = vld [vmem:[%s22206_s10 + $0x1bc4] ss:$24 sps:$4 sm:$0xff]  }
 0x217   : > { %13853 = vmatpush2.bf16.msra.mxu0 %v18652_v17 }
 0x218   : > { %13896 = vmatpush2.bf16.msra.mxu1 %v18655_v18  ;;  %13854 = vmatprep.subr.bf16.mxu0 %v18660_v19  ;;  %v18718_v19 = vld [vmem:[%s22206_s10 + $0x18c0] ss:$24 sps:$4 sm:$0xff]  }
 0x219   : > { %13897 = vmatprep.subr.bf16.mxu1 %v18663_v20 }
 0x21b   : > { %13855 = vmatpush2.bf16.msra.mxu0 %v18658_v21  ;;  %v18721_v21 = vld [vmem:[%s22206_s10 + $0x1bc0] ss:$24 sps:$4 sm:$0xff]  }
 0x21c   : > { %13898 = vmatpush2.bf16.msra.mxu1 %v18661_v22  ;;  %13856 = vmatprep.subr.bf16.mxu0 %v18666_v23  ;;  %v18726_v22 = vld [vmem:[%s22206_s10 + $0x1894] ss:$24 sps:$4 sm:$0xff]  }
 0x21d   : > { %13899 = vmatprep.subr.bf16.mxu1 %v18669_v24  ;;  %v18729_v23 = vld [vmem:[%s22206_s10 + $0x1b94] ss:$24 sps:$4 sm:$0xff]   ;;  %v18724_v24 = vld [vmem:[%s22206_s10 + $0x1890] ss:$24 sps:$4 sm:$0xff]  }
 0x21f   : > { %13857 = vmatpush2.bf16.msra.mxu0 %v18664_v25  ;;  %v18727_v25 = vld [vmem:[%s22206_s10 + $0x1b90] ss:$24 sps:$4 sm:$0xff]  }
 0x220   : > { %13900 = vmatpush2.bf16.msra.mxu1 %v18667_v26  ;;  %13858 = vmatprep.subr.bf16.mxu0 %v18672_v27  ;;  %v18732_v26 = vld [vmem:[%s22206_s10 + $0x1864] ss:$24 sps:$4 sm:$0xff]  }
 0x221   : > { %13901 = vmatprep.subr.bf16.mxu1 %v18675_v28  ;;  %v18735_v27 = vld [vmem:[%s22206_s10 + $0x1b64] ss:$24 sps:$4 sm:$0xff]   ;;  %v18730_v28 = vld [vmem:[%s22206_s10 + $0x1860] ss:$24 sps:$4 sm:$0xff]  }
 0x223   : > { %13859 = vmatpush2.bf16.msra.mxu0 %v18670_v29  ;;  %v18733_v29 = vld [vmem:[%s22206_s10 + $0x1b60] ss:$24 sps:$4 sm:$0xff]  }
 0x224   : > { %13902 = vmatpush2.bf16.msra.mxu1 %v18673_v30  ;;  %13860 = vmatprep.subr.bf16.mxu0 %v18678_v31  ;;  %v18738_v30 = vld [vmem:[%s22206_s10 + $0x1834] ss:$24 sps:$4 sm:$0xff]  }
 0x225   : > { %13903 = vmatprep.subr.bf16.mxu1 %v18681_v32  ;;  %v18741_v31 = vld [vmem:[%s22206_s10 + $0x1b34] ss:$24 sps:$4 sm:$0xff]   ;;  %v18736_v32 = vld [vmem:[%s22206_s10 + $0x1830] ss:$24 sps:$4 sm:$0xff]  }
 0x227   : > { %13861 = vmatpush2.bf16.msra.mxu0 %v18676_v33  ;;  %v18739_v33 = vld [vmem:[%s22206_s10 + $0x1b30] ss:$24 sps:$4 sm:$0xff]  }
 0x228   : > { %13904 = vmatpush2.bf16.msra.mxu1 %v18679_v34  ;;  %13862 = vmatprep.subr.bf16.mxu0 %v18684_v36  ;;  %v18744_v34 = vld [vmem:[%s22206_s10 + $0x1804] ss:$24 sps:$4 sm:$0xff]   ;;  %v18742_v36 = vld [vmem:[%s22206_s10 + $0x1800] ss:$24 sps:$4 sm:$0xff]  }
 0x229   : > { %13905 = vmatprep.subr.bf16.mxu1 %v18687_v37  ;;  %v18745_v37 = vld [vmem:[%s22206_s10 + $0x1b00] ss:$24 sps:$4 sm:$0xff]  }
 0x22b   : > { %13863 = vmatpush2.bf16.msra.mxu0 %v18682_v38  ;;  %v18750_v38 = vld [vmem:[%s22206_s10 + $0x1ad4] ss:$24 sps:$4 sm:$0xff]  }
 0x22c   : > { %13906 = vmatpush2.bf16.msra.mxu1 %v18685_v39  ;;  %13864 = vmatprep.subr.bf16.mxu0 %v18690_v41  ;;  %v18753_v39 = vld [vmem:[%s22206_s10 + $0x1dd4] ss:$24 sps:$4 sm:$0xff]   ;;  %v18748_v41 = vld [vmem:[%s22206_s10 + $0x1ad0] ss:$24 sps:$4 sm:$0xff]  }
 0x22d   : > { %13907 = vmatprep.subr.bf16.mxu1 %v18693_v42  ;;  %v18751_v42 = vld [vmem:[%s22206_s10 + $0x1dd0] ss:$24 sps:$4 sm:$0xff]  }
 0x22f   : > { %13865 = vmatpush2.bf16.msra.mxu0 %v18688_v43  ;;  %v18756_v43 = vld [vmem:[%s22206_s10 + $0x1aa4] ss:$24 sps:$4 sm:$0xff]  }
 0x230   : > { %13908 = vmatpush2.bf16.msra.mxu1 %v18691_v44  ;;  %13920 = vmatprep.subr.bf16.mxu0 %v18702_v47  ;;  %v18759_v44 = vld [vmem:[%s22206_s10 + $0x1da4] ss:$24 sps:$4 sm:$0xff]   ;;  %v18762_v47 = vld [vmem:[%s22206_s10 + $0x1a74] ss:$24 sps:$4 sm:$0xff]  }
 0x231   : > { %13963 = vmatprep.subr.bf16.mxu1 %v18705_v48  ;;  %v18765_v48 = vld [vmem:[%s22206_s10 + $0x1d74] ss:$24 sps:$4 sm:$0xff]  }
 0x232   : > { %v13610_v60 = vpop.f32.mrf.mxu0  ;;  %13867 = vmatmul.mubr.bf16.vlgmr.msra.gmra.mxu0 %v18694_v49  ;;  %v18760_v49 = vld [vmem:[%s22206_s10 + $0x1a70] ss:$24 sps:$4 sm:$0xff]  }
 0x233   : > { %13910 = vmatmul.mubr.bf16.vlgmr.msra.gmra.mxu1 %v18697_v50  ;;  %v13653_v61 = vpop.f32.mrf.mxu1  ;;  %v13611_v63 = vadd.f32 %v13610_v60, %v5276_v53  ;;  %13921 = vmatpush1.bf16.msra.mxu0 %v18700_v52  ;;  %v18763_v50 = vld [vmem:[%s22206_s10 + $0x1d70] ss:$24 sps:$4 sm:$0xff]   ;;  %v18771_v52 = vld [vmem:[%s22206_s10 + $0x1d44] ss:$24 sps:$4 sm:$0xff]  }
 0x234   : > { %13964 = vmatpush1.bf16.msra.mxu1 %v18703_v54  ;;  %v13612_v1 = vpop.f32.mrf.mxu0  ;;  %13922 = vmatprep.subr.bf16.mxu0 %v18708_v55  ;;  %v18769_v54 = vld [vmem:[%s22206_s10 + $0x1d40] ss:$24 sps:$4 sm:$0xff]   ;;  %v18774_v55 = vld [vmem:[%s22206_s10 + $0x1a14] ss:$24 sps:$4 sm:$0xff]   ;;  %v18783_v60 = vld [vmem:[%s22206_s10 + $0x1ce4] ss:$24 sps:$4 sm:$0xff]  }
 0x235   : > { %v13655_v2 = vpop.f32.mrf.mxu1  ;;  %13965 = vmatprep.subr.bf16.mxu1 %v18711_v56  ;;  %v13613_v5 = vadd.f32 %v13612_v1, %v5280_v57  ;;  %v22537_v6 = vadd.f32 %v13653_v61, %v13611_v63  ;;  %13952 = vmatprep.mubr.bf16.mxu0 %v18798_v58  ;;  %v18777_v56 = vld [vmem:[%s22206_s10 + $0x1d14] ss:$24 sps:$4 sm:$0xff]   ;;  %v18775_v58 = vld [vmem:[%s22206_s10 + $0x1d10] ss:$24 sps:$4 sm:$0xff]   ;;  %v18778_v61 = vld [vmem:[%s22206_s10 + $0x19e0] ss:$24 sps:$4 sm:$0xff]  }
 0x236   : > { %13995 = vmatprep.mubr.bf16.mxu1 %v18801_v59  ;;  %v13614_v7 = vpop.f32.mrf.mxu0  ;;  %v18780_v59 = vld [vmem:[%s22206_s10 + $0x19e4] ss:$24 sps:$4 sm:$0xff]   ;;  %v18786_v63 = vld [vmem:[%s22206_s10 + $0x19b4] ss:$24 sps:$4 sm:$0xff]   ;;  %v18784_v1 = vld [vmem:[%s22206_s10 + $0x19b0] ss:$24 sps:$4 sm:$0xff]  }
 0x237   : > { %v13657_v8 = vpop.f32.mrf.mxu1  ;;  %v13615_v10 = vadd.f32 %v13614_v7, %v5276_v53  ;;  %v22540_v11 = vadd.f32 %v13655_v2, %v13613_v5  ;;  %13923 = vmatpush1.bf16.msra.mxu0 %v18706_v62  ;;  %v18766_v53 = vld [vmem:[%s22206_s10 + $0x1a40] ss:$24 sps:$4 sm:$0xff]   ;;  %v18787_v2 = vld [vmem:[%s22206_s10 + $0x1cb0] ss:$24 sps:$4 sm:$0xff]  }
 0x238   : > { %13966 = vmatpush1.bf16.msra.mxu1 %v18709_v0  ;;  %v13616_v13 = vpop.f32.mrf.mxu0  ;;  %13924 = vmatprep.subr.bf16.mxu0 %v18714_v3  ;;  %v18781_v62 = vld [vmem:[%s22206_s10 + $0x1ce0] ss:$24 sps:$4 sm:$0xff]   ;;  %v18789_v0 = vld [vmem:[%s22206_s10 + $0x1cb4] ss:$24 sps:$4 sm:$0xff]   ;;  %v18792_v3 = vld [vmem:[%s22206_s10 + $0x1984] ss:$24 sps:$4 sm:$0xff]  }
 0x239   : > { %v13659_v14 = vpop.f32.mrf.mxu1  ;;  %13967 = vmatprep.subr.bf16.mxu1 %v18717_v4  ;;  %v13617_v17 = vadd.f32 %v13616_v13, %v5280_v57  ;;  %v22545_v18 = vadd.f32 %v13657_v8, %v13615_v10  ;;  %v18772_v57 = vld [vmem:[%s22206_s10 + $0x1a10] ss:$24 sps:$4 sm:$0xff]   ;;  %v18795_v4 = vld [vmem:[%s22206_s10 + $0x1c84] ss:$24 sps:$4 sm:$0xff]   ;;  %v18790_v5 = vld [vmem:[%s22206_s10 + $0x1980] ss:$24 sps:$4 sm:$0xff]  }
 0x23a   : > { %v18793_v7 = vld [vmem:[%s22206_s10 + $0x1c80] ss:$24 sps:$4 sm:$0xff]   ;;  %v18804_v10 = vld [vmem:[%s22206_s10 + $0x1f54] ss:$24 sps:$4 sm:$0xff]   ;;  %v18802_v13 = vld [vmem:[%s22206_s10 + $0x1f50] ss:$24 sps:$4 sm:$0xff]  }
 0x23b   : > { %v22548_v20 = vadd.f32 %v13659_v14, %v13617_v17  ;;  %13925 = vmatpush1.bf16.msra.mxu0 %v18712_v9  ;;  %v18796_v8 = vld [vmem:[%s24555_s0 + $0x40] ss:$136 sps:$4 sm:$0xff]  }
 0x23c   : > { %13968 = vmatpush1.bf16.msra.mxu1 %v18715_v12  ;;  %13926 = vmatprep.subr.bf16.mxu0 %v18720_v15  ;;  %v18799_v9 = vld [vmem:[%s24555_s0 + $0x48] ss:$136 sps:$4 sm:$0xff]   ;;  %v18807_v12 = vld [vmem:[%s22206_s10 + $0x2254] ss:$24 sps:$4 sm:$0xff]   ;;  %v18805_v14 = vld [vmem:[%s22206_s10 + $0x2250] ss:$24 sps:$4 sm:$0xff]  }
 0x23d   : > { %13969 = vmatprep.subr.bf16.mxu1 %v18723_v16  ;;  %v18810_v15 = vld [vmem:[%s22206_s10 + $0x1f24] ss:$24 sps:$4 sm:$0xff]   ;;  %v18808_v17 = vld [vmem:[%s22206_s10 + $0x1f20] ss:$24 sps:$4 sm:$0xff]  }
 0x23e   : > { %v18813_v16 = vld [vmem:[%s22206_s10 + $0x2224] ss:$24 sps:$4 sm:$0xff]  }
 0x23f   : > { %13927 = vmatpush1.bf16.msra.mxu0 %v18718_v19  ;;  %v18811_v19 = vld [vmem:[%s22206_s10 + $0x2220] ss:$24 sps:$4 sm:$0xff]  }
 0x240   : > { %13970 = vmatpush1.bf16.msra.mxu1 %v18721_v21  ;;  %13928 = vmatprep.subr.bf16.mxu0 %v18726_v22  ;;  %v18900_v21 = vld [vmem:[%s24555_s0 + $0x54] ss:$136 sps:$4 sm:$0xff]  }
 0x241   : > { %13971 = vmatprep.subr.bf16.mxu1 %v18729_v23  ;;  %v18903_v22 = vld [vmem:[%s24555_s0 + $0x5c] ss:$136 sps:$4 sm:$0xff]  }
 0x243   : > { %13929 = vmatpush1.bf16.msra.mxu0 %v18724_v24 }
 0x244   : > { %13972 = vmatpush1.bf16.msra.mxu1 %v18727_v25  ;;  %13930 = vmatprep.subr.bf16.mxu0 %v18732_v26 }
 0x245   : > { %13973 = vmatprep.subr.bf16.mxu1 %v18735_v27 }
 0x247   : > { %13931 = vmatpush1.bf16.msra.mxu0 %v18730_v28  ;;  %v18816_v28 = vld [vmem:[%s22206_s10 + $0x1ef4] ss:$24 sps:$4 sm:$0xff]  }
 0x248   : > { %13974 = vmatpush1.bf16.msra.mxu1 %v18733_v29  ;;  %13932 = vmatprep.subr.bf16.mxu0 %v18738_v30  ;;  %v18819_v29 = vld [vmem:[%s22206_s10 + $0x21f4] ss:$24 sps:$4 sm:$0xff]  }
 0x249   : > { %13975 = vmatprep.subr.bf16.mxu1 %v18741_v31 }
 0x24b   : > { %13933 = vmatpush1.bf16.msra.mxu0 %v18736_v32  ;;  %v18814_v32 = vld [vmem:[%s22206_s10 + $0x1ef0] ss:$24 sps:$4 sm:$0xff]  }
 0x24c   : > { %13976 = vmatpush1.bf16.msra.mxu1 %v18739_v33  ;;  %13934 = vmatprep.subr.bf16.mxu0 %v18744_v34  ;;  %v18817_v33 = vld [vmem:[%s22206_s10 + $0x21f0] ss:$24 sps:$4 sm:$0xff]  }
 0x24d   : > { %13977 = vmatprep.subr.bf16.mxu1 %v18747_v35 }
 0x24f   : > { %13935 = vmatpush1.bf16.msra.mxu0 %v18742_v36 }
 0x250   : > { %13978 = vmatpush1.bf16.msra.mxu1 %v18745_v37  ;;  %13936 = vmatprep.subr.bf16.mxu0 %v18750_v38  ;;  %v18825_v37 = vld [vmem:[%s22206_s10 + $0x21c4] ss:$24 sps:$4 sm:$0xff]  }
 0x251   : > { %13979 = vmatprep.subr.bf16.mxu1 %v18753_v39  ;;  %v18820_v39 = vld [vmem:[%s22206_s10 + $0x1ec0] ss:$24 sps:$4 sm:$0xff]  }
 0x253   : > { %13937 = vmatpush2.bf16.msra.mxu0 %v18748_v41  ;;  %v18828_v41 = vld [vmem:[%s22206_s10 + $0x1e94] ss:$24 sps:$4 sm:$0xff]  }
 0x254   : > { %13980 = vmatpush2.bf16.msra.mxu1 %v18751_v42  ;;  %13938 = vmatprep.subr.bf16.mxu0 %v18756_v43  ;;  %v18831_v42 = vld [vmem:[%s22206_s10 + $0x2194] ss:$24 sps:$4 sm:$0xff]   ;;  %v18826_v43 = vld [vmem:[%s22206_s10 + $0x1e90] ss:$24 sps:$4 sm:$0xff]  }
 0x255   : > { %13981 = vmatprep.subr.bf16.mxu1 %v18759_v44  ;;  %v18829_v44 = vld [vmem:[%s22206_s10 + $0x2190] ss:$24 sps:$4 sm:$0xff]  }
 0x257   : > { %13939 = vmatpush2.bf16.msra.mxu0 %v18754_v45  ;;  %v18834_v45 = vld [vmem:[%s22206_s10 + $0x1e64] ss:$24 sps:$4 sm:$0xff]  }
 0x258   : > { %13982 = vmatpush2.bf16.msra.mxu1 %v18757_v46  ;;  %13940 = vmatprep.subr.bf16.mxu0 %v18762_v47  ;;  %v18837_v46 = vld [vmem:[%s22206_s10 + $0x2164] ss:$24 sps:$4 sm:$0xff]   ;;  %v18832_v47 = vld [vmem:[%s22206_s10 + $0x1e60] ss:$24 sps:$4 sm:$0xff]  }
 0x259   : > { %13983 = vmatprep.subr.bf16.mxu1 %v18765_v48  ;;  %v18835_v48 = vld [vmem:[%s22206_s10 + $0x2160] ss:$24 sps:$4 sm:$0xff]  }
 0x25b   : > { %13941 = vmatpush2.bf16.msra.mxu0 %v18760_v49  ;;  %v18840_v49 = vld [vmem:[%s22206_s10 + $0x1e34] ss:$24 sps:$4 sm:$0xff]  }
 0x25c   : > { %13984 = vmatpush2.bf16.msra.mxu1 %v18763_v50  ;;  %13942 = vmatprep.subr.bf16.mxu0 %v18768_v51  ;;  %v18843_v50 = vld [vmem:[%s22206_s10 + $0x2134] ss:$24 sps:$4 sm:$0xff]   ;;  %v18838_v51 = vld [vmem:[%s22206_s10 + $0x1e30] ss:$24 sps:$4 sm:$0xff]  }
 0x25d   : > { %13985 = vmatprep.subr.bf16.mxu1 %v18771_v52  ;;  %v18841_v52 = vld [vmem:[%s22206_s10 + $0x2130] ss:$24 sps:$4 sm:$0xff]  }
 0x25f   : > { %13943 = vmatpush2.bf16.msra.mxu0 %v18766_v53  ;;  %v18846_v53 = vld [vmem:[%s22206_s10 + $0x1e04] ss:$24 sps:$4 sm:$0xff]  }
 0x260   : > { %13986 = vmatpush2.bf16.msra.mxu1 %v18769_v54  ;;  %13944 = vmatprep.subr.bf16.mxu0 %v18774_v55  ;;  %v18849_v54 = vld [vmem:[%s22206_s10 + $0x2104] ss:$24 sps:$4 sm:$0xff]   ;;  %v18844_v55 = vld [vmem:[%s22206_s10 + $0x1e00] ss:$24 sps:$4 sm:$0xff]  }
 0x261   : > { %13987 = vmatprep.subr.bf16.mxu1 %v18777_v56  ;;  %v18847_v56 = vld [vmem:[%s22206_s10 + $0x2100] ss:$24 sps:$4 sm:$0xff]  }
 0x263   : > { %13945 = vmatpush2.bf16.msra.mxu0 %v18772_v57  ;;  %v18852_v57 = vld [vmem:[%s22206_s10 + $0x20d4] ss:$24 sps:$4 sm:$0xff]  }
 0x264   : > { %13988 = vmatpush2.bf16.msra.mxu1 %v18775_v58  ;;  %13946 = vmatprep.subr.bf16.mxu0 %v18780_v59  ;;  %v18855_v58 = vld [vmem:[%s22206_s10 + $0x23d4] ss:$24 sps:$4 sm:$0xff]   ;;  %v18850_v59 = vld [vmem:[%s22206_s10 + $0x20d0] ss:$24 sps:$4 sm:$0xff]  }
 0x265   : > { %13989 = vmatprep.subr.bf16.mxu1 %v18783_v60  ;;  %v18853_v60 = vld [vmem:[%s22206_s10 + $0x23d0] ss:$24 sps:$4 sm:$0xff]  }
 0x267   : > { %13947 = vmatpush2.bf16.msra.mxu0 %v18778_v61  ;;  %v18858_v61 = vld [vmem:[%s22206_s10 + $0x20a4] ss:$24 sps:$4 sm:$0xff]  }
 0x268   : > { %13990 = vmatpush2.bf16.msra.mxu1 %v18781_v62  ;;  %13948 = vmatprep.subr.bf16.mxu0 %v18786_v63  ;;  %v18861_v62 = vld [vmem:[%s22206_s10 + $0x23a4] ss:$24 sps:$4 sm:$0xff]   ;;  %v18856_v63 = vld [vmem:[%s22206_s10 + $0x20a0] ss:$24 sps:$4 sm:$0xff]  }
 0x269   : > { %13991 = vmatprep.subr.bf16.mxu1 %v18789_v0  ;;  %v18859_v0 = vld [vmem:[%s22206_s10 + $0x23a0] ss:$24 sps:$4 sm:$0xff]  }
 0x26b   : > { %13949 = vmatpush2.bf16.msra.mxu0 %v18784_v1  ;;  %v18864_v1 = vld [vmem:[%s22206_s10 + $0x2074] ss:$24 sps:$4 sm:$0xff]  }
 0x26c   : > { %13992 = vmatpush2.bf16.msra.mxu1 %v18787_v2  ;;  %13950 = vmatprep.subr.bf16.mxu0 %v18792_v3  ;;  %v18867_v2 = vld [vmem:[%s22206_s10 + $0x2374] ss:$24 sps:$4 sm:$0xff]   ;;  %v18862_v3 = vld [vmem:[%s22206_s10 + $0x2070] ss:$24 sps:$4 sm:$0xff]  }
 0x26d   : > { %13993 = vmatprep.subr.bf16.mxu1 %v18795_v4  ;;  %v18865_v4 = vld [vmem:[%s22206_s10 + $0x2370] ss:$24 sps:$4 sm:$0xff]  }
 0x26f   : > { %13951 = vmatpush2.bf16.msra.mxu0 %v18790_v5  ;;  %v18870_v5 = vld [vmem:[%s22206_s10 + $0x2044] ss:$24 sps:$4 sm:$0xff]  }
 0x270   : > { %13994 = vmatpush2.bf16.msra.mxu1 %v18793_v7  ;;  %14006 = vmatprep.subr.bf16.mxu0 %v18804_v10  ;;  %v18873_v7 = vld [vmem:[%s22206_s10 + $0x2344] ss:$24 sps:$4 sm:$0xff]   ;;  %v18876_v10 = vld [vmem:[%s22206_s10 + $0x2014] ss:$24 sps:$4 sm:$0xff]  }
 0x271   : > { %14049 = vmatprep.subr.bf16.mxu1 %v18807_v12  ;;  %v18879_v12 = vld [vmem:[%s22206_s10 + $0x2314] ss:$24 sps:$4 sm:$0xff]  }
 0x272   : > { %v13696_v23 = vpop.f32.mrf.mxu0  ;;  %13953 = vmatmul.mubr.bf16.vlgmr.msra.gmra.mxu0 %v18796_v8  ;;  %v18868_v8 = vld [vmem:[%s22206_s10 + $0x2040] ss:$24 sps:$4 sm:$0xff]  }
 0x273   : > { %13996 = vmatmul.mubr.bf16.vlgmr.msra.gmra.mxu1 %v18799_v9  ;;  %v13739_v24 = vpop.f32.mrf.mxu1  ;;  %v13697_v25 = vadd.f32 %v13696_v23, %v22537_v6  ;;  %14007 = vmatpush1.bf16.msra.mxu0 %v18802_v13  ;;  %v18871_v9 = vld [vmem:[%s22206_s10 + $0x2340] ss:$24 sps:$4 sm:$0xff]   ;;  %v18874_v13 = vld [vmem:[%s22206_s10 + $0x2010] ss:$24 sps:$4 sm:$0xff]  }
 0x274   : > { %14050 = vmatpush1.bf16.msra.mxu1 %v18805_v14  ;;  %v13698_v26 = vpop.f32.mrf.mxu0  ;;  %14008 = vmatprep.subr.bf16.mxu0 %v18810_v15  ;;  %v18877_v14 = vld [vmem:[%s22206_s10 + $0x2310] ss:$24 sps:$4 sm:$0xff]   ;;  %v18882_v15 = vld [vmem:[%s22206_s10 + $0x1fe4] ss:$24 sps:$4 sm:$0xff]  }
 0x275   : > { %v13741_v27 = vpop.f32.mrf.mxu1  ;;  %14051 = vmatprep.subr.bf16.mxu1 %v18813_v16  ;;  %v13699_v30 = vadd.f32 %v13698_v26, %v22540_v11  ;;  %v22623_v31 = vadd.f32 %v13739_v24, %v13697_v25  ;;  %14038 = vmatprep.mubr.bf16.mxu0 %v18900_v21  ;;  %v18822_v11 = vld [vmem:[%s22206_s10 + $0x1ec4] ss:$24 sps:$4 sm:$0xff]   ;;  %v18888_v21 = vld [vmem:[%s22206_s10 + $0x1fb4] ss:$24 sps:$4 sm:$0xff]   ;;  %v18886_v23 = vld [vmem:[%s22206_s10 + $0x1fb0] ss:$24 sps:$4 sm:$0xff]  }
 0x276   : > { %14081 = vmatprep.mubr.bf16.mxu1 %v18903_v22  ;;  %v13700_v6 = vpop.f32.mrf.mxu0  ;;  %v18885_v16 = vld [vmem:[%s22206_s10 + $0x22e4] ss:$24 sps:$4 sm:$0xff]   ;;  %v18891_v22 = vld [vmem:[%s22206_s10 + $0x22b4] ss:$24 sps:$4 sm:$0xff]   ;;  %v18889_v24 = vld [vmem:[%s22206_s10 + $0x22b0] ss:$24 sps:$4 sm:$0xff]  }
 0x277   : > { %v13743_v34 = vpop.f32.mrf.mxu1  ;;  %v13701_v35 = vadd.f32 %v13700_v6, %v22545_v18  ;;  %v22628_v36 = vadd.f32 %v13741_v27, %v13699_v30  ;;  %14009 = vmatpush1.bf16.msra.mxu0 %v18808_v17  ;;  %v18823_v18 = vld [vmem:[%s22206_s10 + $0x21c0] ss:$24 sps:$4 sm:$0xff]   ;;  %v18894_v25 = vld [vmem:[%s22206_s10 + $0x1f84] ss:$24 sps:$4 sm:$0xff]   ;;  %v18901_v30 = vld [vmem:[%s24555_s0 + $0x58] ss:$136 sps:$4 sm:$0xff]  }
 0x278   : > { %14052 = vmatpush1.bf16.msra.mxu1 %v18811_v19  ;;  %14010 = vmatprep.subr.bf16.mxu0 %v18816_v28  ;;  %v18880_v17 = vld [vmem:[%s22206_s10 + $0x1fe0] ss:$24 sps:$4 sm:$0xff]   ;;  %v18897_v26 = vld [vmem:[%s22206_s10 + $0x2284] ss:$24 sps:$4 sm:$0xff]   ;;  %v18904_v6 = vld [vmem:[%s22206_s10 + $0x2550] ss:$24 sps:$4 sm:$0xff]  }
 0x279   : > { %14053 = vmatprep.subr.bf16.mxu1 %v18819_v29  ;;  %v22632_v38 = vadd.f32 %v13743_v34, %v13701_v35  ;;  %v18883_v19 = vld [vmem:[%s22206_s10 + $0x22e0] ss:$24 sps:$4 sm:$0xff]   ;;  %v18907_v34 = vld [vmem:[%s22206_s10 + $0x2850] ss:$24 sps:$4 sm:$0xff]   ;;  %v22694_v35 = vpop.f32.mrf.mxu0 }
 0x27a   : > { %v18892_v27 = vld [vmem:[%s22206_s10 + $0x1f80] ss:$24 sps:$4 sm:$0xff]  }
 0x27b   : > { %14011 = vmatpush1.bf16.msra.mxu0 %v18814_v32  ;;  %v18895_v28 = vld [vmem:[%s22206_s10 + $0x2280] ss:$24 sps:$4 sm:$0xff]   ;;  %v18906_v32 = vld [vmem:[%s22206_s10 + $0x2554] ss:$24 sps:$4 sm:$0xff]  }
 0x27c   : > { %14054 = vmatpush1.bf16.msra.mxu1 %v18817_v33  ;;  %14012 = vmatprep.subr.bf16.mxu0 %v18822_v11  ;;  %v18898_v29 = vld [vmem:[%s24555_s0 + $0x50] ss:$136 sps:$4 sm:$0xff]   ;;  %v18909_v33 = vld [vmem:[%s22206_s10 + $0x2854] ss:$24 sps:$4 sm:$0xff]   ;;  %v22696_v11 = vpop.f32.mrf.mxu1 }
 0x27d   : > { %14055 = vmatprep.subr.bf16.mxu1 %v18825_v37  ;;  %v18912_v37 = vld [vmem:[%s22206_s10 + $0x2524] ss:$24 sps:$4 sm:$0xff]  }
 0x27f   : > { %14013 = vmatpush1.bf16.msra.mxu0 %v18820_v39  ;;  %v18915_v39 = vld [vmem:[%s22206_s10 + $0x2824] ss:$24 sps:$4 sm:$0xff]  }
 0x280   : > { %14056 = vmatpush1.bf16.msra.mxu1 %v18823_v18  ;;  %14014 = vmatprep.subr.bf16.mxu0 %v18828_v41  ;;  %v18910_v18 = vld [vmem:[%s22206_s10 + $0x2520] ss:$24 sps:$4 sm:$0xff]  }
 0x281   : > { %14057 = vmatprep.subr.bf16.mxu1 %v18831_v42  ;;  %v18913_v41 = vld [vmem:[%s22206_s10 + $0x2820] ss:$24 sps:$4 sm:$0xff]   ;;  %v19002_v42 = vld [vmem:[%s24555_s0 + $0x64] ss:$136 sps:$4 sm:$0xff]  }
 0x283   : > { %14015 = vmatpush1.bf16.msra.mxu0 %v18826_v43  ;;  %v19005_v43 = vld [vmem:[%s24555_s0 + $0x6c] ss:$136 sps:$4 sm:$0xff]  }
 0x284   : > { %14058 = vmatpush1.bf16.msra.mxu1 %v18829_v44  ;;  %14016 = vmatprep.subr.bf16.mxu0 %v18834_v45 }
 0x285   : > { %14059 = vmatprep.subr.bf16.mxu1 %v18837_v46 }
 0x287   : > { %14017 = vmatpush1.bf16.msra.mxu0 %v18832_v47 }
 0x288   : > { %14060 = vmatpush1.bf16.msra.mxu1 %v18835_v48  ;;  %14018 = vmatprep.subr.bf16.mxu0 %v18840_v49  ;;  %v18918_v49 = vld [vmem:[%s22206_s10 + $0x24f4] ss:$24 sps:$4 sm:$0xff]  }
 0x289   : > { %14061 = vmatprep.subr.bf16.mxu1 %v18843_v50  ;;  %v18921_v50 = vld [vmem:[%s22206_s10 + $0x27f4] ss:$24 sps:$4 sm:$0xff]  }
 0x28b   : > { %14019 = vmatpush1.bf16.msra.mxu0 %v18838_v51 }
 0x28c   : > { %14062 = vmatpush1.bf16.msra.mxu1 %v18841_v52  ;;  %14020 = vmatprep.subr.bf16.mxu0 %v18846_v53  ;;  %v18916_v52 = vld [vmem:[%s22206_s10 + $0x24f0] ss:$24 sps:$4 sm:$0xff]  }
 0x28d   : > { %14063 = vmatprep.subr.bf16.mxu1 %v18849_v54  ;;  %v18919_v53 = vld [vmem:[%s22206_s10 + $0x27f0] ss:$24 sps:$4 sm:$0xff]  }
 0x28f   : > { %14021 = vmatpush1.bf16.msra.mxu0 %v18844_v55 }
 0x290   : > { %14064 = vmatpush1.bf16.msra.mxu1 %v18847_v56  ;;  %14022 = vmatprep.subr.bf16.mxu0 %v18852_v57  ;;  %v18924_v56 = vld [vmem:[%s22206_s10 + $0x24c4] ss:$24 sps:$4 sm:$0xff]  }
 0x291   : > { %14065 = vmatprep.subr.bf16.mxu1 %v18855_v58  ;;  %v18927_v57 = vld [vmem:[%s22206_s10 + $0x27c4] ss:$24 sps:$4 sm:$0xff]  }
 0x293   : > { %14023 = vmatpush2.bf16.msra.mxu0 %v18850_v59  ;;  %v18922_v59 = vld [vmem:[%s22206_s10 + $0x24c0] ss:$24 sps:$4 sm:$0xff]  }
 0x294   : > { %14066 = vmatpush2.bf16.msra.mxu1 %v18853_v60  ;;  %14024 = vmatprep.subr.bf16.mxu0 %v18858_v61  ;;  %v18925_v60 = vld [vmem:[%s22206_s10 + $0x27c0] ss:$24 sps:$4 sm:$0xff]   ;;  %v18933_v61 = vld [vmem:[%s22206_s10 + $0x2794] ss:$24 sps:$4 sm:$0xff]  }
 0x295   : > { %14067 = vmatprep.subr.bf16.mxu1 %v18861_v62  ;;  %v18928_v62 = vld [vmem:[%s22206_s10 + $0x2490] ss:$24 sps:$4 sm:$0xff]  }
 0x297   : > { %14025 = vmatpush2.bf16.msra.mxu0 %v18856_v63  ;;  %v18931_v63 = vld [vmem:[%s22206_s10 + $0x2790] ss:$24 sps:$4 sm:$0xff]  }
 0x298   : > { %14068 = vmatpush2.bf16.msra.mxu1 %v18859_v0  ;;  %14026 = vmatprep.subr.bf16.mxu0 %v18864_v1  ;;  %v18936_v0 = vld [vmem:[%s22206_s10 + $0x2464] ss:$24 sps:$4 sm:$0xff]  }
 0x299   : > { %14069 = vmatprep.subr.bf16.mxu1 %v18867_v2  ;;  %v18939_v1 = vld [vmem:[%s22206_s10 + $0x2764] ss:$24 sps:$4 sm:$0xff]   ;;  %v18934_v2 = vld [vmem:[%s22206_s10 + $0x2460] ss:$24 sps:$4 sm:$0xff]  }
 0x29b   : > { %14027 = vmatpush2.bf16.msra.mxu0 %v18862_v3  ;;  %v18937_v3 = vld [vmem:[%s22206_s10 + $0x2760] ss:$24 sps:$4 sm:$0xff]  }
 0x29c   : > { %14070 = vmatpush2.bf16.msra.mxu1 %v18865_v4  ;;  %14028 = vmatprep.subr.bf16.mxu0 %v18870_v5  ;;  %v18942_v4 = vld [vmem:[%s22206_s10 + $0x2434] ss:$24 sps:$4 sm:$0xff]  }
 0x29d   : > { %14071 = vmatprep.subr.bf16.mxu1 %v18873_v7  ;;  %v18945_v5 = vld [vmem:[%s22206_s10 + $0x2734] ss:$24 sps:$4 sm:$0xff]   ;;  %v18940_v7 = vld [vmem:[%s22206_s10 + $0x2430] ss:$24 sps:$4 sm:$0xff]  }
 0x29f   : > { %14029 = vmatpush2.bf16.msra.mxu0 %v18868_v8  ;;  %v18943_v8 = vld [vmem:[%s22206_s10 + $0x2730] ss:$24 sps:$4 sm:$0xff]  }
 0x2a0   : > { %14072 = vmatpush2.bf16.msra.mxu1 %v18871_v9  ;;  %14030 = vmatprep.subr.bf16.mxu0 %v18876_v10  ;;  %v18948_v9 = vld [vmem:[%s22206_s10 + $0x2404] ss:$24 sps:$4 sm:$0xff]  }
 0x2a1   : > { %14073 = vmatprep.subr.bf16.mxu1 %v18879_v12  ;;  %v18951_v10 = vld [vmem:[%s22206_s10 + $0x2704] ss:$24 sps:$4 sm:$0xff]   ;;  %v18946_v12 = vld [vmem:[%s22206_s10 + $0x2400] ss:$24 sps:$4 sm:$0xff]  }
 0x2a3   : > { %14031 = vmatpush2.bf16.msra.mxu0 %v18874_v13  ;;  %v18949_v13 = vld [vmem:[%s22206_s10 + $0x2700] ss:$24 sps:$4 sm:$0xff]  }
 0x2a4   : > { %14074 = vmatpush2.bf16.msra.mxu1 %v18877_v14  ;;  %14032 = vmatprep.subr.bf16.mxu0 %v18882_v15  ;;  %v18954_v14 = vld [vmem:[%s22206_s10 + $0x26d4] ss:$24 sps:$4 sm:$0xff]  }
 0x2a5   : > { %14075 = vmatprep.subr.bf16.mxu1 %v18885_v16  ;;  %v18957_v15 = vld [vmem:[%s22206_s10 + $0x29d4] ss:$24 sps:$4 sm:$0xff]   ;;  %v18952_v16 = vld [vmem:[%s22206_s10 + $0x26d0] ss:$24 sps:$4 sm:$0xff]  }
 0x2a7   : > { %14033 = vmatpush2.bf16.msra.mxu0 %v18880_v17  ;;  %v18955_v17 = vld [vmem:[%s22206_s10 + $0x29d0] ss:$24 sps:$4 sm:$0xff]  }
 0x2a8   : > { %14076 = vmatpush2.bf16.msra.mxu1 %v18883_v19  ;;  %14034 = vmatprep.subr.bf16.mxu0 %v18888_v21  ;;  %v18960_v19 = vld [vmem:[%s22206_s10 + $0x26a4] ss:$24 sps:$4 sm:$0xff]  }
 0x2a9   : > { %14077 = vmatprep.subr.bf16.mxu1 %v18891_v22  ;;  %v18963_v21 = vld [vmem:[%s22206_s10 + $0x29a4] ss:$24 sps:$4 sm:$0xff]   ;;  %v18958_v22 = vld [vmem:[%s22206_s10 + $0x26a0] ss:$24 sps:$4 sm:$0xff]  }
 0x2ab   : > { %14035 = vmatpush2.bf16.msra.mxu0 %v18886_v23  ;;  %v18961_v23 = vld [vmem:[%s22206_s10 + $0x29a0] ss:$24 sps:$4 sm:$0xff]  }
 0x2ac   : > { %14078 = vmatpush2.bf16.msra.mxu1 %v18889_v24  ;;  %14036 = vmatprep.subr.bf16.mxu0 %v18894_v25  ;;  %v18966_v24 = vld [vmem:[%s22206_s10 + $0x2674] ss:$24 sps:$4 sm:$0xff]  }
 0x2ad   : > { %14079 = vmatprep.subr.bf16.mxu1 %v18897_v26  ;;  %v18969_v25 = vld [vmem:[%s22206_s10 + $0x2974] ss:$24 sps:$4 sm:$0xff]   ;;  %v18964_v26 = vld [vmem:[%s22206_s10 + $0x2670] ss:$24 sps:$4 sm:$0xff]  }
 0x2af   : > { %14037 = vmatpush2.bf16.msra.mxu0 %v18892_v27  ;;  %v18967_v27 = vld [vmem:[%s22206_s10 + $0x2970] ss:$24 sps:$4 sm:$0xff]  }
 0x2b0   : > { %14080 = vmatpush2.bf16.msra.mxu1 %v18895_v28  ;;  %14092 = vmatprep.subr.bf16.mxu0 %v18906_v32  ;;  %v18972_v28 = vld [vmem:[%s22206_s10 + $0x2644] ss:$24 sps:$4 sm:$0xff]   ;;  %v18973_v32 = vld [vmem:[%s22206_s10 + $0x2940] ss:$24 sps:$4 sm:$0xff]  }
 0x2b1   : > { %14135 = vmatprep.subr.bf16.mxu1 %v18909_v33  ;;  %v18978_v33 = vld [vmem:[%s22206_s10 + $0x2614] ss:$24 sps:$4 sm:$0xff]  }
 0x2b2   : > { %v13782_v44 = vpop.f32.mrf.mxu0  ;;  %14039 = vmatmul.mubr.bf16.vlgmr.msra.gmra.mxu0 %v18898_v29  ;;  %v18975_v29 = vld [vmem:[%s22206_s10 + $0x2944] ss:$24 sps:$4 sm:$0xff]  }
 0x2b3   : > { %14082 = vmatmul.mubr.bf16.vlgmr.msra.gmra.mxu1 %v18901_v30  ;;  %v13825_v45 = vpop.f32.mrf.mxu1  ;;  %v13783_v46 = vadd.f32 %v13782_v44, %v22623_v31  ;;  %14093 = vmatpush1.bf16.msra.mxu0 %v18904_v6  ;;  %v18970_v30 = vld [vmem:[%s22206_s10 + $0x2640] ss:$24 sps:$4 sm:$0xff]   ;;  %v18981_v6 = vld [vmem:[%s22206_s10 + $0x2914] ss:$24 sps:$4 sm:$0xff]  }
 0x2b4   : > { %14136 = vmatpush1.bf16.msra.mxu1 %v18907_v34  ;;  %v22709_v47 = vpop.f32.mrf.mxu0  ;;  %14094 = vmatprep.subr.bf16.mxu0 %v18912_v37  ;;  %v18976_v34 = vld [vmem:[%s22206_s10 + $0x2610] ss:$24 sps:$4 sm:$0xff]   ;;  %v18993_v44 = vld [vmem:[%s22206_s10 + $0x28b4] ss:$24 sps:$4 sm:$0xff]  }
 0x2b5   : > { %v22711_v48 = vpop.f32.mrf.mxu1  ;;  %14137 = vmatprep.subr.bf16.mxu1 %v18915_v39  ;;  %v22715_v51 = vadd.f32 %v13825_v45, %v13783_v46  ;;  %14124 = vmatprep.mubr.bf16.mxu0 %v19002_v42  ;;  %v18979_v37 = vld [vmem:[%s22206_s10 + $0x2910] ss:$24 sps:$4 sm:$0xff]   ;;  %v18984_v39 = vld [vmem:[%s22206_s10 + $0x25e4] ss:$24 sps:$4 sm:$0xff]   ;;  %v18985_v42 = vld [vmem:[%s22206_s10 + $0x28e0] ss:$24 sps:$4 sm:$0xff]  }
 0x2b6   : > { %14167 = vmatprep.mubr.bf16.mxu1 %v19005_v43  ;;  %v13786_v31 = vpop.f32.mrf.mxu0  ;;  %v18990_v43 = vld [vmem:[%s22206_s10 + $0x25b4] ss:$24 sps:$4 sm:$0xff]   ;;  %v18988_v45 = vld [vmem:[%s22206_s10 + $0x25b0] ss:$24 sps:$4 sm:$0xff]  }
 0x2b7   : > { %v13829_v54 = vpop.f32.mrf.mxu1  ;;  %v13787_v55 = vadd.f32 %v13786_v31, %v22632_v38  ;;  %14095 = vmatpush1.bf16.msra.mxu0 %v18910_v18  ;;  %v18930_v38 = vld [vmem:[%s22206_s10 + $0x2494] ss:$24 sps:$4 sm:$0xff]   ;;  %v18987_v18 = vld [vmem:[%s22206_s10 + $0x28e4] ss:$24 sps:$4 sm:$0xff]   ;;  %v18991_v46 = vld [vmem:[%s22206_s10 + $0x28b0] ss:$24 sps:$4 sm:$0xff]  }
 0x2b8   : > { %14138 = vmatpush1.bf16.msra.mxu1 %v18913_v41  ;;  %14096 = vmatprep.subr.bf16.mxu0 %v18918_v49  ;;  %v18982_v41 = vld [vmem:[%s22206_s10 + $0x25e0] ss:$24 sps:$4 sm:$0xff]   ;;  %v18996_v49 = vld [vmem:[%s22206_s10 + $0x2584] ss:$24 sps:$4 sm:$0xff]   ;;  %v19008_v31 = vld [vmem:[%s22206_s10 + $0x2b54] ss:$24 sps:$4 sm:$0xff]  }
 0x2b9   : > { %14139 = vmatprep.subr.bf16.mxu1 %v18921_v50  ;;  %v22722_v58 = vadd.f32 %v13829_v54, %v13787_v55  ;;  %v18999_v50 = vld [vmem:[%s22206_s10 + $0x2884] ss:$24 sps:$4 sm:$0xff]   ;;  %v19000_v54 = vld [vmem:[%s24555_s0 + $0x60] ss:$136 sps:$4 sm:$0xff]  }
 0x2ba   : > { %v19003_v55 = vld [vmem:[%s24555_s0 + $0x68] ss:$136 sps:$4 sm:$0xff]  }
 0x2bb   : > { %14097 = vmatpush1.bf16.msra.mxu0 %v18916_v52  ;;  %v18994_v52 = vld [vmem:[%s22206_s10 + $0x2580] ss:$24 sps:$4 sm:$0xff]  }
 0x2bc   : > { %14140 = vmatpush1.bf16.msra.mxu1 %v18919_v53  ;;  %14098 = vmatprep.subr.bf16.mxu0 %v18924_v56  ;;  %v18997_v53 = vld [vmem:[%s22206_s10 + $0x2880] ss:$24 sps:$4 sm:$0xff]   ;;  %v19011_v56 = vld [vmem:[%s22206_s10 + $0x2e54] ss:$24 sps:$4 sm:$0xff]  }
 0x2bd   : > { %14141 = vmatprep.subr.bf16.mxu1 %v18927_v57  ;;  %v19006_v57 = vld [vmem:[%s22206_s10 + $0x2b50] ss:$24 sps:$4 sm:$0xff]  }
 0x2bf   : > { %14099 = vmatpush1.bf16.msra.mxu0 %v18922_v59  ;;  %v19009_v59 = vld [vmem:[%s22206_s10 + $0x2e50] ss:$24 sps:$4 sm:$0xff]  }
 0x2c0   : > { %14142 = vmatpush1.bf16.msra.mxu1 %v18925_v60  ;;  %14100 = vmatprep.subr.bf16.mxu0 %v18930_v38  ;;  %v22784_v60 = vpop.f32.mrf.mxu0  ;;  %v22786_v38 = vpop.f32.mrf.mxu1 }
 0x2c1   : > { %14143 = vmatprep.subr.bf16.mxu1 %v18933_v61  ;;  %v19014_v61 = vld [vmem:[%s22206_s10 + $0x2b24] ss:$24 sps:$4 sm:$0xff]  }
 0x2c3   : > { %14101 = vmatpush1.bf16.msra.mxu0 %v18928_v62  ;;  %v19017_v62 = vld [vmem:[%s22206_s10 + $0x2e24] ss:$24 sps:$4 sm:$0xff]  }
 0x2c4   : > { %14144 = vmatpush1.bf16.msra.mxu1 %v18931_v63  ;;  %14102 = vmatprep.subr.bf16.mxu0 %v18936_v0  ;;  %v19012_v63 = vld [vmem:[%s22206_s10 + $0x2b20] ss:$24 sps:$4 sm:$0xff]  }
 0x2c5   : > { %14145 = vmatprep.subr.bf16.mxu1 %v18939_v1  ;;  %v19015_v0 = vld [vmem:[%s22206_s10 + $0x2e20] ss:$24 sps:$4 sm:$0xff]   ;;  %v19104_v1 = vld [vmem:[%s24555_s0 + $0x74] ss:$136 sps:$4 sm:$0xff]  }
 0x2c7   : > { %14103 = vmatpush1.bf16.msra.mxu0 %v18934_v2  ;;  %v19107_v2 = vld [vmem:[%s24555_s0 + $0x7c] ss:$136 sps:$4 sm:$0xff]  }
 0x2c8   : > { %14146 = vmatpush1.bf16.msra.mxu1 %v18937_v3  ;;  %14104 = vmatprep.subr.bf16.mxu0 %v18942_v4 }
 0x2c9   : > { %14147 = vmatprep.subr.bf16.mxu1 %v18945_v5 }
 0x2cb   : > { %14105 = vmatpush1.bf16.msra.mxu0 %v18940_v7 }
 0x2cc   : > { %14148 = vmatpush1.bf16.msra.mxu1 %v18943_v8  ;;  %14106 = vmatprep.subr.bf16.mxu0 %v18948_v9  ;;  %v19020_v9 = vld [vmem:[%s22206_s10 + $0x2af4] ss:$24 sps:$4 sm:$0xff]  }
 0x2cd   : > { %14149 = vmatprep.subr.bf16.mxu1 %v18951_v10  ;;  %v19023_v10 = vld [vmem:[%s22206_s10 + $0x2df4] ss:$24 sps:$4 sm:$0xff]  }
 0x2cf   : > { %14107 = vmatpush1.bf16.msra.mxu0 %v18946_v12 }
 0x2d0   : > { %14150 = vmatpush1.bf16.msra.mxu1 %v18949_v13  ;;  %14108 = vmatprep.subr.bf16.mxu0 %v18954_v14  ;;  %v19018_v13 = vld [vmem:[%s22206_s10 + $0x2af0] ss:$24 sps:$4 sm:$0xff]  }
 0x2d1   : > { %14151 = vmatprep.subr.bf16.mxu1 %v18957_v15  ;;  %v19021_v14 = vld [vmem:[%s22206_s10 + $0x2df0] ss:$24 sps:$4 sm:$0xff]  }
 0x2d3   : > { %14109 = vmatpush2.bf16.msra.mxu0 %v18952_v16 }
 0x2d4   : > { %14152 = vmatpush2.bf16.msra.mxu1 %v18955_v17  ;;  %14110 = vmatprep.subr.bf16.mxu0 %v18960_v19  ;;  %v19026_v17 = vld [vmem:[%s22206_s10 + $0x2ac4] ss:$24 sps:$4 sm:$0xff]  }
 0x2d5   : > { %14153 = vmatprep.subr.bf16.mxu1 %v18963_v21  ;;  %v19029_v19 = vld [vmem:[%s22206_s10 + $0x2dc4] ss:$24 sps:$4 sm:$0xff]  }
 0x2d7   : > { %14111 = vmatpush2.bf16.msra.mxu0 %v18958_v22  ;;  %v19024_v22 = vld [vmem:[%s22206_s10 + $0x2ac0] ss:$24 sps:$4 sm:$0xff]  }
 0x2d8   : > { %14154 = vmatpush2.bf16.msra.mxu1 %v18961_v23  ;;  %14112 = vmatprep.subr.bf16.mxu0 %v18966_v24  ;;  %v19027_v23 = vld [vmem:[%s22206_s10 + $0x2dc0] ss:$24 sps:$4 sm:$0xff]   ;;  %v19035_v24 = vld [vmem:[%s22206_s10 + $0x2d94] ss:$24 sps:$4 sm:$0xff]  }
 0x2d9   : > { %14155 = vmatprep.subr.bf16.mxu1 %v18969_v25  ;;  %v19030_v25 = vld [vmem:[%s22206_s10 + $0x2a90] ss:$24 sps:$4 sm:$0xff]  }
 0x2db   : > { %14113 = vmatpush2.bf16.msra.mxu0 %v18964_v26  ;;  %v19033_v26 = vld [vmem:[%s22206_s10 + $0x2d90] ss:$24 sps:$4 sm:$0xff]  }
 0x2dc   : > { %14156 = vmatpush2.bf16.msra.mxu1 %v18967_v27  ;;  %14114 = vmatprep.subr.bf16.mxu0 %v18972_v28  ;;  %v19038_v27 = vld [vmem:[%s22206_s10 + $0x2a64] ss:$24 sps:$4 sm:$0xff]  }
 0x2dd   : > { %14157 = vmatprep.subr.bf16.mxu1 %v18975_v29  ;;  %v19041_v28 = vld [vmem:[%s22206_s10 + $0x2d64] ss:$24 sps:$4 sm:$0xff]   ;;  %v19036_v29 = vld [vmem:[%s22206_s10 + $0x2a60] ss:$24 sps:$4 sm:$0xff]  }
 0x2df   : > { %14115 = vmatpush2.bf16.msra.mxu0 %v18970_v30  ;;  %v19039_v30 = vld [vmem:[%s22206_s10 + $0x2d60] ss:$24 sps:$4 sm:$0xff]  }
 0x2e0   : > { %14158 = vmatpush2.bf16.msra.mxu1 %v18973_v32  ;;  %14116 = vmatprep.subr.bf16.mxu0 %v18978_v33  ;;  %v19044_v32 = vld [vmem:[%s22206_s10 + $0x2a34] ss:$24 sps:$4 sm:$0xff]  }
 0x2e1   : > { %14159 = vmatprep.subr.bf16.mxu1 %v18981_v6  ;;  %v19047_v33 = vld [vmem:[%s22206_s10 + $0x2d34] ss:$24 sps:$4 sm:$0xff]   ;;  %v19042_v6 = vld [vmem:[%s22206_s10 + $0x2a30] ss:$24 sps:$4 sm:$0xff]  }
 0x2e3   : > { %14117 = vmatpush2.bf16.msra.mxu0 %v18976_v34  ;;  %v19045_v34 = vld [vmem:[%s22206_s10 + $0x2d30] ss:$24 sps:$4 sm:$0xff]  }
 0x2e4   : > { %14160 = vmatpush2.bf16.msra.mxu1 %v18979_v37  ;;  %14118 = vmatprep.subr.bf16.mxu0 %v18984_v39  ;;  %v19050_v37 = vld [vmem:[%s22206_s10 + $0x2a04] ss:$24 sps:$4 sm:$0xff]  }
 0x2e5   : > { %14161 = vmatprep.subr.bf16.mxu1 %v18987_v18  ;;  %v19053_v39 = vld [vmem:[%s22206_s10 + $0x2d04] ss:$24 sps:$4 sm:$0xff]   ;;  %v19048_v18 = vld [vmem:[%s22206_s10 + $0x2a00] ss:$24 sps:$4 sm:$0xff]  }
 0x2e7   : > { %14119 = vmatpush2.bf16.msra.mxu0 %v18982_v41  ;;  %v19051_v41 = vld [vmem:[%s22206_s10 + $0x2d00] ss:$24 sps:$4 sm:$0xff]  }
 0x2e8   : > { %14162 = vmatpush2.bf16.msra.mxu1 %v18985_v42  ;;  %14120 = vmatprep.subr.bf16.mxu0 %v18990_v43  ;;  %v19056_v42 = vld [vmem:[%s22206_s10 + $0x2cd4] ss:$24 sps:$4 sm:$0xff]  }
 0x2e9   : > { %14163 = vmatprep.subr.bf16.mxu1 %v18993_v44  ;;  %v19059_v43 = vld [vmem:[%s22206_s10 + $0x2fd4] ss:$24 sps:$4 sm:$0xff]   ;;  %v19054_v44 = vld [vmem:[%s22206_s10 + $0x2cd0] ss:$24 sps:$4 sm:$0xff]  }
 0x2eb   : > { %14121 = vmatpush2.bf16.msra.mxu0 %v18988_v45  ;;  %v19057_v45 = vld [vmem:[%s22206_s10 + $0x2fd0] ss:$24 sps:$4 sm:$0xff]  }
 0x2ec   : > { %14164 = vmatpush2.bf16.msra.mxu1 %v18991_v46  ;;  %14122 = vmatprep.subr.bf16.mxu0 %v18996_v49  ;;  %v19062_v46 = vld [vmem:[%s22206_s10 + $0x2ca4] ss:$24 sps:$4 sm:$0xff]  }
 0x2ed   : > { %14165 = vmatprep.subr.bf16.mxu1 %v18999_v50  ;;  %v19065_v49 = vld [vmem:[%s22206_s10 + $0x2fa4] ss:$24 sps:$4 sm:$0xff]   ;;  %v19060_v50 = vld [vmem:[%s22206_s10 + $0x2ca0] ss:$24 sps:$4 sm:$0xff]  }
 0x2ef   : > { %14123 = vmatpush2.bf16.msra.mxu0 %v18994_v52  ;;  %v19063_v52 = vld [vmem:[%s22206_s10 + $0x2fa0] ss:$24 sps:$4 sm:$0xff]  }
 0x2f0   : > { %14166 = vmatpush2.bf16.msra.mxu1 %v18997_v53  ;;  %14178 = vmatprep.subr.bf16.mxu0 %v19008_v31  ;;  %v19068_v53 = vld [vmem:[%s22206_s10 + $0x2c74] ss:$24 sps:$4 sm:$0xff]  }
 0x2f1   : > { %14221 = vmatprep.subr.bf16.mxu1 %v19011_v56  ;;  %v19071_v31 = vld [vmem:[%s22206_s10 + $0x2f74] ss:$24 sps:$4 sm:$0xff]   ;;  %v19074_v56 = vld [vmem:[%s22206_s10 + $0x2c44] ss:$24 sps:$4 sm:$0xff]  }
 0x2f2   : > { %v13868_v3 = vpop.f32.mrf.mxu0  ;;  %14125 = vmatmul.mubr.bf16.vlgmr.msra.gmra.mxu0 %v19000_v54  ;;  %v19066_v54 = vld [vmem:[%s22206_s10 + $0x2c70] ss:$24 sps:$4 sm:$0xff]  }
 0x2f3   : > { %14168 = vmatmul.mubr.bf16.vlgmr.msra.gmra.mxu1 %v19003_v55  ;;  %v13911_v4 = vpop.f32.mrf.mxu1  ;;  %v13869_v5 = vadd.f32 %v13868_v3, %v22715_v51  ;;  %14179 = vmatpush1.bf16.msra.mxu0 %v19006_v57  ;;  %v19069_v55 = vld [vmem:[%s22206_s10 + $0x2f70] ss:$24 sps:$4 sm:$0xff]   ;;  %v19077_v57 = vld [vmem:[%s22206_s10 + $0x2f44] ss:$24 sps:$4 sm:$0xff]  }
 0x2f4   : > { %14222 = vmatpush1.bf16.msra.mxu1 %v19009_v59  ;;  %v22799_v7 = vpop.f32.mrf.mxu0  ;;  %14180 = vmatprep.subr.bf16.mxu0 %v19014_v61  ;;  %v19072_v59 = vld [vmem:[%s22206_s10 + $0x2c40] ss:$24 sps:$4 sm:$0xff]   ;;  %v19089_v3 = vld [vmem:[%s22206_s10 + $0x2ee4] ss:$24 sps:$4 sm:$0xff]  }
 0x2f5   : > { %v22801_v8 = vpop.f32.mrf.mxu1  ;;  %14223 = vmatprep.subr.bf16.mxu1 %v19017_v62  ;;  %v22805_v12 = vadd.f32 %v13911_v4, %v13869_v5  ;;  %14210 = vmatprep.mubr.bf16.mxu0 %v19104_v1  ;;  %v19075_v61 = vld [vmem:[%s22206_s10 + $0x2f40] ss:$24 sps:$4 sm:$0xff]   ;;  %v19080_v62 = vld [vmem:[%s22206_s10 + $0x2c14] ss:$24 sps:$4 sm:$0xff]   ;;  %v19081_v1 = vld [vmem:[%s22206_s10 + $0x2f10] ss:$24 sps:$4 sm:$0xff]  }
 0x2f6   : > { %14253 = vmatprep.mubr.bf16.mxu1 %v19107_v2  ;;  %v13872_v51 = vpop.f32.mrf.mxu0  ;;  %v19086_v2 = vld [vmem:[%s22206_s10 + $0x2be4] ss:$24 sps:$4 sm:$0xff]   ;;  %v19084_v4 = vld [vmem:[%s22206_s10 + $0x2be0] ss:$24 sps:$4 sm:$0xff]  }
 0x2f7   : > { %v13915_v15 = vpop.f32.mrf.mxu1  ;;  %v13873_v16 = vadd.f32 %v13872_v51, %v22722_v58  ;;  %14181 = vmatpush1.bf16.msra.mxu0 %v19012_v63  ;;  %v19032_v58 = vld [vmem:[%s22206_s10 + $0x2a94] ss:$24 sps:$4 sm:$0xff]   ;;  %v19087_v5 = vld [vmem:[%s22206_s10 + $0x2ee0] ss:$24 sps:$4 sm:$0xff]   ;;  %v19098_v51 = vld [vmem:[%s22206_s10 + $0x2b84] ss:$24 sps:$4 sm:$0xff]  }
 0x2f8   : > { %14224 = vmatpush1.bf16.msra.mxu1 %v19015_v0  ;;  %14182 = vmatprep.subr.bf16.mxu0 %v19020_v9  ;;  %v19083_v63 = vld [vmem:[%s22206_s10 + $0x2f14] ss:$24 sps:$4 sm:$0xff]   ;;  %v19078_v0 = vld [vmem:[%s22206_s10 + $0x2c10] ss:$24 sps:$4 sm:$0xff]  }
 0x2f9   : > { %14225 = vmatprep.subr.bf16.mxu1 %v19023_v10  ;;  %v22812_v21 = vadd.f32 %v13915_v15, %v13873_v16  ;;  %v19092_v9 = vld [vmem:[%s22206_s10 + $0x2bb4] ss:$24 sps:$4 sm:$0xff]   ;;  %v19101_v15 = vld [vmem:[%s22206_s10 + $0x2e84] ss:$24 sps:$4 sm:$0xff]   ;;  %v19096_v16 = vld [vmem:[%s22206_s10 + $0x2b80] ss:$24 sps:$4 sm:$0xff]  }
 0x2fa   : > { %v19095_v10 = vld [vmem:[%s22206_s10 + $0x2eb4] ss:$24 sps:$4 sm:$0xff]  }
 0x2fb   : > { %14183 = vmatpush1.bf16.msra.mxu0 %v19018_v13  ;;  %v19090_v13 = vld [vmem:[%s22206_s10 + $0x2bb0] ss:$24 sps:$4 sm:$0xff]  }
 0x2fc   : > { %14226 = vmatpush1.bf16.msra.mxu1 %v19021_v14  ;;  %14184 = vmatprep.subr.bf16.mxu0 %v19026_v17  ;;  %v19093_v14 = vld [vmem:[%s22206_s10 + $0x2eb0] ss:$24 sps:$4 sm:$0xff]   ;;  %v19099_v17 = vld [vmem:[%s22206_s10 + $0x2e80] ss:$24 sps:$4 sm:$0xff]  }
 0x2fd   : > { %14227 = vmatprep.subr.bf16.mxu1 %v19029_v19  ;;  %v19110_v19 = vld [vmem:[%s22206_s10 + $0x3154] ss:$24 sps:$4 sm:$0xff]  }
 0x2ff   : > { %14185 = vmatpush1.bf16.msra.mxu0 %v19024_v22  ;;  %v19102_v22 = vld [vmem:[%s24555_s0 + $0x70] ss:$136 sps:$4 sm:$0xff]  }
 0x300   : > { %14228 = vmatpush1.bf16.msra.mxu1 %v19027_v23  ;;  %14186 = vmatprep.subr.bf16.mxu0 %v19032_v58  ;;  %v19105_v23 = vld [vmem:[%s24555_s0 + $0x78] ss:$136 sps:$4 sm:$0xff]   ;;  %v19113_v58 = vld [vmem:[%s22206_s10 + $0x15c] ss:$24 sps:$4 sm:$0xff]  }
 0x301   : > { %14229 = vmatprep.subr.bf16.mxu1 %v19035_v24  ;;  %v19108_v24 = vld [vmem:[%s22206_s10 + $0x3150] ss:$24 sps:$4 sm:$0xff]  }
 0x303   : > { %14187 = vmatpush1.bf16.msra.mxu0 %v19030_v25  ;;  %v19111_v25 = vld [vmem:[%s22206_s10 + $0x158] ss:$24 sps:$4 sm:$0xff]  }
 0x304   : > { %14230 = vmatpush1.bf16.msra.mxu1 %v19033_v26  ;;  %14188 = vmatprep.subr.bf16.mxu0 %v19038_v27  ;;  %v22874_v26 = vpop.f32.mrf.mxu0  ;;  %v22876_v27 = vpop.f32.mrf.mxu1 }
 0x305   : > { %14231 = vmatprep.subr.bf16.mxu1 %v19041_v28  ;;  %v19116_v28 = vld [vmem:[%s22206_s10 + $0x3124] ss:$24 sps:$4 sm:$0xff]  }
 0x307   : > { %14189 = vmatpush1.bf16.msra.mxu0 %v19036_v29  ;;  %v19119_v29 = vld [vmem:[%s22206_s10 + $0x12c] ss:$24 sps:$4 sm:$0xff]  }
 0x308   : > { %14232 = vmatpush1.bf16.msra.mxu1 %v19039_v30  ;;  %14190 = vmatprep.subr.bf16.mxu0 %v19044_v32  ;;  %v19114_v30 = vld [vmem:[%s22206_s10 + $0x3120] ss:$24 sps:$4 sm:$0xff]  }
 0x309   : > { %14233 = vmatprep.subr.bf16.mxu1 %v19047_v33  ;;  %v19117_v32 = vld [vmem:[%s22206_s10 + $0x128] ss:$24 sps:$4 sm:$0xff]   ;;  %v19192_v33 = vld [vmem:[%s24555_s0 + $0x84] ss:$136 sps:$4 sm:$0xff]  }
 0x30b   : > { %14191 = vmatpush1.bf16.msra.mxu0 %v19042_v6 }
 0x30c   : > { %14234 = vmatpush1.bf16.msra.mxu1 %v19045_v34  ;;  %14192 = vmatprep.subr.bf16.mxu0 %v19050_v37 }
 0x30d   : > { %14235 = vmatprep.subr.bf16.mxu1 %v19053_v39 }
 0x30f   : > { %14193 = vmatpush1.bf16.msra.mxu0 %v19048_v18 }
 0x310   : > { %14236 = vmatpush1.bf16.msra.mxu1 %v19051_v41  ;;  %14194 = vmatprep.subr.bf16.mxu0 %v19056_v42  ;;  %v19122_v41 = vld [vmem:[%s22206_s10 + $0x30f4] ss:$24 sps:$4 sm:$0xff]  }
 0x311   : > { %14237 = vmatprep.subr.bf16.mxu1 %v19059_v43  ;;  %v19125_v42 = vld [vmem:[%s22206_s10 + $0xfc] ss:$24 sps:$4 sm:$0xff]  }
 0x313   : > { %14195 = vmatpush2.bf16.msra.mxu0 %v19054_v44  ;;  %v19120_v44 = vld [vmem:[%s22206_s10 + $0x30f0] ss:$24 sps:$4 sm:$0xff]  }
 0x314   : > { %14238 = vmatpush2.bf16.msra.mxu1 %v19057_v45  ;;  %14196 = vmatprep.subr.bf16.mxu0 %v19062_v46  ;;  %v19123_v45 = vld [vmem:[%s22206_s10 + $0xf8] ss:$24 sps:$4 sm:$0xff]  }
 0x315   : > { %14239 = vmatprep.subr.bf16.mxu1 %v19065_v49 }
 0x317   : > { %14197 = vmatpush2.bf16.msra.mxu0 %v19060_v50 }
 0x318   : > { %14240 = vmatpush2.bf16.msra.mxu1 %v19063_v52  ;;  %14198 = vmatprep.subr.bf16.mxu0 %v19068_v53  ;;  %v19128_v52 = vld [vmem:[%s22206_s10 + $0x30c4] ss:$24 sps:$4 sm:$0xff]  }
 0x319   : > { %14241 = vmatprep.subr.bf16.mxu1 %v19071_v31  ;;  %v19131_v53 = vld [vmem:[%s22206_s10 + $0xcc] ss:$24 sps:$4 sm:$0xff]  }
 0x31b   : > { %14199 = vmatpush2.bf16.msra.mxu0 %v19066_v54  ;;  %v19126_v54 = vld [vmem:[%s22206_s10 + $0x30c0] ss:$24 sps:$4 sm:$0xff]  }
 0x31c   : > { %14242 = vmatpush2.bf16.msra.mxu1 %v19069_v55  ;;  %14200 = vmatprep.subr.bf16.mxu0 %v19074_v56  ;;  %v19129_v55 = vld [vmem:[%s22206_s10 + $0xc8] ss:$24 sps:$4 sm:$0xff]   ;;  %v19137_v56 = vld [vmem:[%s22206_s10 + $0x9c] ss:$24 sps:$4 sm:$0xff]  }
 0x31d   : > { %14243 = vmatprep.subr.bf16.mxu1 %v19077_v57  ;;  %v19132_v57 = vld [vmem:[%s22206_s10 + $0x3090] ss:$24 sps:$4 sm:$0xff]  }
 0x31f   : > { %14201 = vmatpush2.bf16.msra.mxu0 %v19072_v59  ;;  %v19135_v59 = vld [vmem:[%s22206_s10 + $0x98] ss:$24 sps:$4 sm:$0xff]  }
 0x320   : > { %14244 = vmatpush2.bf16.msra.mxu1 %v19075_v61  ;;  %14202 = vmatprep.subr.bf16.mxu0 %v19080_v62  ;;  %v19140_v61 = vld [vmem:[%s22206_s10 + $0x3064] ss:$24 sps:$4 sm:$0xff]  }
 0x321   : > { %14245 = vmatprep.subr.bf16.mxu1 %v19083_v63  ;;  %v19143_v62 = vld [vmem:[%s22206_s10 + $0x6c] ss:$24 sps:$4 sm:$0xff]   ;;  %v19138_v63 = vld [vmem:[%s22206_s10 + $0x3060] ss:$24 sps:$4 sm:$0xff]  }
 0x323   : > { %14203 = vmatpush2.bf16.msra.mxu0 %v19078_v0  ;;  %v19141_v0 = vld [vmem:[%s22206_s10 + $0x68] ss:$24 sps:$4 sm:$0xff]  }
 0x324   : > { %14246 = vmatpush2.bf16.msra.mxu1 %v19081_v1  ;;  %14204 = vmatprep.subr.bf16.mxu0 %v19086_v2  ;;  %v19146_v1 = vld [vmem:[%s22206_s10 + $0x3034] ss:$24 sps:$4 sm:$0xff]  }
 0x325   : > { %14247 = vmatprep.subr.bf16.mxu1 %v19089_v3  ;;  %v19149_v2 = vld [vmem:[%s22206_s10 + $0x3c] ss:$24 sps:$4 sm:$0xff]   ;;  %v19144_v3 = vld [vmem:[%s22206_s10 + $0x3030] ss:$24 sps:$4 sm:$0xff]  }
 0x327   : > { %14205 = vmatpush2.bf16.msra.mxu0 %v19084_v4  ;;  %v19147_v4 = vld [vmem:[%s22206_s10 + $0x38] ss:$24 sps:$4 sm:$0xff]  }
 0x328   : > { %14248 = vmatpush2.bf16.msra.mxu1 %v19087_v5  ;;  %14206 = vmatprep.subr.bf16.mxu0 %v19092_v9  ;;  %v19152_v5 = vld [vmem:[%s22206_s10 + $0x3004] ss:$24 sps:$4 sm:$0xff]  }
 0x329   : > { %14249 = vmatprep.subr.bf16.mxu1 %v19095_v10  ;;  %v19155_v9 = vld [vmem:[%s22206_s10 + $0xc] ss:$24 sps:$4 sm:$0xff]   ;;  %v19150_v10 = vld [vmem:[%s22206_s10 + $0x3000] ss:$24 sps:$4 sm:$0xff]  }
 0x32b   : > { %14207 = vmatpush2.bf16.msra.mxu0 %v19090_v13  ;;  %v19153_v13 = vld [vmem:[%s22206_s10 + $0x8] ss:$24 sps:$4 sm:$0xff]  }
 0x32c   : > { %14250 = vmatpush2.bf16.msra.mxu1 %v19093_v14  ;;  %14208 = vmatprep.subr.bf16.mxu0 %v19098_v51  ;;  %v19158_v14 = vld [vmem:[%s22206_s10 + $0x3274] ss:$24 sps:$4 sm:$0xff]  }
 0x32d   : > { %14251 = vmatprep.subr.bf16.mxu1 %v19101_v15  ;;  %v19161_v51 = vld [vmem:[%s22206_s10 + $0x2dc] ss:$24 sps:$4 sm:$0xff]   ;;  %v19156_v15 = vld [vmem:[%s22206_s10 + $0x3270] ss:$24 sps:$4 sm:$0xff]  }
 0x32f   : > { %14209 = vmatpush2.bf16.msra.mxu0 %v19096_v16  ;;  %v19159_v16 = vld [vmem:[%s22206_s10 + $0x2d8] ss:$24 sps:$4 sm:$0xff]  }
 0x330   : > { %14252 = vmatpush2.bf16.msra.mxu1 %v19099_v17  ;;  %14264 = vmatprep.subr.bf16.mxu0 %v19110_v19  ;;  %v19164_v17 = vld [vmem:[%s22206_s10 + $0x3244] ss:$24 sps:$4 sm:$0xff]  }
 0x331   : > { %14307 = vmatprep.subr.bf16.mxu1 %v19113_v58  ;;  %v19167_v19 = vld [vmem:[%s22206_s10 + $0x2ac] ss:$24 sps:$4 sm:$0xff]  }
 0x332   : > { %v13954_v6 = vpop.f32.mrf.mxu0  ;;  %14211 = vmatmul.mubr.bf16.vlgmr.msra.gmra.mxu0 %v19102_v22  ;;  %v19162_v22 = vld [vmem:[%s22206_s10 + $0x3240] ss:$24 sps:$4 sm:$0xff]   ;;  %v19170_v58 = vld [vmem:[%s22206_s10 + $0x3214] ss:$24 sps:$4 sm:$0xff]  }
 0x333   : > { %14254 = vmatmul.mubr.bf16.vlgmr.msra.gmra.mxu1 %v19105_v23  ;;  %v13997_v34 = vpop.f32.mrf.mxu1  ;;  %v13955_v37 = vadd.f32 %v13954_v6, %v22805_v12  ;;  %14265 = vmatpush1.bf16.msra.mxu0 %v19108_v24  ;;  %v20845_v12 = vld [vmem:[%s24555_s0 + $0x4] ss:$136 sps:$4 sm:$0xff]   ;;  %v19165_v23 = vld [vmem:[%s22206_s10 + $0x2a8] ss:$24 sps:$4 sm:$0xff]  }
 0x334   : > { %14308 = vmatpush1.bf16.msra.mxu1 %v19111_v25  ;;  %v22886_v39 = vpop.f32.mrf.mxu0  ;;  %14266 = vmatprep.subr.bf16.mxu0 %v19116_v28  ;;  %v19173_v24 = vld [vmem:[%s22206_s10 + $0x27c] ss:$24 sps:$4 sm:$0xff]   ;;  %v19168_v25 = vld [vmem:[%s22206_s10 + $0x3210] ss:$24 sps:$4 sm:$0xff]  }
 0x335   : > { %v22888_v18 = vpop.f32.mrf.mxu1  ;;  %14309 = vmatprep.subr.bf16.mxu1 %v19119_v29  ;;  %v22892_v43 = vadd.f32 %v13997_v34, %v13955_v37  ;;  %18095 = vmatprep.mubr.msk.bf16.mxu0 %vm13572_vm0, %v19192_v33  ;;  %v19171_v28 = vld [vmem:[%s22206_s10 + $0x278] ss:$24 sps:$4 sm:$0xff]   ;;  %v19176_v29 = vld [vmem:[%s22206_s10 + $0x31e4] ss:$24 sps:$4 sm:$0xff]   ;;  %v19177_v33 = vld [vmem:[%s22206_s10 + $0x248] ss:$24 sps:$4 sm:$0xff]  }
 0x336   : > { %14339 = vmatprep.mubr.bf16.mxu1 %v20845_v12  ;;  %v13958_v46 = vpop.f32.mrf.mxu0  ;;  %v19182_v6 = vld [vmem:[%s22206_s10 + $0x31b4] ss:$24 sps:$4 sm:$0xff]   ;;  %v19180_v37 = vld [vmem:[%s22206_s10 + $0x31b0] ss:$24 sps:$4 sm:$0xff]  }
 0x337   : > { %v14001_v49 = vpop.f32.mrf.mxu1  ;;  %v13959_v50 = vadd.f32 %v13958_v46, %v22812_v21  ;;  %14267 = vmatpush1.bf16.msra.mxu0 %v19114_v30  ;;  %v19134_v21 = vld [vmem:[%s22206_s10 + $0x3094] ss:$24 sps:$4 sm:$0xff]   ;;  %v19189_v12 = vld [vmem:[%s22206_s10 + $0x1e8] ss:$24 sps:$4 sm:$0xff]   ;;  %v19194_v46 = vld [vmem:[%s24555_s0 + $0x80] ss:$136 sps:$4 sm:$0xff]  }
 0x338   : > { %14310 = vmatpush1.bf16.msra.mxu1 %v19117_v32  ;;  %14268 = vmatprep.subr.bf16.mxu0 %v19122_v41  ;;  %v19179_v30 = vld [vmem:[%s22206_s10 + $0x24c] ss:$24 sps:$4 sm:$0xff]   ;;  %v19174_v32 = vld [vmem:[%s22206_s10 + $0x31e0] ss:$24 sps:$4 sm:$0xff]   ;;  %v19185_v34 = vld [vmem:[%s22206_s10 + $0x21c] ss:$24 sps:$4 sm:$0xff]  }
 0x339   : > { %14311 = vmatprep.subr.bf16.mxu1 %v19125_v42  ;;  %v22903_v31 = vadd.f32 %v14001_v49, %v13959_v50  ;;  %v19183_v41 = vld [vmem:[%s22206_s10 + $0x218] ss:$24 sps:$4 sm:$0xff]   ;;  %v19188_v42 = vld [vmem:[%s22206_s10 + $0x3184] ss:$24 sps:$4 sm:$0xff]  }
 0x33a   : > { %v19197_v49 = vld [vmem:[%s22206_s10 + $0x1bc] ss:$24 sps:$4 sm:$0xff]  }
 0x33b   : > { %14269 = vmatpush1.bf16.msra.mxu0 %v19120_v44  ;;  %v19191_v44 = vld [vmem:[%s22206_s10 + $0x1ec] ss:$24 sps:$4 sm:$0xff]   ;;  %v19200_v50 = vld [vmem:[%s22206_s10 + $0x45c] ss:$24 sps:$4 sm:$0xff]  }
 0x33c   : > { %14312 = vmatpush1.bf16.msra.mxu1 %v19123_v45  ;;  %14270 = vmatprep.subr.bf16.mxu0 %v19128_v52  ;;  %v19186_v45 = vld [vmem:[%s22206_s10 + $0x3180] ss:$24 sps:$4 sm:$0xff]  }
 0x33d   : > { %14313 = vmatprep.subr.bf16.mxu1 %v19131_v53  ;;  %v19195_v52 = vld [vmem:[%s22206_s10 + $0x1b8] ss:$24 sps:$4 sm:$0xff]  }
 0x33e   : > { %v19198_v53 = vld [vmem:[%s22206_s10 + $0x458] ss:$24 sps:$4 sm:$0xff]  }
 0x33f   : > { %14271 = vmatpush1.bf16.msra.mxu0 %v19126_v54  ;;  %v19203_v54 = vld [vmem:[%s22206_s10 + $0x18c] ss:$24 sps:$4 sm:$0xff]  }
 0x340   : > { %14314 = vmatpush1.bf16.msra.mxu1 %v19129_v55  ;;  %14272 = vmatprep.subr.bf16.mxu0 %v19134_v21  ;;  %v19206_v55 = vld [vmem:[%s22206_s10 + $0x42c] ss:$24 sps:$4 sm:$0xff]   ;;  %v19201_v21 = vld [vmem:[%s22206_s10 + $0x188] ss:$24 sps:$4 sm:$0xff]  }
 0x341   : > { %14315 = vmatprep.subr.bf16.mxu1 %v19137_v56  ;;  %v19204_v56 = vld [vmem:[%s22206_s10 + $0x428] ss:$24 sps:$4 sm:$0xff]  }
 0x343   : > { %14273 = vmatpush1.bf16.msra.mxu0 %v19132_v57  ;;  %v19209_v57 = vld [vmem:[%s22206_s10 + $0x3fc] ss:$24 sps:$4 sm:$0xff]  }
 0x344   : > { %14316 = vmatpush1.bf16.msra.mxu1 %v19135_v59  ;;  %14274 = vmatprep.subr.bf16.mxu0 %v19140_v61  ;;  %v19212_v59 = vld [vmem:[%s22206_s10 + $0x75c] ss:$24 sps:$4 sm:$0xff]   ;;  %v19207_v61 = vld [vmem:[%s22206_s10 + $0x3f8] ss:$24 sps:$4 sm:$0xff]  }
 0x345   : > { %14317 = vmatprep.subr.bf16.mxu1 %v19143_v62  ;;  %v19210_v62 = vld [vmem:[%s22206_s10 + $0x758] ss:$24 sps:$4 sm:$0xff]  }
 0x347   : > { %14275 = vmatpush1.bf16.msra.mxu0 %v19138_v63  ;;  %v20846_v63 = vld [vmem:[%s24555_s0 + $0xc] ss:$136 sps:$4 sm:$0xff]  }
 0x348   : > { %14318 = vmatpush1.bf16.msra.mxu1 %v19141_v0  ;;  %14276 = vmatprep.subr.bf16.mxu0 %v19146_v1  ;;  %v22965_v0 = vpop.f32.mrf.mxu0  ;;  %v22967_v1 = vpop.f32.mrf.mxu1 }
 0x349   : > { %14319 = vmatprep.subr.bf16.mxu1 %v19149_v2  ;;  %v19215_v2 = vld [vmem:[%s22206_s10 + $0x3cc] ss:$24 sps:$4 sm:$0xff]  }
 0x34b   : > { %14277 = vmatpush1.bf16.msra.mxu0 %v19144_v3  ;;  %v19218_v3 = vld [vmem:[%s22206_s10 + $0x72c] ss:$24 sps:$4 sm:$0xff]  }
 0x34c   : > { %14320 = vmatpush1.bf16.msra.mxu1 %v19147_v4  ;;  %14278 = vmatprep.subr.bf16.mxu0 %v19152_v5  ;;  %v19213_v4 = vld [vmem:[%s22206_s10 + $0x3c8] ss:$24 sps:$4 sm:$0xff]  }
 0x34d   : > { %14321 = vmatprep.subr.bf16.mxu1 %v19155_v9  ;;  %v19216_v5 = vld [vmem:[%s22206_s10 + $0x728] ss:$24 sps:$4 sm:$0xff]  }
 0x34f   : > { %14279 = vmatpush1.bf16.msra.mxu0 %v19150_v10  ;;  %v20847_v10 = vld [vmem:[%s24555_s0] ss:$136 sps:$4 sm:$0xff]  }
 0x350   : > { %14322 = vmatpush1.bf16.msra.mxu1 %v19153_v13  ;;  %14284 = vmatprep.subr.bf16.mxu0 %v19158_v14 }
 0x351   : > { %14323 = vmatprep.subr.bf16.mxu1 %v19161_v51 }
 0x353   : > { %14285 = vmatpush2.bf16.msra.mxu0 %v19156_v15 }
 0x354   : > { %14324 = vmatpush2.bf16.msra.mxu1 %v19159_v16  ;;  %14286 = vmatprep.subr.bf16.mxu0 %v19164_v17  ;;  %v19221_v16 = vld [vmem:[%s22206_s10 + $0x39c] ss:$24 sps:$4 sm:$0xff]  }
 0x355   : > { %14325 = vmatprep.subr.bf16.mxu1 %v19167_v19  ;;  %v19224_v17 = vld [vmem:[%s22206_s10 + $0x6fc] ss:$24 sps:$4 sm:$0xff]  }
 0x357   : > { %14287 = vmatpush2.bf16.msra.mxu0 %v19162_v22  ;;  %v19219_v22 = vld [vmem:[%s22206_s10 + $0x398] ss:$24 sps:$4 sm:$0xff]  }
 0x358   : > { %14326 = vmatpush2.bf16.msra.mxu1 %v19165_v23  ;;  %14288 = vmatprep.subr.bf16.mxu0 %v19170_v58  ;;  %v19222_v23 = vld [vmem:[%s22206_s10 + $0x6f8] ss:$24 sps:$4 sm:$0xff]  }
 0x359   : > { %14327 = vmatprep.subr.bf16.mxu1 %v19173_v24 }
 0x35b   : > { %14289 = vmatpush2.bf16.msra.mxu0 %v19168_v25 }
 0x35c   : > { %14328 = vmatpush2.bf16.msra.mxu1 %v19171_v28  ;;  %14290 = vmatprep.subr.bf16.mxu0 %v19176_v29  ;;  %v19227_v28 = vld [vmem:[%s22206_s10 + $0x36c] ss:$24 sps:$4 sm:$0xff]  }
 0x35d   : > { %14329 = vmatprep.subr.bf16.mxu1 %v19179_v30  ;;  %v19230_v29 = vld [vmem:[%s22206_s10 + $0x6cc] ss:$24 sps:$4 sm:$0xff]  }
 0x35f   : > { %14291 = vmatpush2.bf16.msra.mxu0 %v19174_v32  ;;  %v19225_v32 = vld [vmem:[%s22206_s10 + $0x368] ss:$24 sps:$4 sm:$0xff]  }
 0x360   : > { %14330 = vmatpush2.bf16.msra.mxu1 %v19177_v33  ;;  %14292 = vmatprep.subr.bf16.mxu0 %v19182_v6  ;;  %v19228_v33 = vld [vmem:[%s22206_s10 + $0x6c8] ss:$24 sps:$4 sm:$0xff]   ;;  %v19236_v6 = vld [vmem:[%s22206_s10 + $0x69c] ss:$24 sps:$4 sm:$0xff]  }
 0x361   : > { %14331 = vmatprep.subr.bf16.mxu1 %v19185_v34  ;;  %v19231_v34 = vld [vmem:[%s22206_s10 + $0x338] ss:$24 sps:$4 sm:$0xff]  }
 0x363   : > { %14293 = vmatpush2.bf16.msra.mxu0 %v19180_v37  ;;  %v19234_v37 = vld [vmem:[%s22206_s10 + $0x698] ss:$24 sps:$4 sm:$0xff]  }
 0x364   : > { %14332 = vmatpush2.bf16.msra.mxu1 %v19183_v41  ;;  %14294 = vmatprep.subr.bf16.mxu0 %v19188_v42  ;;  %v19239_v41 = vld [vmem:[%s22206_s10 + $0x30c] ss:$24 sps:$4 sm:$0xff]  }
 0x365   : > { %14333 = vmatprep.subr.bf16.mxu1 %v19191_v44  ;;  %v19242_v42 = vld [vmem:[%s22206_s10 + $0x66c] ss:$24 sps:$4 sm:$0xff]   ;;  %v19237_v44 = vld [vmem:[%s22206_s10 + $0x308] ss:$24 sps:$4 sm:$0xff]  }
 0x367   : > { %14295 = vmatpush2.bf16.msra.mxu0 %v19186_v45  ;;  %v19240_v45 = vld [vmem:[%s22206_s10 + $0x668] ss:$24 sps:$4 sm:$0xff]  }
 0x368   : > { %14334 = vmatpush2.bf16.msra.mxu1 %v19189_v12  ;;  %14350 = vmatprep.subr.bf16.mxu0 %v19200_v50  ;;  %v19245_v12 = vld [vmem:[%s22206_s10 + $0x5dc] ss:$24 sps:$4 sm:$0xff]   ;;  %v19246_v50 = vld [vmem:[%s22206_s10 + $0x638] ss:$24 sps:$4 sm:$0xff]  }
 0x369   : > { %14335 = vmatprep.subr.bf16.mxu1 %v19197_v49  ;;  %v19243_v49 = vld [vmem:[%s22206_s10 + $0x5d8] ss:$24 sps:$4 sm:$0xff]  }
 0x36a   : > { %14297 = vmatmul.mubr.bf16.vlgmr.msra.gmra.mxu0 %v19194_v46  ;;  %v19248_v46 = vld [vmem:[%s22206_s10 + $0x63c] ss:$24 sps:$4 sm:$0xff]  }
 0x36b   : > { %14351 = vmatpush1.bf16.msra.mxu0 %v19198_v53  ;;  %14382 = vmatprep.mubr.bf16.mxu0 %v20846_v63  ;;  %v19254_v53 = vld [vmem:[%s22206_s10 + $0x60c] ss:$24 sps:$4 sm:$0xff]   ;;  %v19261_v63 = vld [vmem:[%s22206_s10 + $0x548] ss:$24 sps:$4 sm:$0xff]  }
 0x36c   : > { %14336 = vmatpush2.bf16.msra.mxu1 %v19195_v52  ;;  %14352 = vmatprep.subr.bf16.mxu0 %v19206_v55  ;;  %v19251_v52 = vld [vmem:[%s22206_s10 + $0x5ac] ss:$24 sps:$4 sm:$0xff]   ;;  %v19252_v55 = vld [vmem:[%s22206_s10 + $0x608] ss:$24 sps:$4 sm:$0xff]  }
 0x36d   : > { %14337 = vmatprep.subr.bf16.mxu1 %v19203_v54  ;;  %v19249_v54 = vld [vmem:[%s22206_s10 + $0x5a8] ss:$24 sps:$4 sm:$0xff]  }
 0x36f   : > { %14353 = vmatpush1.bf16.msra.mxu0 %v19204_v56  ;;  %v19260_v56 = vld [vmem:[%s22206_s10 + $0x8dc] ss:$24 sps:$4 sm:$0xff]  }
 0x370   : > { %14338 = vmatpush2.bf16.msra.mxu1 %v19201_v21  ;;  %14354 = vmatprep.subr.bf16.mxu0 %v19209_v57  ;;  %v19257_v21 = vld [vmem:[%s22206_s10 + $0x57c] ss:$24 sps:$4 sm:$0xff]   ;;  %v19255_v57 = vld [vmem:[%s22206_s10 + $0x578] ss:$24 sps:$4 sm:$0xff]  }
 0x371   : > { %14393 = vmatprep.subr.bf16.mxu1 %v19212_v59  ;;  %v19258_v59 = vld [vmem:[%s22206_s10 + $0x8d8] ss:$24 sps:$4 sm:$0xff]  }
 0x372   : > { %v14040_v9 = vpop.f32.mrf.mxu0 }
 0x373   : > { %14340 = vmatmul.mubr.bf16.vlgmr.msra.gmra.mxu1 %v20847_v10  ;;  %v14083_v13 = vpop.f32.mrf.mxu1  ;;  %v14041_v14 = vadd.f32 %v14040_v9, %v22892_v43  ;;  %14355 = vmatpush1.bf16.msra.mxu0 %v19207_v61  ;;  %v20848_v43 = vld [vmem:[%s24555_s0 + $0x14] ss:$136 sps:$4 sm:$0xff]   ;;  %v19270_v9 = vld [vmem:[%s22206_s10 + $0x878] ss:$24 sps:$4 sm:$0xff]  }
 0x374   : > { %14394 = vmatpush1.bf16.msra.mxu1 %v19210_v62  ;;  %v22977_v51 = vpop.f32.mrf.mxu0  ;;  %14356 = vmatprep.subr.bf16.mxu0 %v19215_v2  ;;  %v19263_v61 = vld [vmem:[%s22206_s10 + $0x54c] ss:$24 sps:$4 sm:$0xff]   ;;  %v19264_v2 = vld [vmem:[%s22206_s10 + $0x8a8] ss:$24 sps:$4 sm:$0xff]  }
 0x375   : > { %v22979_v15 = vpop.f32.mrf.mxu1  ;;  %14395 = vmatprep.subr.bf16.mxu1 %v19218_v3  ;;  %v22983_v19 = vadd.f32 %v14083_v13, %v14041_v14  ;;  %14425 = vmatprep.mubr.bf16.mxu1 %v20848_v43  ;;  %v19266_v62 = vld [vmem:[%s22206_s10 + $0x8ac] ss:$24 sps:$4 sm:$0xff]   ;;  %v19269_v3 = vld [vmem:[%s22206_s10 + $0x51c] ss:$24 sps:$4 sm:$0xff]   ;;  %v19273_v14 = vld [vmem:[%s22206_s10 + $0x4e8] ss:$24 sps:$4 sm:$0xff]  }
 0x376   : > { %v14044_v58 = vpop.f32.mrf.mxu0  ;;  %v19275_v10 = vld [vmem:[%s22206_s10 + $0x4ec] ss:$24 sps:$4 sm:$0xff]   ;;  %v19282_v43 = vld [vmem:[%s22206_s10 + $0x818] ss:$24 sps:$4 sm:$0xff]  }
 0x377   : > { %v14087_v24 = vpop.f32.mrf.mxu1  ;;  %v14045_v25 = vadd.f32 %v14044_v58, %v22903_v31  ;;  %14357 = vmatpush1.bf16.msra.mxu0 %v19213_v4  ;;  %v19233_v31 = vld [vmem:[%s22206_s10 + $0x33c] ss:$24 sps:$4 sm:$0xff]   ;;  %v19278_v13 = vld [vmem:[%s22206_s10 + $0x84c] ss:$24 sps:$4 sm:$0xff]  }
 0x378   : > { %14396 = vmatpush1.bf16.msra.mxu1 %v19216_v5  ;;  %14358 = vmatprep.subr.bf16.mxu0 %v19221_v16  ;;  %v19272_v4 = vld [vmem:[%s22206_s10 + $0x87c] ss:$24 sps:$4 sm:$0xff]   ;;  %v19267_v5 = vld [vmem:[%s22206_s10 + $0x518] ss:$24 sps:$4 sm:$0xff]   ;;  %v19276_v16 = vld [vmem:[%s22206_s10 + $0x848] ss:$24 sps:$4 sm:$0xff]  }
 0x379   : > { %14397 = vmatprep.subr.bf16.mxu1 %v19224_v17  ;;  %v22993_v30 = vadd.f32 %v14087_v24, %v14045_v25  ;;  %v19281_v17 = vld [vmem:[%s22206_s10 + $0x4bc] ss:$24 sps:$4 sm:$0xff]   ;;  %v19287_v58 = vld [vmem:[%s22206_s10 + $0x48c] ss:$24 sps:$4 sm:$0xff]   ;;  %v19285_v25 = vld [vmem:[%s22206_s10 + $0x488] ss:$24 sps:$4 sm:$0xff]  }
 0x37a   : > { %v19290_v24 = vld [vmem:[%s22206_s10 + $0x7ec] ss:$24 sps:$4 sm:$0xff]  }
 0x37b   : > { %14359 = vmatpush1.bf16.msra.mxu0 %v19219_v22  ;;  %v19284_v22 = vld [vmem:[%s22206_s10 + $0x81c] ss:$24 sps:$4 sm:$0xff]  }
 0x37c   : > { %14398 = vmatpush1.bf16.msra.mxu1 %v19222_v23  ;;  %14360 = vmatprep.subr.bf16.mxu0 %v19227_v28  ;;  %v19279_v23 = vld [vmem:[%s22206_s10 + $0x4b8] ss:$24 sps:$4 sm:$0xff]   ;;  %v19288_v28 = vld [vmem:[%s22206_s10 + $0x7e8] ss:$24 sps:$4 sm:$0xff]  }
 0x37d   : > { %14399 = vmatprep.subr.bf16.mxu1 %v19230_v29  ;;  %v19293_v29 = vld [vmem:[%s22206_s10 + $0x7bc] ss:$24 sps:$4 sm:$0xff]  }
 0x37f   : > { %14361 = vmatpush1.bf16.msra.mxu0 %v19225_v32  ;;  %v19296_v32 = vld [vmem:[%s22206_s10 + $0xa5c] ss:$24 sps:$4 sm:$0xff]  }
 0x380   : > { %14400 = vmatpush1.bf16.msra.mxu1 %v19228_v33  ;;  %14362 = vmatprep.subr.bf16.mxu0 %v19233_v31  ;;  %v19291_v33 = vld [vmem:[%s22206_s10 + $0x7b8] ss:$24 sps:$4 sm:$0xff]  }
 0x381   : > { %14401 = vmatprep.subr.bf16.mxu1 %v19236_v6  ;;  %v19294_v31 = vld [vmem:[%s22206_s10 + $0xa58] ss:$24 sps:$4 sm:$0xff]   ;;  %v19299_v6 = vld [vmem:[%s22206_s10 + $0x78c] ss:$24 sps:$4 sm:$0xff]  }
 0x383   : > { %14363 = vmatpush1.bf16.msra.mxu0 %v19231_v34  ;;  %v19302_v34 = vld [vmem:[%s22206_s10 + $0xa2c] ss:$24 sps:$4 sm:$0xff]  }
 0x384   : > { %14402 = vmatpush1.bf16.msra.mxu1 %v19234_v37  ;;  %14364 = vmatprep.subr.bf16.mxu0 %v19239_v41  ;;  %v19297_v37 = vld [vmem:[%s22206_s10 + $0x788] ss:$24 sps:$4 sm:$0xff]  }
 0x385   : > { %14403 = vmatprep.subr.bf16.mxu1 %v19242_v42  ;;  %v19300_v41 = vld [vmem:[%s22206_s10 + $0xa28] ss:$24 sps:$4 sm:$0xff]  }
 0x386   : > { %v20849_v42 = vld [vmem:[%s24555_s0 + $0x8] ss:$136 sps:$4 sm:$0xff]  }
 0x387   : > { %14365 = vmatpush1.bf16.msra.mxu0 %v19237_v44  ;;  %v19305_v44 = vld [vmem:[%s22206_s10 + $0x9fc] ss:$24 sps:$4 sm:$0xff]  }
 0x388   : > { %14404 = vmatpush1.bf16.msra.mxu1 %v19240_v45  ;;  %14366 = vmatprep.subr.bf16.mxu0 %v19245_v12  ;;  %v19308_v45 = vld [vmem:[%s22206_s10 + $0xd5c] ss:$24 sps:$4 sm:$0xff]   ;;  %v19303_v12 = vld [vmem:[%s22206_s10 + $0x9f8] ss:$24 sps:$4 sm:$0xff]  }
 0x389   : > { %14405 = vmatprep.subr.bf16.mxu1 %v19248_v46  ;;  %v19306_v46 = vld [vmem:[%s22206_s10 + $0xd58] ss:$24 sps:$4 sm:$0xff]  }
 0x38b   : > { %14367 = vmatpush2.bf16.msra.mxu0 %v19243_v49  ;;  %v20850_v49 = vld [vmem:[%s24555_s0 + $0x1c] ss:$136 sps:$4 sm:$0xff]  }
 0x38c   : > { %14406 = vmatpush1.bf16.msra.mxu1 %v19246_v50  ;;  %14368 = vmatprep.subr.bf16.mxu0 %v19251_v52  ;;  %v23055_v50 = vpop.f32.mrf.mxu0  ;;  %v23057_v52 = vpop.f32.mrf.mxu1 }
 0x38d   : > { %14407 = vmatprep.subr.bf16.mxu1 %v19254_v53  ;;  %v19311_v53 = vld [vmem:[%s22206_s10 + $0x9cc] ss:$24 sps:$4 sm:$0xff]  }
 0x38f   : > { %14369 = vmatpush2.bf16.msra.mxu0 %v19249_v54  ;;  %v19314_v54 = vld [vmem:[%s22206_s10 + $0xd2c] ss:$24 sps:$4 sm:$0xff]  }
 0x390   : > { %14408 = vmatpush1.bf16.msra.mxu1 %v19252_v55  ;;  %14370 = vmatprep.subr.bf16.mxu0 %v19257_v21  ;;  %v20851_v21 = vld [vmem:[%s24555_s0 + $0x10] ss:$136 sps:$4 sm:$0xff]  }
 0x391   : > { %14409 = vmatprep.subr.bf16.mxu1 %v19260_v56 }
 0x393   : > { %14371 = vmatpush2.bf16.msra.mxu0 %v19255_v57 }
 0x394   : > { %14410 = vmatpush2.bf16.msra.mxu1 %v19258_v59  ;;  %14372 = vmatprep.subr.bf16.mxu0 %v19263_v61  ;;  %v19309_v59 = vld [vmem:[%s22206_s10 + $0x9c8] ss:$24 sps:$4 sm:$0xff]  }
 0x395   : > { %14411 = vmatprep.subr.bf16.mxu1 %v19266_v62  ;;  %v19312_v61 = vld [vmem:[%s22206_s10 + $0xd28] ss:$24 sps:$4 sm:$0xff]  }
 0x397   : > { %14373 = vmatpush2.bf16.msra.mxu0 %v19261_v63 }
 0x398   : > { %14412 = vmatpush2.bf16.msra.mxu1 %v19264_v2  ;;  %14374 = vmatprep.subr.bf16.mxu0 %v19269_v3  ;;  %v19317_v2 = vld [vmem:[%s22206_s10 + $0x99c] ss:$24 sps:$4 sm:$0xff]  }
 0x399   : > { %14413 = vmatprep.subr.bf16.mxu1 %v19272_v4  ;;  %v19320_v3 = vld [vmem:[%s22206_s10 + $0xcfc] ss:$24 sps:$4 sm:$0xff]  }
 0x39b   : > { %14375 = vmatpush2.bf16.msra.mxu0 %v19267_v5 }
 0x39c   : > { %14414 = vmatpush2.bf16.msra.mxu1 %v19270_v9  ;;  %14376 = vmatprep.subr.bf16.mxu0 %v19275_v10 }
 0x39d   : > { %14415 = vmatprep.subr.bf16.mxu1 %v19278_v13  ;;  %v19315_v13 = vld [vmem:[%s22206_s10 + $0x998] ss:$24 sps:$4 sm:$0xff]  }
 0x39f   : > { %14377 = vmatpush2.bf16.msra.mxu0 %v19273_v14  ;;  %v19318_v14 = vld [vmem:[%s22206_s10 + $0xcf8] ss:$24 sps:$4 sm:$0xff]  }
 0x3a0   : > { %14416 = vmatpush2.bf16.msra.mxu1 %v19276_v16  ;;  %14378 = vmatprep.subr.bf16.mxu0 %v19281_v17  ;;  %v19323_v16 = vld [vmem:[%s22206_s10 + $0x96c] ss:$24 sps:$4 sm:$0xff]  }
 0x3a1   : > { %14417 = vmatprep.subr.bf16.mxu1 %v19284_v22  ;;  %v19326_v17 = vld [vmem:[%s22206_s10 + $0xccc] ss:$24 sps:$4 sm:$0xff]  }
 0x3a3   : > { %14379 = vmatpush2.bf16.msra.mxu0 %v19279_v23  ;;  %v19321_v23 = vld [vmem:[%s22206_s10 + $0x968] ss:$24 sps:$4 sm:$0xff]  }
 0x3a4   : > { %14418 = vmatpush2.bf16.msra.mxu1 %v19282_v43  ;;  %14380 = vmatprep.subr.bf16.mxu0 %v19287_v58  ;;  %v19329_v43 = vld [vmem:[%s22206_s10 + $0x93c] ss:$24 sps:$4 sm:$0xff]  }
 0x3a5   : > { %14419 = vmatprep.subr.bf16.mxu1 %v19290_v24  ;;  %v19332_v58 = vld [vmem:[%s22206_s10 + $0xc9c] ss:$24 sps:$4 sm:$0xff]   ;;  %v19327_v24 = vld [vmem:[%s22206_s10 + $0x938] ss:$24 sps:$4 sm:$0xff]  }
 0x3a7   : > { %14381 = vmatpush2.bf16.msra.mxu0 %v19285_v25  ;;  %v19330_v25 = vld [vmem:[%s22206_s10 + $0xc98] ss:$24 sps:$4 sm:$0xff]  }
 0x3a8   : > { %14420 = vmatpush2.bf16.msra.mxu1 %v19288_v28  ;;  %14436 = vmatprep.subr.bf16.mxu0 %v19296_v32  ;;  %v19335_v28 = vld [vmem:[%s22206_s10 + $0x90c] ss:$24 sps:$4 sm:$0xff]   ;;  %v19333_v32 = vld [vmem:[%s22206_s10 + $0x908] ss:$24 sps:$4 sm:$0xff]  }
 0x3a9   : > { %14421 = vmatprep.subr.bf16.mxu1 %v19293_v29  ;;  %v19338_v29 = vld [vmem:[%s22206_s10 + $0xc6c] ss:$24 sps:$4 sm:$0xff]  }
 0x3aa   : > { %14383 = vmatmul.mubr.bf16.vlgmr.msra.gmra.mxu0 %v20849_v42  ;;  %v19350_v42 = vld [vmem:[%s22206_s10 + $0xc0c] ss:$24 sps:$4 sm:$0xff]  }
 0x3ab   : > { %14437 = vmatpush1.bf16.msra.mxu0 %v19294_v31  ;;  %14468 = vmatprep.mubr.bf16.mxu0 %v20850_v49  ;;  %v19341_v31 = vld [vmem:[%s22206_s10 + $0xbdc] ss:$24 sps:$4 sm:$0xff]   ;;  %v19351_v49 = vld [vmem:[%s22206_s10 + $0xb78] ss:$24 sps:$4 sm:$0xff]  }
 0x3ac   : > { %14422 = vmatpush2.bf16.msra.mxu1 %v19291_v33  ;;  %14438 = vmatprep.subr.bf16.mxu0 %v19302_v34  ;;  %v19336_v33 = vld [vmem:[%s22206_s10 + $0xc68] ss:$24 sps:$4 sm:$0xff]   ;;  %v19339_v34 = vld [vmem:[%s22206_s10 + $0xbd8] ss:$24 sps:$4 sm:$0xff]  }
 0x3ad   : > { %14423 = vmatprep.subr.bf16.mxu1 %v19299_v6  ;;  %v19344_v6 = vld [vmem:[%s22206_s10 + $0xc3c] ss:$24 sps:$4 sm:$0xff]  }
 0x3af   : > { %14439 = vmatpush1.bf16.msra.mxu0 %v19300_v41  ;;  %v19347_v41 = vld [vmem:[%s22206_s10 + $0xbac] ss:$24 sps:$4 sm:$0xff]  }
 0x3b0   : > { %14424 = vmatpush2.bf16.msra.mxu1 %v19297_v37  ;;  %14440 = vmatprep.subr.bf16.mxu0 %v19305_v44  ;;  %v19342_v37 = vld [vmem:[%s22206_s10 + $0xc38] ss:$24 sps:$4 sm:$0xff]   ;;  %v19345_v44 = vld [vmem:[%s22206_s10 + $0xba8] ss:$24 sps:$4 sm:$0xff]  }
 0x3b1   : > { %14479 = vmatprep.subr.bf16.mxu1 %v19308_v45  ;;  %v19348_v45 = vld [vmem:[%s22206_s10 + $0xc08] ss:$24 sps:$4 sm:$0xff]  }
 0x3b2   : > { %v14126_v55 = vpop.f32.mrf.mxu0 }
 0x3b3   : > { %14426 = vmatmul.mubr.bf16.vlgmr.msra.gmra.mxu1 %v20851_v21  ;;  %v14169_v56 = vpop.f32.mrf.mxu1  ;;  %v14127_v57 = vadd.f32 %v14126_v55, %v22983_v19  ;;  %14441 = vmatpush1.bf16.msra.mxu0 %v19303_v12  ;;  %v20852_v19 = vld [vmem:[%s24555_s0 + $0x24] ss:$136 sps:$4 sm:$0xff]   ;;  %v19362_v55 = vld [vmem:[%s22206_s10 + $0xeac] ss:$24 sps:$4 sm:$0xff]   ;;  %v19357_v21 = vld [vmem:[%s22206_s10 + $0xb48] ss:$24 sps:$4 sm:$0xff]  }
 0x3b4   : > { %14480 = vmatpush1.bf16.msra.mxu1 %v19306_v46  ;;  %v23067_v62 = vpop.f32.mrf.mxu0  ;;  %14442 = vmatprep.subr.bf16.mxu0 %v19311_v53  ;;  %v19353_v12 = vld [vmem:[%s22206_s10 + $0xb7c] ss:$24 sps:$4 sm:$0xff]   ;;  %v19354_v53 = vld [vmem:[%s22206_s10 + $0xed8] ss:$24 sps:$4 sm:$0xff]  }
 0x3b5   : > { %v23069_v63 = vpop.f32.mrf.mxu1  ;;  %14481 = vmatprep.subr.bf16.mxu1 %v19314_v54  ;;  %v23073_v4 = vadd.f32 %v14169_v56, %v14127_v57  ;;  %14511 = vmatprep.mubr.bf16.mxu1 %v20852_v19  ;;  %v19356_v46 = vld [vmem:[%s22206_s10 + $0xedc] ss:$24 sps:$4 sm:$0xff]   ;;  %v19359_v54 = vld [vmem:[%s22206_s10 + $0xb4c] ss:$24 sps:$4 sm:$0xff]   ;;  %v19360_v56 = vld [vmem:[%s22206_s10 + $0xea8] ss:$24 sps:$4 sm:$0xff]  }
 0x3b6   : > { %v14130_v5 = vpop.f32.mrf.mxu0  ;;  %v19365_v57 = vld [vmem:[%s22206_s10 + $0xb1c] ss:$24 sps:$4 sm:$0xff]   ;;  %v19374_v19 = vld [vmem:[%s22206_s10 + $0xe4c] ss:$24 sps:$4 sm:$0xff]  }
 0x3b7   : > { %v14173_v9 = vpop.f32.mrf.mxu1  ;;  %v14131_v10 = vadd.f32 %v14130_v5, %v22993_v30  ;;  %14443 = vmatpush1.bf16.msra.mxu0 %v19309_v59  ;;  %v19324_v30 = vld [vmem:[%s22206_s10 + $0xcc8] ss:$24 sps:$4 sm:$0xff]   ;;  %v19368_v59 = vld [vmem:[%s22206_s10 + $0xe7c] ss:$24 sps:$4 sm:$0xff]  }
 0x3b8   : > { %14482 = vmatpush1.bf16.msra.mxu1 %v19312_v61  ;;  %14444 = vmatprep.subr.bf16.mxu0 %v19317_v2  ;;  %v19363_v61 = vld [vmem:[%s22206_s10 + $0xb18] ss:$24 sps:$4 sm:$0xff]   ;;  %v19369_v5 = vld [vmem:[%s22206_s10 + $0xae8] ss:$24 sps:$4 sm:$0xff]  }
 0x3b9   : > { %14483 = vmatprep.subr.bf16.mxu1 %v19320_v3  ;;  %v23083_v22 = vadd.f32 %v14173_v9, %v14131_v10  ;;  %v19366_v2 = vld [vmem:[%s22206_s10 + $0xe78] ss:$24 sps:$4 sm:$0xff]   ;;  %v19371_v3 = vld [vmem:[%s22206_s10 + $0xaec] ss:$24 sps:$4 sm:$0xff]   ;;  %v19372_v9 = vld [vmem:[%s22206_s10 + $0xe48] ss:$24 sps:$4 sm:$0xff]  }
 0x3ba   : > { %v19377_v10 = vld [vmem:[%s22206_s10 + $0xabc] ss:$24 sps:$4 sm:$0xff]  }
 0x3bb   : > { %14445 = vmatpush1.bf16.msra.mxu0 %v19315_v13  ;;  %v19380_v13 = vld [vmem:[%s22206_s10 + $0xe1c] ss:$24 sps:$4 sm:$0xff]  }
 0x3bc   : > { %14484 = vmatpush1.bf16.msra.mxu1 %v19318_v14  ;;  %14446 = vmatprep.subr.bf16.mxu0 %v19323_v16  ;;  %v19375_v14 = vld [vmem:[%s22206_s10 + $0xab8] ss:$24 sps:$4 sm:$0xff]  }
 0x3bd   : > { %14485 = vmatprep.subr.bf16.mxu1 %v19326_v17  ;;  %v19378_v16 = vld [vmem:[%s22206_s10 + $0xe18] ss:$24 sps:$4 sm:$0xff]   ;;  %v19383_v17 = vld [vmem:[%s22206_s10 + $0xa8c] ss:$24 sps:$4 sm:$0xff]  }
 0x3bf   : > { %14447 = vmatpush1.bf16.msra.mxu0 %v19321_v23  ;;  %v19386_v23 = vld [vmem:[%s22206_s10 + $0xdec] ss:$24 sps:$4 sm:$0xff]  }
 0x3c0   : > { %14486 = vmatpush1.bf16.msra.mxu1 %v19324_v30  ;;  %14448 = vmatprep.subr.bf16.mxu0 %v19329_v43  ;;  %v19381_v30 = vld [vmem:[%s22206_s10 + $0xa88] ss:$24 sps:$4 sm:$0xff]  }
 0x3c1   : > { %14487 = vmatprep.subr.bf16.mxu1 %v19332_v58  ;;  %v19384_v43 = vld [vmem:[%s22206_s10 + $0xde8] ss:$24 sps:$4 sm:$0xff]   ;;  %v19389_v58 = vld [vmem:[%s22206_s10 + $0xdbc] ss:$24 sps:$4 sm:$0xff]  }
 0x3c3   : > { %14449 = vmatpush1.bf16.msra.mxu0 %v19327_v24  ;;  %v19392_v24 = vld [vmem:[%s22206_s10 + $0x105c] ss:$24 sps:$4 sm:$0xff]  }
 0x3c4   : > { %14488 = vmatpush1.bf16.msra.mxu1 %v19330_v25  ;;  %14450 = vmatprep.subr.bf16.mxu0 %v19335_v28  ;;  %v19387_v25 = vld [vmem:[%s22206_s10 + $0xdb8] ss:$24 sps:$4 sm:$0xff]  }
 0x3c5   : > { %14489 = vmatprep.subr.bf16.mxu1 %v19338_v29  ;;  %v19390_v28 = vld [vmem:[%s22206_s10 + $0x1058] ss:$24 sps:$4 sm:$0xff]   ;;  %v19395_v29 = vld [vmem:[%s22206_s10 + $0xd8c] ss:$24 sps:$4 sm:$0xff]  }
 0x3c7   : > { %14451 = vmatpush1.bf16.msra.mxu0 %v19333_v32  ;;  %v19398_v32 = vld [vmem:[%s22206_s10 + $0x102c] ss:$24 sps:$4 sm:$0xff]  }
 0x3c8   : > { %14490 = vmatpush1.bf16.msra.mxu1 %v19336_v33  ;;  %14452 = vmatprep.subr.bf16.mxu0 %v19341_v31  ;;  %v19393_v33 = vld [vmem:[%s22206_s10 + $0xd88] ss:$24 sps:$4 sm:$0xff]  }
 0x3c9   : > { %14491 = vmatprep.subr.bf16.mxu1 %v19344_v6  ;;  %v19396_v31 = vld [vmem:[%s22206_s10 + $0x1028] ss:$24 sps:$4 sm:$0xff]  }
 0x3ca   : > { %v20853_v6 = vld [vmem:[%s24555_s0 + $0x18] ss:$136 sps:$4 sm:$0xff]  }
 0x3cb   : > { %14453 = vmatpush2.bf16.msra.mxu0 %v19339_v34  ;;  %v19401_v34 = vld [vmem:[%s22206_s10 + $0xffc] ss:$24 sps:$4 sm:$0xff]  }
 0x3cc   : > { %14492 = vmatpush1.bf16.msra.mxu1 %v19342_v37  ;;  %14454 = vmatprep.subr.bf16.mxu0 %v19347_v41  ;;  %v19404_v37 = vld [vmem:[%s22206_s10 + $0x135c] ss:$24 sps:$4 sm:$0xff]   ;;  %v19399_v41 = vld [vmem:[%s22206_s10 + $0xff8] ss:$24 sps:$4 sm:$0xff]  }
 0x3cd   : > { %14493 = vmatprep.subr.bf16.mxu1 %v19350_v42  ;;  %v19402_v42 = vld [vmem:[%s22206_s10 + $0x1358] ss:$24 sps:$4 sm:$0xff]  }
 0x3cf   : > { %14455 = vmatpush2.bf16.msra.mxu0 %v19345_v44  ;;  %v20854_v44 = vld [vmem:[%s24555_s0 + $0x2c] ss:$136 sps:$4 sm:$0xff]  }
 0x3d0   : > { %14494 = vmatpush1.bf16.msra.mxu1 %v19348_v45  ;;  %14456 = vmatprep.subr.bf16.mxu0 %v19353_v12  ;;  %v23145_v45 = vpop.f32.mrf.mxu0  ;;  %v23147_v12 = vpop.f32.mrf.mxu1 }
 0x3d1   : > { %14495 = vmatprep.subr.bf16.mxu1 %v19356_v46  ;;  %v19407_v46 = vld [vmem:[%s22206_s10 + $0xfcc] ss:$24 sps:$4 sm:$0xff]  }
 0x3d3   : > { %14457 = vmatpush2.bf16.msra.mxu0 %v19351_v49  ;;  %v19410_v49 = vld [vmem:[%s22206_s10 + $0x132c] ss:$24 sps:$4 sm:$0xff]  }
 0x3d4   : > { %14496 = vmatpush2.bf16.msra.mxu1 %v19354_v53  ;;  %14458 = vmatprep.subr.bf16.mxu0 %v19359_v54  ;;  %v19405_v53 = vld [vmem:[%s22206_s10 + $0xfc8] ss:$24 sps:$4 sm:$0xff]  }
 0x3d5   : > { %14497 = vmatprep.subr.bf16.mxu1 %v19362_v55  ;;  %v19408_v54 = vld [vmem:[%s22206_s10 + $0x1328] ss:$24 sps:$4 sm:$0xff]  }
 0x3d7   : > { %14459 = vmatpush2.bf16.msra.mxu0 %v19357_v21  ;;  %v20855_v21 = vld [vmem:[%s24555_s0 + $0x20] ss:$136 sps:$4 sm:$0xff]  }
 0x3d8   : > { %14498 = vmatpush2.bf16.msra.mxu1 %v19360_v56  ;;  %14460 = vmatprep.subr.bf16.mxu0 %v19365_v57 }
 0x3d9   : > { %14499 = vmatprep.subr.bf16.mxu1 %v19368_v59 }
 0x3db   : > { %14461 = vmatpush2.bf16.msra.mxu0 %v19363_v61 }
 0x3dc   : > { %14500 = vmatpush2.bf16.msra.mxu1 %v19366_v2  ;;  %14462 = vmatprep.subr.bf16.mxu0 %v19371_v3  ;;  %v19413_v2 = vld [vmem:[%s22206_s10 + $0xf9c] ss:$24 sps:$4 sm:$0xff]  }
 0x3dd   : > { %14501 = vmatprep.subr.bf16.mxu1 %v19374_v19  ;;  %v19416_v3 = vld [vmem:[%s22206_s10 + $0x12fc] ss:$24 sps:$4 sm:$0xff]  }
 0x3df   : > { %14463 = vmatpush2.bf16.msra.mxu0 %v19369_v5  ;;  %v19411_v5 = vld [vmem:[%s22206_s10 + $0xf98] ss:$24 sps:$4 sm:$0xff]  }
 0x3e0   : > { %14502 = vmatpush2.bf16.msra.mxu1 %v19372_v9  ;;  %14464 = vmatprep.subr.bf16.mxu0 %v19377_v10  ;;  %v19414_v9 = vld [vmem:[%s22206_s10 + $0x12f8] ss:$24 sps:$4 sm:$0xff]  }
 0x3e1   : > { %14503 = vmatprep.subr.bf16.mxu1 %v19380_v13 }
 0x3e3   : > { %14465 = vmatpush2.bf16.msra.mxu0 %v19375_v14 }
 0x3e4   : > { %14504 = vmatpush2.bf16.msra.mxu1 %v19378_v16  ;;  %14466 = vmatprep.subr.bf16.mxu0 %v19383_v17  ;;  %v19419_v16 = vld [vmem:[%s22206_s10 + $0xf6c] ss:$24 sps:$4 sm:$0xff]  }
 0x3e5   : > { %14505 = vmatprep.subr.bf16.mxu1 %v19386_v23  ;;  %v19422_v17 = vld [vmem:[%s22206_s10 + $0x12cc] ss:$24 sps:$4 sm:$0xff]  }
 0x3e7   : > { %14467 = vmatpush2.bf16.msra.mxu0 %v19381_v30  ;;  %v19417_v30 = vld [vmem:[%s22206_s10 + $0xf68] ss:$24 sps:$4 sm:$0xff]  }
 0x3e8   : > { %14506 = vmatpush2.bf16.msra.mxu1 %v19384_v43  ;;  %14522 = vmatprep.subr.bf16.mxu0 %v19392_v24  ;;  %v19420_v43 = vld [vmem:[%s22206_s10 + $0x12c8] ss:$24 sps:$4 sm:$0xff]   ;;  %v19423_v24 = vld [vmem:[%s22206_s10 + $0xf38] ss:$24 sps:$4 sm:$0xff]  }
 0x3e9   : > { %14507 = vmatprep.subr.bf16.mxu1 %v19389_v58  ;;  %v19428_v58 = vld [vmem:[%s22206_s10 + $0x129c] ss:$24 sps:$4 sm:$0xff]  }
 0x3ea   : > { %14469 = vmatmul.mubr.bf16.vlgmr.msra.gmra.mxu0 %v20853_v6  ;;  %v19440_v6 = vld [vmem:[%s22206_s10 + $0x123c] ss:$24 sps:$4 sm:$0xff]  }
 0x3eb   : > { %14523 = vmatpush1.bf16.msra.mxu0 %v19390_v28  ;;  %14554 = vmatprep.mubr.bf16.mxu0 %v20854_v44  ;;  %v19431_v28 = vld [vmem:[%s22206_s10 + $0xf0c] ss:$24 sps:$4 sm:$0xff]  }
 0x3ec   : > { %14508 = vmatpush2.bf16.msra.mxu1 %v19387_v25  ;;  %14524 = vmatprep.subr.bf16.mxu0 %v19398_v32  ;;  %v19426_v25 = vld [vmem:[%s22206_s10 + $0x1298] ss:$24 sps:$4 sm:$0xff]   ;;  %v19429_v32 = vld [vmem:[%s22206_s10 + $0xf08] ss:$24 sps:$4 sm:$0xff]   ;;  %v19446_v44 = vld [vmem:[%s22206_s10 + $0x120c] ss:$24 sps:$4 sm:$0xff]  }
 0x3ed   : > { %14509 = vmatprep.subr.bf16.mxu1 %v19395_v29  ;;  %v19434_v29 = vld [vmem:[%s22206_s10 + $0x126c] ss:$24 sps:$4 sm:$0xff]  }
 0x3ef   : > { %14525 = vmatpush1.bf16.msra.mxu0 %v19396_v31  ;;  %v19437_v31 = vld [vmem:[%s22206_s10 + $0x11dc] ss:$24 sps:$4 sm:$0xff]  }
 0x3f0   : > { %14510 = vmatpush2.bf16.msra.mxu1 %v19393_v33  ;;  %14526 = vmatprep.subr.bf16.mxu0 %v19401_v34  ;;  %v19432_v33 = vld [vmem:[%s22206_s10 + $0x1268] ss:$24 sps:$4 sm:$0xff]   ;;  %v13703_v34 = vadd.f32 %v22694_v35, %v22548_v20 }
 0x3f1   : > { %14565 = vmatprep.subr.bf16.mxu1 %v19404_v37  ;;  %v19435_v37 = vld [vmem:[%s22206_s10 + $0x11d8] ss:$24 sps:$4 sm:$0xff]   ;;  %v19441_v20 = vld [vmem:[%s22206_s10 + $0x11a8] ss:$24 sps:$4 sm:$0xff]  }
 0x3f2   : > { %v14212_v55 = vpop.f32.mrf.mxu0  ;;  %v19444_v35 = vld [vmem:[%s22206_s10 + $0x1208] ss:$24 sps:$4 sm:$0xff]  }
 0x3f3   : > { %14512 = vmatmul.mubr.bf16.vlgmr.msra.gmra.mxu1 %v20855_v21  ;;  %v14255_v56 = vpop.f32.mrf.mxu1  ;;  %v14213_v57 = vadd.f32 %v14212_v55, %v23073_v4  ;;  %14527 = vmatpush1.bf16.msra.mxu0 %v19399_v41  ;;  %v20856_v4 = vld [vmem:[%s24555_s0 + $0x34] ss:$136 sps:$4 sm:$0xff]   ;;  %v19438_v41 = vld [vmem:[%s22206_s10 + $0x1238] ss:$24 sps:$4 sm:$0xff]  }
 0x3f4   : > { %14566 = vmatpush1.bf16.msra.mxu1 %v19402_v42  ;;  %v23157_v59 = vpop.f32.mrf.mxu0  ;;  %14528 = vmatprep.subr.bf16.mxu0 %v19407_v46  ;;  %v19443_v42 = vld [vmem:[%s22206_s10 + $0x11ac] ss:$24 sps:$4 sm:$0xff]   ;;  %v13785_v46 = vadd.f32 %v22709_v47, %v22628_v36  ;;  %v19447_v36 = vld [vmem:[%s22206_s10 + $0x1178] ss:$24 sps:$4 sm:$0xff]  }
 0x3f5   : > { %v23159_v61 = vpop.f32.mrf.mxu1  ;;  %14567 = vmatprep.subr.bf16.mxu1 %v19410_v49  ;;  %v23163_v19 = vadd.f32 %v14255_v56, %v14213_v57  ;;  %14597 = vmatprep.mubr.bf16.mxu1 %v20856_v4  ;;  %v13746_v49 = vadd.f32 %v22696_v11, %v13703_v34  ;;  %v19450_v11 = vld [vmem:[%s22206_s10 + $0x14d8] ss:$24 sps:$4 sm:$0xff]   ;;  %v19455_v56 = vld [vmem:[%s22206_s10 + $0x114c] ss:$24 sps:$4 sm:$0xff]  }
 0x3f6   : > { %v14216_v10 = vpop.f32.mrf.mxu0  ;;  %v13828_v21 = vadd.f32 %v22711_v48, %v13785_v46  ;;  %v19458_v57 = vld [vmem:[%s22206_s10 + $0x14ac] ss:$24 sps:$4 sm:$0xff]   ;;  %v19453_v48 = vld [vmem:[%s22206_s10 + $0x1148] ss:$24 sps:$4 sm:$0xff]  }
 0x3f7   : > { %v14259_v13 = vpop.f32.mrf.mxu1  ;;  %v14217_v14 = vadd.f32 %v14216_v10, %v23083_v22  ;;  %14529 = vmatpush1.bf16.msra.mxu0 %v19405_v53  ;;  %v19425_v22 = vld [vmem:[%s22206_s10 + $0xf3c] ss:$24 sps:$4 sm:$0xff]   ;;  %v13789_v55 = vadd.f32 %v22784_v60, %v13746_v49  ;;  %v19462_v10 = vld [vmem:[%s22206_s10 + $0x1478] ss:$24 sps:$4 sm:$0xff]  }
 0x3f8   : > { %14568 = vmatpush1.bf16.msra.mxu1 %v19408_v54  ;;  %14530 = vmatprep.subr.bf16.mxu0 %v19413_v2  ;;  %v19449_v53 = vld [vmem:[%s22206_s10 + $0x117c] ss:$24 sps:$4 sm:$0xff]   ;;  %v13871_v47 = vadd.f32 %v22799_v7, %v13828_v21  ;;  %v14218_v34 = vpop.f32.mrf.mxu0  ;;  %v19498_v21 = vld [vmem:[%s22206_s10 + $0x1958] ss:$24 sps:$4 sm:$0xff]  }
 0x3f9   : > { %14569 = vmatprep.subr.bf16.mxu1 %v19416_v3  ;;  %v23173_v23 = vadd.f32 %v14259_v13, %v14217_v14  ;;  %v19452_v54 = vld [vmem:[%s22206_s10 + $0x14dc] ss:$24 sps:$4 sm:$0xff]   ;;  %v13832_v2 = vadd.f32 %v22786_v38, %v13789_v55  ;;  %v19456_v3 = vld [vmem:[%s22206_s10 + $0x14a8] ss:$24 sps:$4 sm:$0xff]   ;;  %v19467_v13 = vld [vmem:[%s22206_s10 + $0x10ec] ss:$24 sps:$4 sm:$0xff]  }
 0x3fa   : > { %v19461_v7 = vld [vmem:[%s22206_s10 + $0x111c] ss:$24 sps:$4 sm:$0xff]   ;;  %v19495_v55 = vld [vmem:[%s22206_s10 + $0x15f8] ss:$24 sps:$4 sm:$0xff]  }
 0x3fb   : > { %14531 = vmatpush1.bf16.msra.mxu0 %v19411_v5  ;;  %v13875_v60 = vadd.f32 %v22874_v26, %v13832_v2  ;;  %v13914_v5 = vadd.f32 %v22801_v8, %v13871_v47  ;;  %v19459_v26 = vld [vmem:[%s22206_s10 + $0x1118] ss:$24 sps:$4 sm:$0xff]   ;;  %v19470_v8 = vld [vmem:[%s22206_s10 + $0x144c] ss:$24 sps:$4 sm:$0xff]  }
 0x3fc   : > { %14570 = vmatpush1.bf16.msra.mxu1 %v19414_v9  ;;  %14532 = vmatprep.subr.bf16.mxu0 %v19419_v16  ;;  %v19464_v9 = vld [vmem:[%s22206_s10 + $0x147c] ss:$24 sps:$4 sm:$0xff]   ;;  %v19506_v2 = vld [vmem:[%s22206_s10 + $0x192c] ss:$24 sps:$4 sm:$0xff]  }
 0x3fd   : > { %14571 = vmatprep.subr.bf16.mxu1 %v19422_v17  ;;  %v13957_v4 = vadd.f32 %v22886_v39, %v13914_v5  ;;  %v13918_v38 = vadd.f32 %v22876_v27, %v13875_v60  ;;  %v19465_v39 = vld [vmem:[%s22206_s10 + $0x10e8] ss:$24 sps:$4 sm:$0xff]   ;;  %v19509_v5 = vld [vmem:[%s22206_s10 + $0x159c] ss:$24 sps:$4 sm:$0xff]  }
 0x3fe   : > { %v19468_v27 = vld [vmem:[%s22206_s10 + $0x1448] ss:$24 sps:$4 sm:$0xff]  }
 0x3ff   : > { %14533 = vmatpush1.bf16.msra.mxu0 %v19417_v30  ;;  %v13961_v14 = vadd.f32 %v22965_v0, %v13918_v38  ;;  %v14000_v16 = vadd.f32 %v22888_v18, %v13957_v4  ;;  %v19473_v30 = vld [vmem:[%s22206_s10 + $0x10bc] ss:$24 sps:$4 sm:$0xff]   ;;  %v19471_v18 = vld [vmem:[%s22206_s10 + $0x10b8] ss:$24 sps:$4 sm:$0xff]  }
 0x400   : > { %14572 = vmatpush1.bf16.msra.mxu1 %v19420_v43  ;;  %14534 = vmatprep.subr.bf16.mxu0 %v19425_v22  ;;  %v19476_v43 = vld [vmem:[%s22206_s10 + $0x141c] ss:$24 sps:$4 sm:$0xff]   ;;  %v19510_v4 = vld [vmem:[%s22206_s10 + $0x18f8] ss:$24 sps:$4 sm:$0xff]  }
 0x401   : > { %14573 = vmatprep.subr.bf16.mxu1 %v19428_v58  ;;  %v14043_v17 = vadd.f32 %v22977_v51, %v14000_v16  ;;  %v14004_v22 = vadd.f32 %v22967_v1, %v13961_v14  ;;  %v19474_v58 = vld [vmem:[%s22206_s10 + $0x1418] ss:$24 sps:$4 sm:$0xff]   ;;  %v19479_v51 = vld [vmem:[%s22206_s10 + $0x108c] ss:$24 sps:$4 sm:$0xff]   ;;  %v20860_v38 = vld [vmem:[%s24555_s0 + $0x44] ss:$136 sps:$4 sm:$0xff]  }
 0x402   : > { %v19521_v14 = vld [vmem:[%s22206_s10 + $0x153c] ss:$24 sps:$4 sm:$0xff]  }
 0x403   : > { %14535 = vmatpush1.bf16.msra.mxu0 %v19423_v24  ;;  %v14047_v0 = vadd.f32 %v23055_v50, %v14004_v22  ;;  %v14086_v24 = vadd.f32 %v22979_v15, %v14043_v17  ;;  %v19477_v50 = vld [vmem:[%s22206_s10 + $0x1088] ss:$24 sps:$4 sm:$0xff]   ;;  %v19485_v15 = vld [vmem:[%s22206_s10 + $0x13bc] ss:$24 sps:$4 sm:$0xff]  }
 0x404   : > { %14574 = vmatpush1.bf16.msra.mxu1 %v19426_v25  ;;  %14536 = vmatprep.subr.bf16.mxu0 %v19431_v28  ;;  %v19482_v25 = vld [vmem:[%s22206_s10 + $0x13ec] ss:$24 sps:$4 sm:$0xff]   ;;  %v19524_v16 = vld [vmem:[%s22206_s10 + $0x189c] ss:$24 sps:$4 sm:$0xff]  }
 0x405   : > { %14575 = vmatprep.subr.bf16.mxu1 %v19434_v29  ;;  %v14129_v28 = vadd.f32 %v23067_v62, %v14086_v24  ;;  %v14090_v1 = vadd.f32 %v23057_v52, %v14047_v0  ;;  %v19480_v29 = vld [vmem:[%s22206_s10 + $0x13e8] ss:$24 sps:$4 sm:$0xff]  }
 0x407   : > { %14537 = vmatpush1.bf16.msra.mxu0 %v19429_v32  ;;  %v19488_v32 = vld [vmem:[%s22206_s10 + $0x165c] ss:$24 sps:$4 sm:$0xff]   ;;  %v14172_v62 = vadd.f32 %v23069_v63, %v14129_v28  ;;  %v20857_v63 = vld [vmem:[%s24555_s0 + $0x28] ss:$136 sps:$4 sm:$0xff]  }
 0x408   : > { %14576 = vmatpush1.bf16.msra.mxu1 %v19432_v33  ;;  %14538 = vmatprep.subr.bf16.mxu0 %v19437_v31  ;;  %v14133_v33 = vadd.f32 %v23145_v45, %v14090_v1  ;;  %v19483_v31 = vld [vmem:[%s22206_s10 + $0x13b8] ss:$24 sps:$4 sm:$0xff]   ;;  %v19492_v45 = vld [vmem:[%s22206_s10 + $0x1628] ss:$24 sps:$4 sm:$0xff]   ;;  %v19533_v28 = vld [vmem:[%s22206_s10 + $0x17dc] ss:$24 sps:$4 sm:$0xff]  }
 0x409   : > { %14577 = vmatprep.subr.bf16.mxu1 %v19440_v6  ;;  %v19486_v6 = vld [vmem:[%s22206_s10 + $0x1658] ss:$24 sps:$4 sm:$0xff]   ;;  %v14215_v52 = vadd.f32 %v23157_v59, %v14172_v62  ;;  %v19536_v1 = vld [vmem:[%s22206_s10 + $0x183c] ss:$24 sps:$4 sm:$0xff]  }
 0x40a   : > { %v19548_v62 = vld [vmem:[%s22206_s10 + $0x1adc] ss:$24 sps:$4 sm:$0xff]  }
 0x40b   : > { %14539 = vmatpush2.bf16.msra.mxu0 %v19435_v37  ;;  %v19491_v37 = vld [vmem:[%s22206_s10 + $0x138c] ss:$24 sps:$4 sm:$0xff]  }
 0x40c   : > { %14578 = vmatpush1.bf16.msra.mxu1 %v19438_v41  ;;  %14540 = vmatprep.subr.bf16.mxu0 %v19443_v42  ;;  %v19494_v41 = vld [vmem:[%s22206_s10 + $0x162c] ss:$24 sps:$4 sm:$0xff]   ;;  %v14176_v42 = vadd.f32 %v23147_v12, %v14133_v33  ;;  %v19537_v33 = vld [vmem:[%s22206_s10 + $0x17a8] ss:$24 sps:$4 sm:$0xff]  }
 0x40d   : > { %14579 = vmatprep.subr.bf16.mxu1 %v19446_v44  ;;  %v19489_v44 = vld [vmem:[%s22206_s10 + $0x1388] ss:$24 sps:$4 sm:$0xff]  }
 0x40e   : > { %v14219_v59 = vadd.f32 %v14218_v34, %v14176_v42  ;;  %v19546_v34 = vld [vmem:[%s22206_s10 + $0x1ad8] ss:$24 sps:$4 sm:$0xff]   ;;  %v19549_v42 = vld [vmem:[%s22206_s10 + $0x1748] ss:$24 sps:$4 sm:$0xff]  }
 0x40f   : > { %14541 = vmatpush2.bf16.msra.mxu0 %v19441_v20  ;;  %v14258_v20 = vadd.f32 %v23159_v61, %v14215_v52  ;;  %v19543_v52 = vld [vmem:[%s22206_s10 + $0x1778] ss:$24 sps:$4 sm:$0xff]  }
 0x410   : > { %14580 = vmatpush1.bf16.msra.mxu1 %v19444_v35  ;;  %14542 = vmatprep.subr.bf16.mxu0 %v19449_v53  ;;  %v14261_v35 = vpop.f32.mrf.mxu1  ;;  %v19497_v53 = vld [vmem:[%s22206_s10 + $0x15fc] ss:$24 sps:$4 sm:$0xff]  }
 0x411   : > { %14581 = vmatprep.subr.bf16.mxu1 %v19452_v54  ;;  %v19500_v54 = vld [vmem:[%s22206_s10 + $0x195c] ss:$24 sps:$4 sm:$0xff]   ;;  %v14262_v61 = vadd.f32 %v14261_v35, %v14219_v59  ;;  %v19558_v59 = vld [vmem:[%s22206_s10 + $0x1a78] ss:$24 sps:$4 sm:$0xff]   ;;  %v19561_v35 = vld [vmem:[%s22206_s10 + $0x16e8] ss:$24 sps:$4 sm:$0xff]  }
 0x413   : > { %14543 = vmatpush2.bf16.msra.mxu0 %v19447_v36  ;;  %v20858_v36 = vld [vmem:[%s24555_s0 + $0x3c] ss:$136 sps:$4 sm:$0xff]  }
 0x414   : > { %14582 = vmatpush2.bf16.msra.mxu1 %v19450_v11  ;;  %14544 = vmatprep.subr.bf16.mxu0 %v19455_v56 }
 0x415   : > { %14583 = vmatprep.subr.bf16.mxu1 %v19458_v57  ;;  %v19503_v57 = vld [vmem:[%s22206_s10 + $0x15cc] ss:$24 sps:$4 sm:$0xff]  }
 0x417   : > { %14545 = vmatpush2.bf16.msra.mxu0 %v19453_v48  ;;  %v19501_v48 = vld [vmem:[%s22206_s10 + $0x15c8] ss:$24 sps:$4 sm:$0xff]  }
 0x418   : > { %14584 = vmatpush2.bf16.msra.mxu1 %v19456_v3  ;;  %14546 = vmatprep.subr.bf16.mxu0 %v19461_v7  ;;  %v19504_v3 = vld [vmem:[%s22206_s10 + $0x1928] ss:$24 sps:$4 sm:$0xff]   ;;  %v19512_v7 = vld [vmem:[%s22206_s10 + $0x18fc] ss:$24 sps:$4 sm:$0xff]  }
 0x419   : > { %14585 = vmatprep.subr.bf16.mxu1 %v19464_v9  ;;  %v19507_v9 = vld [vmem:[%s22206_s10 + $0x1598] ss:$24 sps:$4 sm:$0xff]  }
 0x41b   : > { %14547 = vmatpush2.bf16.msra.mxu0 %v19459_v26  ;;  %v19515_v26 = vld [vmem:[%s22206_s10 + $0x156c] ss:$24 sps:$4 sm:$0xff]  }
 0x41c   : > { %14586 = vmatpush2.bf16.msra.mxu1 %v19462_v10  ;;  %14548 = vmatprep.subr.bf16.mxu0 %v19467_v13  ;;  %v19518_v10 = vld [vmem:[%s22206_s10 + $0x18cc] ss:$24 sps:$4 sm:$0xff]   ;;  %v19513_v13 = vld [vmem:[%s22206_s10 + $0x1568] ss:$24 sps:$4 sm:$0xff]  }
 0x41d   : > { %14587 = vmatprep.subr.bf16.mxu1 %v19470_v8  ;;  %v19516_v8 = vld [vmem:[%s22206_s10 + $0x18c8] ss:$24 sps:$4 sm:$0xff]  }
 0x41f   : > { %14549 = vmatpush2.bf16.msra.mxu0 %v19465_v39 }
 0x420   : > { %14588 = vmatpush2.bf16.msra.mxu1 %v19468_v27  ;;  %14550 = vmatprep.subr.bf16.mxu0 %v19473_v30  ;;  %v19519_v30 = vld [vmem:[%s22206_s10 + $0x1538] ss:$24 sps:$4 sm:$0xff]  }
 0x421   : > { %14589 = vmatprep.subr.bf16.mxu1 %v19476_v43  ;;  %v19522_v43 = vld [vmem:[%s22206_s10 + $0x1898] ss:$24 sps:$4 sm:$0xff]  }
 0x423   : > { %14551 = vmatpush2.bf16.msra.mxu0 %v19471_v18  ;;  %v19527_v18 = vld [vmem:[%s22206_s10 + $0x150c] ss:$24 sps:$4 sm:$0xff]  }
 0x424   : > { %14590 = vmatpush2.bf16.msra.mxu1 %v19474_v58  ;;  %14552 = vmatprep.subr.bf16.mxu0 %v19479_v51  ;;  %v19530_v58 = vld [vmem:[%s22206_s10 + $0x186c] ss:$24 sps:$4 sm:$0xff]   ;;  %v19525_v51 = vld [vmem:[%s22206_s10 + $0x1508] ss:$24 sps:$4 sm:$0xff]  }
 0x425   : > { %14591 = vmatprep.subr.bf16.mxu1 %v19482_v25  ;;  %v19528_v25 = vld [vmem:[%s22206_s10 + $0x1868] ss:$24 sps:$4 sm:$0xff]  }
 0x427   : > { %14553 = vmatpush2.bf16.msra.mxu0 %v19477_v50  ;;  %v19531_v50 = vld [vmem:[%s22206_s10 + $0x17d8] ss:$24 sps:$4 sm:$0xff]  }
 0x428   : > { %14592 = vmatpush2.bf16.msra.mxu1 %v19480_v29  ;;  %14608 = vmatprep.subr.bf16.mxu0 %v19488_v32  ;;  %v19534_v29 = vld [vmem:[%s22206_s10 + $0x1838] ss:$24 sps:$4 sm:$0xff]   ;;  %v19542_v32 = vld [vmem:[%s22206_s10 + $0x180c] ss:$24 sps:$4 sm:$0xff]  }
 0x429   : > { %14593 = vmatprep.subr.bf16.mxu1 %v19485_v15  ;;  %v19539_v15 = vld [vmem:[%s22206_s10 + $0x17ac] ss:$24 sps:$4 sm:$0xff]  }
 0x42a   : > { %v14298_v46 = vpop.f32.mrf.mxu0  ;;  %14555 = vmatmul.mubr.bf16.vlgmr.msra.gmra.mxu0 %v20857_v63  ;;  %v19555_v63 = vld [vmem:[%s22206_s10 + $0x1718] ss:$24 sps:$4 sm:$0xff]  }
 0x42b   : > { %v14299_v49 = vadd.f32 %v14298_v46, %v23163_v19  ;;  %14609 = vmatpush1.bf16.msra.mxu0 %v19486_v6  ;;  %14640 = vmatprep.mubr.bf16.mxu0 %v20858_v36  ;;  %v19545_v6 = vld [vmem:[%s22206_s10 + $0x177c] ss:$24 sps:$4 sm:$0xff]   ;;  %v5283_v36 = vsub.s32 2, %v22506_v40 }
 0x42c   : > { %14594 = vmatpush2.bf16.msra.mxu1 %v19483_v31  ;;  %v14300_v12 = vpop.f32.mrf.mxu0  ;;  %14610 = vmatprep.subr.bf16.mxu0 %v19494_v41  ;;  %v19540_v31 = vld [vmem:[%s22206_s10 + $0x1808] ss:$24 sps:$4 sm:$0xff]   ;;  %v19554_v41 = vld [vmem:[%s22206_s10 + $0x1aac] ss:$24 sps:$4 sm:$0xff]   ;;  %v19560_v46 = vld [vmem:[%s22206_s10 + $0x1a7c] ss:$24 sps:$4 sm:$0xff]  }
 0x42d   : > { %14595 = vmatprep.subr.bf16.mxu1 %v19491_v37  ;;  %v14301_v19 = vadd.f32 %v14300_v12, %v14258_v20  ;;  %20821 = vtanh.f32 %v14299_v49  ;;  %v19551_v37 = vld [vmem:[%s22206_s10 + $0x174c] ss:$24 sps:$4 sm:$0xff]   ;;  %v19564_v12 = vld [vmem:[%s22206_s10 + $0x1a48] ss:$24 sps:$4 sm:$0xff]  }
 0x42e   : > { %v14302_v11 = vpop.f32.mrf.mxu0  ;;  %v19563_v49 = vld [vmem:[%s22206_s10 + $0x16ec] ss:$24 sps:$4 sm:$0xff]  }
 0x42f   : > { %v14303_v47 = vadd.f32 %v14302_v11, %v23173_v23  ;;  %14611 = vmatpush1.bf16.msra.mxu0 %v19492_v45  ;;  %v20859_v23 = vld [vmem:[%s24555_s0 + $0x30] ss:$136 sps:$4 sm:$0xff]   ;;  %v19557_v45 = vld [vmem:[%s22206_s10 + $0x171c] ss:$24 sps:$4 sm:$0xff]   ;;  %v19566_v20 = vld [vmem:[%s22206_s10 + $0x1a4c] ss:$24 sps:$4 sm:$0xff]  }
 0x430   : > { %14596 = vmatpush2.bf16.msra.mxu1 %v19489_v44  ;;  %v14304_v56 = vpop.f32.mrf.mxu0  ;;  %14612 = vmatprep.subr.bf16.mxu0 %v19497_v53  ;;  %v19552_v44 = vld [vmem:[%s22206_s10 + $0x1aa8] ss:$24 sps:$4 sm:$0xff]   ;;  %v19569_v53 = vld [vmem:[%s22206_s10 + $0x16bc] ss:$24 sps:$4 sm:$0xff]   ;;  %v19578_v11 = vld [vmem:[%s22206_s10 + $0x19ec] ss:$24 sps:$4 sm:$0xff]  }
 0x431   : > { %14651 = vmatprep.subr.bf16.mxu1 %v19500_v54  ;;  %20823 = vtanh.f32 %v14303_v47  ;;  %v14305_v60 = vadd.f32 %v14304_v56, %v14262_v61  ;;  %v19572_v54 = vld [vmem:[%s22206_s10 + $0x1a1c] ss:$24 sps:$4 sm:$0xff]   ;;  %v19573_v56 = vld [vmem:[%s22206_s10 + $0x1688] ss:$24 sps:$4 sm:$0xff]  }
 0x432   : > { %20825 = vtanh.f32 %v14301_v19  ;;  %v19575_v19 = vld [vmem:[%s22206_s10 + $0x168c] ss:$24 sps:$4 sm:$0xff]   ;;  %v20861_v61 = vld [vmem:[%s22199_s29] sm:$0x3f] }
 0x433   : > { %14598 = vmatmul.mubr.bf16.vlgmr.msra.gmra.mxu1 %v20859_v23  ;;  %20827 = vtanh.f32 %v14305_v60  ;;  %14613 = vmatpush1.bf16.msra.mxu0 %v19495_v55  ;;  %v19567_v55 = vld [vmem:[%s22206_s10 + $0x16b8] ss:$24 sps:$4 sm:$0xff]   ;;  %v23333_v47 = vrot.slane %v20861_v61, %v5283_v36  ;;  %v19581_v60 = vld [vmem:[%s22206_s10 + $0x19bc] ss:$24 sps:$4 sm:$0xff]   ;;  %v19638_v36 = vld [vmem:[%s22206_s10 + $0x1e0c] ss:$24 sps:$4 sm:$0xff]  }
 0x434   : > { %14652 = vmatpush1.bf16.msra.mxu1 %v19498_v21  ;;  %14614 = vmatprep.subr.bf16.mxu0 %v19503_v57  ;;  %v19570_v21 = vld [vmem:[%s22206_s10 + $0x1a18] ss:$24 sps:$4 sm:$0xff]   ;;  %v19576_v57 = vld [vmem:[%s22206_s10 + $0x19e8] ss:$24 sps:$4 sm:$0xff]   ;;  %v19641_v61 = vld [vmem:[%s22206_s10 + $0x1d7c] ss:$24 sps:$4 sm:$0xff]  }
 0x435   : > { %14653 = vmatprep.subr.bf16.mxu1 %v19506_v2  ;;  %14683 = vmatprep.mubr.bf16.mxu1 %v20860_v38  ;;  %v14341_v2 = vpop.f32.mrf.mxu1  ;;  %v19582_v23 = vld [vmem:[%s22206_s10 + $0x1c58] ss:$24 sps:$4 sm:$0xff]   ;;  %v19585_v38 = vld [vmem:[%s22206_s10 + $0x1988] ss:$24 sps:$4 sm:$0xff]  }
 0x437   : > { %14615 = vmatpush1.bf16.msra.mxu0 %v19501_v48  ;;  %v19584_v48 = vld [vmem:[%s22206_s10 + $0x1c5c] ss:$24 sps:$4 sm:$0xff]  }
 0x438   : > { %14654 = vmatpush1.bf16.msra.mxu1 %v19504_v3  ;;  %14616 = vmatprep.subr.bf16.mxu0 %v19509_v5  ;;  %v19579_v3 = vld [vmem:[%s22206_s10 + $0x19b8] ss:$24 sps:$4 sm:$0xff]   ;;  %v14342_v5 = vadd.f32 %v14341_v2, %v23333_v47 }
 0x439   : > { %14655 = vmatprep.subr.bf16.mxu1 %v19512_v7  ;;  %v23342_v7 = vpop.f32.mrf.mxu1  ;;  %v19642_v2 = vld [vmem:[%s22206_s10 + $0x20d8] ss:$24 sps:$4 sm:$0xff]  }
 0x43a   : > { %v23283_v39 = vpop.eup %20821 }
 0x43b   : > { %14617 = vmatpush1.bf16.msra.mxu0 %v19507_v9  ;;  %v19587_v9 = vld [vmem:[%s22206_s10 + $0x198c] ss:$24 sps:$4 sm:$0xff]  }
 0x43c   : > { %14656 = vmatpush1.bf16.msra.mxu1 %v19510_v4  ;;  %14618 = vmatprep.subr.bf16.mxu0 %v19515_v26  ;;  %v19590_v4 = vld [vmem:[%s22206_s10 + $0x1c2c] ss:$24 sps:$4 sm:$0xff]   ;;  %v19588_v26 = vld [vmem:[%s22206_s10 + $0x1c28] ss:$24 sps:$4 sm:$0xff]  }
 0x43d   : > { %14657 = vmatprep.subr.bf16.mxu1 %v19518_v10 }
 0x43e   : > { %v23285_v27 = vpop.eup %20823 }
 0x43f   : > { %v23287_v17 = vpop.eup %20825  ;;  %14619 = vmatpush1.bf16.msra.mxu0 %v19513_v13  ;;  %v20862_v13 = vld [vmem:[%s24555_s0 + $0x38] ss:$136 sps:$4 sm:$0xff]  }
 0x440   : > { %14658 = vmatpush1.bf16.msra.mxu1 %v19516_v8  ;;  %v23293_v0 = vpop.eup %20827  ;;  %14620 = vmatprep.subr.bf16.mxu0 %v19521_v14  ;;  %v23351_v14 = vpop.f32.mrf.mxu1 }
 0x441   : > { %14659 = vmatprep.subr.bf16.mxu1 %v19524_v16  ;;  %v15784_v24 = vpack.c.bf16 %v23293_v0, %v23287_v17  ;;  %v19593_v16 = vld [vmem:[%s22206_s10 + $0x1bfc] ss:$24 sps:$4 sm:$0xff]   ;;  %v20741_v17 = vld [vmem:[%s22206_s10 + $0x3100] ss:$24 sps:$4 sm:$0xff]  }
 0x442   : > { %v20745_v0 = vld [vmem:[%s22204_s9 + $0x28] sm:$0xff]  }
 0x443   : > { %14621 = vmatpush1.bf16.msra.mxu0 %v19519_v30  ;;  %v19596_v30 = vld [vmem:[%s22206_s10 + $0x1f5c] ss:$24 sps:$4 sm:$0xff]  }
 0x444   : > { %14660 = vmatpush1.bf16.msra.mxu1 %v19522_v43  ;;  %14622 = vmatprep.subr.bf16.mxu0 %v19527_v18  ;;  %v19591_v43 = vld [vmem:[%s22206_s10 + $0x1bf8] ss:$24 sps:$4 sm:$0xff]  }
 0x445   : > { %14661 = vmatprep.subr.bf16.mxu1 %v19530_v58  ;;  %v19594_v18 = vld [vmem:[%s22206_s10 + $0x1f58] ss:$24 sps:$4 sm:$0xff]   ;;  %v20863_v58 = vld [vmem:[%s24555_s0 + $0x4c] ss:$136 sps:$4 sm:$0xff]  }
 0x447   : > { %14623 = vmatpush1.bf16.msra.mxu0 %v19525_v51  ;;  %v23360_v51 = vpop.f32.mrf.mxu1 }
 0x448   : > { %14662 = vmatpush1.bf16.msra.mxu1 %v19528_v25  ;;  %14624 = vmatprep.subr.bf16.mxu0 %v19533_v28  ;;  %v19599_v25 = vld [vmem:[%s22206_s10 + $0x1bcc] ss:$24 sps:$4 sm:$0xff]  }
 0x449   : > { %14663 = vmatprep.subr.bf16.mxu1 %v19536_v1  ;;  %v19602_v28 = vld [vmem:[%s22206_s10 + $0x1f2c] ss:$24 sps:$4 sm:$0xff]   ;;  %v19597_v1 = vld [vmem:[%s22206_s10 + $0x1bc8] ss:$24 sps:$4 sm:$0xff]  }
 0x44b   : > { %14625 = vmatpush2.bf16.msra.mxu0 %v19531_v50  ;;  %v19600_v50 = vld [vmem:[%s22206_s10 + $0x1f28] ss:$24 sps:$4 sm:$0xff]  }
 0x44c   : > { %14664 = vmatpush1.bf16.msra.mxu1 %v19534_v29  ;;  %14626 = vmatprep.subr.bf16.mxu0 %v19539_v15  ;;  %v20864_v15 = vld [vmem:[%s24555_s0 + $0x40] ss:$136 sps:$4 sm:$0xff]  }
 0x44d   : > { %14665 = vmatprep.subr.bf16.mxu1 %v19542_v32 }
 0x44f   : > { %14627 = vmatpush2.bf16.msra.mxu0 %v19537_v33  ;;  %v19605_v33 = vld [vmem:[%s22206_s10 + $0x1b9c] ss:$24 sps:$4 sm:$0xff]  }
 0x450   : > { %14666 = vmatpush1.bf16.msra.mxu1 %v19540_v31  ;;  %14628 = vmatprep.subr.bf16.mxu0 %v19545_v6  ;;  %v19608_v31 = vld [vmem:[%s22206_s10 + $0x1efc] ss:$24 sps:$4 sm:$0xff]   ;;  %v19603_v6 = vld [vmem:[%s22206_s10 + $0x1b98] ss:$24 sps:$4 sm:$0xff]  }
 0x451   : > { %14667 = vmatprep.subr.bf16.mxu1 %v19548_v62  ;;  %v19606_v62 = vld [vmem:[%s22206_s10 + $0x1ef8] ss:$24 sps:$4 sm:$0xff]  }
 0x453   : > { %14629 = vmatpush2.bf16.msra.mxu0 %v19543_v52  ;;  %v20865_v52 = vld [vmem:[%s24555_s0 + $0x54] ss:$136 sps:$4 sm:$0xff]  }
 0x454   : > { %14668 = vmatpush2.bf16.msra.mxu1 %v19546_v34  ;;  %14630 = vmatprep.subr.bf16.mxu0 %v19551_v37  ;;  %v19611_v34 = vld [vmem:[%s22206_s10 + $0x1b6c] ss:$24 sps:$4 sm:$0xff]  }
 0x455   : > { %14669 = vmatprep.subr.bf16.mxu1 %v19554_v41  ;;  %v19614_v37 = vld [vmem:[%s22206_s10 + $0x1ecc] ss:$24 sps:$4 sm:$0xff]   ;;  %v19609_v41 = vld [vmem:[%s22206_s10 + $0x1b68] ss:$24 sps:$4 sm:$0xff]  }
 0x457   : > { %14631 = vmatpush2.bf16.msra.mxu0 %v19549_v42  ;;  %v19612_v42 = vld [vmem:[%s22206_s10 + $0x1ec8] ss:$24 sps:$4 sm:$0xff]  }
 0x458   : > { %14670 = vmatpush2.bf16.msra.mxu1 %v19552_v44  ;;  %14632 = vmatprep.subr.bf16.mxu0 %v19557_v45  ;;  %v19617_v44 = vld [vmem:[%s22206_s10 + $0x1b3c] ss:$24 sps:$4 sm:$0xff]  }
 0x459   : > { %14671 = vmatprep.subr.bf16.mxu1 %v19560_v46  ;;  %v19620_v45 = vld [vmem:[%s22206_s10 + $0x1e9c] ss:$24 sps:$4 sm:$0xff]   ;;  %v19615_v46 = vld [vmem:[%s22206_s10 + $0x1b38] ss:$24 sps:$4 sm:$0xff]  }
 0x45b   : > { %14633 = vmatpush2.bf16.msra.mxu0 %v19555_v63  ;;  %v19618_v63 = vld [vmem:[%s22206_s10 + $0x1e98] ss:$24 sps:$4 sm:$0xff]  }
 0x45c   : > { %14672 = vmatpush2.bf16.msra.mxu1 %v19558_v59  ;;  %14634 = vmatprep.subr.bf16.mxu0 %v19563_v49  ;;  %v19623_v59 = vld [vmem:[%s22206_s10 + $0x1b0c] ss:$24 sps:$4 sm:$0xff]  }
 0x45d   : > { %14673 = vmatprep.subr.bf16.mxu1 %v19566_v20  ;;  %v19626_v49 = vld [vmem:[%s22206_s10 + $0x1e6c] ss:$24 sps:$4 sm:$0xff]   ;;  %v19621_v20 = vld [vmem:[%s22206_s10 + $0x1b08] ss:$24 sps:$4 sm:$0xff]  }
 0x45f   : > { %14635 = vmatpush2.bf16.msra.mxu0 %v19561_v35  ;;  %v19624_v35 = vld [vmem:[%s22206_s10 + $0x1e68] ss:$24 sps:$4 sm:$0xff]  }
 0x460   : > { %14674 = vmatpush2.bf16.msra.mxu1 %v19564_v12  ;;  %14636 = vmatprep.subr.bf16.mxu0 %v19569_v53  ;;  %v19629_v12 = vld [vmem:[%s22206_s10 + $0x1ddc] ss:$24 sps:$4 sm:$0xff]  }
 0x461   : > { %14675 = vmatprep.subr.bf16.mxu1 %v19572_v54  ;;  %v19632_v53 = vld [vmem:[%s22206_s10 + $0x1e3c] ss:$24 sps:$4 sm:$0xff]   ;;  %v19627_v54 = vld [vmem:[%s22206_s10 + $0x1dd8] ss:$24 sps:$4 sm:$0xff]  }
 0x463   : > { %14637 = vmatpush2.bf16.msra.mxu0 %v19567_v55  ;;  %v19630_v55 = vld [vmem:[%s22206_s10 + $0x1e38] ss:$24 sps:$4 sm:$0xff]  }
 0x464   : > { %14676 = vmatpush2.bf16.msra.mxu1 %v19570_v21  ;;  %14638 = vmatprep.subr.bf16.mxu0 %v19575_v19  ;;  %v19635_v21 = vld [vmem:[%s22206_s10 + $0x1dac] ss:$24 sps:$4 sm:$0xff]   ;;  %v19633_v19 = vld [vmem:[%s22206_s10 + $0x1da8] ss:$24 sps:$4 sm:$0xff]  }
 0x465   : > { %14677 = vmatprep.subr.bf16.mxu1 %v19578_v11  ;;  %v19636_v11 = vld [vmem:[%s22206_s10 + $0x1e08] ss:$24 sps:$4 sm:$0xff]  }
 0x467   : > { %14639 = vmatpush2.bf16.msra.mxu0 %v19573_v56  ;;  %v19644_v56 = vld [vmem:[%s22206_s10 + $0x20dc] ss:$24 sps:$4 sm:$0xff]  }
 0x468   : > { %14678 = vmatpush2.bf16.msra.mxu1 %v19576_v57  ;;  %14694 = vmatprep.subr.bf16.mxu0 %v19584_v48  ;;  %v19639_v57 = vld [vmem:[%s22206_s10 + $0x1d78] ss:$24 sps:$4 sm:$0xff]   ;;  %v19650_v48 = vld [vmem:[%s22206_s10 + $0x20ac] ss:$24 sps:$4 sm:$0xff]  }
 0x469   : > { %14679 = vmatprep.subr.bf16.mxu1 %v19581_v60  ;;  %v19647_v60 = vld [vmem:[%s22206_s10 + $0x1d4c] ss:$24 sps:$4 sm:$0xff]  }
 0x46a   : > { %v14384_v10 = vpop.f32.mrf.mxu0  ;;  %14641 = vmatmul.mubr.bf16.vlgmr.msra.gmra.mxu0 %v20862_v13  ;;  %v19657_v13 = vld [vmem:[%s22206_s10 + $0x1ce8] ss:$24 sps:$4 sm:$0xff]  }
 0x46b   : > { %v14385_v8 = vadd.f32 %v14384_v10, %v14342_v5  ;;  %14695 = vmatpush1.bf16.msra.mxu0 %v19582_v23  ;;  %14726 = vmatprep.mubr.bf16.mxu0 %v20863_v58  ;;  %v19648_v23 = vld [vmem:[%s22206_s10 + $0x20a8] ss:$24 sps:$4 sm:$0xff]   ;;  %v19653_v5 = vld [vmem:[%s22206_s10 + $0x1d1c] ss:$24 sps:$4 sm:$0xff]   ;;  %v19662_v10 = vld [vmem:[%s22206_s10 + $0x204c] ss:$24 sps:$4 sm:$0xff]  }
 0x46c   : > { %14680 = vmatpush2.bf16.msra.mxu1 %v19579_v3  ;;  %14696 = vmatprep.subr.bf16.mxu0 %v19590_v4  ;;  %v19645_v3 = vld [vmem:[%s22206_s10 + $0x1d48] ss:$24 sps:$4 sm:$0xff]   ;;  %v19651_v4 = vld [vmem:[%s22206_s10 + $0x1d18] ss:$24 sps:$4 sm:$0xff]   ;;  %v19671_v58 = vld [vmem:[%s22206_s10 + $0x1c8c] ss:$24 sps:$4 sm:$0xff]  }
 0x46d   : > { %14681 = vmatprep.subr.bf16.mxu1 %v19587_v9  ;;  %v19656_v9 = vld [vmem:[%s22206_s10 + $0x207c] ss:$24 sps:$4 sm:$0xff]  }
 0x46f   : > { %14697 = vmatpush1.bf16.msra.mxu0 %v19588_v26  ;;  %v19659_v26 = vld [vmem:[%s22206_s10 + $0x1cec] ss:$24 sps:$4 sm:$0xff]  }
 0x470   : > { %14682 = vmatpush2.bf16.msra.mxu1 %v19585_v38  ;;  %14698 = vmatprep.subr.bf16.mxu0 %v19593_v16  ;;  %v19654_v38 = vld [vmem:[%s22206_s10 + $0x2078] ss:$24 sps:$4 sm:$0xff]   ;;  %v19665_v16 = vld [vmem:[%s22206_s10 + $0x1cbc] ss:$24 sps:$4 sm:$0xff]  }
 0x471   : > { %14737 = vmatprep.subr.bf16.mxu1 %v19596_v30  ;;  %v19668_v30 = vld [vmem:[%s22206_s10 + $0x201c] ss:$24 sps:$4 sm:$0xff]  }
 0x473   : > { %v14427_v29 = vpop.f32.mrf.mxu1  ;;  %14684 = vmatmul.mubr.bf16.vlgmr.msra.gmra.mxu1 %v20864_v15  ;;  %14699 = vmatpush1.bf16.msra.mxu0 %v19591_v43  ;;  %v19663_v43 = vld [vmem:[%s22206_s10 + $0x1cb8] ss:$24 sps:$4 sm:$0xff]  }
 0x474   : > { %v23369_v32 = vadd.f32 %v14427_v29, %v14385_v8  ;;  %14738 = vmatpush1.bf16.msra.mxu1 %v19594_v18  ;;  %14700 = vmatprep.subr.bf16.mxu0 %v19599_v25  ;;  %v19660_v8 = vld [vmem:[%s22206_s10 + $0x2048] ss:$24 sps:$4 sm:$0xff]   ;;  %v19666_v18 = vld [vmem:[%s22206_s10 + $0x2018] ss:$24 sps:$4 sm:$0xff]   ;;  %v19674_v25 = vld [vmem:[%s22206_s10 + $0x1fec] ss:$24 sps:$4 sm:$0xff]  }
 0x475   : > { %14739 = vmatprep.subr.bf16.mxu1 %v19602_v28  ;;  %14769 = vmatprep.mubr.bf16.mxu1 %v20865_v52  ;;  %v19669_v28 = vld [vmem:[%s22206_s10 + $0x1c88] ss:$24 sps:$4 sm:$0xff]   ;;  %v19680_v29 = vld [vmem:[%s22206_s10 + $0x225c] ss:$24 sps:$4 sm:$0xff]   ;;  %v19675_v15 = vld [vmem:[%s22206_s10 + $0x1fb8] ss:$24 sps:$4 sm:$0xff]  }
 0x476   : > { %v19684_v52 = vld [vmem:[%s22206_s10 + $0x2228] ss:$24 sps:$4 sm:$0xff]  }
 0x477   : > { %14701 = vmatpush1.bf16.msra.mxu0 %v19597_v1  ;;  %v19672_v1 = vld [vmem:[%s22206_s10 + $0x1fe8] ss:$24 sps:$4 sm:$0xff]  }
 0x478   : > { %14740 = vmatpush1.bf16.msra.mxu1 %v19600_v50  ;;  %14702 = vmatprep.subr.bf16.mxu0 %v19605_v33  ;;  %v19677_v50 = vld [vmem:[%s22206_s10 + $0x1fbc] ss:$24 sps:$4 sm:$0xff]   ;;  %v19678_v33 = vld [vmem:[%s22206_s10 + $0x2258] ss:$24 sps:$4 sm:$0xff]  }
 0x479   : > { %14741 = vmatprep.subr.bf16.mxu1 %v19608_v31  ;;  %v19683_v31 = vld [vmem:[%s22206_s10 + $0x1f8c] ss:$24 sps:$4 sm:$0xff]  }
 0x47b   : > { %14703 = vmatpush1.bf16.msra.mxu0 %v19603_v6  ;;  %v19686_v6 = vld [vmem:[%s22206_s10 + $0x222c] ss:$24 sps:$4 sm:$0xff]  }
 0x47c   : > { %14742 = vmatpush1.bf16.msra.mxu1 %v19606_v62  ;;  %14704 = vmatprep.subr.bf16.mxu0 %v19611_v34  ;;  %v19681_v62 = vld [vmem:[%s22206_s10 + $0x1f88] ss:$24 sps:$4 sm:$0xff]  }
 0x47d   : > { %14743 = vmatprep.subr.bf16.mxu1 %v19614_v37  ;;  %v20866_v34 = vld [vmem:[%s24555_s0 + $0x48] ss:$136 sps:$4 sm:$0xff]   ;;  %v19689_v37 = vld [vmem:[%s22206_s10 + $0x21fc] ss:$24 sps:$4 sm:$0xff]  }
 0x47f   : > { %14705 = vmatpush1.bf16.msra.mxu0 %v19609_v41  ;;  %v19692_v41 = vld [vmem:[%s22206_s10 + $0x255c] ss:$24 sps:$4 sm:$0xff]  }
 0x480   : > { %14744 = vmatpush1.bf16.msra.mxu1 %v19612_v42  ;;  %14706 = vmatprep.subr.bf16.mxu0 %v19617_v44  ;;  %v19687_v42 = vld [vmem:[%s22206_s10 + $0x21f8] ss:$24 sps:$4 sm:$0xff]  }
 0x481   : > { %14745 = vmatprep.subr.bf16.mxu1 %v19620_v45  ;;  %v19690_v44 = vld [vmem:[%s22206_s10 + $0x2558] ss:$24 sps:$4 sm:$0xff]   ;;  %v20867_v45 = vld [vmem:[%s24555_s0 + $0x5c] ss:$136 sps:$4 sm:$0xff]  }
 0x483   : > { %14707 = vmatpush1.bf16.msra.mxu0 %v19615_v46  ;;  %v19695_v46 = vld [vmem:[%s22206_s10 + $0x21cc] ss:$24 sps:$4 sm:$0xff]  }
 0x484   : > { %14746 = vmatpush1.bf16.msra.mxu1 %v19618_v63  ;;  %14708 = vmatprep.subr.bf16.mxu0 %v19623_v59  ;;  %v19698_v63 = vld [vmem:[%s22206_s10 + $0x252c] ss:$24 sps:$4 sm:$0xff]   ;;  %v19693_v59 = vld [vmem:[%s22206_s10 + $0x21c8] ss:$24 sps:$4 sm:$0xff]  }
 0x485   : > { %14747 = vmatprep.subr.bf16.mxu1 %v19626_v49  ;;  %v19696_v49 = vld [vmem:[%s22206_s10 + $0x2528] ss:$24 sps:$4 sm:$0xff]  }
 0x487   : > { %14709 = vmatpush1.bf16.msra.mxu0 %v19621_v20  ;;  %v20868_v20 = vld [vmem:[%s24555_s0 + $0x50] ss:$136 sps:$4 sm:$0xff]  }
 0x488   : > { %14748 = vmatpush1.bf16.msra.mxu1 %v19624_v35  ;;  %14710 = vmatprep.subr.bf16.mxu0 %v19629_v12  ;;  %v19701_v35 = vld [vmem:[%s22206_s10 + $0x219c] ss:$24 sps:$4 sm:$0xff]  }
 0x489   : > { %14749 = vmatprep.subr.bf16.mxu1 %v19632_v53  ;;  %v19704_v12 = vld [vmem:[%s22206_s10 + $0x24fc] ss:$24 sps:$4 sm:$0xff]   ;;  %v19699_v53 = vld [vmem:[%s22206_s10 + $0x2198] ss:$24 sps:$4 sm:$0xff]  }
 0x48b   : > { %14711 = vmatpush2.bf16.msra.mxu0 %v19627_v54  ;;  %v19702_v54 = vld [vmem:[%s22206_s10 + $0x24f8] ss:$24 sps:$4 sm:$0xff]  }
 0x48c   : > { %14750 = vmatpush1.bf16.msra.mxu1 %v19630_v55  ;;  %14712 = vmatprep.subr.bf16.mxu0 %v19635_v21  ;;  %v20869_v55 = vld [vmem:[%s24555_s0 + $0x64] ss:$136 sps:$4 sm:$0xff]   ;;  %v19707_v21 = vld [vmem:[%s22206_s10 + $0x216c] ss:$24 sps:$4 sm:$0xff]  }
 0x48d   : > { %14751 = vmatprep.subr.bf16.mxu1 %v19638_v36  ;;  %v19710_v36 = vld [vmem:[%s22206_s10 + $0x24cc] ss:$24 sps:$4 sm:$0xff]  }
 0x48f   : > { %14713 = vmatpush2.bf16.msra.mxu0 %v19633_v19  ;;  %v19705_v19 = vld [vmem:[%s22206_s10 + $0x2168] ss:$24 sps:$4 sm:$0xff]  }
 0x490   : > { %14752 = vmatpush1.bf16.msra.mxu1 %v19636_v11  ;;  %14714 = vmatprep.subr.bf16.mxu0 %v19641_v61  ;;  %v19708_v11 = vld [vmem:[%s22206_s10 + $0x24c8] ss:$24 sps:$4 sm:$0xff]   ;;  %v19713_v61 = vld [vmem:[%s22206_s10 + $0x213c] ss:$24 sps:$4 sm:$0xff]  }
 0x491   : > { %14753 = vmatprep.subr.bf16.mxu1 %v19644_v56  ;;  %v19716_v56 = vld [vmem:[%s22206_s10 + $0x249c] ss:$24 sps:$4 sm:$0xff]  }
 0x493   : > { %14715 = vmatpush2.bf16.msra.mxu0 %v19639_v57  ;;  %v19711_v57 = vld [vmem:[%s22206_s10 + $0x2138] ss:$24 sps:$4 sm:$0xff]  }
 0x494   : > { %14754 = vmatpush2.bf16.msra.mxu1 %v19642_v2  ;;  %14716 = vmatprep.subr.bf16.mxu0 %v19647_v60  ;;  %v19714_v2 = vld [vmem:[%s22206_s10 + $0x2498] ss:$24 sps:$4 sm:$0xff]   ;;  %v19719_v60 = vld [vmem:[%s22206_s10 + $0x210c] ss:$24 sps:$4 sm:$0xff]  }
 0x495   : > { %14755 = vmatprep.subr.bf16.mxu1 %v19650_v48  ;;  %v19722_v48 = vld [vmem:[%s22206_s10 + $0x246c] ss:$24 sps:$4 sm:$0xff]  }
 0x497   : > { %14717 = vmatpush2.bf16.msra.mxu0 %v19645_v3  ;;  %v19717_v3 = vld [vmem:[%s22206_s10 + $0x2108] ss:$24 sps:$4 sm:$0xff]  }
 0x498   : > { %14756 = vmatpush2.bf16.msra.mxu1 %v19648_v23  ;;  %14718 = vmatprep.subr.bf16.mxu0 %v19653_v5  ;;  %v19720_v23 = vld [vmem:[%s22206_s10 + $0x2468] ss:$24 sps:$4 sm:$0xff]   ;;  %v19725_v5 = vld [vmem:[%s22206_s10 + $0x23dc] ss:$24 sps:$4 sm:$0xff]  }
 0x499   : > { %14757 = vmatprep.subr.bf16.mxu1 %v19656_v9  ;;  %v19728_v9 = vld [vmem:[%s22206_s10 + $0x243c] ss:$24 sps:$4 sm:$0xff]  }
 0x49b   : > { %14719 = vmatpush2.bf16.msra.mxu0 %v19651_v4  ;;  %v19723_v4 = vld [vmem:[%s22206_s10 + $0x23d8] ss:$24 sps:$4 sm:$0xff]  }
 0x49c   : > { %14758 = vmatpush2.bf16.msra.mxu1 %v19654_v38  ;;  %14720 = vmatprep.subr.bf16.mxu0 %v19659_v26  ;;  %v19726_v38 = vld [vmem:[%s22206_s10 + $0x2438] ss:$24 sps:$4 sm:$0xff]   ;;  %v19731_v26 = vld [vmem:[%s22206_s10 + $0x23ac] ss:$24 sps:$4 sm:$0xff]  }
 0x49d   : > { %14759 = vmatprep.subr.bf16.mxu1 %v19662_v10  ;;  %v19734_v10 = vld [vmem:[%s22206_s10 + $0x240c] ss:$24 sps:$4 sm:$0xff]  }
 0x49f   : > { %14721 = vmatpush2.bf16.msra.mxu0 %v19657_v13  ;;  %v19729_v13 = vld [vmem:[%s22206_s10 + $0x23a8] ss:$24 sps:$4 sm:$0xff]  }
 0x4a0   : > { %14760 = vmatpush2.bf16.msra.mxu1 %v19660_v8  ;;  %14722 = vmatprep.subr.bf16.mxu0 %v19665_v16  ;;  %v19732_v8 = vld [vmem:[%s22206_s10 + $0x2408] ss:$24 sps:$4 sm:$0xff]   ;;  %v19737_v16 = vld [vmem:[%s22206_s10 + $0x237c] ss:$24 sps:$4 sm:$0xff]  }
 0x4a1   : > { %14761 = vmatprep.subr.bf16.mxu1 %v19668_v30  ;;  %v19740_v30 = vld [vmem:[%s22206_s10 + $0x26dc] ss:$24 sps:$4 sm:$0xff]  }
 0x4a3   : > { %14723 = vmatpush2.bf16.msra.mxu0 %v19663_v43  ;;  %v19735_v43 = vld [vmem:[%s22206_s10 + $0x2378] ss:$24 sps:$4 sm:$0xff]  }
 0x4a4   : > { %14762 = vmatpush2.bf16.msra.mxu1 %v19666_v18  ;;  %14724 = vmatprep.subr.bf16.mxu0 %v19671_v58  ;;  %v19738_v18 = vld [vmem:[%s22206_s10 + $0x26d8] ss:$24 sps:$4 sm:$0xff]   ;;  %v19743_v58 = vld [vmem:[%s22206_s10 + $0x234c] ss:$24 sps:$4 sm:$0xff]  }
 0x4a5   : > { %14763 = vmatprep.subr.bf16.mxu1 %v19674_v25  ;;  %v19746_v25 = vld [vmem:[%s22206_s10 + $0x26ac] ss:$24 sps:$4 sm:$0xff]  }
 0x4a7   : > { %14725 = vmatpush2.bf16.msra.mxu0 %v19669_v28  ;;  %v19741_v28 = vld [vmem:[%s22206_s10 + $0x2348] ss:$24 sps:$4 sm:$0xff]  }
 0x4a8   : > { %14764 = vmatpush2.bf16.msra.mxu1 %v19672_v1  ;;  %14780 = vmatprep.subr.bf16.mxu0 %v19680_v29  ;;  %v19744_v1 = vld [vmem:[%s22206_s10 + $0x26a8] ss:$24 sps:$4 sm:$0xff]   ;;  %v19752_v29 = vld [vmem:[%s22206_s10 + $0x267c] ss:$24 sps:$4 sm:$0xff]  }
 0x4a9   : > { %14765 = vmatprep.subr.bf16.mxu1 %v19677_v50  ;;  %v19749_v50 = vld [vmem:[%s22206_s10 + $0x231c] ss:$24 sps:$4 sm:$0xff]  }
 0x4aa   : > { %14727 = vmatmul.mubr.bf16.vlgmr.msra.gmra.mxu0 %v20866_v34  ;;  %v19761_v34 = vld [vmem:[%s22206_s10 + $0x22bc] ss:$24 sps:$4 sm:$0xff]  }
 0x4ab   : > { %14781 = vmatpush1.bf16.msra.mxu0 %v19678_v33  ;;  %14812 = vmatprep.mubr.bf16.mxu0 %v20867_v45  ;;  %v19750_v33 = vld [vmem:[%s22206_s10 + $0x2678] ss:$24 sps:$4 sm:$0xff]   ;;  %v19770_v45 = vld [vmem:[%s22206_s10 + $0x25ec] ss:$24 sps:$4 sm:$0xff]  }
 0x4ac   : > { %14766 = vmatpush2.bf16.msra.mxu1 %v19675_v15  ;;  %14782 = vmatprep.subr.bf16.mxu0 %v19686_v6  ;;  %v19747_v15 = vld [vmem:[%s22206_s10 + $0x2318] ss:$24 sps:$4 sm:$0xff]   ;;  %v19758_v6 = vld [vmem:[%s22206_s10 + $0x264c] ss:$24 sps:$4 sm:$0xff]  }
 0x4ad   : > { %14767 = vmatprep.subr.bf16.mxu1 %v19683_v31  ;;  %v19755_v31 = vld [vmem:[%s22206_s10 + $0x22ec] ss:$24 sps:$4 sm:$0xff]  }
 0x4af   : > { %14783 = vmatpush1.bf16.msra.mxu0 %v19684_v52  ;;  %v19756_v52 = vld [vmem:[%s22206_s10 + $0x2648] ss:$24 sps:$4 sm:$0xff]  }
 0x4b0   : > { %14768 = vmatpush2.bf16.msra.mxu1 %v19681_v62  ;;  %14784 = vmatprep.subr.bf16.mxu0 %v19689_v37  ;;  %v19753_v62 = vld [vmem:[%s22206_s10 + $0x22e8] ss:$24 sps:$4 sm:$0xff]   ;;  %v19764_v37 = vld [vmem:[%s22206_s10 + $0x261c] ss:$24 sps:$4 sm:$0xff]  }
 0x4b1   : > { %14823 = vmatprep.subr.bf16.mxu1 %v19692_v41  ;;  %v19759_v41 = vld [vmem:[%s22206_s10 + $0x22b8] ss:$24 sps:$4 sm:$0xff]  }
 0x4b3   : > { %14770 = vmatmul.mubr.bf16.vlgmr.msra.gmra.mxu1 %v20868_v20  ;;  %14785 = vmatpush1.bf16.msra.mxu0 %v19687_v42  ;;  %v19762_v42 = vld [vmem:[%s22206_s10 + $0x2618] ss:$24 sps:$4 sm:$0xff]  }
 0x4b4   : > { %14824 = vmatpush1.bf16.msra.mxu1 %v19690_v44  ;;  %14786 = vmatprep.subr.bf16.mxu0 %v19695_v46  ;;  %v19767_v44 = vld [vmem:[%s22206_s10 + $0x228c] ss:$24 sps:$4 sm:$0xff]   ;;  %v19765_v46 = vld [vmem:[%s22206_s10 + $0x2288] ss:$24 sps:$4 sm:$0xff]   ;;  %v19771_v20 = vld [vmem:[%s22206_s10 + $0x25b8] ss:$24 sps:$4 sm:$0xff]  }
 0x4b5   : > { %14825 = vmatprep.subr.bf16.mxu1 %v19698_v63  ;;  %14855 = vmatprep.mubr.bf16.mxu1 %v20869_v55  ;;  %v19768_v63 = vld [vmem:[%s22206_s10 + $0x25e8] ss:$24 sps:$4 sm:$0xff]  }
 0x4b6   : > { %v19777_v55 = vld [vmem:[%s22206_s10 + $0x2588] ss:$24 sps:$4 sm:$0xff]  }
 0x4b7   : > { %14787 = vmatpush1.bf16.msra.mxu0 %v19693_v59  ;;  %v19773_v59 = vld [vmem:[%s22206_s10 + $0x25bc] ss:$24 sps:$4 sm:$0xff]  }
 0x4b8   : > { %14826 = vmatpush1.bf16.msra.mxu1 %v19696_v49  ;;  %14788 = vmatprep.subr.bf16.mxu0 %v19701_v35  ;;  %v19776_v49 = vld [vmem:[%s22206_s10 + $0x285c] ss:$24 sps:$4 sm:$0xff]   ;;  %v19774_v35 = vld [vmem:[%s22206_s10 + $0x2858] ss:$24 sps:$4 sm:$0xff]  }
 0x4b9   : > { %14827 = vmatprep.subr.bf16.mxu1 %v19704_v12  ;;  %v19779_v12 = vld [vmem:[%s22206_s10 + $0x258c] ss:$24 sps:$4 sm:$0xff]  }
 0x4bb   : > { %14789 = vmatpush1.bf16.msra.mxu0 %v19699_v53  ;;  %v19782_v53 = vld [vmem:[%s22206_s10 + $0x282c] ss:$24 sps:$4 sm:$0xff]  }
 0x4bc   : > { %14828 = vmatpush1.bf16.msra.mxu1 %v19702_v54  ;;  %14790 = vmatprep.subr.bf16.mxu0 %v19707_v21  ;;  %v20870_v54 = vld [vmem:[%s24555_s0 + $0x58] ss:$136 sps:$4 sm:$0xff]  }
 0x4bd   : > { %14829 = vmatprep.subr.bf16.mxu1 %v19710_v36  ;;  %v19780_v21 = vld [vmem:[%s22206_s10 + $0x2828] ss:$24 sps:$4 sm:$0xff]   ;;  %v19785_v36 = vld [vmem:[%s22206_s10 + $0x27fc] ss:$24 sps:$4 sm:$0xff]  }
 0x4bf   : > { %14791 = vmatpush1.bf16.msra.mxu0 %v19705_v19  ;;  %v19788_v19 = vld [vmem:[%s22206_s10 + $0x2b5c] ss:$24 sps:$4 sm:$0xff]  }
 0x4c0   : > { %14830 = vmatpush1.bf16.msra.mxu1 %v19708_v11  ;;  %14792 = vmatprep.subr.bf16.mxu0 %v19713_v61  ;;  %v20871_v11 = vld [vmem:[%s24555_s0 + $0x6c] ss:$136 sps:$4 sm:$0xff]   ;;  %v19783_v61 = vld [vmem:[%s22206_s10 + $0x27f8] ss:$24 sps:$4 sm:$0xff]  }
 0x4c1   : > { %14831 = vmatprep.subr.bf16.mxu1 %v19716_v56  ;;  %v19786_v56 = vld [vmem:[%s22206_s10 + $0x2b58] ss:$24 sps:$4 sm:$0xff]  }
 0x4c3   : > { %14793 = vmatpush1.bf16.msra.mxu0 %v19711_v57  ;;  %v19791_v57 = vld [vmem:[%s22206_s10 + $0x27cc] ss:$24 sps:$4 sm:$0xff]  }
 0x4c4   : > { %14832 = vmatpush1.bf16.msra.mxu1 %v19714_v2  ;;  %14794 = vmatprep.subr.bf16.mxu0 %v19719_v60  ;;  %v19794_v2 = vld [vmem:[%s22206_s10 + $0x2b2c] ss:$24 sps:$4 sm:$0xff]   ;;  %v20872_v60 = vld [vmem:[%s24555_s0 + $0x60] ss:$136 sps:$4 sm:$0xff]  }
 0x4c5   : > { %14833 = vmatprep.subr.bf16.mxu1 %v19722_v48  ;;  %v19789_v48 = vld [vmem:[%s22206_s10 + $0x27c8] ss:$24 sps:$4 sm:$0xff]  }
 0x4c7   : > { %14795 = vmatpush1.bf16.msra.mxu0 %v19717_v3  ;;  %v19792_v3 = vld [vmem:[%s22206_s10 + $0x2b28] ss:$24 sps:$4 sm:$0xff]  }
 0x4c8   : > { %14834 = vmatpush1.bf16.msra.mxu1 %v19720_v23  ;;  %14796 = vmatprep.subr.bf16.mxu0 %v19725_v5  ;;  %v19797_v23 = vld [vmem:[%s22206_s10 + $0x279c] ss:$24 sps:$4 sm:$0xff]  }
 0x4c9   : > { %14835 = vmatprep.subr.bf16.mxu1 %v19728_v9  ;;  %v19800_v5 = vld [vmem:[%s22206_s10 + $0x2afc] ss:$24 sps:$4 sm:$0xff]   ;;  %v20873_v9 = vld [vmem:[%s24555_s0 + $0x74] ss:$136 sps:$4 sm:$0xff]  }
 0x4cb   : > { %14797 = vmatpush2.bf16.msra.mxu0 %v19723_v4  ;;  %v19795_v4 = vld [vmem:[%s22206_s10 + $0x2798] ss:$24 sps:$4 sm:$0xff]  }
 0x4cc   : > { %14836 = vmatpush1.bf16.msra.mxu1 %v19726_v38  ;;  %14798 = vmatprep.subr.bf16.mxu0 %v19731_v26  ;;  %v19798_v38 = vld [vmem:[%s22206_s10 + $0x2af8] ss:$24 sps:$4 sm:$0xff]   ;;  %v19803_v26 = vld [vmem:[%s22206_s10 + $0x276c] ss:$24 sps:$4 sm:$0xff]  }
 0x4cd   : > { %14837 = vmatprep.subr.bf16.mxu1 %v19734_v10  ;;  %v19806_v10 = vld [vmem:[%s22206_s10 + $0x2acc] ss:$24 sps:$4 sm:$0xff]  }
 0x4cf   : > { %14799 = vmatpush2.bf16.msra.mxu0 %v19729_v13  ;;  %v19801_v13 = vld [vmem:[%s22206_s10 + $0x2768] ss:$24 sps:$4 sm:$0xff]  }
 0x4d0   : > { %14838 = vmatpush1.bf16.msra.mxu1 %v19732_v8  ;;  %14800 = vmatprep.subr.bf16.mxu0 %v19737_v16  ;;  %v19804_v8 = vld [vmem:[%s22206_s10 + $0x2ac8] ss:$24 sps:$4 sm:$0xff]   ;;  %v19809_v16 = vld [vmem:[%s22206_s10 + $0x273c] ss:$24 sps:$4 sm:$0xff]  }
 0x4d1   : > { %14839 = vmatprep.subr.bf16.mxu1 %v19740_v30  ;;  %v19812_v30 = vld [vmem:[%s22206_s10 + $0x2a9c] ss:$24 sps:$4 sm:$0xff]  }
 0x4d3   : > { %14801 = vmatpush2.bf16.msra.mxu0 %v19735_v43  ;;  %v19807_v43 = vld [vmem:[%s22206_s10 + $0x2738] ss:$24 sps:$4 sm:$0xff]  }
 0x4d4   : > { %14840 = vmatpush2.bf16.msra.mxu1 %v19738_v18  ;;  %14802 = vmatprep.subr.bf16.mxu0 %v19743_v58  ;;  %v19810_v18 = vld [vmem:[%s22206_s10 + $0x2a98] ss:$24 sps:$4 sm:$0xff]   ;;  %v19815_v58 = vld [vmem:[%s22206_s10 + $0x270c] ss:$24 sps:$4 sm:$0xff]  }
 0x4d5   : > { %14841 = vmatprep.subr.bf16.mxu1 %v19746_v25  ;;  %v19818_v25 = vld [vmem:[%s22206_s10 + $0x2a6c] ss:$24 sps:$4 sm:$0xff]  }
 0x4d7   : > { %14803 = vmatpush2.bf16.msra.mxu0 %v19741_v28  ;;  %v19813_v28 = vld [vmem:[%s22206_s10 + $0x2708] ss:$24 sps:$4 sm:$0xff]  }
 0x4d8   : > { %14842 = vmatpush2.bf16.msra.mxu1 %v19744_v1  ;;  %14804 = vmatprep.subr.bf16.mxu0 %v19749_v50  ;;  %v19816_v1 = vld [vmem:[%s22206_s10 + $0x2a68] ss:$24 sps:$4 sm:$0xff]   ;;  %v19821_v50 = vld [vmem:[%s22206_s10 + $0x29dc] ss:$24 sps:$4 sm:$0xff]  }
 0x4d9   : > { %14843 = vmatprep.subr.bf16.mxu1 %v19752_v29  ;;  %v19824_v29 = vld [vmem:[%s22206_s10 + $0x2a3c] ss:$24 sps:$4 sm:$0xff]  }
 0x4db   : > { %14805 = vmatpush2.bf16.msra.mxu0 %v19747_v15  ;;  %v19819_v15 = vld [vmem:[%s22206_s10 + $0x29d8] ss:$24 sps:$4 sm:$0xff]  }
 0x4dc   : > { %14844 = vmatpush2.bf16.msra.mxu1 %v19750_v33  ;;  %14806 = vmatprep.subr.bf16.mxu0 %v19755_v31  ;;  %v19822_v33 = vld [vmem:[%s22206_s10 + $0x2a38] ss:$24 sps:$4 sm:$0xff]   ;;  %v19827_v31 = vld [vmem:[%s22206_s10 + $0x29ac] ss:$24 sps:$4 sm:$0xff]  }
 0x4dd   : > { %14845 = vmatprep.subr.bf16.mxu1 %v19758_v6  ;;  %v19830_v6 = vld [vmem:[%s22206_s10 + $0x2a0c] ss:$24 sps:$4 sm:$0xff]  }
 0x4df   : > { %14807 = vmatpush2.bf16.msra.mxu0 %v19753_v62  ;;  %v19825_v62 = vld [vmem:[%s22206_s10 + $0x29a8] ss:$24 sps:$4 sm:$0xff]  }
 0x4e0   : > { %14846 = vmatpush2.bf16.msra.mxu1 %v19756_v52  ;;  %14808 = vmatprep.subr.bf16.mxu0 %v19761_v34  ;;  %v19828_v52 = vld [vmem:[%s22206_s10 + $0x2a08] ss:$24 sps:$4 sm:$0xff]   ;;  %v19833_v34 = vld [vmem:[%s22206_s10 + $0x297c] ss:$24 sps:$4 sm:$0xff]  }
 0x4e1   : > { %14847 = vmatprep.subr.bf16.mxu1 %v19764_v37  ;;  %v19836_v37 = vld [vmem:[%s22206_s10 + $0x2cdc] ss:$24 sps:$4 sm:$0xff]  }
 0x4e3   : > { %14809 = vmatpush2.bf16.msra.mxu0 %v19759_v41  ;;  %v19831_v41 = vld [vmem:[%s22206_s10 + $0x2978] ss:$24 sps:$4 sm:$0xff]  }
 0x4e4   : > { %14848 = vmatpush2.bf16.msra.mxu1 %v19762_v42  ;;  %14810 = vmatprep.subr.bf16.mxu0 %v19767_v44  ;;  %v19834_v42 = vld [vmem:[%s22206_s10 + $0x2cd8] ss:$24 sps:$4 sm:$0xff]   ;;  %v19839_v44 = vld [vmem:[%s22206_s10 + $0x294c] ss:$24 sps:$4 sm:$0xff]  }
 0x4e5   : > { %14849 = vmatprep.subr.bf16.mxu1 %v19770_v45  ;;  %v19842_v45 = vld [vmem:[%s22206_s10 + $0x2cac] ss:$24 sps:$4 sm:$0xff]  }
 0x4e7   : > { %14811 = vmatpush2.bf16.msra.mxu0 %v19765_v46  ;;  %v19837_v46 = vld [vmem:[%s22206_s10 + $0x2948] ss:$24 sps:$4 sm:$0xff]  }
 0x4e8   : > { %14850 = vmatpush2.bf16.msra.mxu1 %v19768_v63  ;;  %14866 = vmatprep.subr.bf16.mxu0 %v19776_v49  ;;  %v19840_v63 = vld [vmem:[%s22206_s10 + $0x2ca8] ss:$24 sps:$4 sm:$0xff]   ;;  %v19848_v49 = vld [vmem:[%s22206_s10 + $0x2c7c] ss:$24 sps:$4 sm:$0xff]  }
 0x4e9   : > { %14851 = vmatprep.subr.bf16.mxu1 %v19773_v59  ;;  %v19845_v59 = vld [vmem:[%s22206_s10 + $0x291c] ss:$24 sps:$4 sm:$0xff]  }
 0x4ea   : > { %14813 = vmatmul.mubr.bf16.vlgmr.msra.gmra.mxu0 %v20870_v54  ;;  %v19849_v54 = vld [vmem:[%s22206_s10 + $0x28e8] ss:$24 sps:$4 sm:$0xff]  }
 0x4eb   : > { %14867 = vmatpush1.bf16.msra.mxu0 %v19774_v35  ;;  %14898 = vmatprep.mubr.bf16.mxu0 %v20871_v11  ;;  %v19846_v35 = vld [vmem:[%s22206_s10 + $0x2c78] ss:$24 sps:$4 sm:$0xff]  }
 0x4ec   : > { %14852 = vmatpush2.bf16.msra.mxu1 %v19771_v20  ;;  %14868 = vmatprep.subr.bf16.mxu0 %v19782_v53  ;;  %v19843_v20 = vld [vmem:[%s22206_s10 + $0x2918] ss:$24 sps:$4 sm:$0xff]   ;;  %v19854_v53 = vld [vmem:[%s22206_s10 + $0x2c4c] ss:$24 sps:$4 sm:$0xff]  }
 0x4ed   : > { %14853 = vmatprep.subr.bf16.mxu1 %v19779_v12  ;;  %v19851_v12 = vld [vmem:[%s22206_s10 + $0x28ec] ss:$24 sps:$4 sm:$0xff]   ;;  %v19858_v11 = vld [vmem:[%s22206_s10 + $0x2c18] ss:$24 sps:$4 sm:$0xff]  }
 0x4ef   : > { %14869 = vmatpush1.bf16.msra.mxu0 %v19780_v21  ;;  %v19857_v21 = vld [vmem:[%s22206_s10 + $0x28bc] ss:$24 sps:$4 sm:$0xff]  }
 0x4f0   : > { %14854 = vmatpush2.bf16.msra.mxu1 %v19777_v55  ;;  %14870 = vmatprep.subr.bf16.mxu0 %v19785_v36  ;;  %v19852_v55 = vld [vmem:[%s22206_s10 + $0x2c48] ss:$24 sps:$4 sm:$0xff]   ;;  %v19860_v36 = vld [vmem:[%s22206_s10 + $0x2c1c] ss:$24 sps:$4 sm:$0xff]  }
 0x4f1   : > { %14909 = vmatprep.subr.bf16.mxu1 %v19788_v19  ;;  %v19855_v19 = vld [vmem:[%s22206_s10 + $0x28b8] ss:$24 sps:$4 sm:$0xff]  }
 0x4f3   : > { %14856 = vmatmul.mubr.bf16.vlgmr.msra.gmra.mxu1 %v20872_v60  ;;  %14871 = vmatpush1.bf16.msra.mxu0 %v19783_v61  ;;  %v19863_v61 = vld [vmem:[%s22206_s10 + $0x288c] ss:$24 sps:$4 sm:$0xff]   ;;  %v19869_v60 = vld [vmem:[%s22206_s10 + $0x2bbc] ss:$24 sps:$4 sm:$0xff]  }
 0x4f4   : > { %14910 = vmatpush1.bf16.msra.mxu1 %v19786_v56  ;;  %14872 = vmatprep.subr.bf16.mxu0 %v19791_v57  ;;  %v19866_v56 = vld [vmem:[%s22206_s10 + $0x2bec] ss:$24 sps:$4 sm:$0xff]   ;;  %v19861_v57 = vld [vmem:[%s22206_s10 + $0x2888] ss:$24 sps:$4 sm:$0xff]  }
 0x4f5   : > { %14911 = vmatprep.subr.bf16.mxu1 %v19794_v2  ;;  %14941 = vmatprep.mubr.bf16.mxu1 %v20873_v9  ;;  %v19864_v2 = vld [vmem:[%s22206_s10 + $0x2be8] ss:$24 sps:$4 sm:$0xff]   ;;  %v19878_v9 = vld [vmem:[%s22206_s10 + $0x2e2c] ss:$24 sps:$4 sm:$0xff]  }
 0x4f7   : > { %14873 = vmatpush1.bf16.msra.mxu0 %v19789_v48  ;;  %v19872_v48 = vld [vmem:[%s22206_s10 + $0x2e5c] ss:$24 sps:$4 sm:$0xff]  }
 0x4f8   : > { %14912 = vmatpush1.bf16.msra.mxu1 %v19792_v3  ;;  %14874 = vmatprep.subr.bf16.mxu0 %v19797_v23  ;;  %v19867_v3 = vld [vmem:[%s22206_s10 + $0x2bb8] ss:$24 sps:$4 sm:$0xff]  }
 0x4f9   : > { %14913 = vmatprep.subr.bf16.mxu1 %v19800_v5  ;;  %v19870_v23 = vld [vmem:[%s22206_s10 + $0x2e58] ss:$24 sps:$4 sm:$0xff]   ;;  %v19875_v5 = vld [vmem:[%s22206_s10 + $0x2b8c] ss:$24 sps:$4 sm:$0xff]  }
 0x4fb   : > { %14875 = vmatpush1.bf16.msra.mxu0 %v19795_v4  ;;  %v20874_v4 = vld [vmem:[%s24555_s0 + $0x68] ss:$136 sps:$4 sm:$0xff]  }
 0x4fc   : > { %14914 = vmatpush1.bf16.msra.mxu1 %v19798_v38  ;;  %14876 = vmatprep.subr.bf16.mxu0 %v19803_v26  ;;  %v19873_v38 = vld [vmem:[%s22206_s10 + $0x2b88] ss:$24 sps:$4 sm:$0xff]  }
 0x4fd   : > { %14915 = vmatprep.subr.bf16.mxu1 %v19806_v10  ;;  %v19876_v26 = vld [vmem:[%s22206_s10 + $0x2e28] ss:$24 sps:$4 sm:$0xff]   ;;  %v19881_v10 = vld [vmem:[%s22206_s10 + $0x2dfc] ss:$24 sps:$4 sm:$0xff]  }
 0x4ff   : > { %14877 = vmatpush1.bf16.msra.mxu0 %v19801_v13  ;;  %v19884_v13 = vld [vmem:[%s22206_s10 + $0x315c] ss:$24 sps:$4 sm:$0xff]  }
 0x500   : > { %14916 = vmatpush1.bf16.msra.mxu1 %v19804_v8  ;;  %14878 = vmatprep.subr.bf16.mxu0 %v19809_v16  ;;  %v20875_v8 = vld [vmem:[%s24555_s0 + $0x7c] ss:$136 sps:$4 sm:$0xff]   ;;  %v19879_v16 = vld [vmem:[%s22206_s10 + $0x2df8] ss:$24 sps:$4 sm:$0xff]  }
 0x501   : > { %14917 = vmatprep.subr.bf16.mxu1 %v19812_v30  ;;  %v19882_v30 = vld [vmem:[%s22206_s10 + $0x3158] ss:$24 sps:$4 sm:$0xff]  }
 0x503   : > { %14879 = vmatpush1.bf16.msra.mxu0 %v19807_v43  ;;  %v19887_v43 = vld [vmem:[%s22206_s10 + $0x2dcc] ss:$24 sps:$4 sm:$0xff]  }
 0x504   : > { %14918 = vmatpush1.bf16.msra.mxu1 %v19810_v18  ;;  %14880 = vmatprep.subr.bf16.mxu0 %v19815_v58  ;;  %v19890_v18 = vld [vmem:[%s22206_s10 + $0x312c] ss:$24 sps:$4 sm:$0xff]   ;;  %v20876_v58 = vld [vmem:[%s24555_s0 + $0x70] ss:$136 sps:$4 sm:$0xff]  }
 0x505   : > { %14919 = vmatprep.subr.bf16.mxu1 %v19818_v25  ;;  %v19885_v25 = vld [vmem:[%s22206_s10 + $0x2dc8] ss:$24 sps:$4 sm:$0xff]  }
 0x507   : > { %14881 = vmatpush1.bf16.msra.mxu0 %v19813_v28  ;;  %v19888_v28 = vld [vmem:[%s22206_s10 + $0x3128] ss:$24 sps:$4 sm:$0xff]  }
 0x508   : > { %14920 = vmatpush1.bf16.msra.mxu1 %v19816_v1  ;;  %14882 = vmatprep.subr.bf16.mxu0 %v19821_v50  ;;  %v19893_v1 = vld [vmem:[%s22206_s10 + $0x2d9c] ss:$24 sps:$4 sm:$0xff]  }
 0x509   : > { %14921 = vmatprep.subr.bf16.mxu1 %v19824_v29  ;;  %v19896_v50 = vld [vmem:[%s22206_s10 + $0x30fc] ss:$24 sps:$4 sm:$0xff]  }
 0x50a   : > { %v20877_v29 = vld [vmem:[%s24555_s0 + $0x84] ss:$136 sps:$4 sm:$0xff]  }
 0x50b   : > { %14883 = vmatpush2.bf16.msra.mxu0 %v19819_v15  ;;  %v19891_v15 = vld [vmem:[%s22206_s10 + $0x2d98] ss:$24 sps:$4 sm:$0xff]  }
 0x50c   : > { %14922 = vmatpush1.bf16.msra.mxu1 %v19822_v33  ;;  %14884 = vmatprep.subr.bf16.mxu0 %v19827_v31  ;;  %v19894_v33 = vld [vmem:[%s22206_s10 + $0x30f8] ss:$24 sps:$4 sm:$0xff]   ;;  %v19899_v31 = vld [vmem:[%s22206_s10 + $0x2d6c] ss:$24 sps:$4 sm:$0xff]  }
 0x50d   : > { %14923 = vmatprep.subr.bf16.mxu1 %v19830_v6  ;;  %v19902_v6 = vld [vmem:[%s22206_s10 + $0x30cc] ss:$24 sps:$4 sm:$0xff]  }
 0x50f   : > { %14885 = vmatpush2.bf16.msra.mxu0 %v19825_v62  ;;  %v19897_v62 = vld [vmem:[%s22206_s10 + $0x2d68] ss:$24 sps:$4 sm:$0xff]  }
 0x510   : > { %14924 = vmatpush1.bf16.msra.mxu1 %v19828_v52  ;;  %14886 = vmatprep.subr.bf16.mxu0 %v19833_v34  ;;  %v19900_v52 = vld [vmem:[%s22206_s10 + $0x30c8] ss:$24 sps:$4 sm:$0xff]   ;;  %v19905_v34 = vld [vmem:[%s22206_s10 + $0x2d3c] ss:$24 sps:$4 sm:$0xff]  }
 0x511   : > { %14925 = vmatprep.subr.bf16.mxu1 %v19836_v37  ;;  %v19908_v37 = vld [vmem:[%s22206_s10 + $0x309c] ss:$24 sps:$4 sm:$0xff]  }
 0x513   : > { %14887 = vmatpush2.bf16.msra.mxu0 %v19831_v41  ;;  %v19903_v41 = vld [vmem:[%s22206_s10 + $0x2d38] ss:$24 sps:$4 sm:$0xff]  }
 0x514   : > { %14926 = vmatpush2.bf16.msra.mxu1 %v19834_v42  ;;  %14888 = vmatprep.subr.bf16.mxu0 %v19839_v44  ;;  %v19906_v42 = vld [vmem:[%s22206_s10 + $0x3098] ss:$24 sps:$4 sm:$0xff]   ;;  %v19911_v44 = vld [vmem:[%s22206_s10 + $0x2d0c] ss:$24 sps:$4 sm:$0xff]  }
 0x515   : > { %14927 = vmatprep.subr.bf16.mxu1 %v19842_v45  ;;  %v19914_v45 = vld [vmem:[%s22206_s10 + $0x306c] ss:$24 sps:$4 sm:$0xff]  }
 0x517   : > { %14889 = vmatpush2.bf16.msra.mxu0 %v19837_v46  ;;  %v19909_v46 = vld [vmem:[%s22206_s10 + $0x2d08] ss:$24 sps:$4 sm:$0xff]  }
 0x518   : > { %14928 = vmatpush2.bf16.msra.mxu1 %v19840_v63  ;;  %14890 = vmatprep.subr.bf16.mxu0 %v19845_v59  ;;  %v19912_v63 = vld [vmem:[%s22206_s10 + $0x3068] ss:$24 sps:$4 sm:$0xff]   ;;  %v19917_v59 = vld [vmem:[%s22206_s10 + $0x2fdc] ss:$24 sps:$4 sm:$0xff]  }
 0x519   : > { %14929 = vmatprep.subr.bf16.mxu1 %v19848_v49  ;;  %v19920_v49 = vld [vmem:[%s22206_s10 + $0x303c] ss:$24 sps:$4 sm:$0xff]  }
 0x51b   : > { %14891 = vmatpush2.bf16.msra.mxu0 %v19843_v20  ;;  %v19915_v20 = vld [vmem:[%s22206_s10 + $0x2fd8] ss:$24 sps:$4 sm:$0xff]  }
 0x51c   : > { %14930 = vmatpush2.bf16.msra.mxu1 %v19846_v35  ;;  %14892 = vmatprep.subr.bf16.mxu0 %v19851_v12  ;;  %v19918_v35 = vld [vmem:[%s22206_s10 + $0x3038] ss:$24 sps:$4 sm:$0xff]   ;;  %v19923_v12 = vld [vmem:[%s22206_s10 + $0x2fac] ss:$24 sps:$4 sm:$0xff]  }
 0x51d   : > { %14931 = vmatprep.subr.bf16.mxu1 %v19854_v53  ;;  %v19926_v53 = vld [vmem:[%s22206_s10 + $0x300c] ss:$24 sps:$4 sm:$0xff]  }
 0x51f   : > { %14893 = vmatpush2.bf16.msra.mxu0 %v19849_v54  ;;  %v19921_v54 = vld [vmem:[%s22206_s10 + $0x2fa8] ss:$24 sps:$4 sm:$0xff]  }
 0x520   : > { %14932 = vmatpush2.bf16.msra.mxu1 %v19852_v55  ;;  %14894 = vmatprep.subr.bf16.mxu0 %v19857_v21  ;;  %v19924_v55 = vld [vmem:[%s22206_s10 + $0x3008] ss:$24 sps:$4 sm:$0xff]   ;;  %v19929_v21 = vld [vmem:[%s22206_s10 + $0x2f7c] ss:$24 sps:$4 sm:$0xff]  }
 0x521   : > { %14933 = vmatprep.subr.bf16.mxu1 %v19860_v36  ;;  %v19932_v36 = vld [vmem:[%s22206_s10 + $0x327c] ss:$24 sps:$4 sm:$0xff]  }
 0x523   : > { %14895 = vmatpush2.bf16.msra.mxu0 %v19855_v19  ;;  %v19927_v19 = vld [vmem:[%s22206_s10 + $0x2f78] ss:$24 sps:$4 sm:$0xff]  }
 0x524   : > { %14934 = vmatpush2.bf16.msra.mxu1 %v19858_v11  ;;  %14896 = vmatprep.subr.bf16.mxu0 %v19863_v61  ;;  %v19930_v11 = vld [vmem:[%s22206_s10 + $0x3278] ss:$24 sps:$4 sm:$0xff]   ;;  %v19935_v61 = vld [vmem:[%s22206_s10 + $0x2f4c] ss:$24 sps:$4 sm:$0xff]  }
 0x525   : > { %14935 = vmatprep.subr.bf16.mxu1 %v19866_v56  ;;  %v19938_v56 = vld [vmem:[%s22206_s10 + $0x324c] ss:$24 sps:$4 sm:$0xff]  }
 0x527   : > { %14897 = vmatpush2.bf16.msra.mxu0 %v19861_v57  ;;  %v19933_v57 = vld [vmem:[%s22206_s10 + $0x2f48] ss:$24 sps:$4 sm:$0xff]  }
 0x528   : > { %14936 = vmatpush2.bf16.msra.mxu1 %v19864_v2  ;;  %14952 = vmatprep.subr.bf16.mxu0 %v19872_v48  ;;  %v19936_v2 = vld [vmem:[%s22206_s10 + $0x3248] ss:$24 sps:$4 sm:$0xff]   ;;  %v19944_v48 = vld [vmem:[%s22206_s10 + $0x321c] ss:$24 sps:$4 sm:$0xff]  }
 0x529   : > { %14937 = vmatprep.subr.bf16.mxu1 %v19869_v60  ;;  %v19941_v60 = vld [vmem:[%s22206_s10 + $0x2f1c] ss:$24 sps:$4 sm:$0xff]  }
 0x52a   : > { %14899 = vmatmul.mubr.bf16.vlgmr.msra.gmra.mxu0 %v20874_v4  ;;  %v19945_v4 = vld [vmem:[%s22206_s10 + $0x2ee8] ss:$24 sps:$4 sm:$0xff]  }
 0x52b   : > { %14953 = vmatpush1.bf16.msra.mxu0 %v19870_v23  ;;  %14984 = vmatprep.mubr.bf16.mxu0 %v20875_v8  ;;  %v19942_v23 = vld [vmem:[%s22206_s10 + $0x3218] ss:$24 sps:$4 sm:$0xff]  }
 0x52c   : > { %14938 = vmatpush2.bf16.msra.mxu1 %v19867_v3  ;;  %14954 = vmatprep.subr.bf16.mxu0 %v19878_v9  ;;  %v19939_v3 = vld [vmem:[%s22206_s10 + $0x2f18] ss:$24 sps:$4 sm:$0xff]   ;;  %v19950_v9 = vld [vmem:[%s22206_s10 + $0x31ec] ss:$24 sps:$4 sm:$0xff]  }
 0x52d   : > { %14939 = vmatprep.subr.bf16.mxu1 %v19875_v5  ;;  %v19947_v5 = vld [vmem:[%s22206_s10 + $0x2eec] ss:$24 sps:$4 sm:$0xff]   ;;  %v19954_v8 = vld [vmem:[%s22206_s10 + $0x31b8] ss:$24 sps:$4 sm:$0xff]  }
 0x52f   : > { %14955 = vmatpush1.bf16.msra.mxu0 %v19876_v26  ;;  %v19953_v26 = vld [vmem:[%s22206_s10 + $0x2ebc] ss:$24 sps:$4 sm:$0xff]  }
 0x530   : > { %14940 = vmatpush2.bf16.msra.mxu1 %v19873_v38  ;;  %14956 = vmatprep.subr.bf16.mxu0 %v19881_v10  ;;  %v19948_v38 = vld [vmem:[%s22206_s10 + $0x31e8] ss:$24 sps:$4 sm:$0xff]   ;;  %v19956_v10 = vld [vmem:[%s22206_s10 + $0x31bc] ss:$24 sps:$4 sm:$0xff]  }
 0x531   : > { %14995 = vmatprep.subr.bf16.mxu1 %v19884_v13  ;;  %v19951_v13 = vld [vmem:[%s22206_s10 + $0x2eb8] ss:$24 sps:$4 sm:$0xff]  }
 0x533   : > { %14942 = vmatmul.mubr.bf16.vlgmr.msra.gmra.mxu1 %v20876_v58  ;;  %14957 = vmatpush1.bf16.msra.mxu0 %v19879_v16  ;;  %v19959_v16 = vld [vmem:[%s22206_s10 + $0x2e8c] ss:$24 sps:$4 sm:$0xff]  }
 0x534   : > { %14996 = vmatpush1.bf16.msra.mxu1 %v19882_v30  ;;  %14958 = vmatprep.subr.bf16.mxu0 %v19887_v43  ;;  %v19962_v30 = vld [vmem:[%s22206_s10 + $0x318c] ss:$24 sps:$4 sm:$0xff]   ;;  %v19957_v43 = vld [vmem:[%s22206_s10 + $0x2e88] ss:$24 sps:$4 sm:$0xff]  }
 0x535   : > { %14997 = vmatprep.subr.bf16.mxu1 %v19890_v18  ;;  %18096 = vmatprep.mubr.msk.bf16.mxu1 %vm13572_vm0, %v20877_v29  ;;  %v19960_v18 = vld [vmem:[%s22206_s10 + $0x3188] ss:$24 sps:$4 sm:$0xff]   ;;  %v19965_v58 = vld [vmem:[%s22206_s10 + $0x164] ss:$24 sps:$4 sm:$0xff]   ;;  %v19974_v29 = vld [vmem:[%s22206_s10 + $0x434] ss:$24 sps:$4 sm:$0xff]  }
 0x537   : > { %14959 = vmatpush1.bf16.msra.mxu0 %v19885_v25  ;;  %v19968_v25 = vld [vmem:[%s22206_s10 + $0x464] ss:$24 sps:$4 sm:$0xff]  }
 0x538   : > { %14998 = vmatpush1.bf16.msra.mxu1 %v19888_v28  ;;  %14960 = vmatprep.subr.bf16.mxu0 %v19893_v1  ;;  %v19963_v28 = vld [vmem:[%s22206_s10 + $0x160] ss:$24 sps:$4 sm:$0xff]  }
 0x539   : > { %14999 = vmatprep.subr.bf16.mxu1 %v19896_v50  ;;  %v19966_v1 = vld [vmem:[%s22206_s10 + $0x460] ss:$24 sps:$4 sm:$0xff]   ;;  %v19971_v50 = vld [vmem:[%s22206_s10 + $0x134] ss:$24 sps:$4 sm:$0xff]  }
 0x53b   : > { %14961 = vmatpush1.bf16.msra.mxu0 %v19891_v15  ;;  %v20878_v15 = vld [vmem:[%s24555_s0 + $0x78] ss:$136 sps:$4 sm:$0xff]  }
 0x53c   : > { %15000 = vmatpush1.bf16.msra.mxu1 %v19894_v33  ;;  %14962 = vmatprep.subr.bf16.mxu0 %v19899_v31  ;;  %v20879_v33 = vld [vmem:[%s24555_s0 + $0x80] ss:$136 sps:$4 sm:$0xff]  }
 0x53d   : > { %15001 = vmatprep.subr.bf16.mxu1 %v19902_v6  ;;  %v19969_v31 = vld [vmem:[%s22206_s10 + $0x130] ss:$24 sps:$4 sm:$0xff]  }
 0x53e   : > { %v19972_v6 = vld [vmem:[%s22206_s10 + $0x430] ss:$24 sps:$4 sm:$0xff]  }
 0x53f   : > { %14963 = vmatpush1.bf16.msra.mxu0 %v19897_v62  ;;  %v19977_v62 = vld [vmem:[%s22206_s10 + $0x104] ss:$24 sps:$4 sm:$0xff]  }
 0x540   : > { %15002 = vmatpush1.bf16.msra.mxu1 %v19900_v52  ;;  %14964 = vmatprep.subr.bf16.mxu0 %v19905_v34  ;;  %v19980_v52 = vld [vmem:[%s22206_s10 + $0x404] ss:$24 sps:$4 sm:$0xff]  }
 0x541   : > { %15003 = vmatprep.subr.bf16.mxu1 %v19908_v37  ;;  %v20880_v34 = vld [vmem:[%s24555_s0 + $0x4] ss:$136 sps:$4 sm:$0xff]  }
 0x542   : > { %v20881_v37 = vld [vmem:[%s24555_s0 + $0xc] ss:$136 sps:$4 sm:$0xff]  }
 0x543   : > { %14965 = vmatpush1.bf16.msra.mxu0 %v19903_v41  ;;  %v19975_v41 = vld [vmem:[%s22206_s10 + $0x100] ss:$24 sps:$4 sm:$0xff]  }
 0x544   : > { %15004 = vmatpush1.bf16.msra.mxu1 %v19906_v42  ;;  %14966 = vmatprep.subr.bf16.mxu0 %v19911_v44  ;;  %v19978_v42 = vld [vmem:[%s22206_s10 + $0x400] ss:$24 sps:$4 sm:$0xff]   ;;  %v19983_v44 = vld [vmem:[%s22206_s10 + $0xd4] ss:$24 sps:$4 sm:$0xff]  }
 0x545   : > { %15005 = vmatprep.subr.bf16.mxu1 %v19914_v45  ;;  %v19986_v45 = vld [vmem:[%s22206_s10 + $0x3d4] ss:$24 sps:$4 sm:$0xff]  }
 0x547   : > { %14967 = vmatpush1.bf16.msra.mxu0 %v19909_v46  ;;  %v19981_v46 = vld [vmem:[%s22206_s10 + $0xd0] ss:$24 sps:$4 sm:$0xff]  }
 0x548   : > { %15006 = vmatpush1.bf16.msra.mxu1 %v19912_v63  ;;  %14968 = vmatprep.subr.bf16.mxu0 %v19917_v59  ;;  %v19984_v63 = vld [vmem:[%s22206_s10 + $0x3d0] ss:$24 sps:$4 sm:$0xff]   ;;  %v19989_v59 = vld [vmem:[%s22206_s10 + $0xa4] ss:$24 sps:$4 sm:$0xff]  }
 0x549   : > { %15007 = vmatprep.subr.bf16.mxu1 %v19920_v49  ;;  %v19992_v49 = vld [vmem:[%s22206_s10 + $0x3a4] ss:$24 sps:$4 sm:$0xff]  }
 0x54b   : > { %14969 = vmatpush2.bf16.msra.mxu0 %v19915_v20  ;;  %v19987_v20 = vld [vmem:[%s22206_s10 + $0xa0] ss:$24 sps:$4 sm:$0xff]  }
 0x54c   : > { %15008 = vmatpush1.bf16.msra.mxu1 %v19918_v35  ;;  %14970 = vmatprep.subr.bf16.mxu0 %v19923_v12  ;;  %v19990_v35 = vld [vmem:[%s22206_s10 + $0x3a0] ss:$24 sps:$4 sm:$0xff]   ;;  %v19995_v12 = vld [vmem:[%s22206_s10 + $0x74] ss:$24 sps:$4 sm:$0xff]  }
 0x54d   : > { %15009 = vmatprep.subr.bf16.mxu1 %v19926_v53  ;;  %v19998_v53 = vld [vmem:[%s22206_s10 + $0x374] ss:$24 sps:$4 sm:$0xff]  }
 0x54f   : > { %14971 = vmatpush2.bf16.msra.mxu0 %v19921_v54  ;;  %v19993_v54 = vld [vmem:[%s22206_s10 + $0x70] ss:$24 sps:$4 sm:$0xff]  }
 0x550   : > { %15010 = vmatpush1.bf16.msra.mxu1 %v19924_v55  ;;  %14972 = vmatprep.subr.bf16.mxu0 %v19929_v21  ;;  %v19996_v55 = vld [vmem:[%s22206_s10 + $0x370] ss:$24 sps:$4 sm:$0xff]   ;;  %v20001_v21 = vld [vmem:[%s22206_s10 + $0x44] ss:$24 sps:$4 sm:$0xff]  }
 0x551   : > { %15015 = vmatprep.subr.bf16.mxu1 %v19932_v36  ;;  %v20004_v36 = vld [vmem:[%s22206_s10 + $0x344] ss:$24 sps:$4 sm:$0xff]  }
 0x553   : > { %14973 = vmatpush2.bf16.msra.mxu0 %v19927_v19  ;;  %v19999_v19 = vld [vmem:[%s22206_s10 + $0x40] ss:$24 sps:$4 sm:$0xff]  }
 0x554   : > { %15016 = vmatpush2.bf16.msra.mxu1 %v19930_v11  ;;  %14974 = vmatprep.subr.bf16.mxu0 %v19935_v61  ;;  %v20002_v11 = vld [vmem:[%s22206_s10 + $0x340] ss:$24 sps:$4 sm:$0xff]   ;;  %v20007_v61 = vld [vmem:[%s22206_s10 + $0x14] ss:$24 sps:$4 sm:$0xff]  }
 0x555   : > { %15017 = vmatprep.subr.bf16.mxu1 %v19938_v56  ;;  %v20010_v56 = vld [vmem:[%s22206_s10 + $0x314] ss:$24 sps:$4 sm:$0xff]  }
 0x557   : > { %14975 = vmatpush2.bf16.msra.mxu0 %v19933_v57  ;;  %v20005_v57 = vld [vmem:[%s22206_s10 + $0x10] ss:$24 sps:$4 sm:$0xff]  }
 0x558   : > { %15018 = vmatpush2.bf16.msra.mxu1 %v19936_v2  ;;  %14976 = vmatprep.subr.bf16.mxu0 %v19941_v60  ;;  %v20008_v2 = vld [vmem:[%s22206_s10 + $0x310] ss:$24 sps:$4 sm:$0xff]   ;;  %v20013_v60 = vld [vmem:[%s22206_s10 + $0x2e4] ss:$24 sps:$4 sm:$0xff]  }
 0x559   : > { %15019 = vmatprep.subr.bf16.mxu1 %v19944_v48  ;;  %v20016_v48 = vld [vmem:[%s22206_s10 + $0x5e4] ss:$24 sps:$4 sm:$0xff]  }
 0x55b   : > { %14977 = vmatpush2.bf16.msra.mxu0 %v19939_v3  ;;  %v20011_v3 = vld [vmem:[%s22206_s10 + $0x2e0] ss:$24 sps:$4 sm:$0xff]  }
 0x55c   : > { %15020 = vmatpush2.bf16.msra.mxu1 %v19942_v23  ;;  %14978 = vmatprep.subr.bf16.mxu0 %v19947_v5  ;;  %v20014_v23 = vld [vmem:[%s22206_s10 + $0x5e0] ss:$24 sps:$4 sm:$0xff]   ;;  %v20019_v5 = vld [vmem:[%s22206_s10 + $0x2b4] ss:$24 sps:$4 sm:$0xff]  }
 0x55d   : > { %15021 = vmatprep.subr.bf16.mxu1 %v19950_v9  ;;  %v20022_v9 = vld [vmem:[%s22206_s10 + $0x5b4] ss:$24 sps:$4 sm:$0xff]  }
 0x55f   : > { %14979 = vmatpush2.bf16.msra.mxu0 %v19945_v4  ;;  %v20017_v4 = vld [vmem:[%s22206_s10 + $0x2b0] ss:$24 sps:$4 sm:$0xff]  }
 0x560   : > { %15022 = vmatpush2.bf16.msra.mxu1 %v19948_v38  ;;  %14980 = vmatprep.subr.bf16.mxu0 %v19953_v26  ;;  %v20020_v38 = vld [vmem:[%s22206_s10 + $0x5b0] ss:$24 sps:$4 sm:$0xff]   ;;  %v20025_v26 = vld [vmem:[%s22206_s10 + $0x284] ss:$24 sps:$4 sm:$0xff]  }
 0x561   : > { %15023 = vmatprep.subr.bf16.mxu1 %v19956_v10  ;;  %v20028_v10 = vld [vmem:[%s22206_s10 + $0x584] ss:$24 sps:$4 sm:$0xff]  }
 0x563   : > { %14981 = vmatpush2.bf16.msra.mxu0 %v19951_v13  ;;  %v20023_v13 = vld [vmem:[%s22206_s10 + $0x280] ss:$24 sps:$4 sm:$0xff]  }
 0x564   : > { %15024 = vmatpush2.bf16.msra.mxu1 %v19954_v8  ;;  %14982 = vmatprep.subr.bf16.mxu0 %v19959_v16  ;;  %v20026_v8 = vld [vmem:[%s22206_s10 + $0x580] ss:$24 sps:$4 sm:$0xff]   ;;  %v20031_v16 = vld [vmem:[%s22206_s10 + $0x254] ss:$24 sps:$4 sm:$0xff]  }
 0x565   : > { %15025 = vmatprep.subr.bf16.mxu1 %v19962_v30  ;;  %v20034_v30 = vld [vmem:[%s22206_s10 + $0x554] ss:$24 sps:$4 sm:$0xff]  }
 0x567   : > { %14983 = vmatpush2.bf16.msra.mxu0 %v19957_v43  ;;  %v20029_v43 = vld [vmem:[%s22206_s10 + $0x250] ss:$24 sps:$4 sm:$0xff]  }
 0x568   : > { %15026 = vmatpush2.bf16.msra.mxu1 %v19960_v18  ;;  %15038 = vmatprep.subr.bf16.mxu0 %v19965_v58  ;;  %v20032_v18 = vld [vmem:[%s22206_s10 + $0x550] ss:$24 sps:$4 sm:$0xff]   ;;  %v20037_v58 = vld [vmem:[%s22206_s10 + $0x224] ss:$24 sps:$4 sm:$0xff]  }
 0x569   : > { %15081 = vmatprep.subr.bf16.mxu1 %v19968_v25  ;;  %v20040_v25 = vld [vmem:[%s22206_s10 + $0x524] ss:$24 sps:$4 sm:$0xff]  }
 0x56a   : > { %14985 = vmatmul.mubr.bf16.vlgmr.msra.gmra.mxu0 %v20878_v15  ;;  %v20041_v15 = vld [vmem:[%s22206_s10 + $0x1f0] ss:$24 sps:$4 sm:$0xff]  }
 0x56b   : > { %15028 = vmatmul.mubr.bf16.vlgmr.msra.gmra.mxu1 %v20879_v33  ;;  %15039 = vmatpush1.bf16.msra.mxu0 %v19963_v28  ;;  %v20035_v28 = vld [vmem:[%s22206_s10 + $0x220] ss:$24 sps:$4 sm:$0xff]   ;;  %v20044_v33 = vld [vmem:[%s22206_s10 + $0x4f0] ss:$24 sps:$4 sm:$0xff]  }
 0x56c   : > { %15082 = vmatpush1.bf16.msra.mxu1 %v19966_v1  ;;  %15040 = vmatprep.subr.bf16.mxu0 %v19971_v50  ;;  %v20038_v1 = vld [vmem:[%s22206_s10 + $0x520] ss:$24 sps:$4 sm:$0xff]   ;;  %v20043_v50 = vld [vmem:[%s22206_s10 + $0x1f4] ss:$24 sps:$4 sm:$0xff]  }
 0x56d   : > { %15083 = vmatprep.subr.bf16.mxu1 %v19974_v29  ;;  %15070 = vmatprep.mubr.bf16.mxu0 %v20880_v34  ;;  %v20046_v29 = vld [vmem:[%s22206_s10 + $0x4f4] ss:$24 sps:$4 sm:$0xff]  }
 0x56e   : > { %15113 = vmatprep.mubr.bf16.mxu1 %v20881_v37  ;;  %v20055_v34 = vld [vmem:[%s22206_s10 + $0x194] ss:$24 sps:$4 sm:$0xff]  }
 0x56f   : > { %15041 = vmatpush1.bf16.msra.mxu0 %v19969_v31  ;;  %v20049_v31 = vld [vmem:[%s22206_s10 + $0x1c4] ss:$24 sps:$4 sm:$0xff]   ;;  %v20058_v37 = vld [vmem:[%s22206_s10 + $0x494] ss:$24 sps:$4 sm:$0xff]  }
 0x570   : > { %15084 = vmatpush1.bf16.msra.mxu1 %v19972_v6  ;;  %15042 = vmatprep.subr.bf16.mxu0 %v19977_v62  ;;  %v20052_v6 = vld [vmem:[%s22206_s10 + $0x4c4] ss:$24 sps:$4 sm:$0xff]   ;;  %v20047_v62 = vld [vmem:[%s22206_s10 + $0x1c0] ss:$24 sps:$4 sm:$0xff]  }
 0x571   : > { %15085 = vmatprep.subr.bf16.mxu1 %v19980_v52  ;;  %v20050_v52 = vld [vmem:[%s22206_s10 + $0x4c0] ss:$24 sps:$4 sm:$0xff]  }
 0x573   : > { %15043 = vmatpush1.bf16.msra.mxu0 %v19975_v41  ;;  %v20053_v41 = vld [vmem:[%s22206_s10 + $0x190] ss:$24 sps:$4 sm:$0xff]  }
 0x574   : > { %15086 = vmatpush1.bf16.msra.mxu1 %v19978_v42  ;;  %15044 = vmatprep.subr.bf16.mxu0 %v19983_v44  ;;  %v20056_v42 = vld [vmem:[%s22206_s10 + $0x490] ss:$24 sps:$4 sm:$0xff]   ;;  %v20061_v44 = vld [vmem:[%s22206_s10 + $0x764] ss:$24 sps:$4 sm:$0xff]  }
 0x575   : > { %15087 = vmatprep.subr.bf16.mxu1 %v19986_v45  ;;  %v20064_v45 = vld [vmem:[%s22206_s10 + $0xa64] ss:$24 sps:$4 sm:$0xff]  }
 0x577   : > { %15045 = vmatpush1.bf16.msra.mxu0 %v19981_v46  ;;  %v20059_v46 = vld [vmem:[%s22206_s10 + $0x760] ss:$24 sps:$4 sm:$0xff]  }
 0x578   : > { %15088 = vmatpush1.bf16.msra.mxu1 %v19984_v63  ;;  %15046 = vmatprep.subr.bf16.mxu0 %v19989_v59  ;;  %v20062_v63 = vld [vmem:[%s22206_s10 + $0xa60] ss:$24 sps:$4 sm:$0xff]   ;;  %v20067_v59 = vld [vmem:[%s22206_s10 + $0x734] ss:$24 sps:$4 sm:$0xff]  }
 0x579   : > { %15089 = vmatprep.subr.bf16.mxu1 %v19992_v49  ;;  %v20070_v49 = vld [vmem:[%s22206_s10 + $0xa34] ss:$24 sps:$4 sm:$0xff]  }
 0x57b   : > { %15047 = vmatpush1.bf16.msra.mxu0 %v19987_v20  ;;  %v20882_v20 = vld [vmem:[%s24555_s0] ss:$136 sps:$4 sm:$0xff]  }
 0x57c   : > { %15090 = vmatpush1.bf16.msra.mxu1 %v19990_v35  ;;  %15048 = vmatprep.subr.bf16.mxu0 %v19995_v12  ;;  %v20883_v35 = vld [vmem:[%s24555_s0 + $0x8] ss:$136 sps:$4 sm:$0xff]   ;;  %v20065_v12 = vld [vmem:[%s22206_s10 + $0x730] ss:$24 sps:$4 sm:$0xff]  }
 0x57d   : > { %15091 = vmatprep.subr.bf16.mxu1 %v19998_v53  ;;  %v20068_v53 = vld [vmem:[%s22206_s10 + $0xa30] ss:$24 sps:$4 sm:$0xff]  }
 0x57f   : > { %15049 = vmatpush1.bf16.msra.mxu0 %v19993_v54  ;;  %v20073_v54 = vld [vmem:[%s22206_s10 + $0x704] ss:$24 sps:$4 sm:$0xff]  }
 0x580   : > { %15092 = vmatpush1.bf16.msra.mxu1 %v19996_v55  ;;  %15050 = vmatprep.subr.bf16.mxu0 %v20001_v21  ;;  %v20076_v55 = vld [vmem:[%s22206_s10 + $0xa04] ss:$24 sps:$4 sm:$0xff]  }
 0x581   : > { %15093 = vmatprep.subr.bf16.mxu1 %v20004_v36  ;;  %v20884_v21 = vld [vmem:[%s24555_s0 + $0x14] ss:$136 sps:$4 sm:$0xff]  }
 0x582   : > { %v20885_v36 = vld [vmem:[%s24555_s0 + $0x1c] ss:$136 sps:$4 sm:$0xff]  }
 0x583   : > { %15051 = vmatpush1.bf16.msra.mxu0 %v19999_v19  ;;  %v20071_v19 = vld [vmem:[%s22206_s10 + $0x700] ss:$24 sps:$4 sm:$0xff]  }
 0x584   : > { %15094 = vmatpush1.bf16.msra.mxu1 %v20002_v11  ;;  %15052 = vmatprep.subr.bf16.mxu0 %v20007_v61  ;;  %v20074_v11 = vld [vmem:[%s22206_s10 + $0xa00] ss:$24 sps:$4 sm:$0xff]   ;;  %v20079_v61 = vld [vmem:[%s22206_s10 + $0x6d4] ss:$24 sps:$4 sm:$0xff]  }
 0x585   : > { %15095 = vmatprep.subr.bf16.mxu1 %v20010_v56  ;;  %v20082_v56 = vld [vmem:[%s22206_s10 + $0x9d4] ss:$24 sps:$4 sm:$0xff]  }
 0x587   : > { %15053 = vmatpush1.bf16.msra.mxu0 %v20005_v57  ;;  %v20077_v57 = vld [vmem:[%s22206_s10 + $0x6d0] ss:$24 sps:$4 sm:$0xff]  }
 0x588   : > { %15096 = vmatpush1.bf16.msra.mxu1 %v20008_v2  ;;  %15054 = vmatprep.subr.bf16.mxu0 %v20013_v60  ;;  %v20080_v2 = vld [vmem:[%s22206_s10 + $0x9d0] ss:$24 sps:$4 sm:$0xff]   ;;  %v20085_v60 = vld [vmem:[%s22206_s10 + $0x6a4] ss:$24 sps:$4 sm:$0xff]  }
 0x589   : > { %15097 = vmatprep.subr.bf16.mxu1 %v20016_v48  ;;  %v20088_v48 = vld [vmem:[%s22206_s10 + $0x9a4] ss:$24 sps:$4 sm:$0xff]  }
 0x58b   : > { %15055 = vmatpush2.bf16.msra.mxu0 %v20011_v3  ;;  %v20083_v3 = vld [vmem:[%s22206_s10 + $0x6a0] ss:$24 sps:$4 sm:$0xff]  }
 0x58c   : > { %15098 = vmatpush2.bf16.msra.mxu1 %v20014_v23  ;;  %15056 = vmatprep.subr.bf16.mxu0 %v20019_v5  ;;  %v20086_v23 = vld [vmem:[%s22206_s10 + $0x9a0] ss:$24 sps:$4 sm:$0xff]   ;;  %v20091_v5 = vld [vmem:[%s22206_s10 + $0x674] ss:$24 sps:$4 sm:$0xff]  }
 0x58d   : > { %15099 = vmatprep.subr.bf16.mxu1 %v20022_v9  ;;  %v20094_v9 = vld [vmem:[%s22206_s10 + $0x974] ss:$24 sps:$4 sm:$0xff]  }
 0x58f   : > { %15057 = vmatpush2.bf16.msra.mxu0 %v20017_v4  ;;  %v20089_v4 = vld [vmem:[%s22206_s10 + $0x670] ss:$24 sps:$4 sm:$0xff]  }
 0x590   : > { %15100 = vmatpush2.bf16.msra.mxu1 %v20020_v38  ;;  %15058 = vmatprep.subr.bf16.mxu0 %v20025_v26  ;;  %v20092_v38 = vld [vmem:[%s22206_s10 + $0x970] ss:$24 sps:$4 sm:$0xff]   ;;  %v20097_v26 = vld [vmem:[%s22206_s10 + $0x644] ss:$24 sps:$4 sm:$0xff]  }
 0x591   : > { %15101 = vmatprep.subr.bf16.mxu1 %v20028_v10  ;;  %v20100_v10 = vld [vmem:[%s22206_s10 + $0x944] ss:$24 sps:$4 sm:$0xff]  }
 0x593   : > { %15059 = vmatpush2.bf16.msra.mxu0 %v20023_v13  ;;  %v20095_v13 = vld [vmem:[%s22206_s10 + $0x640] ss:$24 sps:$4 sm:$0xff]  }
 0x594   : > { %15102 = vmatpush2.bf16.msra.mxu1 %v20026_v8  ;;  %15060 = vmatprep.subr.bf16.mxu0 %v20031_v16  ;;  %v20098_v8 = vld [vmem:[%s22206_s10 + $0x940] ss:$24 sps:$4 sm:$0xff]   ;;  %v20103_v16 = vld [vmem:[%s22206_s10 + $0x614] ss:$24 sps:$4 sm:$0xff]  }
 0x595   : > { %15103 = vmatprep.subr.bf16.mxu1 %v20034_v30  ;;  %v20106_v30 = vld [vmem:[%s22206_s10 + $0x914] ss:$24 sps:$4 sm:$0xff]  }
 0x597   : > { %15061 = vmatpush2.bf16.msra.mxu0 %v20029_v43  ;;  %v20101_v43 = vld [vmem:[%s22206_s10 + $0x610] ss:$24 sps:$4 sm:$0xff]  }
 0x598   : > { %15104 = vmatpush2.bf16.msra.mxu1 %v20032_v18  ;;  %15062 = vmatprep.subr.bf16.mxu0 %v20037_v58  ;;  %v20104_v18 = vld [vmem:[%s22206_s10 + $0x910] ss:$24 sps:$4 sm:$0xff]   ;;  %v20109_v58 = vld [vmem:[%s22206_s10 + $0x8e4] ss:$24 sps:$4 sm:$0xff]  }
 0x599   : > { %15105 = vmatprep.subr.bf16.mxu1 %v20040_v25  ;;  %v20112_v25 = vld [vmem:[%s22206_s10 + $0xbe4] ss:$24 sps:$4 sm:$0xff]  }
 0x59b   : > { %15063 = vmatpush2.bf16.msra.mxu0 %v20035_v28  ;;  %v20107_v28 = vld [vmem:[%s22206_s10 + $0x8e0] ss:$24 sps:$4 sm:$0xff]  }
 0x59c   : > { %15106 = vmatpush2.bf16.msra.mxu1 %v20038_v1  ;;  %15064 = vmatprep.subr.bf16.mxu0 %v20043_v50  ;;  %v20110_v1 = vld [vmem:[%s22206_s10 + $0xbe0] ss:$24 sps:$4 sm:$0xff]   ;;  %v20115_v50 = vld [vmem:[%s22206_s10 + $0x8b4] ss:$24 sps:$4 sm:$0xff]  }
 0x59d   : > { %15107 = vmatprep.subr.bf16.mxu1 %v20046_v29  ;;  %v20118_v29 = vld [vmem:[%s22206_s10 + $0xbb4] ss:$24 sps:$4 sm:$0xff]  }
 0x59f   : > { %15065 = vmatpush2.bf16.msra.mxu0 %v20041_v15  ;;  %v20113_v15 = vld [vmem:[%s22206_s10 + $0x8b0] ss:$24 sps:$4 sm:$0xff]  }
 0x5a0   : > { %15108 = vmatpush2.bf16.msra.mxu1 %v20044_v33  ;;  %15066 = vmatprep.subr.bf16.mxu0 %v20049_v31  ;;  %v20116_v33 = vld [vmem:[%s22206_s10 + $0xbb0] ss:$24 sps:$4 sm:$0xff]   ;;  %v23779_v31 = vpop.f32.mrf.mxu0 }
 0x5a1   : > { %15109 = vmatprep.subr.bf16.mxu1 %v20052_v6  ;;  %v23781_v6 = vpop.f32.mrf.mxu1 }
 0x5a3   : > { %15067 = vmatpush2.bf16.msra.mxu0 %v20047_v62  ;;  %v20121_v62 = vld [vmem:[%s22206_s10 + $0x884] ss:$24 sps:$4 sm:$0xff]  }
 0x5a4   : > { %15110 = vmatpush2.bf16.msra.mxu1 %v20050_v52  ;;  %15068 = vmatprep.subr.bf16.mxu0 %v20055_v34  ;;  %v20124_v52 = vld [vmem:[%s22206_s10 + $0xb84] ss:$24 sps:$4 sm:$0xff]   ;;  %v20119_v34 = vld [vmem:[%s22206_s10 + $0x880] ss:$24 sps:$4 sm:$0xff]  }
 0x5a5   : > { %15111 = vmatprep.subr.bf16.mxu1 %v20058_v37  ;;  %v20122_v37 = vld [vmem:[%s22206_s10 + $0xb80] ss:$24 sps:$4 sm:$0xff]  }
 0x5a7   : > { %15069 = vmatpush2.bf16.msra.mxu0 %v20053_v41  ;;  %v23787_v41 = vpop.f32.mrf.mxu0 }
 0x5a8   : > { %15112 = vmatpush2.bf16.msra.mxu1 %v20056_v42  ;;  %15124 = vmatprep.subr.bf16.mxu0 %v20061_v44  ;;  %v23789_v42 = vpop.f32.mrf.mxu1  ;;  %v20127_v44 = vld [vmem:[%s22206_s10 + $0x854] ss:$24 sps:$4 sm:$0xff]  }
 0x5a9   : > { %15167 = vmatprep.subr.bf16.mxu1 %v20064_v45  ;;  %v20130_v45 = vld [vmem:[%s22206_s10 + $0xb54] ss:$24 sps:$4 sm:$0xff]  }
 0x5aa   : > { %15071 = vmatmul.mubr.bf16.vlgmr.msra.gmra.mxu0 %v20882_v20  ;;  %v20133_v20 = vld [vmem:[%s22206_s10 + $0x824] ss:$24 sps:$4 sm:$0xff]  }
 0x5ab   : > { %15114 = vmatmul.mubr.bf16.vlgmr.msra.gmra.mxu1 %v20883_v35  ;;  %15125 = vmatpush1.bf16.msra.mxu0 %v20059_v46  ;;  %v20125_v46 = vld [vmem:[%s22206_s10 + $0x850] ss:$24 sps:$4 sm:$0xff]   ;;  %v20136_v35 = vld [vmem:[%s22206_s10 + $0xb24] ss:$24 sps:$4 sm:$0xff]  }
 0x5ac   : > { %15168 = vmatpush1.bf16.msra.mxu1 %v20062_v63  ;;  %15126 = vmatprep.subr.bf16.mxu0 %v20067_v59  ;;  %v20128_v63 = vld [vmem:[%s22206_s10 + $0xb50] ss:$24 sps:$4 sm:$0xff]   ;;  %v23795_v59 = vpop.f32.mrf.mxu0 }
 0x5ad   : > { %15169 = vmatprep.subr.bf16.mxu1 %v20070_v49  ;;  %15156 = vmatprep.mubr.bf16.mxu0 %v20884_v21  ;;  %v23797_v49 = vpop.f32.mrf.mxu1  ;;  %v20139_v21 = vld [vmem:[%s22206_s10 + $0x7f4] ss:$24 sps:$4 sm:$0xff]  }
 0x5ae   : > { %15199 = vmatprep.mubr.bf16.mxu1 %v20885_v36  ;;  %v20142_v36 = vld [vmem:[%s22206_s10 + $0xaf4] ss:$24 sps:$4 sm:$0xff]  }
 0x5af   : > { %15127 = vmatpush1.bf16.msra.mxu0 %v20065_v12  ;;  %v23801_v12 = vpop.f32.mrf.mxu0 }
 0x5b0   : > { %15170 = vmatpush1.bf16.msra.mxu1 %v20068_v53  ;;  %15128 = vmatprep.subr.bf16.mxu0 %v20073_v54  ;;  %v23803_v53 = vpop.f32.mrf.mxu1  ;;  %v20131_v54 = vld [vmem:[%s22206_s10 + $0x820] ss:$24 sps:$4 sm:$0xff]  }
 0x5b1   : > { %15171 = vmatprep.subr.bf16.mxu1 %v20076_v55  ;;  %v20134_v55 = vld [vmem:[%s22206_s10 + $0xb20] ss:$24 sps:$4 sm:$0xff]  }
 0x5b3   : > { %15129 = vmatpush1.bf16.msra.mxu0 %v20071_v19  ;;  %v23809_v19 = vpop.f32.mrf.mxu0 }
 0x5b4   : > { %15172 = vmatpush1.bf16.msra.mxu1 %v20074_v11  ;;  %15130 = vmatprep.subr.bf16.mxu0 %v20079_v61  ;;  %v23811_v11 = vpop.f32.mrf.mxu1  ;;  %v20137_v61 = vld [vmem:[%s22206_s10 + $0x7f0] ss:$24 sps:$4 sm:$0xff]  }
 0x5b5   : > { %15173 = vmatprep.subr.bf16.mxu1 %v20082_v56  ;;  %v20140_v56 = vld [vmem:[%s22206_s10 + $0xaf0] ss:$24 sps:$4 sm:$0xff]  }
 0x5b7   : > { %15131 = vmatpush1.bf16.msra.mxu0 %v20077_v57  ;;  %v20145_v57 = vld [vmem:[%s22206_s10 + $0x7c4] ss:$24 sps:$4 sm:$0xff]  }
 0x5b8   : > { %15174 = vmatpush1.bf16.msra.mxu1 %v20080_v2  ;;  %15132 = vmatprep.subr.bf16.mxu0 %v20085_v60  ;;  %v20148_v2 = vld [vmem:[%s22206_s10 + $0xac4] ss:$24 sps:$4 sm:$0xff]   ;;  %v23817_v60 = vpop.f32.mrf.mxu0 }
 0x5b9   : > { %15175 = vmatprep.subr.bf16.mxu1 %v20088_v48  ;;  %v23819_v48 = vpop.f32.mrf.mxu1 }
 0x5bb   : > { %15133 = vmatpush1.bf16.msra.mxu0 %v20083_v3  ;;  %v20143_v3 = vld [vmem:[%s22206_s10 + $0x7c0] ss:$24 sps:$4 sm:$0xff]  }
 0x5bc   : > { %15176 = vmatpush1.bf16.msra.mxu1 %v20086_v23  ;;  %15134 = vmatprep.subr.bf16.mxu0 %v20091_v5  ;;  %v20146_v23 = vld [vmem:[%s22206_s10 + $0xac0] ss:$24 sps:$4 sm:$0xff]   ;;  %v20151_v5 = vld [vmem:[%s22206_s10 + $0x794] ss:$24 sps:$4 sm:$0xff]  }
 0x5bd   : > { %15177 = vmatprep.subr.bf16.mxu1 %v20094_v9  ;;  %v20154_v9 = vld [vmem:[%s22206_s10 + $0xa94] ss:$24 sps:$4 sm:$0xff]  }
 0x5bf   : > { %15135 = vmatpush1.bf16.msra.mxu0 %v20089_v4  ;;  %v23825_v4 = vpop.f32.mrf.mxu0 }
 0x5c0   : > { %15178 = vmatpush1.bf16.msra.mxu1 %v20092_v38  ;;  %15136 = vmatprep.subr.bf16.mxu0 %v20097_v26  ;;  %v23827_v38 = vpop.f32.mrf.mxu1  ;;  %v20149_v26 = vld [vmem:[%s22206_s10 + $0x790] ss:$24 sps:$4 sm:$0xff]  }
 0x5c1   : > { %15179 = vmatprep.subr.bf16.mxu1 %v20100_v10  ;;  %v20152_v10 = vld [vmem:[%s22206_s10 + $0xa90] ss:$24 sps:$4 sm:$0xff]  }
 0x5c3   : > { %15137 = vmatpush1.bf16.msra.mxu0 %v20095_v13  ;;  %v23831_v13 = vpop.f32.mrf.mxu0 }
 0x5c4   : > { %15180 = vmatpush1.bf16.msra.mxu1 %v20098_v8  ;;  %15138 = vmatprep.subr.bf16.mxu0 %v20103_v16  ;;  %v23833_v8 = vpop.f32.mrf.mxu1  ;;  %v20157_v16 = vld [vmem:[%s22206_s10 + $0xd64] ss:$24 sps:$4 sm:$0xff]  }
 0x5c5   : > { %15181 = vmatprep.subr.bf16.mxu1 %v20106_v30  ;;  %v20160_v30 = vld [vmem:[%s22206_s10 + $0x1064] ss:$24 sps:$4 sm:$0xff]  }
 0x5c7   : > { %15139 = vmatpush1.bf16.msra.mxu0 %v20101_v43  ;;  %v20155_v43 = vld [vmem:[%s22206_s10 + $0xd60] ss:$24 sps:$4 sm:$0xff]  }
 0x5c8   : > { %15182 = vmatpush1.bf16.msra.mxu1 %v20104_v18  ;;  %15140 = vmatprep.subr.bf16.mxu0 %v20109_v58  ;;  %v20158_v18 = vld [vmem:[%s22206_s10 + $0x1060] ss:$24 sps:$4 sm:$0xff]   ;;  %v23839_v58 = vpop.f32.mrf.mxu0 }
 0x5c9   : > { %15183 = vmatprep.subr.bf16.mxu1 %v20112_v25  ;;  %v23841_v25 = vpop.f32.mrf.mxu1 }
 0x5cb   : > { %15141 = vmatpush2.bf16.msra.mxu0 %v20107_v28  ;;  %v20163_v28 = vld [vmem:[%s22206_s10 + $0xd34] ss:$24 sps:$4 sm:$0xff]  }
 0x5cc   : > { %15184 = vmatpush2.bf16.msra.mxu1 %v20110_v1  ;;  %15142 = vmatprep.subr.bf16.mxu0 %v20115_v50  ;;  %v20166_v1 = vld [vmem:[%s22206_s10 + $0x1034] ss:$24 sps:$4 sm:$0xff]   ;;  %v20886_v50 = vld [vmem:[%s24555_s0 + $0x10] ss:$136 sps:$4 sm:$0xff]  }
 0x5cd   : > { %15185 = vmatprep.subr.bf16.mxu1 %v20118_v29  ;;  %v20887_v29 = vld [vmem:[%s24555_s0 + $0x18] ss:$136 sps:$4 sm:$0xff]  }
 0x5cf   : > { %15143 = vmatpush2.bf16.msra.mxu0 %v20113_v15  ;;  %v20161_v15 = vld [vmem:[%s22206_s10 + $0xd30] ss:$24 sps:$4 sm:$0xff]  }
 0x5d0   : > { %15186 = vmatpush2.bf16.msra.mxu1 %v20116_v33  ;;  %15144 = vmatprep.subr.bf16.mxu0 %v20121_v62  ;;  %v20164_v33 = vld [vmem:[%s22206_s10 + $0x1030] ss:$24 sps:$4 sm:$0xff]   ;;  %v23853_v62 = vpop.f32.mrf.mxu0 }
 0x5d1   : > { %15187 = vmatprep.subr.bf16.mxu1 %v20124_v52  ;;  %v23855_v52 = vpop.f32.mrf.mxu1 }
 0x5d3   : > { %15145 = vmatpush2.bf16.msra.mxu0 %v20119_v34  ;;  %v20169_v34 = vld [vmem:[%s22206_s10 + $0xd04] ss:$24 sps:$4 sm:$0xff]  }
 0x5d4   : > { %15188 = vmatpush2.bf16.msra.mxu1 %v20122_v37  ;;  %15146 = vmatprep.subr.bf16.mxu0 %v20127_v44  ;;  %v20172_v37 = vld [vmem:[%s22206_s10 + $0x1004] ss:$24 sps:$4 sm:$0xff]  }
 0x5d5   : > { %15189 = vmatprep.subr.bf16.mxu1 %v20130_v45  ;;  %v20888_v44 = vld [vmem:[%s24555_s0 + $0x24] ss:$136 sps:$4 sm:$0xff]  }
 0x5d6   : > { %v20889_v45 = vld [vmem:[%s24555_s0 + $0x2c] ss:$136 sps:$4 sm:$0xff]  }
 0x5d7   : > { %15147 = vmatpush2.bf16.msra.mxu0 %v20125_v46  ;;  %v20167_v46 = vld [vmem:[%s22206_s10 + $0xd00] ss:$24 sps:$4 sm:$0xff]  }
 0x5d8   : > { %15190 = vmatpush2.bf16.msra.mxu1 %v20128_v63  ;;  %15148 = vmatprep.subr.bf16.mxu0 %v20133_v20  ;;  %v20170_v63 = vld [vmem:[%s22206_s10 + $0x1000] ss:$24 sps:$4 sm:$0xff]   ;;  %v23867_v20 = vpop.f32.mrf.mxu0 }
 0x5d9   : > { %15191 = vmatprep.subr.bf16.mxu1 %v20136_v35  ;;  %v23869_v35 = vpop.f32.mrf.mxu1 }
 0x5db   : > { %15149 = vmatpush2.bf16.msra.mxu0 %v20131_v54  ;;  %v20175_v54 = vld [vmem:[%s22206_s10 + $0xcd4] ss:$24 sps:$4 sm:$0xff]  }
 0x5dc   : > { %15192 = vmatpush2.bf16.msra.mxu1 %v20134_v55  ;;  %15150 = vmatprep.subr.bf16.mxu0 %v20139_v21  ;;  %v20178_v55 = vld [vmem:[%s22206_s10 + $0xfd4] ss:$24 sps:$4 sm:$0xff]   ;;  %v23873_v21 = vpop.f32.mrf.mxu0 }
 0x5dd   : > { %15193 = vmatprep.subr.bf16.mxu1 %v20142_v36  ;;  %v23875_v36 = vpop.f32.mrf.mxu1 }
 0x5df   : > { %15151 = vmatpush2.bf16.msra.mxu0 %v20137_v61  ;;  %v20173_v61 = vld [vmem:[%s22206_s10 + $0xcd0] ss:$24 sps:$4 sm:$0xff]  }
 0x5e0   : > { %15194 = vmatpush2.bf16.msra.mxu1 %v20140_v56  ;;  %15152 = vmatprep.subr.bf16.mxu0 %v20145_v57  ;;  %v20176_v56 = vld [vmem:[%s22206_s10 + $0xfd0] ss:$24 sps:$4 sm:$0xff]   ;;  %v20181_v57 = vld [vmem:[%s22206_s10 + $0xca4] ss:$24 sps:$4 sm:$0xff]  }
 0x5e1   : > { %15195 = vmatprep.subr.bf16.mxu1 %v20148_v2  ;;  %v20184_v2 = vld [vmem:[%s22206_s10 + $0xfa4] ss:$24 sps:$4 sm:$0xff]  }
 0x5e3   : > { %15153 = vmatpush2.bf16.msra.mxu0 %v20143_v3  ;;  %v23881_v3 = vpop.f32.mrf.mxu0 }
 0x5e4   : > { %15196 = vmatpush2.bf16.msra.mxu1 %v20146_v23  ;;  %15154 = vmatprep.subr.bf16.mxu0 %v20151_v5  ;;  %v23883_v23 = vpop.f32.mrf.mxu1  ;;  %v20179_v5 = vld [vmem:[%s22206_s10 + $0xca0] ss:$24 sps:$4 sm:$0xff]  }
 0x5e5   : > { %15197 = vmatprep.subr.bf16.mxu1 %v20154_v9  ;;  %v20182_v9 = vld [vmem:[%s22206_s10 + $0xfa0] ss:$24 sps:$4 sm:$0xff]  }
 0x5e7   : > { %15155 = vmatpush2.bf16.msra.mxu0 %v20149_v26  ;;  %v20187_v26 = vld [vmem:[%s22206_s10 + $0xc74] ss:$24 sps:$4 sm:$0xff]  }
 0x5e8   : > { %15198 = vmatpush2.bf16.msra.mxu1 %v20152_v10  ;;  %15210 = vmatprep.subr.bf16.mxu0 %v20157_v16  ;;  %v20190_v10 = vld [vmem:[%s22206_s10 + $0xf74] ss:$24 sps:$4 sm:$0xff]   ;;  %v23889_v16 = vpop.f32.mrf.mxu0 }
 0x5e9   : > { %15253 = vmatprep.subr.bf16.mxu1 %v20160_v30  ;;  %v23891_v30 = vpop.f32.mrf.mxu1 }
 0x5ea   : > { %15157 = vmatmul.mubr.bf16.vlgmr.msra.gmra.mxu0 %v20886_v50  ;;  %v23897_v50 = vpop.f32.mrf.mxu0 }
 0x5eb   : > { %15200 = vmatmul.mubr.bf16.vlgmr.msra.gmra.mxu1 %v20887_v29  ;;  %15211 = vmatpush1.bf16.msra.mxu0 %v20155_v43  ;;  %v20185_v43 = vld [vmem:[%s22206_s10 + $0xc70] ss:$24 sps:$4 sm:$0xff]   ;;  %v23899_v29 = vpop.f32.mrf.mxu1 }
 0x5ec   : > { %15254 = vmatpush1.bf16.msra.mxu1 %v20158_v18  ;;  %15212 = vmatprep.subr.bf16.mxu0 %v20163_v28  ;;  %v20188_v18 = vld [vmem:[%s22206_s10 + $0xf70] ss:$24 sps:$4 sm:$0xff]   ;;  %v20193_v28 = vld [vmem:[%s22206_s10 + $0xc44] ss:$24 sps:$4 sm:$0xff]  }
 0x5ed   : > { %15255 = vmatprep.subr.bf16.mxu1 %v20166_v1  ;;  %15242 = vmatprep.mubr.bf16.mxu0 %v20888_v44  ;;  %v20196_v1 = vld [vmem:[%s22206_s10 + $0xf44] ss:$24 sps:$4 sm:$0xff]   ;;  %v20199_v44 = vld [vmem:[%s22206_s10 + $0xc14] ss:$24 sps:$4 sm:$0xff]  }
 0x5ee   : > { %15285 = vmatprep.mubr.bf16.mxu1 %v20889_v45  ;;  %v20202_v45 = vld [vmem:[%s22206_s10 + $0xf14] ss:$24 sps:$4 sm:$0xff]  }
 0x5ef   : > { %15213 = vmatpush1.bf16.msra.mxu0 %v20161_v15  ;;  %v20191_v15 = vld [vmem:[%s22206_s10 + $0xc40] ss:$24 sps:$4 sm:$0xff]  }
 0x5f0   : > { %15256 = vmatpush1.bf16.msra.mxu1 %v20164_v33  ;;  %15214 = vmatprep.subr.bf16.mxu0 %v20169_v34  ;;  %v20194_v33 = vld [vmem:[%s22206_s10 + $0xf40] ss:$24 sps:$4 sm:$0xff]   ;;  %v23903_v34 = vpop.f32.mrf.mxu0 }
 0x5f1   : > { %15257 = vmatprep.subr.bf16.mxu1 %v20172_v37  ;;  %v23905_v37 = vpop.f32.mrf.mxu1 }
 0x5f3   : > { %15215 = vmatpush1.bf16.msra.mxu0 %v20167_v46  ;;  %v20197_v46 = vld [vmem:[%s22206_s10 + $0xc10] ss:$24 sps:$4 sm:$0xff]  }
 0x5f4   : > { %15258 = vmatpush1.bf16.msra.mxu1 %v20170_v63  ;;  %15216 = vmatprep.subr.bf16.mxu0 %v20175_v54  ;;  %v20200_v63 = vld [vmem:[%s22206_s10 + $0xf10] ss:$24 sps:$4 sm:$0xff]   ;;  %v23911_v54 = vpop.f32.mrf.mxu0 }
 0x5f5   : > { %15259 = vmatprep.subr.bf16.mxu1 %v20178_v55  ;;  %v23913_v55 = vpop.f32.mrf.mxu1 }
 0x5f7   : > { %15217 = vmatpush1.bf16.msra.mxu0 %v20173_v61  ;;  %v20205_v61 = vld [vmem:[%s22206_s10 + $0xee4] ss:$24 sps:$4 sm:$0xff]  }
 0x5f8   : > { %15260 = vmatpush1.bf16.msra.mxu1 %v20176_v56  ;;  %15218 = vmatprep.subr.bf16.mxu0 %v20181_v57  ;;  %v20208_v56 = vld [vmem:[%s22206_s10 + $0x11e4] ss:$24 sps:$4 sm:$0xff]   ;;  %v20203_v57 = vld [vmem:[%s22206_s10 + $0xee0] ss:$24 sps:$4 sm:$0xff]  }
 0x5f9   : > { %15261 = vmatprep.subr.bf16.mxu1 %v20184_v2  ;;  %v20206_v2 = vld [vmem:[%s22206_s10 + $0x11e0] ss:$24 sps:$4 sm:$0xff]  }
 0x5fb   : > { %15219 = vmatpush1.bf16.msra.mxu0 %v20179_v5  ;;  %v23919_v5 = vpop.f32.mrf.mxu0 }
 0x5fc   : > { %15262 = vmatpush1.bf16.msra.mxu1 %v20182_v9  ;;  %15220 = vmatprep.subr.bf16.mxu0 %v20187_v26  ;;  %v23921_v9 = vpop.f32.mrf.mxu1  ;;  %v20211_v26 = vld [vmem:[%s22206_s10 + $0xeb4] ss:$24 sps:$4 sm:$0xff]  }
 0x5fd   : > { %15263 = vmatprep.subr.bf16.mxu1 %v20190_v10  ;;  %v20214_v10 = vld [vmem:[%s22206_s10 + $0x11b4] ss:$24 sps:$4 sm:$0xff]  }
 0x5ff   : > { %15221 = vmatpush1.bf16.msra.mxu0 %v20185_v43  ;;  %v20209_v43 = vld [vmem:[%s22206_s10 + $0xeb0] ss:$24 sps:$4 sm:$0xff]  }
 0x600   : > { %15264 = vmatpush1.bf16.msra.mxu1 %v20188_v18  ;;  %15222 = vmatprep.subr.bf16.mxu0 %v20193_v28  ;;  %v20212_v18 = vld [vmem:[%s22206_s10 + $0x11b0] ss:$24 sps:$4 sm:$0xff]   ;;  %v23927_v28 = vpop.f32.mrf.mxu0 }
 0x601   : > { %15265 = vmatprep.subr.bf16.mxu1 %v20196_v1  ;;  %v23929_v1 = vpop.f32.mrf.mxu1 }
 0x603   : > { %15223 = vmatpush1.bf16.msra.mxu0 %v20191_v15  ;;  %v20217_v15 = vld [vmem:[%s22206_s10 + $0xe84] ss:$24 sps:$4 sm:$0xff]  }
 0x604   : > { %15266 = vmatpush1.bf16.msra.mxu1 %v20194_v33  ;;  %15224 = vmatprep.subr.bf16.mxu0 %v20199_v44  ;;  %v20220_v33 = vld [vmem:[%s22206_s10 + $0x1184] ss:$24 sps:$4 sm:$0xff]   ;;  %v23933_v44 = vpop.f32.mrf.mxu0 }
 0x605   : > { %15267 = vmatprep.subr.bf16.mxu1 %v20202_v45  ;;  %v23935_v45 = vpop.f32.mrf.mxu1 }
 0x607   : > { %15225 = vmatpush1.bf16.msra.mxu0 %v20197_v46  ;;  %v20215_v46 = vld [vmem:[%s22206_s10 + $0xe80] ss:$24 sps:$4 sm:$0xff]  }
 0x608   : > { %15268 = vmatpush1.bf16.msra.mxu1 %v20200_v63  ;;  %15226 = vmatprep.subr.bf16.mxu0 %v20205_v61  ;;  %v20218_v63 = vld [vmem:[%s22206_s10 + $0x1180] ss:$24 sps:$4 sm:$0xff]   ;;  %v20223_v61 = vld [vmem:[%s22206_s10 + $0xe54] ss:$24 sps:$4 sm:$0xff]  }
 0x609   : > { %15269 = vmatprep.subr.bf16.mxu1 %v20208_v56  ;;  %v20226_v56 = vld [vmem:[%s22206_s10 + $0x1154] ss:$24 sps:$4 sm:$0xff]  }
 0x60b   : > { %15227 = vmatpush2.bf16.msra.mxu0 %v20203_v57  ;;  %v14346_v57 = vadd.f32 %v23351_v14, %v23333_v47  ;;  %v20229_v47 = vld [vmem:[%s22206_s10 + $0xe24] ss:$24 sps:$4 sm:$0xff]  }
 0x60c   : > { %15270 = vmatpush2.bf16.msra.mxu1 %v20206_v2  ;;  %15228 = vmatprep.subr.bf16.mxu0 %v20211_v26  ;;  %v23943_v2 = vpop.f32.mrf.mxu0  ;;  %v23945_v26 = vpop.f32.mrf.mxu1  ;;  %v20232_v14 = vld [vmem:[%s22206_s10 + $0x1124] ss:$24 sps:$4 sm:$0xff]  }
 0x60d   : > { %15271 = vmatprep.subr.bf16.mxu1 %v20214_v10  ;;  %v14389_v10 = vadd.f32 %v23787_v41, %v14346_v57 }
 0x60e   : > { %v14818_v41 = vpop.f32.mrf.mxu0  ;;  %v23956_v57 = vpop.f32.mrf.mxu1 }
 0x60f   : > { %15229 = vmatpush2.bf16.msra.mxu0 %v20209_v43  ;;  %v14471_v43 = vadd.f32 %v23801_v12, %v23369_v32 }
 0x610   : > { %15272 = vmatpush2.bf16.msra.mxu1 %v20212_v18  ;;  %15230 = vmatprep.subr.bf16.mxu0 %v20217_v15  ;;  %v20221_v18 = vld [vmem:[%s22206_s10 + $0xe50] ss:$24 sps:$4 sm:$0xff]  }
 0x611   : > { %15273 = vmatprep.subr.bf16.mxu1 %v20220_v33  ;;  %v20224_v15 = vld [vmem:[%s22206_s10 + $0x1150] ss:$24 sps:$4 sm:$0xff]   ;;  %v14432_v33 = vadd.f32 %v23789_v42, %v14389_v10  ;;  %v14514_v22 = vadd.f32 %v23803_v53, %v14471_v43  ;;  %v20238_v42 = vld [vmem:[%s22206_s10 + $0x10f4] ss:$24 sps:$4 sm:$0xff]   ;;  %v23966_v10 = vpop.f32.mrf.mxu0 }
 0x612   : > { %v20233_v43 = vld [vmem:[%s22206_s10 + $0xdf0] ss:$24 sps:$4 sm:$0xff]  }
 0x613   : > { %15231 = vmatpush2.bf16.msra.mxu0 %v20215_v46  ;;  %v14475_v32 = vadd.f32 %v23817_v60, %v14432_v33  ;;  %v14557_v12 = vadd.f32 %v23831_v13, %v14514_v22  ;;  %v20227_v46 = vld [vmem:[%s22206_s10 + $0xe20] ss:$24 sps:$4 sm:$0xff]   ;;  %v23968_v60 = vpop.f32.mrf.mxu1 }
 0x614   : > { %15274 = vmatpush2.bf16.msra.mxu1 %v20218_v63  ;;  %15232 = vmatprep.subr.bf16.mxu0 %v20223_v61  ;;  %v20230_v63 = vld [vmem:[%s22206_s10 + $0x1120] ss:$24 sps:$4 sm:$0xff]   ;;  %v20235_v61 = vld [vmem:[%s22206_s10 + $0xdf4] ss:$24 sps:$4 sm:$0xff]  }
 0x615   : > { %15275 = vmatprep.subr.bf16.mxu1 %v20226_v56  ;;  %v14518_v53 = vadd.f32 %v23819_v48, %v14475_v32  ;;  %v14600_v56 = vadd.f32 %v23833_v8, %v14557_v12  ;;  %v20241_v48 = vld [vmem:[%s22206_s10 + $0xdc4] ss:$24 sps:$4 sm:$0xff]   ;;  %v20239_v32 = vld [vmem:[%s22206_s10 + $0xdc0] ss:$24 sps:$4 sm:$0xff]  }
 0x616   : > { %v20244_v8 = vld [vmem:[%s22206_s10 + $0x10c4] ss:$24 sps:$4 sm:$0xff]   ;;  %v20242_v12 = vld [vmem:[%s22206_s10 + $0x10c0] ss:$24 sps:$4 sm:$0xff]  }
 0x617   : > { %15233 = vmatpush2.bf16.msra.mxu0 %v20221_v18  ;;  %v14561_v22 = vadd.f32 %v23853_v62, %v14518_v53  ;;  %v14643_v13 = vadd.f32 %v23873_v21, %v14600_v56  ;;  %v20236_v18 = vld [vmem:[%s22206_s10 + $0x10f0] ss:$24 sps:$4 sm:$0xff]  }
 0x618   : > { %15276 = vmatpush2.bf16.msra.mxu1 %v20224_v15  ;;  %15234 = vmatprep.subr.bf16.mxu0 %v20229_v47  ;;  %v14900_v15 = vpop.f32.mrf.mxu0  ;;  %v14943_v47 = vpop.f32.mrf.mxu1  ;;  %v20245_v53 = vld [vmem:[%s22206_s10 + $0xd90] ss:$24 sps:$4 sm:$0xff]  }
 0x619   : > { %15277 = vmatprep.subr.bf16.mxu1 %v20232_v14  ;;  %v14604_v14 = vadd.f32 %v23855_v52, %v14561_v22  ;;  %v14686_v62 = vadd.f32 %v23875_v36, %v14643_v13  ;;  %v20247_v52 = vld [vmem:[%s22206_s10 + $0xd94] ss:$24 sps:$4 sm:$0xff]   ;;  %v20248_v56 = vld [vmem:[%s22206_s10 + $0x1090] ss:$24 sps:$4 sm:$0xff]  }
 0x61a   : > { %v20250_v36 = vld [vmem:[%s22206_s10 + $0x1094] ss:$24 sps:$4 sm:$0xff]  }
 0x61b   : > { %15235 = vmatpush2.bf16.msra.mxu0 %v20227_v46  ;;  %v14647_v21 = vadd.f32 %v23889_v16, %v14604_v14  ;;  %v14729_v33 = vadd.f32 %v23903_v34, %v14686_v62  ;;  %v23982_v46 = vpop.f32.mrf.mxu0 }
 0x61c   : > { %15278 = vmatpush2.bf16.msra.mxu1 %v20230_v63  ;;  %15236 = vmatprep.subr.bf16.mxu0 %v20235_v61  ;;  %v23984_v63 = vpop.f32.mrf.mxu1 }
 0x61d   : > { %15279 = vmatprep.subr.bf16.mxu1 %v20238_v42  ;;  %v14690_v16 = vadd.f32 %v23891_v30, %v14647_v21  ;;  %v14772_v34 = vadd.f32 %v23905_v37, %v14729_v33  ;;  %v14904_v22 = vpop.f32.mrf.mxu0  ;;  %v20256_v30 = vld [vmem:[%s22206_s10 + $0x1664] ss:$24 sps:$4 sm:$0xff]   ;;  %v20259_v21 = vld [vmem:[%s22206_s10 + $0x1334] ss:$24 sps:$4 sm:$0xff]  }
 0x61e   : > { %v14947_v13 = vpop.f32.mrf.mxu1  ;;  %v20262_v33 = vld [vmem:[%s22206_s10 + $0x1634] ss:$24 sps:$4 sm:$0xff]  }
 0x61f   : > { %15237 = vmatpush2.bf16.msra.mxu0 %v20233_v43  ;;  %v14733_v61 = vadd.f32 %v23919_v5, %v14690_v16  ;;  %v14815_v42 = vadd.f32 %v23933_v44, %v14772_v34  ;;  %v20253_v43 = vld [vmem:[%s22206_s10 + $0x1364] ss:$24 sps:$4 sm:$0xff]   ;;  %v24000_v14 = vpop.f32.mrf.mxu0 }
 0x620   : > { %15280 = vmatpush2.bf16.msra.mxu1 %v20236_v18  ;;  %15238 = vmatprep.subr.bf16.mxu0 %v20241_v48  ;;  %v20251_v48 = vld [vmem:[%s22206_s10 + $0x1360] ss:$24 sps:$4 sm:$0xff]   ;;  %v24002_v62 = vpop.f32.mrf.mxu1 }
 0x621   : > { %15281 = vmatprep.subr.bf16.mxu1 %v20244_v8  ;;  %v14776_v37 = vadd.f32 %v23921_v9, %v14733_v61  ;;  %v14858_v5 = vadd.f32 %v23935_v45, %v14815_v42  ;;  %v20254_v8 = vld [vmem:[%s22206_s10 + $0x1660] ss:$24 sps:$4 sm:$0xff]   ;;  %v20265_v61 = vld [vmem:[%s22206_s10 + $0x1304] ss:$24 sps:$4 sm:$0xff]  }
 0x622   : > { %v20268_v42 = vld [vmem:[%s22206_s10 + $0x1604] ss:$24 sps:$4 sm:$0xff]  }
 0x623   : > { %15239 = vmatpush2.bf16.msra.mxu0 %v20239_v32  ;;  %v14819_v18 = vadd.f32 %v14818_v41, %v14776_v37  ;;  %v14901_v44 = vadd.f32 %v14900_v15, %v14858_v5  ;;  %v20890_v41 = vld [vmem:[%s24555_s0 + $0x20] ss:$136 sps:$4 sm:$0xff]  }
 0x624   : > { %15282 = vmatpush2.bf16.msra.mxu1 %v20242_v12  ;;  %15240 = vmatprep.subr.bf16.mxu0 %v20247_v52  ;;  %v20891_v15 = vld [vmem:[%s24555_s0 + $0x28] ss:$136 sps:$4 sm:$0xff]  }
 0x625   : > { %15283 = vmatprep.subr.bf16.mxu1 %v20250_v36  ;;  %v14862_v9 = vadd.f32 %v23956_v57, %v14819_v18  ;;  %v14944_v32 = vadd.f32 %v14943_v47, %v14901_v44  ;;  %v20257_v57 = vld [vmem:[%s22206_s10 + $0x1330] ss:$24 sps:$4 sm:$0xff]   ;;  %v20266_v18 = vld [vmem:[%s22206_s10 + $0x1600] ss:$24 sps:$4 sm:$0xff]   ;;  %v20271_v44 = vld [vmem:[%s22206_s10 + $0x12d4] ss:$24 sps:$4 sm:$0xff]  }
 0x626   : > { %v20260_v47 = vld [vmem:[%s22206_s10 + $0x1630] ss:$24 sps:$4 sm:$0xff]  }
 0x627   : > { %15241 = vmatpush2.bf16.msra.mxu0 %v20245_v53  ;;  %v14905_v52 = vadd.f32 %v14904_v22, %v14862_v9  ;;  %v20893_v22 = vld [vmem:[%s24555_s0 + $0x3c] ss:$136 sps:$4 sm:$0xff]   ;;  %v20277_v9 = vld [vmem:[%s22206_s10 + $0x12a4] ss:$24 sps:$4 sm:$0xff]  }
 0x628   : > { %15284 = vmatpush2.bf16.msra.mxu1 %v20248_v56  ;;  %15296 = vmatprep.subr.bf16.mxu0 %v20253_v43  ;;  %v20892_v56 = vld [vmem:[%s24555_s0 + $0x34] ss:$136 sps:$4 sm:$0xff]  }
 0x629   : > { %15339 = vmatprep.subr.bf16.mxu1 %v20256_v30  ;;  %v14948_v53 = vadd.f32 %v14947_v13, %v14905_v52  ;;  %v20263_v13 = vld [vmem:[%s22206_s10 + $0x1300] ss:$24 sps:$4 sm:$0xff]   ;;  %v20281_v52 = vld [vmem:[%s22206_s10 + $0x1270] ss:$24 sps:$4 sm:$0xff]  }
 0x62a   : > { %v14986_v45 = vpop.f32.mrf.mxu0  ;;  %15243 = vmatmul.mubr.bf16.vlgmr.msra.gmra.mxu0 %v20890_v41  ;;  %v20278_v41 = vld [vmem:[%s22206_s10 + $0x15a0] ss:$24 sps:$4 sm:$0xff]  }
 0x62b   : > { %15286 = vmatmul.mubr.bf16.vlgmr.msra.gmra.mxu1 %v20891_v15  ;;  %v15029_v12 = vpop.f32.mrf.mxu1  ;;  %v14987_v36 = vadd.f32 %v14986_v45, %v14944_v32  ;;  %15297 = vmatpush1.bf16.msra.mxu0 %v20251_v48  ;;  %v20274_v48 = vld [vmem:[%s22206_s10 + $0x15d4] ss:$24 sps:$4 sm:$0xff]   ;;  %v20280_v32 = vld [vmem:[%s22206_s10 + $0x15a4] ss:$24 sps:$4 sm:$0xff]   ;;  %v20275_v45 = vld [vmem:[%s22206_s10 + $0x12a0] ss:$24 sps:$4 sm:$0xff]  }
 0x62c   : > { %15340 = vmatpush1.bf16.msra.mxu1 %v20254_v8  ;;  %v24015_v16 = vpop.f32.mrf.mxu0  ;;  %15298 = vmatprep.subr.bf16.mxu0 %v20259_v21  ;;  %v20269_v21 = vld [vmem:[%s22206_s10 + $0x12d0] ss:$24 sps:$4 sm:$0xff]   ;;  %v20283_v15 = vld [vmem:[%s22206_s10 + $0x1274] ss:$24 sps:$4 sm:$0xff]  }
 0x62d   : > { %v24017_v34 = vpop.f32.mrf.mxu1  ;;  %15341 = vmatprep.subr.bf16.mxu1 %v20262_v33  ;;  %15328 = vmatprep.mubr.bf16.mxu0 %v20892_v56  ;;  %v15030_v43 = vadd.f32 %v15029_v12, %v14987_v36  ;;  %v20272_v33 = vld [vmem:[%s22206_s10 + $0x15d0] ss:$24 sps:$4 sm:$0xff]   ;;  %v20286_v12 = vld [vmem:[%s22206_s10 + $0x1574] ss:$24 sps:$4 sm:$0xff]  }
 0x62e   : > { %15371 = vmatprep.mubr.bf16.mxu1 %v20893_v22  ;;  %v14990_v30 = vpop.f32.mrf.mxu0  ;;  %v20284_v36 = vld [vmem:[%s22206_s10 + $0x1570] ss:$24 sps:$4 sm:$0xff]   ;;  %v20295_v22 = vld [vmem:[%s22206_s10 + $0x1214] ss:$24 sps:$4 sm:$0xff]  }
 0x62f   : > { %v15033_v37 = vpop.f32.mrf.mxu1  ;;  %v14991_v5 = vadd.f32 %v14990_v30, %v14948_v53  ;;  %15299 = vmatpush1.bf16.msra.mxu0 %v20257_v57  ;;  %20829 = vtanh.f32 %v15030_v43  ;;  %v20289_v57 = vld [vmem:[%s22206_s10 + $0x1244] ss:$24 sps:$4 sm:$0xff]   ;;  %v20290_v53 = vld [vmem:[%s22206_s10 + $0x1540] ss:$24 sps:$4 sm:$0xff]   ;;  %v20298_v43 = vld [vmem:[%s22206_s10 + $0x1514] ss:$24 sps:$4 sm:$0xff]  }
 0x630   : > { %15342 = vmatpush1.bf16.msra.mxu1 %v20260_v47  ;;  %15300 = vmatprep.subr.bf16.mxu0 %v20265_v61  ;;  %v20292_v47 = vld [vmem:[%s22206_s10 + $0x1544] ss:$24 sps:$4 sm:$0xff]  }
 0x631   : > { %15343 = vmatprep.subr.bf16.mxu1 %v20268_v42  ;;  %v15034_v8 = vadd.f32 %v15033_v37, %v14991_v5  ;;  %v20287_v42 = vld [vmem:[%s22206_s10 + $0x1240] ss:$24 sps:$4 sm:$0xff]   ;;  %v20293_v37 = vld [vmem:[%s22206_s10 + $0x1210] ss:$24 sps:$4 sm:$0xff]  }
 0x632   : > { %v20296_v5 = vld [vmem:[%s22206_s10 + $0x1510] ss:$24 sps:$4 sm:$0xff]  }
 0x633   : > { %20831 = vtanh.f32 %v15034_v8  ;;  %15301 = vmatpush1.bf16.msra.mxu0 %v20263_v13  ;;  %v20301_v13 = vld [vmem:[%s22206_s10 + $0x14e4] ss:$24 sps:$4 sm:$0xff]   ;;  %v20307_v8 = vld [vmem:[%s22206_s10 + $0x14b4] ss:$24 sps:$4 sm:$0xff]  }
 0x634   : > { %15344 = vmatpush1.bf16.msra.mxu1 %v20266_v18  ;;  %15302 = vmatprep.subr.bf16.mxu0 %v20271_v44  ;;  %v20304_v18 = vld [vmem:[%s22206_s10 + $0x17e4] ss:$24 sps:$4 sm:$0xff]   ;;  %v20299_v44 = vld [vmem:[%s22206_s10 + $0x14e0] ss:$24 sps:$4 sm:$0xff]  }
 0x635   : > { %15345 = vmatprep.subr.bf16.mxu1 %v20274_v48  ;;  %v20302_v48 = vld [vmem:[%s22206_s10 + $0x17e0] ss:$24 sps:$4 sm:$0xff]  }
 0x637   : > { %15303 = vmatpush1.bf16.msra.mxu0 %v20269_v21  ;;  %v20310_v21 = vld [vmem:[%s22206_s10 + $0x17b4] ss:$24 sps:$4 sm:$0xff]  }
 0x638   : > { %15346 = vmatpush1.bf16.msra.mxu1 %v20272_v33  ;;  %15304 = vmatprep.subr.bf16.mxu0 %v20277_v9  ;;  %v20305_v33 = vld [vmem:[%s22206_s10 + $0x14b0] ss:$24 sps:$4 sm:$0xff]  }
 0x639   : > { %15347 = vmatprep.subr.bf16.mxu1 %v20280_v32  ;;  %v20308_v9 = vld [vmem:[%s22206_s10 + $0x17b0] ss:$24 sps:$4 sm:$0xff]   ;;  %v20313_v32 = vld [vmem:[%s22206_s10 + $0x1484] ss:$24 sps:$4 sm:$0xff]  }
 0x63b   : > { %15305 = vmatpush1.bf16.msra.mxu0 %v20275_v45  ;;  %v20316_v45 = vld [vmem:[%s22206_s10 + $0x1784] ss:$24 sps:$4 sm:$0xff]  }
 0x63c   : > { %15348 = vmatpush1.bf16.msra.mxu1 %v20278_v41  ;;  %15306 = vmatprep.subr.bf16.mxu0 %v20283_v15  ;;  %v24043_v61 = vpop.eup %20829  ;;  %v20311_v41 = vld [vmem:[%s22206_s10 + $0x1480] ss:$24 sps:$4 sm:$0xff]  }
 0x63d   : > { %15349 = vmatprep.subr.bf16.mxu1 %v20286_v12  ;;  %v20314_v15 = vld [vmem:[%s22206_s10 + $0x1780] ss:$24 sps:$4 sm:$0xff]   ;;  %v20319_v12 = vld [vmem:[%s22206_s10 + $0x1454] ss:$24 sps:$4 sm:$0xff]  }
 0x63f   : > { %15307 = vmatpush1.bf16.msra.mxu0 %v20281_v52  ;;  %v20322_v52 = vld [vmem:[%s22206_s10 + $0x1754] ss:$24 sps:$4 sm:$0xff]  }
 0x640   : > { %15350 = vmatpush1.bf16.msra.mxu1 %v20284_v36  ;;  %v24047_v56 = vpop.eup %20831  ;;  %15308 = vmatprep.subr.bf16.mxu0 %v20289_v57  ;;  %v20317_v36 = vld [vmem:[%s22206_s10 + $0x1450] ss:$24 sps:$4 sm:$0xff]  }
 0x641   : > { %15351 = vmatprep.subr.bf16.mxu1 %v20292_v47  ;;  %v15785_v30 = vpack.c.bf16 %v24047_v56, %v24043_v61  ;;  %v20320_v57 = vld [vmem:[%s22206_s10 + $0x1750] ss:$24 sps:$4 sm:$0xff]   ;;  %v20325_v47 = vld [vmem:[%s22206_s10 + $0x1424] ss:$24 sps:$4 sm:$0xff]  }
 0x642   : > { %v20811_v61 = vld [vmem:[%s22204_s9 + $0x160] sm:$0xff]  }
 0x643   : > { %15309 = vmatpush1.bf16.msra.mxu0 %v20287_v42  ;;  %v20328_v42 = vld [vmem:[%s22206_s10 + $0x1724] ss:$24 sps:$4 sm:$0xff]   ;;  %v20812_v56 = vld [vmem:[%s22204_s9 + $0x120] sm:$0xff]  }
 0x644   : > { %15352 = vmatpush1.bf16.msra.mxu1 %v20290_v53  ;;  %15310 = vmatprep.subr.bf16.mxu0 %v20295_v22  ;;  %v20323_v53 = vld [vmem:[%s22206_s10 + $0x1420] ss:$24 sps:$4 sm:$0xff]  }
 0x645   : > { %15353 = vmatprep.subr.bf16.mxu1 %v20298_v43  ;;  %v20326_v22 = vld [vmem:[%s22206_s10 + $0x1720] ss:$24 sps:$4 sm:$0xff]   ;;  %v20331_v43 = vld [vmem:[%s22206_s10 + $0x13f4] ss:$24 sps:$4 sm:$0xff]  }
 0x647   : > { %15311 = vmatpush1.bf16.msra.mxu0 %v20293_v37  ;;  %v20334_v37 = vld [vmem:[%s22206_s10 + $0x16f4] ss:$24 sps:$4 sm:$0xff]  }
 0x648   : > { %15354 = vmatpush1.bf16.msra.mxu1 %v20296_v5  ;;  %15312 = vmatprep.subr.bf16.mxu0 %v20301_v13  ;;  %v20329_v5 = vld [vmem:[%s22206_s10 + $0x13f0] ss:$24 sps:$4 sm:$0xff]  }
 0x649   : > { %15355 = vmatprep.subr.bf16.mxu1 %v20304_v18  ;;  %v20332_v13 = vld [vmem:[%s22206_s10 + $0x16f0] ss:$24 sps:$4 sm:$0xff]   ;;  %v20337_v18 = vld [vmem:[%s22206_s10 + $0x13c4] ss:$24 sps:$4 sm:$0xff]  }
 0x64b   : > { %15313 = vmatpush2.bf16.msra.mxu0 %v20299_v44  ;;  %v20340_v44 = vld [vmem:[%s22206_s10 + $0x16c4] ss:$24 sps:$4 sm:$0xff]  }
 0x64c   : > { %15356 = vmatpush2.bf16.msra.mxu1 %v20302_v48  ;;  %15314 = vmatprep.subr.bf16.mxu0 %v20307_v8  ;;  %v20335_v48 = vld [vmem:[%s22206_s10 + $0x13c0] ss:$24 sps:$4 sm:$0xff]  }
 0x64d   : > { %15357 = vmatprep.subr.bf16.mxu1 %v20310_v21  ;;  %v20338_v8 = vld [vmem:[%s22206_s10 + $0x16c0] ss:$24 sps:$4 sm:$0xff]   ;;  %v20343_v21 = vld [vmem:[%s22206_s10 + $0x1394] ss:$24 sps:$4 sm:$0xff]  }
 0x64f   : > { %15315 = vmatpush2.bf16.msra.mxu0 %v20305_v33  ;;  %v20346_v33 = vld [vmem:[%s22206_s10 + $0x1694] ss:$24 sps:$4 sm:$0xff]  }
 0x650   : > { %15358 = vmatpush2.bf16.msra.mxu1 %v20308_v9  ;;  %15316 = vmatprep.subr.bf16.mxu0 %v20313_v32  ;;  %v20341_v9 = vld [vmem:[%s22206_s10 + $0x1390] ss:$24 sps:$4 sm:$0xff]  }
 0x651   : > { %15359 = vmatprep.subr.bf16.mxu1 %v20316_v45  ;;  %v20344_v32 = vld [vmem:[%s22206_s10 + $0x1690] ss:$24 sps:$4 sm:$0xff]   ;;  %v20349_v45 = vld [vmem:[%s22206_s10 + $0x1964] ss:$24 sps:$4 sm:$0xff]  }
 0x653   : > { %15317 = vmatpush2.bf16.msra.mxu0 %v20311_v41  ;;  %v20352_v41 = vld [vmem:[%s22206_s10 + $0x1c64] ss:$24 sps:$4 sm:$0xff]  }
 0x654   : > { %15360 = vmatpush2.bf16.msra.mxu1 %v20314_v15  ;;  %15318 = vmatprep.subr.bf16.mxu0 %v20319_v12  ;;  %v20347_v15 = vld [vmem:[%s22206_s10 + $0x1960] ss:$24 sps:$4 sm:$0xff]  }
 0x655   : > { %15361 = vmatprep.subr.bf16.mxu1 %v20322_v52  ;;  %v20350_v12 = vld [vmem:[%s22206_s10 + $0x1c60] ss:$24 sps:$4 sm:$0xff]   ;;  %v20355_v52 = vld [vmem:[%s22206_s10 + $0x1934] ss:$24 sps:$4 sm:$0xff]  }
 0x657   : > { %15319 = vmatpush2.bf16.msra.mxu0 %v20317_v36  ;;  %v20358_v36 = vld [vmem:[%s22206_s10 + $0x1c34] ss:$24 sps:$4 sm:$0xff]  }
 0x658   : > { %15362 = vmatpush2.bf16.msra.mxu1 %v20320_v57  ;;  %15320 = vmatprep.subr.bf16.mxu0 %v20325_v47  ;;  %v20894_v57 = vld [vmem:[%s24555_s0 + $0x30] ss:$136 sps:$4 sm:$0xff]  }
 0x659   : > { %15363 = vmatprep.subr.bf16.mxu1 %v20328_v42  ;;  %v20895_v47 = vld [vmem:[%s24555_s0 + $0x38] ss:$136 sps:$4 sm:$0xff]  }
 0x65a   : > { %v20353_v42 = vld [vmem:[%s22206_s10 + $0x1930] ss:$24 sps:$4 sm:$0xff]  }
 0x65b   : > { %15321 = vmatpush2.bf16.msra.mxu0 %v20323_v53  ;;  %v20356_v53 = vld [vmem:[%s22206_s10 + $0x1c30] ss:$24 sps:$4 sm:$0xff]  }
 0x65c   : > { %15364 = vmatpush2.bf16.msra.mxu1 %v20326_v22  ;;  %15322 = vmatprep.subr.bf16.mxu0 %v20331_v43  ;;  %v20361_v22 = vld [vmem:[%s22206_s10 + $0x1904] ss:$24 sps:$4 sm:$0xff]  }
 0x65d   : > { %15365 = vmatprep.subr.bf16.mxu1 %v20334_v37  ;;  %v20364_v43 = vld [vmem:[%s22206_s10 + $0x1c04] ss:$24 sps:$4 sm:$0xff]  }
 0x65e   : > { %v20896_v37 = vld [vmem:[%s24555_s0 + $0x44] ss:$136 sps:$4 sm:$0xff]  }
 0x65f   : > { %15323 = vmatpush2.bf16.msra.mxu0 %v20329_v5  ;;  %v20897_v5 = vld [vmem:[%s24555_s0 + $0x4c] ss:$136 sps:$4 sm:$0xff]  }
 0x660   : > { %15366 = vmatpush2.bf16.msra.mxu1 %v20332_v13  ;;  %15324 = vmatprep.subr.bf16.mxu0 %v20337_v18  ;;  %v20359_v13 = vld [vmem:[%s22206_s10 + $0x1900] ss:$24 sps:$4 sm:$0xff]  }
 0x661   : > { %15367 = vmatprep.subr.bf16.mxu1 %v20340_v44  ;;  %v20362_v18 = vld [vmem:[%s22206_s10 + $0x1c00] ss:$24 sps:$4 sm:$0xff]   ;;  %v20367_v44 = vld [vmem:[%s22206_s10 + $0x18d4] ss:$24 sps:$4 sm:$0xff]  }
 0x663   : > { %15325 = vmatpush2.bf16.msra.mxu0 %v20335_v48  ;;  %v20370_v48 = vld [vmem:[%s22206_s10 + $0x1bd4] ss:$24 sps:$4 sm:$0xff]  }
 0x664   : > { %15368 = vmatpush2.bf16.msra.mxu1 %v20338_v8  ;;  %15326 = vmatprep.subr.bf16.mxu0 %v20343_v21  ;;  %v20365_v8 = vld [vmem:[%s22206_s10 + $0x18d0] ss:$24 sps:$4 sm:$0xff]  }
 0x665   : > { %15369 = vmatprep.subr.bf16.mxu1 %v20346_v33  ;;  %v20368_v21 = vld [vmem:[%s22206_s10 + $0x1bd0] ss:$24 sps:$4 sm:$0xff]   ;;  %v20373_v33 = vld [vmem:[%s22206_s10 + $0x18a4] ss:$24 sps:$4 sm:$0xff]  }
 0x667   : > { %15327 = vmatpush2.bf16.msra.mxu0 %v20341_v9  ;;  %v20376_v9 = vld [vmem:[%s22206_s10 + $0x1ba4] ss:$24 sps:$4 sm:$0xff]  }
 0x668   : > { %15370 = vmatpush2.bf16.msra.mxu1 %v20344_v32  ;;  %15382 = vmatprep.subr.bf16.mxu0 %v20349_v45  ;;  %v20371_v32 = vld [vmem:[%s22206_s10 + $0x18a0] ss:$24 sps:$4 sm:$0xff]  }
 0x669   : > { %15425 = vmatprep.subr.bf16.mxu1 %v20352_v41  ;;  %v20374_v45 = vld [vmem:[%s22206_s10 + $0x1ba0] ss:$24 sps:$4 sm:$0xff]   ;;  %v20379_v41 = vld [vmem:[%s22206_s10 + $0x1874] ss:$24 sps:$4 sm:$0xff]  }
 0x66a   : > { %15329 = vmatmul.mubr.bf16.vlgmr.msra.gmra.mxu0 %v20894_v57  ;;  %v20388_v57 = vld [vmem:[%s22206_s10 + $0x1b44] ss:$24 sps:$4 sm:$0xff]  }
 0x66b   : > { %15372 = vmatmul.mubr.bf16.vlgmr.msra.gmra.mxu1 %v20895_v47  ;;  %15383 = vmatpush1.bf16.msra.mxu0 %v20347_v15  ;;  %v20382_v15 = vld [vmem:[%s22206_s10 + $0x1b74] ss:$24 sps:$4 sm:$0xff]   ;;  %v20383_v47 = vld [vmem:[%s22206_s10 + $0x1840] ss:$24 sps:$4 sm:$0xff]  }
 0x66c   : > { %15426 = vmatpush1.bf16.msra.mxu1 %v20350_v12  ;;  %15384 = vmatprep.subr.bf16.mxu0 %v20355_v52  ;;  %v20377_v12 = vld [vmem:[%s22206_s10 + $0x1870] ss:$24 sps:$4 sm:$0xff]  }
 0x66d   : > { %15427 = vmatprep.subr.bf16.mxu1 %v20358_v36  ;;  %15414 = vmatprep.mubr.bf16.mxu0 %v20896_v37  ;;  %v20380_v52 = vld [vmem:[%s22206_s10 + $0x1b70] ss:$24 sps:$4 sm:$0xff]   ;;  %v20385_v36 = vld [vmem:[%s22206_s10 + $0x1844] ss:$24 sps:$4 sm:$0xff]  }
 0x66e   : > { %15457 = vmatprep.mubr.bf16.mxu1 %v20897_v5  ;;  %v20392_v37 = vld [vmem:[%s22206_s10 + $0x1b10] ss:$24 sps:$4 sm:$0xff]   ;;  %v20397_v5 = vld [vmem:[%s22206_s10 + $0x1ae4] ss:$24 sps:$4 sm:$0xff]  }
 0x66f   : > { %15385 = vmatpush1.bf16.msra.mxu0 %v20353_v42  ;;  %v20386_v42 = vld [vmem:[%s22206_s10 + $0x1b40] ss:$24 sps:$4 sm:$0xff]  }
 0x670   : > { %15428 = vmatpush1.bf16.msra.mxu1 %v20356_v53  ;;  %15386 = vmatprep.subr.bf16.mxu0 %v20361_v22  ;;  %v20391_v53 = vld [vmem:[%s22206_s10 + $0x1814] ss:$24 sps:$4 sm:$0xff]  }
 0x671   : > { %15429 = vmatprep.subr.bf16.mxu1 %v20364_v43  ;;  %v20394_v22 = vld [vmem:[%s22206_s10 + $0x1b14] ss:$24 sps:$4 sm:$0xff]   ;;  %v20389_v43 = vld [vmem:[%s22206_s10 + $0x1810] ss:$24 sps:$4 sm:$0xff]  }
 0x673   : > { %15387 = vmatpush1.bf16.msra.mxu0 %v20359_v13  ;;  %v20400_v13 = vld [vmem:[%s22206_s10 + $0x1de4] ss:$24 sps:$4 sm:$0xff]  }
 0x674   : > { %15430 = vmatpush1.bf16.msra.mxu1 %v20362_v18  ;;  %15388 = vmatprep.subr.bf16.mxu0 %v20367_v44  ;;  %v20395_v18 = vld [vmem:[%s22206_s10 + $0x1ae0] ss:$24 sps:$4 sm:$0xff]  }
 0x675   : > { %15431 = vmatprep.subr.bf16.mxu1 %v20370_v48  ;;  %v20398_v44 = vld [vmem:[%s22206_s10 + $0x1de0] ss:$24 sps:$4 sm:$0xff]   ;;  %v20403_v48 = vld [vmem:[%s22206_s10 + $0x1ab4] ss:$24 sps:$4 sm:$0xff]  }
 0x677   : > { %15389 = vmatpush1.bf16.msra.mxu0 %v20365_v8  ;;  %v20406_v8 = vld [vmem:[%s22206_s10 + $0x1db4] ss:$24 sps:$4 sm:$0xff]  }
 0x678   : > { %15432 = vmatpush1.bf16.msra.mxu1 %v20368_v21  ;;  %15390 = vmatprep.subr.bf16.mxu0 %v20373_v33  ;;  %v20401_v21 = vld [vmem:[%s22206_s10 + $0x1ab0] ss:$24 sps:$4 sm:$0xff]  }
 0x679   : > { %15433 = vmatprep.subr.bf16.mxu1 %v20376_v9  ;;  %v20404_v33 = vld [vmem:[%s22206_s10 + $0x1db0] ss:$24 sps:$4 sm:$0xff]   ;;  %v20409_v9 = vld [vmem:[%s22206_s10 + $0x1a84] ss:$24 sps:$4 sm:$0xff]  }
 0x67b   : > { %15391 = vmatpush1.bf16.msra.mxu0 %v20371_v32  ;;  %v20412_v32 = vld [vmem:[%s22206_s10 + $0x1d84] ss:$24 sps:$4 sm:$0xff]  }
 0x67c   : > { %15434 = vmatpush1.bf16.msra.mxu1 %v20374_v45  ;;  %15392 = vmatprep.subr.bf16.mxu0 %v20379_v41  ;;  %v20407_v45 = vld [vmem:[%s22206_s10 + $0x1a80] ss:$24 sps:$4 sm:$0xff]  }
 0x67d   : > { %15435 = vmatprep.subr.bf16.mxu1 %v20382_v15  ;;  %v20410_v41 = vld [vmem:[%s22206_s10 + $0x1d80] ss:$24 sps:$4 sm:$0xff]   ;;  %v20415_v15 = vld [vmem:[%s22206_s10 + $0x1a54] ss:$24 sps:$4 sm:$0xff]  }
 0x67f   : > { %15393 = vmatpush1.bf16.msra.mxu0 %v20377_v12  ;;  %v20418_v12 = vld [vmem:[%s22206_s10 + $0x1d54] ss:$24 sps:$4 sm:$0xff]  }
 0x680   : > { %15436 = vmatpush1.bf16.msra.mxu1 %v20380_v52  ;;  %15394 = vmatprep.subr.bf16.mxu0 %v20385_v36  ;;  %v20413_v52 = vld [vmem:[%s22206_s10 + $0x1a50] ss:$24 sps:$4 sm:$0xff]  }
 0x681   : > { %15437 = vmatprep.subr.bf16.mxu1 %v20388_v57  ;;  %v20416_v36 = vld [vmem:[%s22206_s10 + $0x1d50] ss:$24 sps:$4 sm:$0xff]   ;;  %v20421_v57 = vld [vmem:[%s22206_s10 + $0x1a24] ss:$24 sps:$4 sm:$0xff]  }
 0x683   : > { %15395 = vmatpush1.bf16.msra.mxu0 %v20383_v47  ;;  %v20424_v47 = vld [vmem:[%s22206_s10 + $0x1d24] ss:$24 sps:$4 sm:$0xff]  }
 0x684   : > { %15438 = vmatpush1.bf16.msra.mxu1 %v20386_v42  ;;  %15396 = vmatprep.subr.bf16.mxu0 %v20391_v53  ;;  %v20419_v42 = vld [vmem:[%s22206_s10 + $0x1a20] ss:$24 sps:$4 sm:$0xff]  }
 0x685   : > { %15439 = vmatprep.subr.bf16.mxu1 %v20394_v22  ;;  %v20422_v53 = vld [vmem:[%s22206_s10 + $0x1d20] ss:$24 sps:$4 sm:$0xff]   ;;  %v20427_v22 = vld [vmem:[%s22206_s10 + $0x19f4] ss:$24 sps:$4 sm:$0xff]  }
 0x687   : > { %15397 = vmatpush1.bf16.msra.mxu0 %v20389_v43  ;;  %v20430_v43 = vld [vmem:[%s22206_s10 + $0x1cf4] ss:$24 sps:$4 sm:$0xff]  }
 0x688   : > { %15440 = vmatpush1.bf16.msra.mxu1 %v20392_v37  ;;  %15398 = vmatprep.subr.bf16.mxu0 %v20397_v5  ;;  %v20425_v37 = vld [vmem:[%s22206_s10 + $0x19f0] ss:$24 sps:$4 sm:$0xff]  }
 0x689   : > { %15441 = vmatprep.subr.bf16.mxu1 %v20400_v13  ;;  %v20428_v5 = vld [vmem:[%s22206_s10 + $0x1cf0] ss:$24 sps:$4 sm:$0xff]   ;;  %v20433_v13 = vld [vmem:[%s22206_s10 + $0x19c4] ss:$24 sps:$4 sm:$0xff]  }
 0x68b   : > { %15399 = vmatpush2.bf16.msra.mxu0 %v20395_v18  ;;  %v20436_v18 = vld [vmem:[%s22206_s10 + $0x1cc4] ss:$24 sps:$4 sm:$0xff]  }
 0x68c   : > { %15442 = vmatpush2.bf16.msra.mxu1 %v20398_v44  ;;  %15400 = vmatprep.subr.bf16.mxu0 %v20403_v48  ;;  %v20431_v44 = vld [vmem:[%s22206_s10 + $0x19c0] ss:$24 sps:$4 sm:$0xff]  }
 0x68d   : > { %15443 = vmatprep.subr.bf16.mxu1 %v20406_v8  ;;  %v20434_v48 = vld [vmem:[%s22206_s10 + $0x1cc0] ss:$24 sps:$4 sm:$0xff]   ;;  %v20439_v8 = vld [vmem:[%s22206_s10 + $0x1994] ss:$24 sps:$4 sm:$0xff]  }
 0x68f   : > { %15401 = vmatpush2.bf16.msra.mxu0 %v20401_v21  ;;  %v20442_v21 = vld [vmem:[%s22206_s10 + $0x1c94] ss:$24 sps:$4 sm:$0xff]  }
 0x690   : > { %15444 = vmatpush2.bf16.msra.mxu1 %v20404_v33  ;;  %15402 = vmatprep.subr.bf16.mxu0 %v20409_v9  ;;  %v20437_v33 = vld [vmem:[%s22206_s10 + $0x1990] ss:$24 sps:$4 sm:$0xff]  }
 0x691   : > { %15445 = vmatprep.subr.bf16.mxu1 %v20412_v32  ;;  %v20440_v9 = vld [vmem:[%s22206_s10 + $0x1c90] ss:$24 sps:$4 sm:$0xff]   ;;  %v20445_v32 = vld [vmem:[%s22206_s10 + $0x1f64] ss:$24 sps:$4 sm:$0xff]  }
 0x693   : > { %15403 = vmatpush2.bf16.msra.mxu0 %v20407_v45  ;;  %v20448_v45 = vld [vmem:[%s22206_s10 + $0x2264] ss:$24 sps:$4 sm:$0xff]  }
 0x694   : > { %15446 = vmatpush2.bf16.msra.mxu1 %v20410_v41  ;;  %15404 = vmatprep.subr.bf16.mxu0 %v20415_v15  ;;  %v20443_v41 = vld [vmem:[%s22206_s10 + $0x1f60] ss:$24 sps:$4 sm:$0xff]  }
 0x695   : > { %15447 = vmatprep.subr.bf16.mxu1 %v20418_v12  ;;  %v20446_v15 = vld [vmem:[%s22206_s10 + $0x2260] ss:$24 sps:$4 sm:$0xff]   ;;  %v20451_v12 = vld [vmem:[%s22206_s10 + $0x1f34] ss:$24 sps:$4 sm:$0xff]  }
 0x697   : > { %15405 = vmatpush2.bf16.msra.mxu0 %v20413_v52  ;;  %v20454_v52 = vld [vmem:[%s22206_s10 + $0x2234] ss:$24 sps:$4 sm:$0xff]  }
 0x698   : > { %15448 = vmatpush2.bf16.msra.mxu1 %v20416_v36  ;;  %15406 = vmatprep.subr.bf16.mxu0 %v20421_v57  ;;  %v20898_v36 = vld [vmem:[%s24555_s0 + $0x40] ss:$136 sps:$4 sm:$0xff]  }
 0x699   : > { %15449 = vmatprep.subr.bf16.mxu1 %v20424_v47  ;;  %v20899_v57 = vld [vmem:[%s24555_s0 + $0x48] ss:$136 sps:$4 sm:$0xff]   ;;  %v20449_v47 = vld [vmem:[%s22206_s10 + $0x1f30] ss:$24 sps:$4 sm:$0xff]  }
 0x69b   : > { %15407 = vmatpush2.bf16.msra.mxu0 %v20419_v42  ;;  %v20452_v42 = vld [vmem:[%s22206_s10 + $0x2230] ss:$24 sps:$4 sm:$0xff]  }
 0x69c   : > { %15450 = vmatpush2.bf16.msra.mxu1 %v20422_v53  ;;  %15408 = vmatprep.subr.bf16.mxu0 %v20427_v22  ;;  %v20457_v53 = vld [vmem:[%s22206_s10 + $0x1f04] ss:$24 sps:$4 sm:$0xff]  }
 0x69d   : > { %15451 = vmatprep.subr.bf16.mxu1 %v20430_v43  ;;  %v20460_v22 = vld [vmem:[%s22206_s10 + $0x2204] ss:$24 sps:$4 sm:$0xff]  }
 0x69e   : > { %v20900_v43 = vld [vmem:[%s24555_s0 + $0x54] ss:$136 sps:$4 sm:$0xff]  }
 0x69f   : > { %15409 = vmatpush2.bf16.msra.mxu0 %v20425_v37  ;;  %v20901_v37 = vld [vmem:[%s24555_s0 + $0x5c] ss:$136 sps:$4 sm:$0xff]  }
 0x6a0   : > { %15452 = vmatpush2.bf16.msra.mxu1 %v20428_v5  ;;  %15410 = vmatprep.subr.bf16.mxu0 %v20433_v13  ;;  %v20455_v5 = vld [vmem:[%s22206_s10 + $0x1f00] ss:$24 sps:$4 sm:$0xff]  }
 0x6a1   : > { %15453 = vmatprep.subr.bf16.mxu1 %v20436_v18  ;;  %v20458_v13 = vld [vmem:[%s22206_s10 + $0x2200] ss:$24 sps:$4 sm:$0xff]   ;;  %v20463_v18 = vld [vmem:[%s22206_s10 + $0x1ed4] ss:$24 sps:$4 sm:$0xff]  }
 0x6a3   : > { %15411 = vmatpush2.bf16.msra.mxu0 %v20431_v44  ;;  %v20466_v44 = vld [vmem:[%s22206_s10 + $0x21d4] ss:$24 sps:$4 sm:$0xff]  }
 0x6a4   : > { %15454 = vmatpush2.bf16.msra.mxu1 %v20434_v48  ;;  %15412 = vmatprep.subr.bf16.mxu0 %v20439_v8  ;;  %v20461_v48 = vld [vmem:[%s22206_s10 + $0x1ed0] ss:$24 sps:$4 sm:$0xff]  }
 0x6a5   : > { %15455 = vmatprep.subr.bf16.mxu1 %v20442_v21  ;;  %v20464_v8 = vld [vmem:[%s22206_s10 + $0x21d0] ss:$24 sps:$4 sm:$0xff]   ;;  %v20469_v21 = vld [vmem:[%s22206_s10 + $0x1ea4] ss:$24 sps:$4 sm:$0xff]  }
 0x6a7   : > { %15413 = vmatpush2.bf16.msra.mxu0 %v20437_v33  ;;  %v20472_v33 = vld [vmem:[%s22206_s10 + $0x21a4] ss:$24 sps:$4 sm:$0xff]  }
 0x6a8   : > { %15456 = vmatpush2.bf16.msra.mxu1 %v20440_v9  ;;  %15468 = vmatprep.subr.bf16.mxu0 %v20445_v32  ;;  %v20467_v9 = vld [vmem:[%s22206_s10 + $0x1ea0] ss:$24 sps:$4 sm:$0xff]  }
 0x6a9   : > { %15511 = vmatprep.subr.bf16.mxu1 %v20448_v45  ;;  %v20470_v32 = vld [vmem:[%s22206_s10 + $0x21a0] ss:$24 sps:$4 sm:$0xff]   ;;  %v20475_v45 = vld [vmem:[%s22206_s10 + $0x1e74] ss:$24 sps:$4 sm:$0xff]  }
 0x6aa   : > { %15415 = vmatmul.mubr.bf16.vlgmr.msra.gmra.mxu0 %v20898_v36  ;;  %v20484_v36 = vld [vmem:[%s22206_s10 + $0x2144] ss:$24 sps:$4 sm:$0xff]  }
 0x6ab   : > { %15458 = vmatmul.mubr.bf16.vlgmr.msra.gmra.mxu1 %v20899_v57  ;;  %15469 = vmatpush1.bf16.msra.mxu0 %v20443_v41  ;;  %v20478_v41 = vld [vmem:[%s22206_s10 + $0x2174] ss:$24 sps:$4 sm:$0xff]   ;;  %v20479_v57 = vld [vmem:[%s22206_s10 + $0x1e40] ss:$24 sps:$4 sm:$0xff]  }
 0x6ac   : > { %15512 = vmatpush1.bf16.msra.mxu1 %v20446_v15  ;;  %15470 = vmatprep.subr.bf16.mxu0 %v20451_v12  ;;  %v20473_v15 = vld [vmem:[%s22206_s10 + $0x1e70] ss:$24 sps:$4 sm:$0xff]  }
 0x6ad   : > { %15513 = vmatprep.subr.bf16.mxu1 %v20454_v52  ;;  %15500 = vmatprep.mubr.bf16.mxu0 %v20900_v43  ;;  %v20476_v12 = vld [vmem:[%s22206_s10 + $0x2170] ss:$24 sps:$4 sm:$0xff]   ;;  %v20481_v52 = vld [vmem:[%s22206_s10 + $0x1e44] ss:$24 sps:$4 sm:$0xff]  }
 0x6ae   : > { %15543 = vmatprep.mubr.bf16.mxu1 %v20901_v37  ;;  %v20488_v43 = vld [vmem:[%s22206_s10 + $0x2110] ss:$24 sps:$4 sm:$0xff]   ;;  %v20493_v37 = vld [vmem:[%s22206_s10 + $0x20e4] ss:$24 sps:$4 sm:$0xff]  }
 0x6af   : > { %15471 = vmatpush1.bf16.msra.mxu0 %v20449_v47  ;;  %v20482_v47 = vld [vmem:[%s22206_s10 + $0x2140] ss:$24 sps:$4 sm:$0xff]  }
 0x6b0   : > { %15514 = vmatpush1.bf16.msra.mxu1 %v20452_v42  ;;  %15472 = vmatprep.subr.bf16.mxu0 %v20457_v53  ;;  %v20487_v42 = vld [vmem:[%s22206_s10 + $0x1e14] ss:$24 sps:$4 sm:$0xff]  }
 0x6b1   : > { %15515 = vmatprep.subr.bf16.mxu1 %v20460_v22  ;;  %v20490_v53 = vld [vmem:[%s22206_s10 + $0x2114] ss:$24 sps:$4 sm:$0xff]   ;;  %v20485_v22 = vld [vmem:[%s22206_s10 + $0x1e10] ss:$24 sps:$4 sm:$0xff]  }
 0x6b3   : > { %15473 = vmatpush1.bf16.msra.mxu0 %v20455_v5  ;;  %v20496_v5 = vld [vmem:[%s22206_s10 + $0x23e4] ss:$24 sps:$4 sm:$0xff]  }
 0x6b4   : > { %15516 = vmatpush1.bf16.msra.mxu1 %v20458_v13  ;;  %15474 = vmatprep.subr.bf16.mxu0 %v20463_v18  ;;  %v20491_v13 = vld [vmem:[%s22206_s10 + $0x20e0] ss:$24 sps:$4 sm:$0xff]  }
 0x6b5   : > { %15517 = vmatprep.subr.bf16.mxu1 %v20466_v44  ;;  %v20494_v18 = vld [vmem:[%s22206_s10 + $0x23e0] ss:$24 sps:$4 sm:$0xff]   ;;  %v20499_v44 = vld [vmem:[%s22206_s10 + $0x20b4] ss:$24 sps:$4 sm:$0xff]  }
 0x6b7   : > { %15475 = vmatpush1.bf16.msra.mxu0 %v20461_v48  ;;  %v20502_v48 = vld [vmem:[%s22206_s10 + $0x23b4] ss:$24 sps:$4 sm:$0xff]  }
 0x6b8   : > { %15518 = vmatpush1.bf16.msra.mxu1 %v20464_v8  ;;  %15476 = vmatprep.subr.bf16.mxu0 %v20469_v21  ;;  %v20497_v8 = vld [vmem:[%s22206_s10 + $0x20b0] ss:$24 sps:$4 sm:$0xff]  }
 0x6b9   : > { %15519 = vmatprep.subr.bf16.mxu1 %v20472_v33  ;;  %v20500_v21 = vld [vmem:[%s22206_s10 + $0x23b0] ss:$24 sps:$4 sm:$0xff]   ;;  %v20505_v33 = vld [vmem:[%s22206_s10 + $0x2084] ss:$24 sps:$4 sm:$0xff]  }
 0x6bb   : > { %15477 = vmatpush1.bf16.msra.mxu0 %v20467_v9  ;;  %v20508_v9 = vld [vmem:[%s22206_s10 + $0x2384] ss:$24 sps:$4 sm:$0xff]  }
 0x6bc   : > { %15520 = vmatpush1.bf16.msra.mxu1 %v20470_v32  ;;  %15478 = vmatprep.subr.bf16.mxu0 %v20475_v45  ;;  %v20503_v32 = vld [vmem:[%s22206_s10 + $0x2080] ss:$24 sps:$4 sm:$0xff]  }
 0x6bd   : > { %15521 = vmatprep.subr.bf16.mxu1 %v20478_v41  ;;  %v20506_v45 = vld [vmem:[%s22206_s10 + $0x2380] ss:$24 sps:$4 sm:$0xff]   ;;  %v20511_v41 = vld [vmem:[%s22206_s10 + $0x2054] ss:$24 sps:$4 sm:$0xff]  }
 0x6bf   : > { %15479 = vmatpush1.bf16.msra.mxu0 %v20473_v15  ;;  %v20514_v15 = vld [vmem:[%s22206_s10 + $0x2354] ss:$24 sps:$4 sm:$0xff]  }
 0x6c0   : > { %15522 = vmatpush1.bf16.msra.mxu1 %v20476_v12  ;;  %15480 = vmatprep.subr.bf16.mxu0 %v20481_v52  ;;  %v20509_v12 = vld [vmem:[%s22206_s10 + $0x2050] ss:$24 sps:$4 sm:$0xff]  }
 0x6c1   : > { %15523 = vmatprep.subr.bf16.mxu1 %v20484_v36  ;;  %v20512_v52 = vld [vmem:[%s22206_s10 + $0x2350] ss:$24 sps:$4 sm:$0xff]   ;;  %v20517_v36 = vld [vmem:[%s22206_s10 + $0x2024] ss:$24 sps:$4 sm:$0xff]  }
 0x6c3   : > { %15481 = vmatpush1.bf16.msra.mxu0 %v20479_v57  ;;  %v20520_v57 = vld [vmem:[%s22206_s10 + $0x2324] ss:$24 sps:$4 sm:$0xff]  }
 0x6c4   : > { %15524 = vmatpush1.bf16.msra.mxu1 %v20482_v47  ;;  %15482 = vmatprep.subr.bf16.mxu0 %v20487_v42  ;;  %v20515_v47 = vld [vmem:[%s22206_s10 + $0x2020] ss:$24 sps:$4 sm:$0xff]  }
 0x6c5   : > { %15525 = vmatprep.subr.bf16.mxu1 %v20490_v53  ;;  %v20518_v42 = vld [vmem:[%s22206_s10 + $0x2320] ss:$24 sps:$4 sm:$0xff]   ;;  %v20523_v53 = vld [vmem:[%s22206_s10 + $0x1ff4] ss:$24 sps:$4 sm:$0xff]  }
 0x6c7   : > { %15483 = vmatpush1.bf16.msra.mxu0 %v20485_v22  ;;  %v20526_v22 = vld [vmem:[%s22206_s10 + $0x22f4] ss:$24 sps:$4 sm:$0xff]  }
 0x6c8   : > { %15526 = vmatpush1.bf16.msra.mxu1 %v20488_v43  ;;  %15484 = vmatprep.subr.bf16.mxu0 %v20493_v37  ;;  %v20521_v43 = vld [vmem:[%s22206_s10 + $0x1ff0] ss:$24 sps:$4 sm:$0xff]  }
 0x6c9   : > { %15527 = vmatprep.subr.bf16.mxu1 %v20496_v5  ;;  %v20524_v37 = vld [vmem:[%s22206_s10 + $0x22f0] ss:$24 sps:$4 sm:$0xff]   ;;  %v20529_v5 = vld [vmem:[%s22206_s10 + $0x1fc4] ss:$24 sps:$4 sm:$0xff]  }
 0x6cb   : > { %15485 = vmatpush2.bf16.msra.mxu0 %v20491_v13  ;;  %v20532_v13 = vld [vmem:[%s22206_s10 + $0x22c4] ss:$24 sps:$4 sm:$0xff]  }
 0x6cc   : > { %15528 = vmatpush2.bf16.msra.mxu1 %v20494_v18  ;;  %15486 = vmatprep.subr.bf16.mxu0 %v20499_v44  ;;  %v20527_v18 = vld [vmem:[%s22206_s10 + $0x1fc0] ss:$24 sps:$4 sm:$0xff]  }
 0x6cd   : > { %15529 = vmatprep.subr.bf16.mxu1 %v20502_v48  ;;  %v20530_v44 = vld [vmem:[%s22206_s10 + $0x22c0] ss:$24 sps:$4 sm:$0xff]   ;;  %v20535_v48 = vld [vmem:[%s22206_s10 + $0x1f94] ss:$24 sps:$4 sm:$0xff]  }
 0x6cf   : > { %15487 = vmatpush2.bf16.msra.mxu0 %v20497_v8  ;;  %v20538_v8 = vld [vmem:[%s22206_s10 + $0x2294] ss:$24 sps:$4 sm:$0xff]  }
 0x6d0   : > { %15530 = vmatpush2.bf16.msra.mxu1 %v20500_v21  ;;  %15488 = vmatprep.subr.bf16.mxu0 %v20505_v33  ;;  %v20533_v21 = vld [vmem:[%s22206_s10 + $0x1f90] ss:$24 sps:$4 sm:$0xff]  }
 0x6d1   : > { %15531 = vmatprep.subr.bf16.mxu1 %v20508_v9  ;;  %v20536_v33 = vld [vmem:[%s22206_s10 + $0x2290] ss:$24 sps:$4 sm:$0xff]   ;;  %v20541_v9 = vld [vmem:[%s22206_s10 + $0x2564] ss:$24 sps:$4 sm:$0xff]  }
 0x6d3   : > { %15489 = vmatpush2.bf16.msra.mxu0 %v20503_v32  ;;  %v20544_v32 = vld [vmem:[%s22206_s10 + $0x2864] ss:$24 sps:$4 sm:$0xff]  }
 0x6d4   : > { %15532 = vmatpush2.bf16.msra.mxu1 %v20506_v45  ;;  %15490 = vmatprep.subr.bf16.mxu0 %v20511_v41  ;;  %v20539_v45 = vld [vmem:[%s22206_s10 + $0x2560] ss:$24 sps:$4 sm:$0xff]  }
 0x6d5   : > { %15533 = vmatprep.subr.bf16.mxu1 %v20514_v15  ;;  %v20542_v41 = vld [vmem:[%s22206_s10 + $0x2860] ss:$24 sps:$4 sm:$0xff]   ;;  %v20547_v15 = vld [vmem:[%s22206_s10 + $0x2534] ss:$24 sps:$4 sm:$0xff]  }
 0x6d7   : > { %15491 = vmatpush2.bf16.msra.mxu0 %v20509_v12  ;;  %v20550_v12 = vld [vmem:[%s22206_s10 + $0x2834] ss:$24 sps:$4 sm:$0xff]  }
 0x6d8   : > { %15534 = vmatpush2.bf16.msra.mxu1 %v20512_v52  ;;  %15492 = vmatprep.subr.bf16.mxu0 %v20517_v36  ;;  %v20902_v52 = vld [vmem:[%s24555_s0 + $0x50] ss:$136 sps:$4 sm:$0xff]  }
 0x6d9   : > { %15535 = vmatprep.subr.bf16.mxu1 %v20520_v57  ;;  %v20903_v36 = vld [vmem:[%s24555_s0 + $0x58] ss:$136 sps:$4 sm:$0xff]  }
 0x6da   : > { %v20545_v57 = vld [vmem:[%s22206_s10 + $0x2530] ss:$24 sps:$4 sm:$0xff]  }
 0x6db   : > { %15493 = vmatpush2.bf16.msra.mxu0 %v20515_v47  ;;  %v20548_v47 = vld [vmem:[%s22206_s10 + $0x2830] ss:$24 sps:$4 sm:$0xff]  }
 0x6dc   : > { %15536 = vmatpush2.bf16.msra.mxu1 %v20518_v42  ;;  %15494 = vmatprep.subr.bf16.mxu0 %v20523_v53  ;;  %v20553_v42 = vld [vmem:[%s22206_s10 + $0x2504] ss:$24 sps:$4 sm:$0xff]  }
 0x6dd   : > { %15537 = vmatprep.subr.bf16.mxu1 %v20526_v22  ;;  %v20556_v53 = vld [vmem:[%s22206_s10 + $0x2804] ss:$24 sps:$4 sm:$0xff]  }
 0x6de   : > { %v20904_v22 = vld [vmem:[%s24555_s0 + $0x64] ss:$136 sps:$4 sm:$0xff]  }
 0x6df   : > { %15495 = vmatpush2.bf16.msra.mxu0 %v20521_v43  ;;  %v20905_v43 = vld [vmem:[%s24555_s0 + $0x6c] ss:$136 sps:$4 sm:$0xff]  }
 0x6e0   : > { %15538 = vmatpush2.bf16.msra.mxu1 %v20524_v37  ;;  %15496 = vmatprep.subr.bf16.mxu0 %v20529_v5  ;;  %v20551_v37 = vld [vmem:[%s22206_s10 + $0x2500] ss:$24 sps:$4 sm:$0xff]  }
 0x6e1   : > { %15539 = vmatprep.subr.bf16.mxu1 %v20532_v13  ;;  %v20554_v5 = vld [vmem:[%s22206_s10 + $0x2800] ss:$24 sps:$4 sm:$0xff]   ;;  %v20559_v13 = vld [vmem:[%s22206_s10 + $0x24d4] ss:$24 sps:$4 sm:$0xff]  }
 0x6e3   : > { %15497 = vmatpush2.bf16.msra.mxu0 %v20527_v18  ;;  %v20562_v18 = vld [vmem:[%s22206_s10 + $0x27d4] ss:$24 sps:$4 sm:$0xff]  }
 0x6e4   : > { %15540 = vmatpush2.bf16.msra.mxu1 %v20530_v44  ;;  %15498 = vmatprep.subr.bf16.mxu0 %v20535_v48  ;;  %v20557_v44 = vld [vmem:[%s22206_s10 + $0x24d0] ss:$24 sps:$4 sm:$0xff]  }
 0x6e5   : > { %15541 = vmatprep.subr.bf16.mxu1 %v20538_v8  ;;  %v20560_v48 = vld [vmem:[%s22206_s10 + $0x27d0] ss:$24 sps:$4 sm:$0xff]   ;;  %v20565_v8 = vld [vmem:[%s22206_s10 + $0x24a4] ss:$24 sps:$4 sm:$0xff]  }
 0x6e7   : > { %15499 = vmatpush2.bf16.msra.mxu0 %v20533_v21  ;;  %v20568_v21 = vld [vmem:[%s22206_s10 + $0x27a4] ss:$24 sps:$4 sm:$0xff]  }
 0x6e8   : > { %15542 = vmatpush2.bf16.msra.mxu1 %v20536_v33  ;;  %15554 = vmatprep.subr.bf16.mxu0 %v20541_v9  ;;  %v20563_v33 = vld [vmem:[%s22206_s10 + $0x24a0] ss:$24 sps:$4 sm:$0xff]  }
 0x6e9   : > { %15597 = vmatprep.subr.bf16.mxu1 %v20544_v32  ;;  %v20566_v9 = vld [vmem:[%s22206_s10 + $0x27a0] ss:$24 sps:$4 sm:$0xff]   ;;  %v20571_v32 = vld [vmem:[%s22206_s10 + $0x2474] ss:$24 sps:$4 sm:$0xff]  }
 0x6ea   : > { %15501 = vmatmul.mubr.bf16.vlgmr.msra.gmra.mxu0 %v20902_v52  ;;  %v20580_v52 = vld [vmem:[%s22206_s10 + $0x2744] ss:$24 sps:$4 sm:$0xff]  }
 0x6eb   : > { %15544 = vmatmul.mubr.bf16.vlgmr.msra.gmra.mxu1 %v20903_v36  ;;  %15555 = vmatpush1.bf16.msra.mxu0 %v20539_v45  ;;  %v20574_v45 = vld [vmem:[%s22206_s10 + $0x2774] ss:$24 sps:$4 sm:$0xff]   ;;  %v20575_v36 = vld [vmem:[%s22206_s10 + $0x2440] ss:$24 sps:$4 sm:$0xff]  }
 0x6ec   : > { %15598 = vmatpush1.bf16.msra.mxu1 %v20542_v41  ;;  %15556 = vmatprep.subr.bf16.mxu0 %v20547_v15  ;;  %v20569_v41 = vld [vmem:[%s22206_s10 + $0x2470] ss:$24 sps:$4 sm:$0xff]  }
 0x6ed   : > { %15599 = vmatprep.subr.bf16.mxu1 %v20550_v12  ;;  %15586 = vmatprep.mubr.bf16.mxu0 %v20904_v22  ;;  %v20572_v15 = vld [vmem:[%s22206_s10 + $0x2770] ss:$24 sps:$4 sm:$0xff]   ;;  %v20577_v12 = vld [vmem:[%s22206_s10 + $0x2444] ss:$24 sps:$4 sm:$0xff]  }
 0x6ee   : > { %15629 = vmatprep.mubr.bf16.mxu1 %v20905_v43  ;;  %v20584_v22 = vld [vmem:[%s22206_s10 + $0x2710] ss:$24 sps:$4 sm:$0xff]   ;;  %v20589_v43 = vld [vmem:[%s22206_s10 + $0x26e4] ss:$24 sps:$4 sm:$0xff]  }
 0x6ef   : > { %15557 = vmatpush1.bf16.msra.mxu0 %v20545_v57  ;;  %v20578_v57 = vld [vmem:[%s22206_s10 + $0x2740] ss:$24 sps:$4 sm:$0xff]  }
 0x6f0   : > { %15600 = vmatpush1.bf16.msra.mxu1 %v20548_v47  ;;  %15558 = vmatprep.subr.bf16.mxu0 %v20553_v42  ;;  %v20583_v47 = vld [vmem:[%s22206_s10 + $0x2414] ss:$24 sps:$4 sm:$0xff]  }
 0x6f1   : > { %15601 = vmatprep.subr.bf16.mxu1 %v20556_v53  ;;  %v20586_v42 = vld [vmem:[%s22206_s10 + $0x2714] ss:$24 sps:$4 sm:$0xff]   ;;  %v20581_v53 = vld [vmem:[%s22206_s10 + $0x2410] ss:$24 sps:$4 sm:$0xff]  }
 0x6f3   : > { %15559 = vmatpush1.bf16.msra.mxu0 %v20551_v37  ;;  %v20592_v37 = vld [vmem:[%s22206_s10 + $0x29e4] ss:$24 sps:$4 sm:$0xff]  }
 0x6f4   : > { %15602 = vmatpush1.bf16.msra.mxu1 %v20554_v5  ;;  %15560 = vmatprep.subr.bf16.mxu0 %v20559_v13  ;;  %v20587_v5 = vld [vmem:[%s22206_s10 + $0x26e0] ss:$24 sps:$4 sm:$0xff]  }
 0x6f5   : > { %15603 = vmatprep.subr.bf16.mxu1 %v20562_v18  ;;  %v20590_v13 = vld [vmem:[%s22206_s10 + $0x29e0] ss:$24 sps:$4 sm:$0xff]   ;;  %v20595_v18 = vld [vmem:[%s22206_s10 + $0x26b4] ss:$24 sps:$4 sm:$0xff]  }
 0x6f7   : > { %15561 = vmatpush1.bf16.msra.mxu0 %v20557_v44  ;;  %v20598_v44 = vld [vmem:[%s22206_s10 + $0x29b4] ss:$24 sps:$4 sm:$0xff]  }
 0x6f8   : > { %15604 = vmatpush1.bf16.msra.mxu1 %v20560_v48  ;;  %15562 = vmatprep.subr.bf16.mxu0 %v20565_v8  ;;  %v20593_v48 = vld [vmem:[%s22206_s10 + $0x26b0] ss:$24 sps:$4 sm:$0xff]  }
 0x6f9   : > { %15605 = vmatprep.subr.bf16.mxu1 %v20568_v21  ;;  %v20596_v8 = vld [vmem:[%s22206_s10 + $0x29b0] ss:$24 sps:$4 sm:$0xff]   ;;  %v20601_v21 = vld [vmem:[%s22206_s10 + $0x2684] ss:$24 sps:$4 sm:$0xff]  }
 0x6fb   : > { %15563 = vmatpush1.bf16.msra.mxu0 %v20563_v33  ;;  %v20604_v33 = vld [vmem:[%s22206_s10 + $0x2984] ss:$24 sps:$4 sm:$0xff]  }
 0x6fc   : > { %15606 = vmatpush1.bf16.msra.mxu1 %v20566_v9  ;;  %15564 = vmatprep.subr.bf16.mxu0 %v20571_v32  ;;  %v20599_v9 = vld [vmem:[%s22206_s10 + $0x2680] ss:$24 sps:$4 sm:$0xff]  }
 0x6fd   : > { %15607 = vmatprep.subr.bf16.mxu1 %v20574_v45  ;;  %v20602_v32 = vld [vmem:[%s22206_s10 + $0x2980] ss:$24 sps:$4 sm:$0xff]   ;;  %v20607_v45 = vld [vmem:[%s22206_s10 + $0x2654] ss:$24 sps:$4 sm:$0xff]  }
 0x6ff   : > { %15565 = vmatpush1.bf16.msra.mxu0 %v20569_v41  ;;  %v20610_v41 = vld [vmem:[%s22206_s10 + $0x2954] ss:$24 sps:$4 sm:$0xff]  }
 0x700   : > { %15608 = vmatpush1.bf16.msra.mxu1 %v20572_v15  ;;  %15566 = vmatprep.subr.bf16.mxu0 %v20577_v12  ;;  %v20605_v15 = vld [vmem:[%s22206_s10 + $0x2650] ss:$24 sps:$4 sm:$0xff]  }
 0x701   : > { %15609 = vmatprep.subr.bf16.mxu1 %v20580_v52  ;;  %v20608_v12 = vld [vmem:[%s22206_s10 + $0x2950] ss:$24 sps:$4 sm:$0xff]   ;;  %v20613_v52 = vld [vmem:[%s22206_s10 + $0x2624] ss:$24 sps:$4 sm:$0xff]  }
 0x703   : > { %15567 = vmatpush1.bf16.msra.mxu0 %v20575_v36  ;;  %v20616_v36 = vld [vmem:[%s22206_s10 + $0x2924] ss:$24 sps:$4 sm:$0xff]  }
 0x704   : > { %15610 = vmatpush1.bf16.msra.mxu1 %v20578_v57  ;;  %15568 = vmatprep.subr.bf16.mxu0 %v20583_v47  ;;  %v20611_v57 = vld [vmem:[%s22206_s10 + $0x2620] ss:$24 sps:$4 sm:$0xff]  }
 0x705   : > { %15611 = vmatprep.subr.bf16.mxu1 %v20586_v42  ;;  %v20614_v47 = vld [vmem:[%s22206_s10 + $0x2920] ss:$24 sps:$4 sm:$0xff]   ;;  %v20619_v42 = vld [vmem:[%s22206_s10 + $0x25f4] ss:$24 sps:$4 sm:$0xff]  }
 0x707   : > { %15569 = vmatpush1.bf16.msra.mxu0 %v20581_v53  ;;  %v20622_v53 = vld [vmem:[%s22206_s10 + $0x28f4] ss:$24 sps:$4 sm:$0xff]  }
 0x708   : > { %15612 = vmatpush1.bf16.msra.mxu1 %v20584_v22  ;;  %15570 = vmatprep.subr.bf16.mxu0 %v20589_v43  ;;  %v20617_v22 = vld [vmem:[%s22206_s10 + $0x25f0] ss:$24 sps:$4 sm:$0xff]  }
 0x709   : > { %15613 = vmatprep.subr.bf16.mxu1 %v20592_v37  ;;  %v20620_v43 = vld [vmem:[%s22206_s10 + $0x28f0] ss:$24 sps:$4 sm:$0xff]   ;;  %v20625_v37 = vld [vmem:[%s22206_s10 + $0x25c4] ss:$24 sps:$4 sm:$0xff]  }
 0x70b   : > { %15571 = vmatpush2.bf16.msra.mxu0 %v20587_v5  ;;  %v20628_v5 = vld [vmem:[%s22206_s10 + $0x28c4] ss:$24 sps:$4 sm:$0xff]  }
 0x70c   : > { %15614 = vmatpush2.bf16.msra.mxu1 %v20590_v13  ;;  %15572 = vmatprep.subr.bf16.mxu0 %v20595_v18  ;;  %v20623_v13 = vld [vmem:[%s22206_s10 + $0x25c0] ss:$24 sps:$4 sm:$0xff]  }
 0x70d   : > { %15615 = vmatprep.subr.bf16.mxu1 %v20598_v44  ;;  %v20626_v18 = vld [vmem:[%s22206_s10 + $0x28c0] ss:$24 sps:$4 sm:$0xff]   ;;  %v20631_v44 = vld [vmem:[%s22206_s10 + $0x2594] ss:$24 sps:$4 sm:$0xff]  }
 0x70f   : > { %15573 = vmatpush2.bf16.msra.mxu0 %v20593_v48  ;;  %v20634_v48 = vld [vmem:[%s22206_s10 + $0x2894] ss:$24 sps:$4 sm:$0xff]  }
 0x710   : > { %15616 = vmatpush2.bf16.msra.mxu1 %v20596_v8  ;;  %15574 = vmatprep.subr.bf16.mxu0 %v20601_v21  ;;  %v20629_v8 = vld [vmem:[%s22206_s10 + $0x2590] ss:$24 sps:$4 sm:$0xff]  }
 0x711   : > { %15617 = vmatprep.subr.bf16.mxu1 %v20604_v33  ;;  %v20632_v21 = vld [vmem:[%s22206_s10 + $0x2890] ss:$24 sps:$4 sm:$0xff]   ;;  %v20637_v33 = vld [vmem:[%s22206_s10 + $0x2b64] ss:$24 sps:$4 sm:$0xff]  }
 0x713   : > { %15575 = vmatpush2.bf16.msra.mxu0 %v20599_v9  ;;  %v20640_v9 = vld [vmem:[%s22206_s10 + $0x2e64] ss:$24 sps:$4 sm:$0xff]  }
 0x714   : > { %15618 = vmatpush2.bf16.msra.mxu1 %v20602_v32  ;;  %15576 = vmatprep.subr.bf16.mxu0 %v20607_v45  ;;  %v20635_v32 = vld [vmem:[%s22206_s10 + $0x2b60] ss:$24 sps:$4 sm:$0xff]  }
 0x715   : > { %15619 = vmatprep.subr.bf16.mxu1 %v20610_v41  ;;  %v20638_v45 = vld [vmem:[%s22206_s10 + $0x2e60] ss:$24 sps:$4 sm:$0xff]   ;;  %v20643_v41 = vld [vmem:[%s22206_s10 + $0x2b34] ss:$24 sps:$4 sm:$0xff]  }
 0x717   : > { %15577 = vmatpush2.bf16.msra.mxu0 %v20605_v15  ;;  %v20646_v15 = vld [vmem:[%s22206_s10 + $0x2e34] ss:$24 sps:$4 sm:$0xff]  }
 0x718   : > { %15620 = vmatpush2.bf16.msra.mxu1 %v20608_v12  ;;  %15578 = vmatprep.subr.bf16.mxu0 %v20613_v52  ;;  %v20906_v12 = vld [vmem:[%s24555_s0 + $0x60] ss:$136 sps:$4 sm:$0xff]  }
 0x719   : > { %15621 = vmatprep.subr.bf16.mxu1 %v20616_v36  ;;  %v20907_v52 = vld [vmem:[%s24555_s0 + $0x68] ss:$136 sps:$4 sm:$0xff]   ;;  %v20641_v36 = vld [vmem:[%s22206_s10 + $0x2b30] ss:$24 sps:$4 sm:$0xff]  }
 0x71b   : > { %15579 = vmatpush2.bf16.msra.mxu0 %v20611_v57  ;;  %v20644_v57 = vld [vmem:[%s22206_s10 + $0x2e30] ss:$24 sps:$4 sm:$0xff]  }
 0x71c   : > { %15622 = vmatpush2.bf16.msra.mxu1 %v20614_v47  ;;  %15580 = vmatprep.subr.bf16.mxu0 %v20619_v42  ;;  %v20649_v47 = vld [vmem:[%s22206_s10 + $0x2b04] ss:$24 sps:$4 sm:$0xff]  }
 0x71d   : > { %15623 = vmatprep.subr.bf16.mxu1 %v20622_v53  ;;  %v20652_v42 = vld [vmem:[%s22206_s10 + $0x2e04] ss:$24 sps:$4 sm:$0xff]  }
 0x71e   : > { %v20908_v53 = vld [vmem:[%s24555_s0 + $0x74] ss:$136 sps:$4 sm:$0xff]  }
 0x71f   : > { %15581 = vmatpush2.bf16.msra.mxu0 %v20617_v22  ;;  %v20909_v22 = vld [vmem:[%s24555_s0 + $0x7c] ss:$136 sps:$4 sm:$0xff]  }
 0x720   : > { %15624 = vmatpush2.bf16.msra.mxu1 %v20620_v43  ;;  %15582 = vmatprep.subr.bf16.mxu0 %v20625_v37  ;;  %v20647_v43 = vld [vmem:[%s22206_s10 + $0x2b00] ss:$24 sps:$4 sm:$0xff]  }
 0x721   : > { %15625 = vmatprep.subr.bf16.mxu1 %v20628_v5  ;;  %v20650_v37 = vld [vmem:[%s22206_s10 + $0x2e00] ss:$24 sps:$4 sm:$0xff]   ;;  %v20655_v5 = vld [vmem:[%s22206_s10 + $0x2ad4] ss:$24 sps:$4 sm:$0xff]  }
 0x723   : > { %15583 = vmatpush2.bf16.msra.mxu0 %v20623_v13  ;;  %v20658_v13 = vld [vmem:[%s22206_s10 + $0x2dd4] ss:$24 sps:$4 sm:$0xff]  }
 0x724   : > { %15626 = vmatpush2.bf16.msra.mxu1 %v20626_v18  ;;  %15584 = vmatprep.subr.bf16.mxu0 %v20631_v44  ;;  %v20653_v18 = vld [vmem:[%s22206_s10 + $0x2ad0] ss:$24 sps:$4 sm:$0xff]  }
 0x725   : > { %15627 = vmatprep.subr.bf16.mxu1 %v20634_v48  ;;  %v20656_v44 = vld [vmem:[%s22206_s10 + $0x2dd0] ss:$24 sps:$4 sm:$0xff]   ;;  %v20661_v48 = vld [vmem:[%s22206_s10 + $0x2aa4] ss:$24 sps:$4 sm:$0xff]  }
 0x727   : > { %15585 = vmatpush2.bf16.msra.mxu0 %v20629_v8  ;;  %v20664_v8 = vld [vmem:[%s22206_s10 + $0x2da4] ss:$24 sps:$4 sm:$0xff]  }
 0x728   : > { %15628 = vmatpush2.bf16.msra.mxu1 %v20632_v21  ;;  %15640 = vmatprep.subr.bf16.mxu0 %v20637_v33  ;;  %v20659_v21 = vld [vmem:[%s22206_s10 + $0x2aa0] ss:$24 sps:$4 sm:$0xff]  }
 0x729   : > { %15683 = vmatprep.subr.bf16.mxu1 %v20640_v9  ;;  %v20662_v33 = vld [vmem:[%s22206_s10 + $0x2da0] ss:$24 sps:$4 sm:$0xff]   ;;  %v20667_v9 = vld [vmem:[%s22206_s10 + $0x2a74] ss:$24 sps:$4 sm:$0xff]  }
 0x72a   : > { %15587 = vmatmul.mubr.bf16.vlgmr.msra.gmra.mxu0 %v20906_v12  ;;  %v20676_v12 = vld [vmem:[%s22206_s10 + $0x2d44] ss:$24 sps:$4 sm:$0xff]  }
 0x72b   : > { %15630 = vmatmul.mubr.bf16.vlgmr.msra.gmra.mxu1 %v20907_v52  ;;  %15641 = vmatpush1.bf16.msra.mxu0 %v20635_v32  ;;  %v20670_v32 = vld [vmem:[%s22206_s10 + $0x2d74] ss:$24 sps:$4 sm:$0xff]   ;;  %v20671_v52 = vld [vmem:[%s22206_s10 + $0x2a40] ss:$24 sps:$4 sm:$0xff]  }
 0x72c   : > { %15684 = vmatpush1.bf16.msra.mxu1 %v20638_v45  ;;  %15642 = vmatprep.subr.bf16.mxu0 %v20643_v41  ;;  %v20665_v45 = vld [vmem:[%s22206_s10 + $0x2a70] ss:$24 sps:$4 sm:$0xff]  }
 0x72d   : > { %15685 = vmatprep.subr.bf16.mxu1 %v20646_v15  ;;  %15672 = vmatprep.mubr.bf16.mxu0 %v20908_v53  ;;  %v20668_v41 = vld [vmem:[%s22206_s10 + $0x2d70] ss:$24 sps:$4 sm:$0xff]   ;;  %v20673_v15 = vld [vmem:[%s22206_s10 + $0x2a44] ss:$24 sps:$4 sm:$0xff]  }
 0x72e   : > { %15715 = vmatprep.mubr.bf16.mxu1 %v20909_v22  ;;  %v20680_v53 = vld [vmem:[%s22206_s10 + $0x2d10] ss:$24 sps:$4 sm:$0xff]   ;;  %v20685_v22 = vld [vmem:[%s22206_s10 + $0x2ce4] ss:$24 sps:$4 sm:$0xff]  }
 0x72f   : > { %15643 = vmatpush1.bf16.msra.mxu0 %v20641_v36  ;;  %v20674_v36 = vld [vmem:[%s22206_s10 + $0x2d40] ss:$24 sps:$4 sm:$0xff]  }
 0x730   : > { %15686 = vmatpush1.bf16.msra.mxu1 %v20644_v57  ;;  %15644 = vmatprep.subr.bf16.mxu0 %v20649_v47  ;;  %v20679_v57 = vld [vmem:[%s22206_s10 + $0x2a14] ss:$24 sps:$4 sm:$0xff]  }
 0x731   : > { %15687 = vmatprep.subr.bf16.mxu1 %v20652_v42  ;;  %v20682_v47 = vld [vmem:[%s22206_s10 + $0x2d14] ss:$24 sps:$4 sm:$0xff]   ;;  %v20677_v42 = vld [vmem:[%s22206_s10 + $0x2a10] ss:$24 sps:$4 sm:$0xff]  }
 0x733   : > { %15645 = vmatpush1.bf16.msra.mxu0 %v20647_v43  ;;  %v20688_v43 = vld [vmem:[%s22206_s10 + $0x2fe4] ss:$24 sps:$4 sm:$0xff]  }
 0x734   : > { %15688 = vmatpush1.bf16.msra.mxu1 %v20650_v37  ;;  %15646 = vmatprep.subr.bf16.mxu0 %v20655_v5  ;;  %v20683_v37 = vld [vmem:[%s22206_s10 + $0x2ce0] ss:$24 sps:$4 sm:$0xff]  }
 0x735   : > { %15689 = vmatprep.subr.bf16.mxu1 %v20658_v13  ;;  %v20686_v5 = vld [vmem:[%s22206_s10 + $0x2fe0] ss:$24 sps:$4 sm:$0xff]   ;;  %v20691_v13 = vld [vmem:[%s22206_s10 + $0x2cb4] ss:$24 sps:$4 sm:$0xff]  }
 0x737   : > { %15647 = vmatpush1.bf16.msra.mxu0 %v20653_v18  ;;  %v20694_v18 = vld [vmem:[%s22206_s10 + $0x2fb4] ss:$24 sps:$4 sm:$0xff]  }
 0x738   : > { %15690 = vmatpush1.bf16.msra.mxu1 %v20656_v44  ;;  %15648 = vmatprep.subr.bf16.mxu0 %v20661_v48  ;;  %v20689_v44 = vld [vmem:[%s22206_s10 + $0x2cb0] ss:$24 sps:$4 sm:$0xff]  }
 0x739   : > { %15691 = vmatprep.subr.bf16.mxu1 %v20664_v8  ;;  %v20692_v48 = vld [vmem:[%s22206_s10 + $0x2fb0] ss:$24 sps:$4 sm:$0xff]   ;;  %v5287_v8 = vsub.s32 3, %v22506_v40 }
 0x73b   : > { %15649 = vmatpush1.bf16.msra.mxu0 %v20659_v21  ;;  %v20697_v21 = vld [vmem:[%s22206_s10 + $0x2c84] ss:$24 sps:$4 sm:$0xff]  }
 0x73c   : > { %15692 = vmatpush1.bf16.msra.mxu1 %v20662_v33  ;;  %15650 = vmatprep.subr.bf16.mxu0 %v20667_v9  ;;  %v20700_v33 = vld [vmem:[%s22206_s10 + $0x2f84] ss:$24 sps:$4 sm:$0xff]   ;;  %v20695_v9 = vld [vmem:[%s22206_s10 + $0x2c80] ss:$24 sps:$4 sm:$0xff]  }
 0x73d   : > { %15693 = vmatprep.subr.bf16.mxu1 %v20670_v32  ;;  %v20698_v32 = vld [vmem:[%s22206_s10 + $0x2f80] ss:$24 sps:$4 sm:$0xff]  }
 0x73f   : > { %15651 = vmatpush1.bf16.msra.mxu0 %v20665_v45  ;;  %v24373_v45 = vld [vmem:[%s22199_s29] sm:$0x3f] }
 0x740   : > { %15694 = vmatpush1.bf16.msra.mxu1 %v20668_v41  ;;  %15652 = vmatprep.subr.bf16.mxu0 %v20673_v15  ;;  %v5288_v41 = vrot.slane %v24373_v45, %v5287_v8  ;;  %v20703_v15 = vld [vmem:[%s22206_s10 + $0x2c54] ss:$24 sps:$4 sm:$0xff]   ;;  %v20721_v8 = vld [vmem:[%s22206_s10 + $0x2bc4] ss:$24 sps:$4 sm:$0xff]  }
 0x741   : > { %15695 = vmatprep.subr.bf16.mxu1 %v20676_v12  ;;  %v20706_v12 = vld [vmem:[%s22206_s10 + $0x2f54] ss:$24 sps:$4 sm:$0xff]  }
 0x743   : > { %15653 = vmatpush1.bf16.msra.mxu0 %v20671_v52  ;;  %v20701_v52 = vld [vmem:[%s22206_s10 + $0x2c50] ss:$24 sps:$4 sm:$0xff]  }
 0x744   : > { %15696 = vmatpush1.bf16.msra.mxu1 %v20674_v36  ;;  %15654 = vmatprep.subr.bf16.mxu0 %v20679_v57  ;;  %v20704_v36 = vld [vmem:[%s22206_s10 + $0x2f50] ss:$24 sps:$4 sm:$0xff]   ;;  %v14344_v57 = vadd.f32 %v23342_v7, %v5288_v41 }
 0x745   : > { %15697 = vmatprep.subr.bf16.mxu1 %v20682_v47  ;;  %v14348_v47 = vadd.f32 %v23360_v51, %v5288_v41  ;;  %v20715_v51 = vld [vmem:[%s22206_s10 + $0x2bf4] ss:$24 sps:$4 sm:$0xff]  }
 0x746   : > { %v20730_v41 = vld [vmem:[%s22206_s10 + $0x2e94] ss:$24 sps:$4 sm:$0xff]  }
 0x747   : > { %15655 = vmatpush1.bf16.msra.mxu0 %v20677_v42  ;;  %v20709_v42 = vld [vmem:[%s22206_s10 + $0x2c24] ss:$24 sps:$4 sm:$0xff]  }
 0x748   : > { %15698 = vmatpush1.bf16.msra.mxu1 %v20680_v53  ;;  %15656 = vmatprep.subr.bf16.mxu0 %v20685_v22  ;;  %v20712_v53 = vld [vmem:[%s22206_s10 + $0x2f24] ss:$24 sps:$4 sm:$0xff]   ;;  %v14391_v22 = vadd.f32 %v23795_v59, %v14348_v47  ;;  %v20735_v47 = vld [vmem:[%s22204_s9 + $0x38] sm:$0xff]  }
 0x749   : > { %15699 = vmatprep.subr.bf16.mxu1 %v20688_v43  ;;  %v20707_v43 = vld [vmem:[%s22206_s10 + $0x2c20] ss:$24 sps:$4 sm:$0xff]  }
 0x74a   : > { %v14434_v7 = vadd.f32 %v23797_v49, %v14391_v22  ;;  %v20911_v22 = vld [vmem:[%s24555_s0 + $0x70] ss:$136 sps:$4 sm:$0xff]  }
 0x74b   : > { %15657 = vmatpush2.bf16.msra.mxu0 %v20683_v37  ;;  %v20710_v37 = vld [vmem:[%s22206_s10 + $0x2f20] ss:$24 sps:$4 sm:$0xff]  }
 0x74c   : > { %15700 = vmatpush2.bf16.msra.mxu1 %v20686_v5  ;;  %15658 = vmatprep.subr.bf16.mxu0 %v20691_v13  ;;  %v14387_v5 = vadd.f32 %v23779_v31, %v14344_v57  ;;  %v20718_v13 = vld [vmem:[%s22206_s10 + $0x2ef4] ss:$24 sps:$4 sm:$0xff]   ;;  %v14477_v59 = vadd.f32 %v23825_v4, %v14434_v7 }
 0x74d   : > { %15701 = vmatprep.subr.bf16.mxu1 %v20694_v18  ;;  %v20913_v7 = vld [vmem:[%s24555_s0 + $0x84] ss:$136 sps:$4 sm:$0xff]  }
 0x74e   : > { %v14430_v18 = vadd.f32 %v23781_v6, %v14387_v5  ;;  %v14520_v49 = vadd.f32 %v23827_v38, %v14477_v59  ;;  %v20744_v5 = vld [vmem:[%s22204_s9 + $0x68] sm:$0xff]   ;;  %v20749_v59 = vld [vmem:[%s22204_s9 + $0x60] sm:$0xff]  }
 0x74f   : > { %15659 = vmatpush2.bf16.msra.mxu0 %v20689_v44  ;;  %v20713_v44 = vld [vmem:[%s22206_s10 + $0x2bf0] ss:$24 sps:$4 sm:$0xff]  }
 0x750   : > { %15702 = vmatpush2.bf16.msra.mxu1 %v20692_v48  ;;  %15660 = vmatprep.subr.bf16.mxu0 %v20697_v21  ;;  %v20716_v48 = vld [vmem:[%s22206_s10 + $0x2ef0] ss:$24 sps:$4 sm:$0xff]   ;;  %v14473_v31 = vadd.f32 %v23809_v19, %v14430_v18  ;;  %v20724_v21 = vld [vmem:[%s22206_s10 + $0x2ec4] ss:$24 sps:$4 sm:$0xff]   ;;  %v14563_v4 = vadd.f32 %v23867_v20, %v14520_v49  ;;  %v20748_v18 = vld [vmem:[%s22206_s10 + $0x30d4] ss:$24 sps:$4 sm:$0xff]  }
 0x751   : > { %15703 = vmatprep.subr.bf16.mxu1 %v20700_v33  ;;  %v20719_v33 = vld [vmem:[%s22206_s10 + $0x2bc0] ss:$24 sps:$4 sm:$0xff]   ;;  %v20754_v49 = vld [vmem:[%s22204_s9 + $0x58] sm:$0xff]  }
 0x752   : > { %v14516_v6 = vadd.f32 %v23811_v11, %v14473_v31  ;;  %v14606_v38 = vadd.f32 %v23869_v35, %v14563_v4  ;;  %v20759_v4 = vld [vmem:[%s22204_s9 + $0x50] sm:$0xff]  }
 0x753   : > { %15661 = vmatpush2.bf16.msra.mxu0 %v20695_v9  ;;  %v20722_v9 = vld [vmem:[%s22206_s10 + $0x2ec0] ss:$24 sps:$4 sm:$0xff]  }
 0x754   : > { %15704 = vmatpush2.bf16.msra.mxu1 %v20698_v32  ;;  %15662 = vmatprep.subr.bf16.mxu0 %v20703_v15  ;;  %v14559_v19 = vadd.f32 %v23839_v58, %v14516_v6  ;;  %v20727_v32 = vld [vmem:[%s22206_s10 + $0x2b94] ss:$24 sps:$4 sm:$0xff]   ;;  %v14649_v20 = vadd.f32 %v23897_v50, %v14606_v38  ;;  %v20725_v15 = vld [vmem:[%s22206_s10 + $0x2b90] ss:$24 sps:$4 sm:$0xff]   ;;  %v20731_v50 = vld [vmem:[%s22206_s10 + $0x3160] ss:$24 sps:$4 sm:$0xff]  }
 0x755   : > { %15705 = vmatprep.subr.bf16.mxu1 %v20706_v12  ;;  %v20728_v12 = vld [vmem:[%s22206_s10 + $0x2e90] ss:$24 sps:$4 sm:$0xff]   ;;  %v20761_v38 = vld [vmem:[%s22206_s10 + $0x3040] ss:$24 sps:$4 sm:$0xff]  }
 0x756   : > { %v14602_v11 = vadd.f32 %v23841_v25, %v14559_v19  ;;  %v14692_v35 = vadd.f32 %v23899_v29, %v14649_v20  ;;  %v20738_v29 = vld [vmem:[%s22206_s10 + $0x3134] ss:$24 sps:$4 sm:$0xff]   ;;  %v20763_v19 = vld [vmem:[%s22206_s10 + $0x3044] ss:$24 sps:$4 sm:$0xff]   ;;  %v20766_v20 = vld [vmem:[%s22206_s10 + $0x3010] ss:$24 sps:$4 sm:$0xff]  }
 0x757   : > { %15663 = vmatpush2.bf16.msra.mxu0 %v20701_v52  ;;  %v20733_v52 = vld [vmem:[%s22206_s10 + $0x3164] ss:$24 sps:$4 sm:$0xff]  }
 0x758   : > { %15706 = vmatpush2.bf16.msra.mxu1 %v20704_v36  ;;  %15664 = vmatprep.subr.bf16.mxu0 %v20709_v42  ;;  %v14645_v58 = vadd.f32 %v23881_v3, %v14602_v11  ;;  %v20734_v36 = vld [vmem:[%s22204_s9 + $0x78] sm:$0xff]   ;;  %v14735_v57 = vadd.f32 %v23927_v28, %v14692_v35  ;;  %v20769_v11 = vld [vmem:[%s22204_s9 + $0x40] sm:$0xff]  }
 0x759   : > { %15707 = vmatprep.subr.bf16.mxu1 %v20712_v53  ;;  %v20739_v53 = vld [vmem:[%s22204_s9 + $0x70] sm:$0xff]  }
 0x75a   : > { %v14688_v25 = vadd.f32 %v23883_v23, %v14645_v58  ;;  %v14778_v42 = vadd.f32 %v23929_v1, %v14735_v57  ;;  %v20736_v1 = vld [vmem:[%s22206_s10 + $0x3130] ss:$24 sps:$4 sm:$0xff]  }
 0x75b   : > { %15665 = vmatpush2.bf16.msra.mxu0 %v20707_v43  ;;  %v20740_v43 = vld [vmem:[%s22204_s9 + $0x30] sm:$0xff]   ;;  %v20774_v58 = vld [vmem:[%s22204_s9 + $0xf8] sm:$0xff]  }
 0x75c   : > { %15708 = vmatpush2.bf16.msra.mxu1 %v20710_v37  ;;  %15666 = vmatprep.subr.bf16.mxu0 %v20715_v51  ;;  %v14731_v3 = vadd.f32 %v23911_v54, %v14688_v25  ;;  %v14821_v28 = vadd.f32 %v23966_v10, %v14778_v42  ;;  %v20912_v54 = vld [vmem:[%s24555_s0 + $0x78] ss:$136 sps:$4 sm:$0xff]   ;;  %v20743_v37 = vld [vmem:[%s22206_s10 + $0x3104] ss:$24 sps:$4 sm:$0xff]   ;;  %v14992_v51 = vpop.f32.mrf.mxu0  ;;  %v20778_v25 = vld [vmem:[%s22206_s10 + $0x3254] ss:$24 sps:$4 sm:$0xff]  }
 0x75d   : > { %15709 = vmatprep.subr.bf16.mxu1 %v20718_v13  ;;  %v20776_v42 = vld [vmem:[%s22206_s10 + $0x3250] ss:$24 sps:$4 sm:$0xff]  }
 0x75e   : > { %v14774_v23 = vadd.f32 %v23913_v55, %v14731_v3  ;;  %v14864_v10 = vadd.f32 %v23968_v60, %v14821_v28  ;;  %v20788_v28 = vld [vmem:[%s22206_s10 + $0x31f4] ss:$24 sps:$4 sm:$0xff]  }
 0x75f   : > { %15667 = vmatpush2.bf16.msra.mxu0 %v20713_v44  ;;  %v15035_v44 = vpop.f32.mrf.mxu1 }
 0x760   : > { %15710 = vmatpush2.bf16.msra.mxu1 %v20716_v48  ;;  %15668 = vmatprep.subr.bf16.mxu0 %v20721_v8  ;;  %v14817_v55 = vadd.f32 %v23943_v2, %v14774_v23  ;;  %v14907_v60 = vadd.f32 %v24000_v14, %v14864_v10  ;;  %v20746_v48 = vld [vmem:[%s22206_s10 + $0x30d0] ss:$24 sps:$4 sm:$0xff]   ;;  %v20784_v23 = vld [vmem:[%s22204_s9 + $0xe8] sm:$0xff]  }
 0x761   : > { %15711 = vmatprep.subr.bf16.mxu1 %v20724_v21  ;;  %v20755_v21 = vld [vmem:[%s22204_s9 + $0x18] sm:$0xff]   ;;  %v20791_v10 = vld [vmem:[%s22206_s10 + $0x31c0] ss:$24 sps:$4 sm:$0xff]  }
 0x762   : > { %v14860_v2 = vadd.f32 %v23945_v26, %v14817_v55  ;;  %v14950_v13 = vadd.f32 %v24002_v62, %v14907_v60  ;;  %v20753_v62 = vld [vmem:[%s22206_s10 + $0x30a4] ss:$24 sps:$4 sm:$0xff]   ;;  %v20794_v55 = vld [vmem:[%s22204_s9 + $0xd8] sm:$0xff]  }
 0x763   : > { %15669 = vmatpush2.bf16.msra.mxu0 %v20719_v33  ;;  %v20756_v33 = vld [vmem:[%s22206_s10 + $0x3070] ss:$24 sps:$4 sm:$0xff]   ;;  %v20800_v60 = vld [vmem:[%s22204_s9 + $0x90] sm:$0xff]  }
 0x764   : > { %15712 = vmatpush2.bf16.msra.mxu1 %v20722_v9  ;;  %15670 = vmatprep.subr.bf16.mxu0 %v20727_v32  ;;  %v14993_v14 = vadd.f32 %v14992_v51, %v14950_v13  ;;  %v20760_v9 = vld [vmem:[%s22204_s9 + $0x10] sm:$0xff]   ;;  %v20765_v32 = vld [vmem:[%s22204_s9 + $0x8] sm:$0xff]   ;;  %v20804_v13 = vld [vmem:[%s22204_s9 + $0x80] sm:$0xff]  }
 0x765   : > { %15713 = vmatprep.subr.bf16.mxu1 %v20730_v41  ;;  %v20768_v41 = vld [vmem:[%s22206_s10 + $0x3014] ss:$24 sps:$4 sm:$0xff]   ;;  %v20801_v51 = vld [vmem:[%s22204_s9 + $0xc8] sm:$0xff]  }
 0x766   : > { %v15036_v8 = vadd.f32 %v15035_v44, %v14993_v14  ;;  %v20808_v14 = vld [vmem:[%s22204_s9 + $0x130] sm:$0xff]   ;;  %v20809_v44 = vld [vmem:[%s22204_s9 + $0x168] sm:$0xff]  }
 0x767   : > { %15671 = vmatpush2.bf16.msra.mxu0 %v20725_v15  ;;  %v20770_v15 = vld [vmem:[%s22204_s9] sm:$0xff]  }
 0x768   : > { %15714 = vmatpush2.bf16.msra.mxu1 %v20728_v12  ;;  %15726 = vmatprep.subr.bf16.mxu0 %v20733_v52  ;;  %20833 = vtanh.f32 %v15036_v8  ;;  %v20773_v12 = vld [vmem:[%s22206_s10 + $0x3284] ss:$24 sps:$4 sm:$0xff]   ;;  %v20771_v52 = vld [vmem:[%s22206_s10 + $0x3280] ss:$24 sps:$4 sm:$0xff]  }
 0x769   : > { %18152 = vmatprep.subr.bf16.mxu1 %v20734_v36  ;;  %v20775_v36 = vld [vmem:[%s22204_s9 + $0xb8] sm:$0xff]   ;;  %v20817_v8 = vld [vmem:[%s22204_s9 + $0x148] sm:$0xff]  }
 0x76a   : > { %15673 = vmatmul.mubr.bf16.vlgmr.msra.gmra.mxu0 %v20911_v22  ;;  %v20789_v22 = vld [vmem:[%s22204_s9 + $0xe0] sm:$0xff]  }
 0x76b   : > { %15716 = vmatmul.mubr.bf16.vlgmr.msra.gmra.mxu1 %v20912_v54  ;;  %15727 = vmatpush1.bf16.msra.mxu0 %v20731_v50  ;;  %v20779_v50 = vld [vmem:[%s22204_s9 + $0xf0] sm:$0xff]   ;;  %v20786_v54 = vld [vmem:[%s22206_s10 + $0x31f0] ss:$24 sps:$4 sm:$0xff]  }
 0x76c   : > { %18153 = vmatpush3.bf16.msra.mxu1 %v20735_v47  ;;  %16205 = vmatprep.mubr.bf16.mxu1 %v15784_v24  ;;  %v14903_v24 = vadd.f32 %v23982_v46, %v14860_v2  ;;  %v20750_v46 = vld [vmem:[%s22204_s9 + $0x20] sm:$0xff]   ;;  %v24566_v47 = vpack.c.bf16 %v23285_v27, %v23283_v39  ;;  %v20781_v39 = vld [vmem:[%s22206_s10 + $0x3220] ss:$24 sps:$4 sm:$0xff]  }
 0x76d   : > { %15728 = vmatprep.subr.bf16.mxu0 %v20738_v29  ;;  %18154 = vmatprep.subr.bf16.mxu1 %v20739_v53  ;;  %v20780_v29 = vld [vmem:[%s22204_s9 + $0xb0] sm:$0xff]   ;;  %v20785_v27 = vld [vmem:[%s22204_s9 + $0xa8] sm:$0xff]   ;;  %v20796_v2 = vld [vmem:[%s22206_s10 + $0x3190] ss:$24 sps:$4 sm:$0xff]  }
 0x76e   : > { %18097 = vmatprep.mubr.msk.bf16.mxu0 %vm13572_vm0, %v20913_v7  ;;  %v14946_v26 = vadd.f32 %v23984_v63, %v14903_v24  ;;  %v20751_v63 = vld [vmem:[%s22206_s10 + $0x30a0] ss:$24 sps:$4 sm:$0xff]   ;;  %v20783_v53 = vld [vmem:[%s22206_s10 + $0x3224] ss:$24 sps:$4 sm:$0xff]  }
 0x76f   : > { %15729 = vmatpush1.bf16.msra.mxu0 %v20736_v1  ;;  %v20790_v1 = vld [vmem:[%s22204_s9 + $0xa0] sm:$0xff]   ;;  %v20799_v7 = vld [vmem:[%s22204_s9 + $0xd0] sm:$0xff]  }
 0x770   : > { %18155 = vmatpush3.bf16.msra.mxu1 %v20740_v43  ;;  %15730 = vmatprep.subr.bf16.mxu0 %v20743_v37  ;;  %v14989_v31 = vadd.f32 %v24015_v16, %v14946_v26  ;;  %v20758_v16 = vld [vmem:[%s22206_s10 + $0x3074] ss:$24 sps:$4 sm:$0xff]   ;;  %v20793_v43 = vld [vmem:[%s22206_s10 + $0x31c4] ss:$24 sps:$4 sm:$0xff]   ;;  %v20914_v24 = vld [vmem:[%s24555_s0 + $0x80] ss:$136 sps:$4 sm:$0xff]  }
 0x771   : > { %18156 = vmatprep.subr.bf16.mxu1 %v20744_v5  ;;  %v20795_v37 = vld [vmem:[%s22204_s9 + $0x98] sm:$0xff]   ;;  %v20807_v26 = vld [vmem:[%s22204_s9 + $0x170] sm:$0xff]  }
 0x772   : > { %v15032_v6 = vadd.f32 %v24017_v34, %v14989_v31  ;;  %v20764_v34 = vld [vmem:[%s22204_s9 + $0x48] sm:$0xff]   ;;  %v20798_v5 = vld [vmem:[%s22206_s10 + $0x3194] ss:$24 sps:$4 sm:$0xff]   ;;  %v20815_v31 = vld [vmem:[%s22204_s9 + $0x150] sm:$0xff]  }
 0x773   : > { %15731 = vmatpush1.bf16.msra.mxu0 %v20741_v17  ;;  %v20802_v17 = vld [vmem:[%s22204_s9 + $0x88] sm:$0xff]  }
 0x774   : > { %18157 = vmatpush3.bf16.msra.mxu1 %v20745_v0  ;;  %15732 = vmatprep.subr.bf16.mxu0 %v20748_v18  ;;  %20835 = vtanh.f32 %v15032_v6  ;;  %v20803_v0 = vld [vmem:[%s22204_s9 + $0xc0] sm:$0xff]   ;;  %v20805_v18 = vld [vmem:[%s22204_s9 + $0x178] sm:$0xff]  }
 0x775   : > { %18158 = vmatprep.subr.bf16.mxu1 %v20749_v59  ;;  %v20834_v35 = vpop.eup %20833  ;;  %v20806_v59 = vld [vmem:[%s22204_s9 + $0x138] sm:$0xff]  }
 0x777   : > { %15733 = vmatpush1.bf16.msra.mxu0 %v20746_v48  ;;  %v20810_v48 = vld [vmem:[%s22204_s9 + $0x128] sm:$0xff]  }
 0x778   : > { %18159 = vmatpush3.bf16.msra.mxu1 %v20750_v46  ;;  %15734 = vmatprep.subr.bf16.mxu0 %v20753_v62  ;;  %v20814_v46 = vld [vmem:[%s22204_s9 + $0x118] sm:$0xff]   ;;  %v20816_v62 = vld [vmem:[%s22204_s9 + $0x110] sm:$0xff]  }
 0x779   : > { %18160 = vmatprep.subr.bf16.mxu1 %v20754_v49  ;;  %v15072_v49 = vpop.f32.mrf.mxu0 }
 0x77b   : > { %15735 = vmatpush1.bf16.msra.mxu0 %v20751_v63  ;;  %v20818_v63 = vld [vmem:[%s22204_s9 + $0x108] sm:$0xff]   ;;  %v15074_v6 = vpop.f32.mrf.mxu0 }
 0x77c   : > { %18161 = vmatpush3.bf16.msra.mxu1 %v20755_v21  ;;  %15736 = vmatprep.subr.bf16.mxu0 %v20758_v16  ;;  %v20819_v21 = vld [vmem:[%s22204_s9 + $0x140] sm:$0xff]   ;;  %v15115_v16 = vpop.f32.mrf.mxu1 }
 0x77d   : > { %18162 = vmatprep.subr.bf16.mxu1 %v20759_v4  ;;  %v20820_v4 = vld [vmem:[%s22204_s9 + $0x100] sm:$0xff]  }
 0x77f   : > { %15737 = vmatpush1.bf16.msra.mxu0 %v20756_v33  ;;  %v15076_v33 = vpop.f32.mrf.mxu0 }
 0x780   : > { %18163 = vmatpush3.bf16.msra.mxu1 %v20760_v9  ;;  %15738 = vmatprep.subr.bf16.mxu0 %v20763_v19  ;;  %v15117_v9 = vpop.f32.mrf.mxu1 }
 0x781   : > { %18164 = vmatprep.subr.bf16.mxu1 %v20764_v34  ;;  %v20836_v57 = vpop.eup %20835  ;;  %v15078_v19 = vpop.f32.mrf.mxu0 }
 0x782   : > { %v15786_v3 = vpack.c.bf16 %v20834_v35, %v20836_v57  ;;  %v15119_v34 = vpop.f32.mrf.mxu1 }
 0x783   : > { %15739 = vmatpush1.bf16.msra.mxu0 %v20761_v38  ;;  %v15158_v38 = vpop.f32.mrf.mxu0 }
 0x784   : > { %18165 = vmatpush3.bf16.msra.mxu1 %v20765_v32  ;;  %15740 = vmatprep.subr.bf16.mxu0 %v20768_v41  ;;  %v15121_v32 = vpop.f32.mrf.mxu1 }
 0x785   : > { %18166 = vmatprep.subr.bf16.mxu1 %v20769_v11  ;;  %v15160_v41 = vpop.f32.mrf.mxu0 }
 0x786   : > { %v15201_v11 = vpop.f32.mrf.mxu1 }
 0x787   : > { %15741 = vmatpush1.bf16.msra.mxu0 %v20766_v20  ;;  %v15162_v20 = vpop.f32.mrf.mxu0 }
 0x788   : > { %18167 = vmatpush3.bf16.msra.mxu1 %v20770_v15  ;;  %15746 = vmatprep.subr.bf16.mxu0 %v20773_v12  ;;  %v15203_v15 = vpop.f32.mrf.mxu1 }
 0x789   : > { %18174 = vmatprep.subr.bf16.mxu1 %v20774_v58  ;;  %v15164_v12 = vpop.f32.mrf.mxu0 }
 0x78a   : > { %v15205_v58 = vpop.f32.mrf.mxu1 }
 0x78b   : > { %16206 = vmatmul.mubr.bf16.vlgmr.msra.gmra.mxu1 %v24566_v47  ;;  %15747 = vmatpush2.bf16.msra.mxu0 %v20771_v52  ;;  %v15244_v35 = vpop.f32.mrf.mxu0 }
 0x78c   : > { %18175 = vmatpush3.bf16.msra.mxu1 %v20775_v36  ;;  %16246 = vmatprep.mubr.bf16.mxu1 %v15786_v3  ;;  %v15207_v52 = vpop.f32.mrf.mxu1 }
 0x78d   : > { %15748 = vmatprep.subr.bf16.mxu0 %v20778_v25  ;;  %18176 = vmatprep.subr.bf16.mxu1 %v20779_v50  ;;  %v15246_v36 = vpop.f32.mrf.mxu0 }
 0x78e   : > { %v15287_v25 = vpop.f32.mrf.mxu1 }
 0x78f   : > { %15749 = vmatpush2.bf16.msra.mxu0 %v20776_v42  ;;  %v15248_v57 = vpop.f32.mrf.mxu0 }
 0x790   : > { %18177 = vmatpush3.bf16.msra.mxu1 %v20780_v29  ;;  %15750 = vmatprep.subr.bf16.mxu0 %v20783_v53  ;;  %v15289_v50 = vpop.f32.mrf.mxu1 }
 0x791   : > { %18178 = vmatprep.subr.bf16.mxu1 %v20784_v23  ;;  %v15250_v47 = vpop.f32.mrf.mxu0 }
 0x792   : > { %v15291_v3 = vpop.f32.mrf.mxu1 }
 0x793   : > { %15751 = vmatpush2.bf16.msra.mxu0 %v20781_v39  ;;  %v15330_v42 = vpop.f32.mrf.mxu0 }
 0x794   : > { %18179 = vmatpush3.bf16.msra.mxu1 %v20785_v27  ;;  %15752 = vmatprep.subr.bf16.mxu0 %v20788_v28  ;;  %v15293_v29 = vpop.f32.mrf.mxu1 }
 0x795   : > { %18180 = vmatprep.subr.bf16.mxu1 %v20789_v22  ;;  %v15332_v53 = vpop.f32.mrf.mxu0 }
 0x796   : > { %v15373_v23 = vpop.f32.mrf.mxu1 }
 0x797   : > { %15753 = vmatpush2.bf16.msra.mxu0 %v20786_v54  ;;  %v15334_v39 = vpop.f32.mrf.mxu0 }
 0x798   : > { %18181 = vmatpush3.bf16.msra.mxu1 %v20790_v1  ;;  %15754 = vmatprep.subr.bf16.mxu0 %v20793_v43  ;;  %v15375_v27 = vpop.f32.mrf.mxu1  ;;  %v5295_v43 = vsub.s32 5, %v22506_v40 }
 0x799   : > { %18182 = vmatprep.subr.bf16.mxu1 %v20794_v55  ;;  %v15336_v28 = vpop.f32.mrf.mxu0 }
 0x79a   : > { %v15377_v22 = vpop.f32.mrf.mxu1 }
 0x79b   : > { %15755 = vmatpush2.bf16.msra.mxu0 %v20791_v10  ;;  %v15416_v54 = vpop.f32.mrf.mxu0 }
 0x79c   : > { %18183 = vmatpush3.bf16.msra.mxu1 %v20795_v37  ;;  %15756 = vmatprep.subr.bf16.mxu0 %v20798_v5  ;;  %v15379_v1 = vpop.f32.mrf.mxu1  ;;  %v5291_v37 = vsub.s32 4, %v22506_v40  ;;  %v5296_v5 = vrot.slane %v24373_v45, %v5295_v43 }
 0x79d   : > { %18184 = vmatprep.subr.bf16.mxu1 %v20799_v7  ;;  %v15418_v55 = vpop.f32.mrf.mxu0 }
 0x79e   : > { %v24527_v10 = vpop.f32.mrf.mxu1 }
 0x79f   : > { %15757 = vmatpush2.bf16.msra.mxu0 %v20796_v2  ;;  %v15420_v7 = vpop.f32.mrf.mxu0 }
 0x7a0   : > { %18185 = vmatpush3.bf16.msra.mxu1 %v20800_v60  ;;  %18196 = vmatprep.subr.bf16.mxu0 %v20805_v18  ;;  %v15461_v2 = vpop.f32.mrf.mxu1  ;;  %v5292_v60 = vrot.slane %v24373_v45, %v5291_v37 }
 0x7a1   : > { %18186 = vmatprep.subr.bf16.mxu1 %v20801_v51  ;;  %v15075_v51 = vadd.f32 %v15074_v6, %v5296_v5 }
 0x7a2   : > { %15759 = vmatmul.mubr.bf16.vlgmr.msra.gmra.mxu0 %v20914_v24  ;;  %v15077_v24 = vadd.f32 %v15076_v33, %v5292_v60 }
 0x7a3   : > { %18197 = vmatpush3.bf16.msra.mxu0 %v20806_v59  ;;  %v15118_v59 = vadd.f32 %v15117_v9, %v15075_v51 }
 0x7a4   : > { %18187 = vmatpush3.bf16.msra.mxu1 %v20802_v17  ;;  %18198 = vmatprep.subr.bf16.mxu0 %v20807_v26  ;;  %v15422_v17 = vpop.f32.mrf.mxu0  ;;  %v15079_v26 = vadd.f32 %v15078_v19, %v5296_v5 }
 0x7a5   : > { %18188 = vmatprep.subr.bf16.mxu1 %v20803_v0  ;;  %v15463_v0 = vpop.f32.mrf.mxu1 }
 0x7a7   : > { %18199 = vmatpush3.bf16.msra.mxu0 %v20808_v14  ;;  %v15465_v14 = vpop.f32.mrf.mxu1 }
 0x7a8   : > { %18189 = vmatpush3.bf16.msra.mxu1 %v20804_v13  ;;  %18200 = vmatprep.subr.bf16.mxu0 %v20809_v44  ;;  %v15073_v13 = vadd.f32 %v15072_v49, %v5292_v60  ;;  %v15120_v44 = vadd.f32 %v15119_v34, %v15077_v24 }
 0x7aa   : > { %v15502_v18 = vpop.f32.mrf.mxu0 }
 0x7ab   : > { %16247 = vmatmul.mubr.bf16.vlgmr.msra.gmra.mxu1 %v15785_v30  ;;  %18201 = vmatpush3.bf16.msra.mxu0 %v20810_v48  ;;  %v20813_v30 = vld [vmem:[%s22204_s9 + $0x158] sm:$0xff]   ;;  %v15161_v48 = vadd.f32 %v15160_v41, %v15118_v59  ;;  %v15545_v40 = vpop.f32.mrf.mxu1 }
 0x7ac   : > { %18202 = vmatprep.subr.bf16.mxu0 %v20811_v61  ;;  %v15116_v61 = vadd.f32 %v15115_v16, %v15073_v13 }
 0x7af   : > { %18203 = vmatpush3.bf16.msra.mxu0 %v20812_v56  ;;  %v15504_v56 = vpop.f32.mrf.mxu0 }
 0x7b0   : > { %18204 = vmatprep.subr.bf16.mxu0 %v20813_v30  ;;  %v15122_v30 = vadd.f32 %v15121_v32, %v15079_v26 }
 0x7b1   : > { %v15506_v45 = vpop.f32.mrf.mxu0 }
 0x7b3   : > { %18205 = vmatpush3.bf16.msra.mxu0 %v20814_v46  ;;  %v15163_v46 = vadd.f32 %v15162_v20, %v15120_v44  ;;  %v15508_v19 = vpop.f32.mrf.mxu0 }
 0x7b4   : > { %18206 = vmatprep.subr.bf16.mxu0 %v20815_v31  ;;  %v15159_v31 = vadd.f32 %v15158_v38, %v15116_v61 }
 0x7b7   : > { %18207 = vmatpush3.bf16.msra.mxu0 %v20816_v62  ;;  %v15204_v62 = vadd.f32 %v15203_v15, %v15161_v48 }
 0x7b8   : > { %18208 = vmatprep.subr.bf16.mxu0 %v20817_v8  ;;  %v15165_v8 = vadd.f32 %v15164_v12, %v15122_v30 }
 0x7b9   : > { %v15247_v6 = vadd.f32 %v15246_v36, %v15204_v62 }
 0x7ba   : > { %v15208_v49 = vadd.f32 %v15207_v52, %v15165_v8 }
 0x7bb   : > { %18209 = vmatpush3.bf16.msra.mxu0 %v20818_v63  ;;  %v15547_v63 = vpop.f32.mrf.mxu1  ;;  %v15290_v34 = vadd.f32 %v15289_v50, %v15247_v6 }
 0x7bc   : > { %18210 = vmatprep.subr.bf16.mxu0 %v20819_v21  ;;  %v15206_v21 = vadd.f32 %v15205_v58, %v15163_v46  ;;  %v15251_v41 = vadd.f32 %v15250_v47, %v15208_v49 }
 0x7bd   : > { %v15549_v43 = vpop.f32.mrf.mxu1  ;;  %v15333_v5 = vadd.f32 %v15332_v53, %v15290_v34 }
 0x7be   : > { %v15249_v33 = vadd.f32 %v15248_v57, %v15206_v21  ;;  %v15294_v38 = vadd.f32 %v15293_v29, %v15251_v41 }
 0x7bf   : > { %18211 = vmatpush3.bf16.msra.mxu0 %v20820_v4  ;;  %v15202_v4 = vadd.f32 %v15201_v11, %v15159_v31  ;;  %v15551_v20 = vpop.f32.mrf.mxu1  ;;  %v15376_v58 = vadd.f32 %v15375_v27, %v15333_v5 }
 0x7c0   : > { %v15292_v37 = vadd.f32 %v15291_v3, %v15249_v33  ;;  %v15337_v36 = vadd.f32 %v15336_v28, %v15294_v38 }
 0x7c1   : > { %v15245_v9 = vadd.f32 %v15244_v35, %v15202_v4  ;;  %v15419_v52 = vadd.f32 %v15418_v55, %v15376_v58 }
 0x7c2   : > { %v15335_v15 = vadd.f32 %v15334_v39, %v15292_v37  ;;  %v15380_v13 = vadd.f32 %v15379_v1, %v15337_v36 }
 0x7c3   : > { %v15288_v32 = vadd.f32 %v15287_v25, %v15245_v9  ;;  %v15462_v59 = vadd.f32 %v15461_v2, %v15419_v52 }
 0x7c4   : > { %v15378_v11 = vadd.f32 %v15377_v22, %v15335_v15  ;;  %v15423_v3 = vadd.f32 %v15422_v17, %v15380_v13 }
 0x7c5   : > { %v15331_v12 = vadd.f32 %v15330_v42, %v15288_v32  ;;  %v15505_v29 = vadd.f32 %v15504_v56, %v15462_v59 }
 0x7c6   : > { %v15421_v50 = vadd.f32 %v15420_v7, %v15378_v11  ;;  %v15466_v44 = vadd.f32 %v15465_v14, %v15423_v3 }
 0x7c7   : > { %v15374_v57 = vadd.f32 %v15373_v23, %v15331_v12  ;;  %v15548_v55 = vadd.f32 %v15547_v63, %v15505_v29  ;;  %v15781_v29 = vld [vmem:[#allocation2] sm:$0xff] }
 0x7c8   : > { %v15464_v26 = vadd.f32 %v15463_v0, %v15421_v50  ;;  %v15509_v23 = vadd.f32 %v15508_v19, %v15466_v44 }
 0x7c9   : > { %v15417_v47 = vadd.f32 %v15416_v54, %v15374_v57 }
 0x7ca   : > { %v15507_v27 = vadd.f32 %v15506_v45, %v15464_v26  ;;  %v15552_v2 = vadd.f32 %v15551_v20, %v15509_v23  ;;  %v15782_v23 = vld [vmem:[#allocation2 + $0x8] sm:$0xff] }
 0x7cb   : > { %v15460_v42 = vadd.f32 %v24527_v10, %v15417_v47 }
 0x7cc   : > { %v15550_v1 = vadd.f32 %v15549_v43, %v15507_v27 }
 0x7cd   : > { %v15503_v28 = vadd.f32 %v15502_v18, %v15460_v42 }
 0x7cf   : > { %v15546_v54 = vadd.f32 %v15545_v40, %v15503_v28 }
 0x7ea   : > { %v15588_v16 = vpop.f32.mrf.mxu0 }
 0x7eb   : > { %v15631_v51 = vpop.f32.mrf.mxu1  ;;  %v15589_v30 = vadd.f32 %v15588_v16, %v15546_v54 }
 0x7ec   : > { %v15590_v60 = vpop.f32.mrf.mxu0 }
 0x7ed   : > { %v15633_v24 = vpop.f32.mrf.mxu1  ;;  %v15591_v7 = vadd.f32 %v15590_v60, %v15548_v55  ;;  %v15632_v14 = vadd.f32 %v15631_v51, %v15589_v30 }
 0x7ee   : > { %v15592_v35 = vpop.f32.mrf.mxu0 }
 0x7ef   : > { %v15635_v25 = vpop.f32.mrf.mxu1  ;;  %v15593_v17 = vadd.f32 %v15592_v35, %v15550_v1  ;;  %v15634_v56 = vadd.f32 %v15633_v24, %v15591_v7 }
 0x7f0   : > { %v15594_v53 = vpop.f32.mrf.mxu0 }
 0x7f1   : > { %v15637_v22 = vpop.f32.mrf.mxu1  ;;  %v15595_v31 = vadd.f32 %v15594_v53, %v15552_v2  ;;  %v15636_v10 = vadd.f32 %v15635_v25, %v15593_v17 }
 0x7f3   : > { %v15638_v45 = vadd.f32 %v15637_v22, %v15595_v31 }
 0x82a   : > { %v15674_v39 = vpop.f32.mrf.mxu0 }
 0x82b   : > { %v15717_v61 = vpop.f32.mrf.mxu1  ;;  %v15675_v21 = vadd.f32 %v15674_v39, %v15632_v14 }
 0x82c   : > { %v15676_v48 = vpop.f32.mrf.mxu0 }
 0x82d   : > { %v15719_v0 = vpop.f32.mrf.mxu1  ;;  %v15677_v62 = vadd.f32 %v15676_v48, %v15634_v56  ;;  %v15718_v43 = vadd.f32 %v15717_v61, %v15675_v21 }
 0x82e   : > { %v15678_v46 = vpop.f32.mrf.mxu0 }
 0x82f   : > { %v15721_v18 = vpop.f32.mrf.mxu1  ;;  %v15679_v63 = vadd.f32 %v15678_v46, %v15636_v10  ;;  %v15720_v4 = vadd.f32 %v15719_v0, %v15677_v62 }
 0x830   : > { %v15680_v8 = vpop.f32.mrf.mxu0 }
 0x831   : > { %v15681_v49 = vadd.f32 %v15680_v8, %v15638_v45  ;;  %v15723_v33 = vpop.f32.mrf.mxu1  ;;  %v15722_v9 = vadd.f32 %v15721_v18, %v15679_v63 }
 0x833   : > { %v15724_v41 = vadd.f32 %v15723_v33, %v15681_v49 }
 0x84b   : > { %v18168_v58 = vpop.f32.mrf.mxu1 }
 0x84d   : > { %v18169_v36 = vpop.f32.mrf.mxu1 }
 0x84e   : > { %v18170_v59 = vadd.f32 %v18169_v36, %v18168_v58 }
 0x84f   : > { %v18171_v11 = vpop.f32.mrf.mxu1 }
 0x851   : > { %v18172_v52 = vpop.f32.mrf.mxu1 }
 0x852   : > { %v18173_v39 = vadd.f32 %v18172_v52, %v18171_v11 }
 0x862   : > { %v15760_v6 = vpop.f32.mrf.mxu0 }
 0x863   : > { %v15761_v37 = vadd.f32 %v15760_v6, %v15718_v43 }
 0x864   : > { %v15762_v40 = vpop.f32.mrf.mxu0 }
 0x865   : > { %v15763_v19 = vadd.f32 %v15762_v40, %v15720_v4 }
 0x866   : > { %v15764_v34 = vpop.f32.mrf.mxu0 }
 0x867   : > { %v15765_v16 = vadd.f32 %v15764_v34, %v15722_v9  ;;  %20837 = vtanh.f32 %v15763_v19 }
 0x868   : > { %v15766_v5 = vpop.f32.mrf.mxu0 }
 0x869   : > { %v15767_v32 = vadd.f32 %v15766_v5, %v15724_v41  ;;  %20839 = vtanh.f32 %v15765_v16 }
 0x86b   : > { %20841 = vtanh.f32 %v15767_v32  ;;  %v18190_v57 = vpop.f32.mrf.mxu1 }
 0x86c   : > { %20843 = vtanh.f32 %v15761_v37 }
 0x86d   : > { %v18191_v35 = vpop.f32.mrf.mxu1 }
 0x86e   : > { %v18192_v13 = vadd.f32 %v18191_v35, %v18190_v57 }
 0x86f   : > { %v18193_v24 = vpop.f32.mrf.mxu1 }
 0x870   : > { %v16249_v53 = vadd.f32 %v18192_v13, %v18170_v59 }
 0x871   : > { %v18194_v50 = vpop.f32.mrf.mxu1 }
 0x872   : > { %v18195_v25 = vadd.f32 %v18194_v50, %v18193_v24 }
 0x874   : > { %v20838_v20 = vpop.eup %20837  ;;  %v16252_v28 = vadd.f32 %v18195_v25, %v18173_v39 }
 0x876   : > { %v20840_v38 = vpop.eup %20839 }
 0x878   : > { %v20842_v15 = vpop.eup %20841 }
 0x879   : > { %v20844_v12 = vpop.eup %20843  ;;  %v15788_v60 = vpack.c.bf16 %v20842_v15, %v20838_v20 }
 0x87a   : > { %v15787_v51 = vpack.c.bf16 %v20840_v38, %v20844_v12 }
 0x87b   : > { %16287 = vmatprep.mubr.bf16.mxu0 %v15788_v60 }
 0x87c   : > { %16288 = vmatmul.mubr.bf16.vlgmr.msra.gmra.mxu0 %v15787_v51 }
 0x93c   : > { %v18212_v47 = vpop.f32.mrf.mxu0 }
 0x93e   : > { %v18213_v3 = vpop.f32.mrf.mxu0 }
 0x93f   : > { %v18214_v26 = vadd.f32 %v18213_v3, %v18212_v47 }
 0x940   : > { %v18215_v42 = vpop.f32.mrf.mxu0 }
 0x941   : > { %v16290_v44 = vadd.f32 %v18214_v26, %v16249_v53 }
 0x942   : > { %v18216_v27 = vpop.f32.mrf.mxu0 }
 0x943   : > { %v16296_v22 = vadd.f32 %v16290_v44, %v15781_v29  ;;  %v18217_v55 = vadd.f32 %v18216_v27, %v18215_v42 }
 0x945   : > { %16298 = vst [vmem:[#allocation2] sm:$0xff] %v16296_v22  ;;  %v16293_v48 = vadd.f32 %v18217_v55, %v16252_v28  ;;  %16303 = sbr.rel (%p18146_p0) target bundleno = 2386 (0x952), region = 85 }
 0x947   : > { %v16297_v61 = vadd.f32 %v16293_v48, %v15782_v23 }
 0x949   : > { %16299 = vst [vmem:[#allocation2 + $0x8] sm:$0xff] %v16297_v61 }
 0x94c   : > { %v16304_v1 = vld [vmem:[#allocation2] sm:$0xff] }
 0x94d   : > { %16306 = vst [vmem:[%s24560_s5] sm:$0xff] %v16304_v1 }
 0x950   : > { %v16305_v7 = vld [vmem:[#allocation2 + $0x8] sm:$0xff] }
 0x951   : > { %16307 = vst [vmem:[%s24560_s5 + $0x8] sm:$0xff] %v16305_v7 }
 0x952 PF: > { %s15_s22 = sadd.s32 1, %s20969_s22   ;;  %s24567_s18 = smov %s20957_s19 }
 0x953   : > { %p12_p1 = scmp.ge.s32.totalorder %s15_s22, 5   ;;  %s24568_s19 = smov %s21052_s26 }
 0x954   : > { %s24569_s20 = smov %s20965_s21  ;;  %s24570_s21 = smov %s24572_s23 }
 0x955   :  { %14 = sbr.rel (!%p12_p1) target bundleno = 3 (0x3), region = 142 }

</bundles_post_ra>
